<compile_context>
chip_gen: v7x
topology: tpu7x:2x2x1
jax: 0.10.0
libtpu: 0.0.40
codegen_flags: <defaults>
</compile_context>

<pallas_src>
import functools
import math

import jax
import jax.numpy as jnp
from jax.experimental import pallas as pl
from jax.experimental.pallas import tpu as pltpu


_COMPILER_PARAMS = pltpu.CompilerParams(
    dimension_semantics=("parallel", "parallel"),
    vmem_limit_bytes=32 * 1024 * 1024,
)


# --------------------------------------------------------------------------
# Pallas kernel: complex Conv2d (k=3, stride=2, pad=1) + fused bias/ReLU
# --------------------------------------------------------------------------

def _cconv_down_kernel(xe0_ref, xe1_ref, xe2_ref, xo0_ref, xo1_ref, xo2_ref,
                       w_ref, b_ref, o_ref, *, wo, relu):
    """One output row.  xe*/xo*: even/odd-column planes, rows 2j,2j+1,2j+2."""
    cout = w_ref.shape[-1]
    acc = jnp.zeros((wo, cout), jnp.float32)
    xe = (xe0_ref, xe1_ref, xe2_ref)
    xo = (xo0_ref, xo1_ref, xo2_ref)
    for kh in range(3):
        e = xe[kh][...]                     # [wo+1, cin]  (padded even columns)
        o = xo[kh][...]                     # [wo+1, cin]  (padded odd columns)
        acc += jnp.dot(e[:wo, :], w_ref[kh, 0], preferred_element_type=jnp.float32)
        acc += jnp.dot(o[:wo, :], w_ref[kh, 1], preferred_element_type=jnp.float32)
        acc += jnp.dot(e[1:, :],  w_ref[kh, 2], preferred_element_type=jnp.float32)
    acc = acc + b_ref[...]                  # fused bias (f32)
    if relu:
        acc = jnp.maximum(acc, 0.0)         # fused complex_relu (per-component)
    o_ref[...] = acc.astype(o_ref.dtype)


def complex_conv_down(x, w_eff, b_eff, *, relu, out_dtype=jnp.bfloat16):
    """x: [N,H,W,Cin] stacked real/imag.  Conv2d(k=3,s=2,p=1) semantics."""
    n, h, w, cin = x.shape
    cout = w_eff.shape[-1]
    ho, wo = h // 2, w // 2
    we = wo + 1

    xp = jnp.pad(x.astype(jnp.bfloat16), ((0, 0), (1, 1), (1, 1), (0, 0)))
    x_even = xp[:, :, 0::2, :]              # [n, h+2, wo+1, cin]
    x_odd = xp[:, :, 1::2, :]               # [n, h+2, wo+1, cin]
    wb = w_eff.astype(jnp.bfloat16)         # [3,3,cin,cout]
    bb = b_eff.reshape(1, cout).astype(jnp.float32)

    def row_spec(k):
        return pl.BlockSpec((None, None, we, cin),
                            lambda nn, j: (nn, 2 * j + k, 0, 0))

    kernel = functools.partial(_cconv_down_kernel, wo=wo, relu=relu)
    return pl.pallas_call(
        kernel,
        out_shape=jax.ShapeDtypeStruct((n, ho, wo, cout), out_dtype),
        grid=(n, ho),
        in_specs=[row_spec(0), row_spec(1), row_spec(2),
                  row_spec(0), row_spec(1), row_spec(2),
                  pl.BlockSpec((3, 3, cin, cout), lambda nn, j: (0, 0, 0, 0)),
                  pl.BlockSpec((1, cout), lambda nn, j: (0, 0))],
        out_specs=pl.BlockSpec((None, None, wo, cout), lambda nn, j: (nn, j, 0, 0)),
        compiler_params=_COMPILER_PARAMS,
    )(x_even, x_even, x_even, x_odd, x_odd, x_odd, wb, bb)


# --------------------------------------------------------------------------
# Pallas kernel: complex ConvTranspose2d (k=4, stride=2, pad=1) + bias/ReLU
# Output decomposed into 4 parity planes (no zero-dilated input).
# --------------------------------------------------------------------------

def _cconv_up_kernel(x0_ref, x1_ref, x2_ref, w_ref, b_ref,
                     oee_ref, oeo_ref, ooe_ref, ooo_ref, *, wdim, relu):
    r0 = x0_ref[...]                        # padded input row j    [wdim+2, cin]
    r1 = x1_ref[...]                        # padded input row j+1
    r2 = x2_ref[...]                        # padded input row j+2
    b = b_ref[...]
    cout = w_ref.shape[-1]

    def acc_taps(terms):
        acc = jnp.zeros((wdim, cout), jnp.float32)
        for row, off, kh, kw in terms:
            acc += jnp.dot(row[off:off + wdim, :], w_ref[kh, kw],
                           preferred_element_type=jnp.float32)
        acc = acc + b
        if relu:
            acc = jnp.maximum(acc, 0.0)
        return acc

    # y[2j  ,2l  ] = x[j,l]w11 + x[j,l-1]w13 + x[j-1,l]w31 + x[j-1,l-1]w33
    oee_ref[...] = acc_taps([(r1, 1, 1, 1), (r1, 0, 1, 3),
                             (r0, 1, 3, 1), (r0, 0, 3, 3)]).astype(oee_ref.dtype)
    # y[2j  ,2l+1] = x[j,l]w12 + x[j,l+1]w10 + x[j-1,l]w32 + x[j-1,l+1]w30
    oeo_ref[...] = acc_taps([(r1, 1, 1, 2), (r1, 2, 1, 0),
                             (r0, 1, 3, 2), (r0, 2, 3, 0)]).astype(oeo_ref.dtype)
    # y[2j+1,2l  ] = x[j,l]w21 + x[j,l-1]w23 + x[j+1,l]w01 + x[j+1,l-1]w03
    ooe_ref[...] = acc_taps([(r1, 1, 2, 1), (r1, 0, 2, 3),
                             (r2, 1, 0, 1), (r2, 0, 0, 3)]).astype(ooe_ref.dtype)
    # y[2j+1,2l+1] = x[j,l]w22 + x[j,l+1]w20 + x[j+1,l]w02 + x[j+1,l+1]w00
    ooo_ref[...] = acc_taps([(r1, 1, 2, 2), (r1, 2, 2, 0),
                             (r2, 1, 0, 2), (r2, 2, 0, 0)]).astype(ooo_ref.dtype)


def complex_conv_transpose_up(x, w_eff, b_eff, *, relu, out_dtype=jnp.bfloat16):
    """x: [N,H,W,Cin] stacked real/imag.  ConvTranspose2d(k=4,s=2,p=1)."""
    n, h, w, cin = x.shape
    cout = w_eff.shape[-1]
    wp = w + 2

    xp = jnp.pad(x.astype(jnp.bfloat16), ((0, 0), (1, 1), (1, 1), (0, 0)))
    wb = w_eff.astype(jnp.bfloat16)         # [4,4,cin,cout]
    bb = b_eff.reshape(1, cout).astype(jnp.float32)

    def row_spec(k):
        return pl.BlockSpec((None, None, wp, cin),
                            lambda nn, j: (nn, j + k, 0, 0))

    plane_shape = jax.ShapeDtypeStruct((n, h, w, cout), out_dtype)
    plane_spec = pl.BlockSpec((None, None, w, cout), lambda nn, j: (nn, j, 0, 0))

    kernel = functools.partial(_cconv_up_kernel, wdim=w, relu=relu)
    y_ee, y_eo, y_oe, y_oo = pl.pallas_call(
        kernel,
        out_shape=(plane_shape, plane_shape, plane_shape, plane_shape),
        grid=(n, h),
        in_specs=[row_spec(0), row_spec(1), row_spec(2),
                  pl.BlockSpec((4, 4, cin, cout), lambda nn, j: (0, 0, 0, 0)),
                  pl.BlockSpec((1, cout), lambda nn, j: (0, 0))],
        out_specs=(plane_spec, plane_spec, plane_spec, plane_spec),
        compiler_params=_COMPILER_PARAMS,
    )(xp, xp, xp, wb, bb)

    # Interleave the 4 parity planes -> [n, 2h, 2w, cout].  Adjacent-dim
    # reshape after the stacks, so this is a single cheap shuffle pass.
    y = jnp.stack([jnp.stack([y_ee, y_eo], axis=3),
                   jnp.stack([y_oe, y_oo], axis=3)], axis=2)   # [n,h,2,w,2,cout]
    return y.reshape(n, 2 * h, 2 * w, cout)


# --------------------------------------------------------------------------
# Complex -> block-real weight conversion (apply_complex semantics)
# --------------------------------------------------------------------------

def _block_weights(wr, wi, br, bi):
    # columns: [real-out | imag-out]; rows: [real-in ; imag-in]
    w = jnp.concatenate([jnp.concatenate([wr, -wi], axis=2),
                         jnp.concatenate([wi, wr], axis=2)], axis=3)
    b = jnp.concatenate([br - bi, br + bi])
    return w, b


def _complex_conv_weights(p):      # Conv2d weights: [cout, cin, k, k]
    wr = jnp.transpose(p["wr"], (2, 3, 1, 0))
    wi = jnp.transpose(p["wi"], (2, 3, 1, 0))
    return _block_weights(wr, wi, p["br"], p["bi"])


def _complex_convT_weights(p):     # ConvTranspose2d weights: [cin, cout, k, k]
    wr = jnp.transpose(p["wr"], (2, 3, 0, 1))
    wi = jnp.transpose(p["wi"], (2, 3, 0, 1))
    return _block_weights(wr, wi, p["br"], p["bi"])


# --------------------------------------------------------------------------
# CCNN1 / CCNN2 forward (stacked real/imag NHWC domain)
# --------------------------------------------------------------------------

def _cdown(p, x):
    w, b = _complex_conv_weights(p)
    return complex_conv_down(x, w, b, relu=True)


def _cup(p, x, *, relu, out_dtype=jnp.bfloat16):
    w, b = _complex_convT_weights(p)
    return complex_conv_transpose_up(x, w, b, relu=relu, out_dtype=out_dtype)


def ccnn1_forward(p, x):
    out1 = _cdown(p["down1"], x)
    out2 = _cdown(p["down2"], out1)
    out3 = _cdown(p["down3"], out2)
    out4 = _cdown(p["down4"], out3)
    out17 = _cup(p["up4"], out4, relu=True)
    out18 = _cup(p["up3"], out17 + out3, relu=True)
    out19 = _cup(p["up2"], out18 + out2, relu=True)
    out20 = _cup(p["up1"], out19 + out1, relu=False, out_dtype=jnp.float32)
    # TODO(synk): atan2 kept in plain JAX (tiny elementwise, 1 channel).
    return jnp.arctan2(out20[..., 1], out20[..., 0])      # [n, H, W]


def ccnn2_forward(p, x):
    out1 = _cdown(p["down1"], x)
    out2 = _cdown(p["down2"], out1)
    out3 = _cdown(p["down3"], out2)
    out18 = _cup(p["up3"], out3, relu=True)
    out19 = _cup(p["up2"], out18 + out2, relu=True)
    out20 = _cup(p["up1"], out19 + out1, relu=False, out_dtype=jnp.float32)
    return jnp.arctan2(out20[..., 1], out20[..., 0])      # [n, H, W]


# --------------------------------------------------------------------------
# propagation_ASM (precomputed transfer function H) -- plain JAX FFT.
# --------------------------------------------------------------------------

def propagation_asm(u_in, z, linear_conv, feature_size, wavelength, precomped_h):
    # TODO(synk): FFT-based ASM propagation has no Pallas TPU equivalent; jnp.fft.
    del z, feature_size, wavelength        # unused when H is precomputed
    if linear_conv:
        hdim, wdim = u_in.shape[-2], u_in.shape[-1]
        ph, pw = hdim // 2, wdim // 2
        u = jnp.pad(u_in, ((0, 0), (0, 0), (ph, ph), (pw, pw)))
    else:
        u = u_in
    u1 = jnp.fft.fftn(jnp.fft.ifftshift(u, axes=(-2, -1)), axes=(-2, -1), norm="ortho")
    u2 = precomped_h * u1
    u_out = jnp.fft.fftshift(jnp.fft.ifftn(u2, axes=(-2, -1), norm="ortho"),
                             axes=(-2, -1))
    if linear_conv:
        u_out = u_out[..., ph:ph + hdim, pw:pw + wdim]
    return u_out


# --------------------------------------------------------------------------
# ccnncgh forward
# --------------------------------------------------------------------------

def _complex_to_stacked(c):        # [n, C, H, W] complex -> [n, H, W, 2C]
    r = jnp.transpose(jnp.real(c), (0, 2, 3, 1))
    i = jnp.transpose(jnp.imag(c), (0, 2, 3, 1))
    return jnp.concatenate([r, i], axis=-1).astype(jnp.float32)


def ccnncgh_forward(params, amp, phase, z, pad, pitch, wavelength, h_mat):
    """amp/phase: NCHW [N,1,H,W] float32.  Returns (holophase, predict_phase) NCHW."""
    amp_nhwc = jnp.transpose(amp, (0, 2, 3, 1)).astype(jnp.float32)
    phase_nhwc = jnp.transpose(phase, (0, 2, 3, 1)).astype(jnp.float32)
    # target_complex = complex(amp*cos(phase), amp*sin(phase)) as stacked channels
    target = jnp.concatenate([amp_nhwc * jnp.cos(phase_nhwc),
                              amp_nhwc * jnp.sin(phase_nhwc)], axis=-1)

    predict_phase_hw = ccnn1_forward(params["ccnn1"], target)       # [n, H, W]
    predict_phase = predict_phase_hw[:, None, :, :]                 # NCHW

    predict_complex = jax.lax.complex(amp * jnp.cos(predict_phase),
                                      amp * jnp.sin(predict_phase))
    slmfield = propagation_asm(predict_complex, z, pad, (pitch, pitch),
                               wavelength, h_mat)

    holophase_hw = ccnn2_forward(params["ccnn2"], _complex_to_stacked(slmfield))
    holophase = holophase_hw[:, None, :, :]
    return holophase, predict_phase


# --------------------------------------------------------------------------
# Parameter init (random weights, PyTorch-like uniform fan-in scaling)
# --------------------------------------------------------------------------

def _init_cconv(key, cin, cout, k):
    ks = jax.random.split(key, 4)
    scale = 1.0 / math.sqrt(cin * k * k)
    u = lambda kk, shape: jax.random.uniform(kk, shape, jnp.float32, -scale, scale)
    return {"wr": u(ks[0], (cout, cin, k, k)), "wi": u(ks[1], (cout, cin, k, k)),
            "br": u(ks[2], (cout,)), "bi": u(ks[3], (cout,))}


def _init_cconvT(key, cin, cout, k):
    ks = jax.random.split(key, 4)
    scale = 1.0 / math.sqrt(cin * k * k)
    u = lambda kk, shape: jax.random.uniform(kk, shape, jnp.float32, -scale, scale)
    return {"wr": u(ks[0], (cin, cout, k, k)), "wi": u(ks[1], (cin, cout, k, k)),
            "br": u(ks[2], (cout,)), "bi": u(ks[3], (cout,))}


def init_params(key):
    cfg1 = [("down1", 1, 4), ("down2", 4, 8), ("down3", 8, 16), ("down4", 16, 32),
            ("up4", 32, 16), ("up3", 16, 8), ("up2", 8, 4), ("up1", 4, 1)]
    cfg2 = [("down1", 1, 4), ("down2", 4, 8), ("down3", 8, 16),
            ("up3", 16, 8), ("up2", 8, 4), ("up1", 4, 1)]
    keys = jax.random.split(key, len(cfg1) + len(cfg2))
    p1, p2, ki = {}, {}, 0
    for name, cin, cout in cfg1:
        p1[name] = (_init_cconv(keys[ki], cin, cout, 3) if name.startswith("down")
                    else _init_cconvT(keys[ki], cin, cout, 4))
        ki += 1
    for name, cin, cout in cfg2:
        p2[name] = (_init_cconv(keys[ki], cin, cout, 3) if name.startswith("down")
                    else _init_cconvT(keys[ki], cin, cout, 4))
        ki += 1
    return {"ccnn1": p1, "ccnn2": p2}


# --------------------------------------------------------------------------
# demo
# --------------------------------------------------------------------------

if __name__ == "__main__":
    key = jax.random.PRNGKey(0)
    kp, ka, kphi, kh = jax.random.split(key, 4)

    batch, height, width = 2, 64, 64       # H,W must be divisible by 16 (4 downs)
    params = init_params(kp)

    amp = jax.random.uniform(ka, (batch, 1, height, width), jnp.float32, 0.1, 1.0)
    phase = jax.random.uniform(kphi, (batch, 1, height, width), jnp.float32,
                               -math.pi, math.pi)
    z = 0.05
    pad = False                             # linear_conv flag of propagation_ASM
    pitch = 8.0e-6
    wavelength = 520.0e-9
    # Precomputed ASM transfer function (unit-modulus), [1,1,H,W] complex64.
    h_phase = jax.random.uniform(kh, (1, 1, height, width), jnp.float32,
                                 -math.pi, math.pi)
    h_mat = jnp.exp(1j * h_phase).astype(jnp.complex64)

    @jax.jit
    def fwd(amp_, phase_, h_):
        return ccnncgh_forward(params, amp_, phase_, z, pad, pitch, wavelength, h_)

    holophase, predict_phase = jax.block_until_ready(fwd(amp, phase, h_mat))

    assert holophase.shape == (batch, 1, height, width), holophase.shape
    assert predict_phase.shape == (batch, 1, height, width), predict_phase.shape
    assert bool(jnp.all(jnp.isfinite(holophase)))
    assert bool(jnp.all(jnp.isfinite(predict_phase)))
    assert float(jnp.max(jnp.abs(holophase))) <= math.pi + 1e-4
    assert float(jnp.max(jnp.abs(predict_phase))) <= math.pi + 1e-4
    print("KERNEL_OK")
</pallas_src>

<mosaic_0001>
module attributes {stable_mosaic.version = 11 : i64} {
  func.func @_cconv_down_kernel(%arg0: i32, %arg1: i32, %arg2: memref<1x1x33x2xbf16, #tpu.memory_space<vmem>>, %arg3: memref<1x1x33x2xbf16, #tpu.memory_space<vmem>>, %arg4: memref<1x1x33x2xbf16, #tpu.memory_space<vmem>>, %arg5: memref<1x1x33x2xbf16, #tpu.memory_space<vmem>>, %arg6: memref<1x1x33x2xbf16, #tpu.memory_space<vmem>>, %arg7: memref<1x1x33x2xbf16, #tpu.memory_space<vmem>>, %arg8: memref<3x3x2x8xbf16, #tpu.memory_space<vmem>>, %arg9: memref<1x8xf32, #tpu.memory_space<vmem>>, %arg10: memref<1x1x32x8xbf16, #tpu.memory_space<vmem>>) attributes {dimension_semantics = [#tpu.dimension_semantics<parallel>, #tpu.dimension_semantics<parallel>], iteration_bounds = array<i64: 2, 32>, scalar_prefetch = 0 : i64, scratch_operands = 0 : i64, tpu.core_type = #tpu.core_type<tc>, window_params = [{transform_indices = @transform_0, window_bounds = array<i64: 1, 1, 33, 2>}, {transform_indices = @transform_1, window_bounds = array<i64: 1, 1, 33, 2>}, {transform_indices = @transform_2, window_bounds = array<i64: 1, 1, 33, 2>}, {transform_indices = @transform_3, window_bounds = array<i64: 1, 1, 33, 2>}, {transform_indices = @transform_4, window_bounds = array<i64: 1, 1, 33, 2>}, {transform_indices = @transform_5, window_bounds = array<i64: 1, 1, 33, 2>}, {pipeline_mode = #tpu.pipeline_mode<synchronous>, transform_indices = @transform_6, window_bounds = array<i64: 3, 3, 2, 8>}, {pipeline_mode = #tpu.pipeline_mode<synchronous>, transform_indices = @transform_7, window_bounds = array<i64: 1, 8>}, {transform_indices = @transform_8, window_bounds = array<i64: 1, 1, 32, 8>}]} {
    %cst = arith.constant 0.000000e+00 : f32
    %0 = vector.broadcast %cst : f32 to vector<32x8xf32>
    %c0 = arith.constant 0 : index
    %c0_0 = arith.constant 0 : index
    %c0_1 = arith.constant 0 : index
    %c0_2 = arith.constant 0 : index
    %1 = vector.load %arg2[%c0, %c0_0, %c0_1, %c0_2] : memref<1x1x33x2xbf16, #tpu.memory_space<vmem>>, vector<1x1x33x2xbf16>
    %2 = vector.shape_cast %1 : vector<1x1x33x2xbf16> to vector<33x2xbf16>
    %c0_3 = arith.constant 0 : index
    %c0_4 = arith.constant 0 : index
    %c0_5 = arith.constant 0 : index
    %c0_6 = arith.constant 0 : index
    %3 = vector.load %arg5[%c0_3, %c0_4, %c0_5, %c0_6] : memref<1x1x33x2xbf16, #tpu.memory_space<vmem>>, vector<1x1x33x2xbf16>
    %4 = vector.shape_cast %3 : vector<1x1x33x2xbf16> to vector<33x2xbf16>
    %5 = vector.extract_strided_slice %2 {offsets = [0, 0], sizes = [32, 2], strides = [1, 1]} : vector<33x2xbf16> to vector<32x2xbf16>
    %c0_7 = arith.constant 0 : index
    %c0_8 = arith.constant 0 : index
    %c0_9 = arith.constant 0 : index
    %c0_10 = arith.constant 0 : index
    %6 = vector.load %arg8[%c0_7, %c0_8, %c0_9, %c0_10] : memref<3x3x2x8xbf16, #tpu.memory_space<vmem>>, vector<1x1x2x8xbf16>
    %7 = vector.shape_cast %6 : vector<1x1x2x8xbf16> to vector<2x8xbf16>
    %cst_11 = arith.constant dense<0.000000e+00> : vector<32x8xf32>
    %8 = tpu.matmul %5, %7, %cst_11 {dimension_numbers = #tpu.dot_dimension_numbers<[1], [0], [0], [1], [0, 0, 1, 1], [], []>} : vector<32x2xbf16>, vector<2x8xbf16>, vector<32x8xf32> -> vector<32x8xf32>
    %9 = arith.addf %0, %8 : vector<32x8xf32>
    %10 = vector.extract_strided_slice %4 {offsets = [0, 0], sizes = [32, 2], strides = [1, 1]} : vector<33x2xbf16> to vector<32x2xbf16>
    %c0_12 = arith.constant 0 : index
    %c1 = arith.constant 1 : index
    %c0_13 = arith.constant 0 : index
    %c0_14 = arith.constant 0 : index
    %11 = vector.load %arg8[%c0_12, %c1, %c0_13, %c0_14] : memref<3x3x2x8xbf16, #tpu.memory_space<vmem>>, vector<1x1x2x8xbf16>
    %12 = vector.shape_cast %11 : vector<1x1x2x8xbf16> to vector<2x8xbf16>
    %cst_15 = arith.constant dense<0.000000e+00> : vector<32x8xf32>
    %13 = tpu.matmul %10, %12, %cst_15 {dimension_numbers = #tpu.dot_dimension_numbers<[1], [0], [0], [1], [0, 0, 1, 1], [], []>} : vector<32x2xbf16>, vector<2x8xbf16>, vector<32x8xf32> -> vector<32x8xf32>
    %14 = arith.addf %9, %13 : vector<32x8xf32>
    %15 = vector.extract_strided_slice %2 {offsets = [1, 0], sizes = [32, 2], strides = [1, 1]} : vector<33x2xbf16> to vector<32x2xbf16>
    %c0_16 = arith.constant 0 : index
    %c2 = arith.constant 2 : index
    %c0_17 = arith.constant 0 : index
    %c0_18 = arith.constant 0 : index
    %16 = vector.load %arg8[%c0_16, %c2, %c0_17, %c0_18] : memref<3x3x2x8xbf16, #tpu.memory_space<vmem>>, vector<1x1x2x8xbf16>
    %17 = vector.shape_cast %16 : vector<1x1x2x8xbf16> to vector<2x8xbf16>
    %cst_19 = arith.constant dense<0.000000e+00> : vector<32x8xf32>
    %18 = tpu.matmul %15, %17, %cst_19 {dimension_numbers = #tpu.dot_dimension_numbers<[1], [0], [0], [1], [0, 0, 1, 1], [], []>} : vector<32x2xbf16>, vector<2x8xbf16>, vector<32x8xf32> -> vector<32x8xf32>
    %19 = arith.addf %14, %18 : vector<32x8xf32>
    %c0_20 = arith.constant 0 : index
    %c0_21 = arith.constant 0 : index
    %c0_22 = arith.constant 0 : index
    %c0_23 = arith.constant 0 : index
    %20 = vector.load %arg3[%c0_20, %c0_21, %c0_22, %c0_23] : memref<1x1x33x2xbf16, #tpu.memory_space<vmem>>, vector<1x1x33x2xbf16>
    %21 = vector.shape_cast %20 : vector<1x1x33x2xbf16> to vector<33x2xbf16>
    %c0_24 = arith.constant 0 : index
    %c0_25 = arith.constant 0 : index
    %c0_26 = arith.constant 0 : index
    %c0_27 = arith.constant 0 : index
    %22 = vector.load %arg6[%c0_24, %c0_25, %c0_26, %c0_27] : memref<1x1x33x2xbf16, #tpu.memory_space<vmem>>, vector<1x1x33x2xbf16>
    %23 = vector.shape_cast %22 : vector<1x1x33x2xbf16> to vector<33x2xbf16>
    %24 = vector.extract_strided_slice %21 {offsets = [0, 0], sizes = [32, 2], strides = [1, 1]} : vector<33x2xbf16> to vector<32x2xbf16>
    %c1_28 = arith.constant 1 : index
    %c0_29 = arith.constant 0 : index
    %c0_30 = arith.constant 0 : index
    %c0_31 = arith.constant 0 : index
    %25 = vector.load %arg8[%c1_28, %c0_29, %c0_30, %c0_31] : memref<3x3x2x8xbf16, #tpu.memory_space<vmem>>, vector<1x1x2x8xbf16>
    %26 = vector.shape_cast %25 : vector<1x1x2x8xbf16> to vector<2x8xbf16>
    %cst_32 = arith.constant dense<0.000000e+00> : vector<32x8xf32>
    %27 = tpu.matmul %24, %26, %cst_32 {dimension_numbers = #tpu.dot_dimension_numbers<[1], [0], [0], [1], [0, 0, 1, 1], [], []>} : vector<32x2xbf16>, vector<2x8xbf16>, vector<32x8xf32> -> vector<32x8xf32>
    %28 = arith.addf %19, %27 : vector<32x8xf32>
    %29 = vector.extract_strided_slice %23 {offsets = [0, 0], sizes = [32, 2], strides = [1, 1]} : vector<33x2xbf16> to vector<32x2xbf16>
    %c1_33 = arith.constant 1 : index
    %c1_34 = arith.constant 1 : index
    %c0_35 = arith.constant 0 : index
    %c0_36 = arith.constant 0 : index
    %30 = vector.load %arg8[%c1_33, %c1_34, %c0_35, %c0_36] : memref<3x3x2x8xbf16, #tpu.memory_space<vmem>>, vector<1x1x2x8xbf16>
    %31 = vector.shape_cast %30 : vector<1x1x2x8xbf16> to vector<2x8xbf16>
    %cst_37 = arith.constant dense<0.000000e+00> : vector<32x8xf32>
    %32 = tpu.matmul %29, %31, %cst_37 {dimension_numbers = #tpu.dot_dimension_numbers<[1], [0], [0], [1], [0, 0, 1, 1], [], []>} : vector<32x2xbf16>, vector<2x8xbf16>, vector<32x8xf32> -> vector<32x8xf32>
    %33 = arith.addf %28, %32 : vector<32x8xf32>
    %34 = vector.extract_strided_slice %21 {offsets = [1, 0], sizes = [32, 2], strides = [1, 1]} : vector<33x2xbf16> to vector<32x2xbf16>
    %c1_38 = arith.constant 1 : index
    %c2_39 = arith.constant 2 : index
    %c0_40 = arith.constant 0 : index
    %c0_41 = arith.constant 0 : index
    %35 = vector.load %arg8[%c1_38, %c2_39, %c0_40, %c0_41] : memref<3x3x2x8xbf16, #tpu.memory_space<vmem>>, vector<1x1x2x8xbf16>
    %36 = vector.shape_cast %35 : vector<1x1x2x8xbf16> to vector<2x8xbf16>
    %cst_42 = arith.constant dense<0.000000e+00> : vector<32x8xf32>
    %37 = tpu.matmul %34, %36, %cst_42 {dimension_numbers = #tpu.dot_dimension_numbers<[1], [0], [0], [1], [0, 0, 1, 1], [], []>} : vector<32x2xbf16>, vector<2x8xbf16>, vector<32x8xf32> -> vector<32x8xf32>
    %38 = arith.addf %33, %37 : vector<32x8xf32>
    %c0_43 = arith.constant 0 : index
    %c0_44 = arith.constant 0 : index
    %c0_45 = arith.constant 0 : index
    %c0_46 = arith.constant 0 : index
    %39 = vector.load %arg4[%c0_43, %c0_44, %c0_45, %c0_46] : memref<1x1x33x2xbf16, #tpu.memory_space<vmem>>, vector<1x1x33x2xbf16>
    %40 = vector.shape_cast %39 : vector<1x1x33x2xbf16> to vector<33x2xbf16>
    %c0_47 = arith.constant 0 : index
    %c0_48 = arith.constant 0 : index
    %c0_49 = arith.constant 0 : index
    %c0_50 = arith.constant 0 : index
    %41 = vector.load %arg7[%c0_47, %c0_48, %c0_49, %c0_50] : memref<1x1x33x2xbf16, #tpu.memory_space<vmem>>, vector<1x1x33x2xbf16>
    %42 = vector.shape_cast %41 : vector<1x1x33x2xbf16> to vector<33x2xbf16>
    %43 = vector.extract_strided_slice %40 {offsets = [0, 0], sizes = [32, 2], strides = [1, 1]} : vector<33x2xbf16> to vector<32x2xbf16>
    %c2_51 = arith.constant 2 : index
    %c0_52 = arith.constant 0 : index
    %c0_53 = arith.constant 0 : index
    %c0_54 = arith.constant 0 : index
    %44 = vector.load %arg8[%c2_51, %c0_52, %c0_53, %c0_54] : memref<3x3x2x8xbf16, #tpu.memory_space<vmem>>, vector<1x1x2x8xbf16>
    %45 = vector.shape_cast %44 : vector<1x1x2x8xbf16> to vector<2x8xbf16>
    %cst_55 = arith.constant dense<0.000000e+00> : vector<32x8xf32>
    %46 = tpu.matmul %43, %45, %cst_55 {dimension_numbers = #tpu.dot_dimension_numbers<[1], [0], [0], [1], [0, 0, 1, 1], [], []>} : vector<32x2xbf16>, vector<2x8xbf16>, vector<32x8xf32> -> vector<32x8xf32>
    %47 = arith.addf %38, %46 : vector<32x8xf32>
    %48 = vector.extract_strided_slice %42 {offsets = [0, 0], sizes = [32, 2], strides = [1, 1]} : vector<33x2xbf16> to vector<32x2xbf16>
    %c2_56 = arith.constant 2 : index
    %c1_57 = arith.constant 1 : index
    %c0_58 = arith.constant 0 : index
    %c0_59 = arith.constant 0 : index
    %49 = vector.load %arg8[%c2_56, %c1_57, %c0_58, %c0_59] : memref<3x3x2x8xbf16, #tpu.memory_space<vmem>>, vector<1x1x2x8xbf16>
    %50 = vector.shape_cast %49 : vector<1x1x2x8xbf16> to vector<2x8xbf16>
    %cst_60 = arith.constant dense<0.000000e+00> : vector<32x8xf32>
    %51 = tpu.matmul %48, %50, %cst_60 {dimension_numbers = #tpu.dot_dimension_numbers<[1], [0], [0], [1], [0, 0, 1, 1], [], []>} : vector<32x2xbf16>, vector<2x8xbf16>, vector<32x8xf32> -> vector<32x8xf32>
    %52 = arith.addf %47, %51 : vector<32x8xf32>
    %53 = vector.extract_strided_slice %40 {offsets = [1, 0], sizes = [32, 2], strides = [1, 1]} : vector<33x2xbf16> to vector<32x2xbf16>
    %c2_61 = arith.constant 2 : index
    %c2_62 = arith.constant 2 : index
    %c0_63 = arith.constant 0 : index
    %c0_64 = arith.constant 0 : index
    %54 = vector.load %arg8[%c2_61, %c2_62, %c0_63, %c0_64] : memref<3x3x2x8xbf16, #tpu.memory_space<vmem>>, vector<1x1x2x8xbf16>
    %55 = vector.shape_cast %54 : vector<1x1x2x8xbf16> to vector<2x8xbf16>
    %cst_65 = arith.constant dense<0.000000e+00> : vector<32x8xf32>
    %56 = tpu.matmul %53, %55, %cst_65 {dimension_numbers = #tpu.dot_dimension_numbers<[1], [0], [0], [1], [0, 0, 1, 1], [], []>} : vector<32x2xbf16>, vector<2x8xbf16>, vector<32x8xf32> -> vector<32x8xf32>
    %57 = arith.addf %52, %56 : vector<32x8xf32>
    %c0_66 = arith.constant 0 : index
    %c0_67 = arith.constant 0 : index
    %58 = vector.load %arg9[%c0_66, %c0_67] : memref<1x8xf32, #tpu.memory_space<vmem>>, vector<1x8xf32>
    %59 = vector.broadcast %58 : vector<1x8xf32> to vector<32x8xf32>
    %60 = arith.addf %57, %59 : vector<32x8xf32>
    %cst_68 = arith.constant 0.000000e+00 : f32
    %61 = vector.broadcast %cst_68 : f32 to vector<32x8xf32>
    %62 = arith.maximumf %60, %61 : vector<32x8xf32>
    %63 = arith.truncf %62 : vector<32x8xf32> to vector<32x8xbf16>
    %c0_69 = arith.constant 0 : index
    %c0_70 = arith.constant 0 : index
    %c0_71 = arith.constant 0 : index
    %c0_72 = arith.constant 0 : index
    %64 = vector.load %arg10[%c0_69, %c0_70, %c0_71, %c0_72] : memref<1x1x32x8xbf16, #tpu.memory_space<vmem>>, vector<1x1x32x8xbf16>
    %65 = vector.shape_cast %64 : vector<1x1x32x8xbf16> to vector<32x8xbf16>
    %66 = vector.shape_cast %63 : vector<32x8xbf16> to vector<1x1x32x8xbf16>
    tpu.vector_store %arg10[%c0_69, %c0_70, %c0_71, %c0_72], %66 {strides = array<i32>} : memref<1x1x32x8xbf16, #tpu.memory_space<vmem>>, vector<1x1x32x8xbf16>,
    return
  }
  func.func @transform_0(%arg0: i32, %arg1: i32) -> (i32, i32, i32, i32) {
    %c2_i32 = arith.constant 2 : i32
    %0 = arith.muli %c2_i32, %arg1 : i32
    %c0_i32 = arith.constant 0 : i32
    %1 = arith.addi %0, %c0_i32 : i32
    %c0_i32_0 = arith.constant 0 : i32
    %c0_i32_1 = arith.constant 0 : i32
    %c0_i32_2 = arith.constant 0 : i32
    return %arg0, %1, %c0_i32_0, %c0_i32_1 : i32, i32, i32, i32
  }
  func.func @transform_1(%arg0: i32, %arg1: i32) -> (i32, i32, i32, i32) {
    %c2_i32 = arith.constant 2 : i32
    %0 = arith.muli %c2_i32, %arg1 : i32
    %c1_i32 = arith.constant 1 : i32
    %1 = arith.addi %0, %c1_i32 : i32
    %c0_i32 = arith.constant 0 : i32
    %c0_i32_0 = arith.constant 0 : i32
    %c0_i32_1 = arith.constant 0 : i32
    return %arg0, %1, %c0_i32, %c0_i32_0 : i32, i32, i32, i32
  }
  func.func @transform_2(%arg0: i32, %arg1: i32) -> (i32, i32, i32, i32) {
    %c2_i32 = arith.constant 2 : i32
    %0 = arith.muli %c2_i32, %arg1 : i32
    %c2_i32_0 = arith.constant 2 : i32
    %1 = arith.addi %0, %c2_i32_0 : i32
    %c0_i32 = arith.constant 0 : i32
    %c0_i32_1 = arith.constant 0 : i32
    %c0_i32_2 = arith.constant 0 : i32
    return %arg0, %1, %c0_i32, %c0_i32_1 : i32, i32, i32, i32
  }
  func.func @transform_3(%arg0: i32, %arg1: i32) -> (i32, i32, i32, i32) {
    %c2_i32 = arith.constant 2 : i32
    %0 = arith.muli %c2_i32, %arg1 : i32
    %c0_i32 = arith.constant 0 : i32
    %1 = arith.addi %0, %c0_i32 : i32
    %c0_i32_0 = arith.constant 0 : i32
    %c0_i32_1 = arith.constant 0 : i32
    %c0_i32_2 = arith.constant 0 : i32
    return %arg0, %1, %c0_i32_0, %c0_i32_1 : i32, i32, i32, i32
  }
  func.func @transform_4(%arg0: i32, %arg1: i32) -> (i32, i32, i32, i32) {
    %c2_i32 = arith.constant 2 : i32
    %0 = arith.muli %c2_i32, %arg1 : i32
    %c1_i32 = arith.constant 1 : i32
    %1 = arith.addi %0, %c1_i32 : i32
    %c0_i32 = arith.constant 0 : i32
    %c0_i32_0 = arith.constant 0 : i32
    %c0_i32_1 = arith.constant 0 : i32
    return %arg0, %1, %c0_i32, %c0_i32_0 : i32, i32, i32, i32
  }
  func.func @transform_5(%arg0: i32, %arg1: i32) -> (i32, i32, i32, i32) {
    %c2_i32 = arith.constant 2 : i32
    %0 = arith.muli %c2_i32, %arg1 : i32
    %c2_i32_0 = arith.constant 2 : i32
    %1 = arith.addi %0, %c2_i32_0 : i32
    %c0_i32 = arith.constant 0 : i32
    %c0_i32_1 = arith.constant 0 : i32
    %c0_i32_2 = arith.constant 0 : i32
    return %arg0, %1, %c0_i32, %c0_i32_1 : i32, i32, i32, i32
  }
  func.func @transform_6(%arg0: i32, %arg1: i32) -> (i32, i32, i32, i32) {
    %c0_i32 = arith.constant 0 : i32
    %c0_i32_0 = arith.constant 0 : i32
    %c0_i32_1 = arith.constant 0 : i32
    %c0_i32_2 = arith.constant 0 : i32
    %c0_i32_3 = arith.constant 0 : i32
    return %c0_i32, %c0_i32_0, %c0_i32_1, %c0_i32_2 : i32, i32, i32, i32
  }
  func.func @transform_7(%arg0: i32, %arg1: i32) -> (i32, i32) {
    %c0_i32 = arith.constant 0 : i32
    %c0_i32_0 = arith.constant 0 : i32
    %c0_i32_1 = arith.constant 0 : i32
    return %c0_i32, %c0_i32_0 : i32, i32
  }
  func.func @transform_8(%arg0: i32, %arg1: i32) -> (i32, i32, i32, i32) {
    %c0_i32 = arith.constant 0 : i32
    %c0_i32_0 = arith.constant 0 : i32
    %c0_i32_1 = arith.constant 0 : i32
    return %arg0, %arg1, %c0_i32, %c0_i32_0 : i32, i32, i32, i32
  }
}

module attributes {stable_mosaic.version = 11 : i64} {
  func.func @_cconv_down_kernel(%arg0: i32, %arg1: i32, %arg2: memref<1x1x17x8xbf16, #tpu.memory_space<vmem>>, %arg3: memref<1x1x17x8xbf16, #tpu.memory_space<vmem>>, %arg4: memref<1x1x17x8xbf16, #tpu.memory_space<vmem>>, %arg5: memref<1x1x17x8xbf16, #tpu.memory_space<vmem>>, %arg6: memref<1x1x17x8xbf16, #tpu.memory_space<vmem>>, %arg7: memref<1x1x17x8xbf16, #tpu.memory_space<vmem>>, %arg8: memref<3x3x8x16xbf16, #tpu.memory_space<vmem>>, %arg9: memref<1x16xf32, #tpu.memory_space<vmem>>, %arg10: memref<1x1x16x16xbf16, #tpu.memory_space<vmem>>) attributes {dimension_semantics = [#tpu.dimension_semantics<parallel>, #tpu.dimension_semantics<parallel>], iteration_bounds = array<i64: 2, 16>, scalar_prefetch = 0 : i64, scratch_operands = 0 : i64, tpu.core_type = #tpu.core_type<tc>, window_params = [{transform_indices = @transform_0, window_bounds = array<i64: 1, 1, 17, 8>}, {transform_indices = @transform_1, window_bounds = array<i64: 1, 1, 17, 8>}, {transform_indices = @transform_2, window_bounds = array<i64: 1, 1, 17, 8>}, {transform_indices = @transform_3, window_bounds = array<i64: 1, 1, 17, 8>}, {transform_indices = @transform_4, window_bounds = array<i64: 1, 1, 17, 8>}, {transform_indices = @transform_5, window_bounds = array<i64: 1, 1, 17, 8>}, {pipeline_mode = #tpu.pipeline_mode<synchronous>, transform_indices = @transform_6, window_bounds = array<i64: 3, 3, 8, 16>}, {pipeline_mode = #tpu.pipeline_mode<synchronous>, transform_indices = @transform_7, window_bounds = array<i64: 1, 16>}, {transform_indices = @transform_8, window_bounds = array<i64: 1, 1, 16, 16>}]} {
    %cst = arith.constant 0.000000e+00 : f32
    %0 = vector.broadcast %cst : f32 to vector<16x16xf32>
    %c0 = arith.constant 0 : index
    %c0_0 = arith.constant 0 : index
    %c0_1 = arith.constant 0 : index
    %c0_2 = arith.constant 0 : index
    %1 = vector.load %arg2[%c0, %c0_0, %c0_1, %c0_2] : memref<1x1x17x8xbf16, #tpu.memory_space<vmem>>, vector<1x1x17x8xbf16>
    %2 = vector.shape_cast %1 : vector<1x1x17x8xbf16> to vector<17x8xbf16>
    %c0_3 = arith.constant 0 : index
    %c0_4 = arith.constant 0 : index
    %c0_5 = arith.constant 0 : index
    %c0_6 = arith.constant 0 : index
    %3 = vector.load %arg5[%c0_3, %c0_4, %c0_5, %c0_6] : memref<1x1x17x8xbf16, #tpu.memory_space<vmem>>, vector<1x1x17x8xbf16>
    %4 = vector.shape_cast %3 : vector<1x1x17x8xbf16> to vector<17x8xbf16>
    %5 = vector.extract_strided_slice %2 {offsets = [0, 0], sizes = [16, 8], strides = [1, 1]} : vector<17x8xbf16> to vector<16x8xbf16>
    %c0_7 = arith.constant 0 : index
    %c0_8 = arith.constant 0 : index
    %c0_9 = arith.constant 0 : index
    %c0_10 = arith.constant 0 : index
    %6 = vector.load %arg8[%c0_7, %c0_8, %c0_9, %c0_10] : memref<3x3x8x16xbf16, #tpu.memory_space<vmem>>, vector<1x1x8x16xbf16>
    %7 = vector.shape_cast %6 : vector<1x1x8x16xbf16> to vector<8x16xbf16>
    %cst_11 = arith.constant dense<0.000000e+00> : vector<16x16xf32>
    %8 = tpu.matmul %5, %7, %cst_11 {dimension_numbers = #tpu.dot_dimension_numbers<[1], [0], [0], [1], [0, 0, 1, 1], [], []>} : vector<16x8xbf16>, vector<8x16xbf16>, vector<16x16xf32> -> vector<16x16xf32>
    %9 = arith.addf %0, %8 : vector<16x16xf32>
    %10 = vector.extract_strided_slice %4 {offsets = [0, 0], sizes = [16, 8], strides = [1, 1]} : vector<17x8xbf16> to vector<16x8xbf16>
    %c0_12 = arith.constant 0 : index
    %c1 = arith.constant 1 : index
    %c0_13 = arith.constant 0 : index
    %c0_14 = arith.constant 0 : index
    %11 = vector.load %arg8[%c0_12, %c1, %c0_13, %c0_14] : memref<3x3x8x16xbf16, #tpu.memory_space<vmem>>, vector<1x1x8x16xbf16>
    %12 = vector.shape_cast %11 : vector<1x1x8x16xbf16> to vector<8x16xbf16>
    %cst_15 = arith.constant dense<0.000000e+00> : vector<16x16xf32>
    %13 = tpu.matmul %10, %12, %cst_15 {dimension_numbers = #tpu.dot_dimension_numbers<[1], [0], [0], [1], [0, 0, 1, 1], [], []>} : vector<16x8xbf16>, vector<8x16xbf16>, vector<16x16xf32> -> vector<16x16xf32>
    %14 = arith.addf %9, %13 : vector<16x16xf32>
    %15 = vector.extract_strided_slice %2 {offsets = [1, 0], sizes = [16, 8], strides = [1, 1]} : vector<17x8xbf16> to vector<16x8xbf16>
    %c0_16 = arith.constant 0 : index
    %c2 = arith.constant 2 : index
    %c0_17 = arith.constant 0 : index
    %c0_18 = arith.constant 0 : index
    %16 = vector.load %arg8[%c0_16, %c2, %c0_17, %c0_18] : memref<3x3x8x16xbf16, #tpu.memory_space<vmem>>, vector<1x1x8x16xbf16>
    %17 = vector.shape_cast %16 : vector<1x1x8x16xbf16> to vector<8x16xbf16>
    %cst_19 = arith.constant dense<0.000000e+00> : vector<16x16xf32>
    %18 = tpu.matmul %15, %17, %cst_19 {dimension_numbers = #tpu.dot_dimension_numbers<[1], [0], [0], [1], [0, 0, 1, 1], [], []>} : vector<16x8xbf16>, vector<8x16xbf16>, vector<16x16xf32> -> vector<16x16xf32>
    %19 = arith.addf %14, %18 : vector<16x16xf32>
    %c0_20 = arith.constant 0 : index
    %c0_21 = arith.constant 0 : index
    %c0_22 = arith.constant 0 : index
    %c0_23 = arith.constant 0 : index
    %20 = vector.load %arg3[%c0_20, %c0_21, %c0_22, %c0_23] : memref<1x1x17x8xbf16, #tpu.memory_space<vmem>>, vector<1x1x17x8xbf16>
    %21 = vector.shape_cast %20 : vector<1x1x17x8xbf16> to vector<17x8xbf16>
    %c0_24 = arith.constant 0 : index
    %c0_25 = arith.constant 0 : index
    %c0_26 = arith.constant 0 : index
    %c0_27 = arith.constant 0 : index
    %22 = vector.load %arg6[%c0_24, %c0_25, %c0_26, %c0_27] : memref<1x1x17x8xbf16, #tpu.memory_space<vmem>>, vector<1x1x17x8xbf16>
    %23 = vector.shape_cast %22 : vector<1x1x17x8xbf16> to vector<17x8xbf16>
    %24 = vector.extract_strided_slice %21 {offsets = [0, 0], sizes = [16, 8], strides = [1, 1]} : vector<17x8xbf16> to vector<16x8xbf16>
    %c1_28 = arith.constant 1 : index
    %c0_29 = arith.constant 0 : index
    %c0_30 = arith.constant 0 : index
    %c0_31 = arith.constant 0 : index
    %25 = vector.load %arg8[%c1_28, %c0_29, %c0_30, %c0_31] : memref<3x3x8x16xbf16, #tpu.memory_space<vmem>>, vector<1x1x8x16xbf16>
    %26 = vector.shape_cast %25 : vector<1x1x8x16xbf16> to vector<8x16xbf16>
    %cst_32 = arith.constant dense<0.000000e+00> : vector<16x16xf32>
    %27 = tpu.matmul %24, %26, %cst_32 {dimension_numbers = #tpu.dot_dimension_numbers<[1], [0], [0], [1], [0, 0, 1, 1], [], []>} : vector<16x8xbf16>, vector<8x16xbf16>, vector<16x16xf32> -> vector<16x16xf32>
    %28 = arith.addf %19, %27 : vector<16x16xf32>
    %29 = vector.extract_strided_slice %23 {offsets = [0, 0], sizes = [16, 8], strides = [1, 1]} : vector<17x8xbf16> to vector<16x8xbf16>
    %c1_33 = arith.constant 1 : index
    %c1_34 = arith.constant 1 : index
    %c0_35 = arith.constant 0 : index
    %c0_36 = arith.constant 0 : index
    %30 = vector.load %arg8[%c1_33, %c1_34, %c0_35, %c0_36] : memref<3x3x8x16xbf16, #tpu.memory_space<vmem>>, vector<1x1x8x16xbf16>
    %31 = vector.shape_cast %30 : vector<1x1x8x16xbf16> to vector<8x16xbf16>
    %cst_37 = arith.constant dense<0.000000e+00> : vector<16x16xf32>
    %32 = tpu.matmul %29, %31, %cst_37 {dimension_numbers = #tpu.dot_dimension_numbers<[1], [0], [0], [1], [0, 0, 1, 1], [], []>} : vector<16x8xbf16>, vector<8x16xbf16>, vector<16x16xf32> -> vector<16x16xf32>
    %33 = arith.addf %28, %32 : vector<16x16xf32>
    %34 = vector.extract_strided_slice %21 {offsets = [1, 0], sizes = [16, 8], strides = [1, 1]} : vector<17x8xbf16> to vector<16x8xbf16>
    %c1_38 = arith.constant 1 : index
    %c2_39 = arith.constant 2 : index
    %c0_40 = arith.constant 0 : index
    %c0_41 = arith.constant 0 : index
    %35 = vector.load %arg8[%c1_38, %c2_39, %c0_40, %c0_41] : memref<3x3x8x16xbf16, #tpu.memory_space<vmem>>, vector<1x1x8x16xbf16>
    %36 = vector.shape_cast %35 : vector<1x1x8x16xbf16> to vector<8x16xbf16>
    %cst_42 = arith.constant dense<0.000000e+00> : vector<16x16xf32>
    %37 = tpu.matmul %34, %36, %cst_42 {dimension_numbers = #tpu.dot_dimension_numbers<[1], [0], [0], [1], [0, 0, 1, 1], [], []>} : vector<16x8xbf16>, vector<8x16xbf16>, vector<16x16xf32> -> vector<16x16xf32>
    %38 = arith.addf %33, %37 : vector<16x16xf32>
    %c0_43 = arith.constant 0 : index
    %c0_44 = arith.constant 0 : index
    %c0_45 = arith.constant 0 : index
    %c0_46 = arith.constant 0 : index
    %39 = vector.load %arg4[%c0_43, %c0_44, %c0_45, %c0_46] : memref<1x1x17x8xbf16, #tpu.memory_space<vmem>>, vector<1x1x17x8xbf16>
    %40 = vector.shape_cast %39 : vector<1x1x17x8xbf16> to vector<17x8xbf16>
    %c0_47 = arith.constant 0 : index
    %c0_48 = arith.constant 0 : index
    %c0_49 = arith.constant 0 : index
    %c0_50 = arith.constant 0 : index
    %41 = vector.load %arg7[%c0_47, %c0_48, %c0_49, %c0_50] : memref<1x1x17x8xbf16, #tpu.memory_space<vmem>>, vector<1x1x17x8xbf16>
    %42 = vector.shape_cast %41 : vector<1x1x17x8xbf16> to vector<17x8xbf16>
    %43 = vector.extract_strided_slice %40 {offsets = [0, 0], sizes = [16, 8], strides = [1, 1]} : vector<17x8xbf16> to vector<16x8xbf16>
    %c2_51 = arith.constant 2 : index
    %c0_52 = arith.constant 0 : index
    %c0_53 = arith.constant 0 : index
    %c0_54 = arith.constant 0 : index
    %44 = vector.load %arg8[%c2_51, %c0_52, %c0_53, %c0_54] : memref<3x3x8x16xbf16, #tpu.memory_space<vmem>>, vector<1x1x8x16xbf16>
    %45 = vector.shape_cast %44 : vector<1x1x8x16xbf16> to vector<8x16xbf16>
    %cst_55 = arith.constant dense<0.000000e+00> : vector<16x16xf32>
    %46 = tpu.matmul %43, %45, %cst_55 {dimension_numbers = #tpu.dot_dimension_numbers<[1], [0], [0], [1], [0, 0, 1, 1], [], []>} : vector<16x8xbf16>, vector<8x16xbf16>, vector<16x16xf32> -> vector<16x16xf32>
    %47 = arith.addf %38, %46 : vector<16x16xf32>
    %48 = vector.extract_strided_slice %42 {offsets = [0, 0], sizes = [16, 8], strides = [1, 1]} : vector<17x8xbf16> to vector<16x8xbf16>
    %c2_56 = arith.constant 2 : index
    %c1_57 = arith.constant 1 : index
    %c0_58 = arith.constant 0 : index
    %c0_59 = arith.constant 0 : index
    %49 = vector.load %arg8[%c2_56, %c1_57, %c0_58, %c0_59] : memref<3x3x8x16xbf16, #tpu.memory_space<vmem>>, vector<1x1x8x16xbf16>
    %50 = vector.shape_cast %49 : vector<1x1x8x16xbf16> to vector<8x16xbf16>
    %cst_60 = arith.constant dense<0.000000e+00> : vector<16x16xf32>
    %51 = tpu.matmul %48, %50, %cst_60 {dimension_numbers = #tpu.dot_dimension_numbers<[1], [0], [0], [1], [0, 0, 1, 1], [], []>} : vector<16x8xbf16>, vector<8x16xbf16>, vector<16x16xf32> -> vector<16x16xf32>
    %52 = arith.addf %47, %51 : vector<16x16xf32>
    %53 = vector.extract_strided_slice %40 {offsets = [1, 0], sizes = [16, 8], strides = [1, 1]} : vector<17x8xbf16> to vector<16x8xbf16>
    %c2_61 = arith.constant 2 : index
    %c2_62 = arith.constant 2 : index
    %c0_63 = arith.constant 0 : index
    %c0_64 = arith.constant 0 : index
    %54 = vector.load %arg8[%c2_61, %c2_62, %c0_63, %c0_64] : memref<3x3x8x16xbf16, #tpu.memory_space<vmem>>, vector<1x1x8x16xbf16>
    %55 = vector.shape_cast %54 : vector<1x1x8x16xbf16> to vector<8x16xbf16>
    %cst_65 = arith.constant dense<0.000000e+00> : vector<16x16xf32>
    %56 = tpu.matmul %53, %55, %cst_65 {dimension_numbers = #tpu.dot_dimension_numbers<[1], [0], [0], [1], [0, 0, 1, 1], [], []>} : vector<16x8xbf16>, vector<8x16xbf16>, vector<16x16xf32> -> vector<16x16xf32>
    %57 = arith.addf %52, %56 : vector<16x16xf32>
    %c0_66 = arith.constant 0 : index
    %c0_67 = arith.constant 0 : index
    %58 = vector.load %arg9[%c0_66, %c0_67] : memref<1x16xf32, #tpu.memory_space<vmem>>, vector<1x16xf32>
    %59 = vector.broadcast %58 : vector<1x16xf32> to vector<16x16xf32>
    %60 = arith.addf %57, %59 : vector<16x16xf32>
    %cst_68 = arith.constant 0.000000e+00 : f32
    %61 = vector.broadcast %cst_68 : f32 to vector<16x16xf32>
    %62 = arith.maximumf %60, %61 : vector<16x16xf32>
    %63 = arith.truncf %62 : vector<16x16xf32> to vector<16x16xbf16>
    %c0_69 = arith.constant 0 : index
    %c0_70 = arith.constant 0 : index
    %c0_71 = arith.constant 0 : index
    %c0_72 = arith.constant 0 : index
    %64 = vector.load %arg10[%c0_69, %c0_70, %c0_71, %c0_72] : memref<1x1x16x16xbf16, #tpu.memory_space<vmem>>, vector<1x1x16x16xbf16>
    %65 = vector.shape_cast %64 : vector<1x1x16x16xbf16> to vector<16x16xbf16>
    %66 = vector.shape_cast %63 : vector<16x16xbf16> to vector<1x1x16x16xbf16>
    tpu.vector_store %arg10[%c0_69, %c0_70, %c0_71, %c0_72], %66 {strides = array<i32>} : memref<1x1x16x16xbf16, #tpu.memory_space<vmem>>, vector<1x1x16x16xbf16>,
    return
  }
  func.func @transform_0(%arg0: i32, %arg1: i32) -> (i32, i32, i32, i32) {
    %c2_i32 = arith.constant 2 : i32
    %0 = arith.muli %c2_i32, %arg1 : i32
    %c0_i32 = arith.constant 0 : i32
    %1 = arith.addi %0, %c0_i32 : i32
    %c0_i32_0 = arith.constant 0 : i32
    %c0_i32_1 = arith.constant 0 : i32
    %c0_i32_2 = arith.constant 0 : i32
    return %arg0, %1, %c0_i32_0, %c0_i32_1 : i32, i32, i32, i32
  }
  func.func @transform_1(%arg0: i32, %arg1: i32) -> (i32, i32, i32, i32) {
    %c2_i32 = arith.constant 2 : i32
    %0 = arith.muli %c2_i32, %arg1 : i32
    %c1_i32 = arith.constant 1 : i32
    %1 = arith.addi %0, %c1_i32 : i32
    %c0_i32 = arith.constant 0 : i32
    %c0_i32_0 = arith.constant 0 : i32
    %c0_i32_1 = arith.constant 0 : i32
    return %arg0, %1, %c0_i32, %c0_i32_0 : i32, i32, i32, i32
  }
  func.func @transform_2(%arg0: i32, %arg1: i32) -> (i32, i32, i32, i32) {
    %c2_i32 = arith.constant 2 : i32
    %0 = arith.muli %c2_i32, %arg1 : i32
    %c2_i32_0 = arith.constant 2 : i32
    %1 = arith.addi %0, %c2_i32_0 : i32
    %c0_i32 = arith.constant 0 : i32
    %c0_i32_1 = arith.constant 0 : i32
    %c0_i32_2 = arith.constant 0 : i32
    return %arg0, %1, %c0_i32, %c0_i32_1 : i32, i32, i32, i32
  }
  func.func @transform_3(%arg0: i32, %arg1: i32) -> (i32, i32, i32, i32) {
    %c2_i32 = arith.constant 2 : i32
    %0 = arith.muli %c2_i32, %arg1 : i32
    %c0_i32 = arith.constant 0 : i32
    %1 = arith.addi %0, %c0_i32 : i32
    %c0_i32_0 = arith.constant 0 : i32
    %c0_i32_1 = arith.constant 0 : i32
    %c0_i32_2 = arith.constant 0 : i32
    return %arg0, %1, %c0_i32_0, %c0_i32_1 : i32, i32, i32, i32
  }
  func.func @transform_4(%arg0: i32, %arg1: i32) -> (i32, i32, i32, i32) {
    %c2_i32 = arith.constant 2 : i32
    %0 = arith.muli %c2_i32, %arg1 : i32
    %c1_i32 = arith.constant 1 : i32
    %1 = arith.addi %0, %c1_i32 : i32
    %c0_i32 = arith.constant 0 : i32
    %c0_i32_0 = arith.constant 0 : i32
    %c0_i32_1 = arith.constant 0 : i32
    return %arg0, %1, %c0_i32, %c0_i32_0 : i32, i32, i32, i32
  }
  func.func @transform_5(%arg0: i32, %arg1: i32) -> (i32, i32, i32, i32) {
    %c2_i32 = arith.constant 2 : i32
    %0 = arith.muli %c2_i32, %arg1 : i32
    %c2_i32_0 = arith.constant 2 : i32
    %1 = arith.addi %0, %c2_i32_0 : i32
    %c0_i32 = arith.constant 0 : i32
    %c0_i32_1 = arith.constant 0 : i32
    %c0_i32_2 = arith.constant 0 : i32
    return %arg0, %1, %c0_i32, %c0_i32_1 : i32, i32, i32, i32
  }
  func.func @transform_6(%arg0: i32, %arg1: i32) -> (i32, i32, i32, i32) {
    %c0_i32 = arith.constant 0 : i32
    %c0_i32_0 = arith.constant 0 : i32
    %c0_i32_1 = arith.constant 0 : i32
    %c0_i32_2 = arith.constant 0 : i32
    %c0_i32_3 = arith.constant 0 : i32
    return %c0_i32, %c0_i32_0, %c0_i32_1, %c0_i32_2 : i32, i32, i32, i32
  }
  func.func @transform_7(%arg0: i32, %arg1: i32) -> (i32, i32) {
    %c0_i32 = arith.constant 0 : i32
    %c0_i32_0 = arith.constant 0 : i32
    %c0_i32_1 = arith.constant 0 : i32
    return %c0_i32, %c0_i32_0 : i32, i32
  }
  func.func @transform_8(%arg0: i32, %arg1: i32) -> (i32, i32, i32, i32) {
    %c0_i32 = arith.constant 0 : i32
    %c0_i32_0 = arith.constant 0 : i32
    %c0_i32_1 = arith.constant 0 : i32
    return %arg0, %arg1, %c0_i32, %c0_i32_0 : i32, i32, i32, i32
  }
}

module attributes {stable_mosaic.version = 11 : i64} {
  func.func @_cconv_down_kernel(%arg0: i32, %arg1: i32, %arg2: memref<1x1x9x16xbf16, #tpu.memory_space<vmem>>, %arg3: memref<1x1x9x16xbf16, #tpu.memory_space<vmem>>, %arg4: memref<1x1x9x16xbf16, #tpu.memory_space<vmem>>, %arg5: memref<1x1x9x16xbf16, #tpu.memory_space<vmem>>, %arg6: memref<1x1x9x16xbf16, #tpu.memory_space<vmem>>, %arg7: memref<1x1x9x16xbf16, #tpu.memory_space<vmem>>, %arg8: memref<3x3x16x32xbf16, #tpu.memory_space<vmem>>, %arg9: memref<1x32xf32, #tpu.memory_space<vmem>>, %arg10: memref<1x1x8x32xbf16, #tpu.memory_space<vmem>>) attributes {dimension_semantics = [#tpu.dimension_semantics<parallel>, #tpu.dimension_semantics<parallel>], iteration_bounds = array<i64: 2, 8>, scalar_prefetch = 0 : i64, scratch_operands = 0 : i64, tpu.core_type = #tpu.core_type<tc>, window_params = [{transform_indices = @transform_0, window_bounds = array<i64: 1, 1, 9, 16>}, {transform_indices = @transform_1, window_bounds = array<i64: 1, 1, 9, 16>}, {transform_indices = @transform_2, window_bounds = array<i64: 1, 1, 9, 16>}, {transform_indices = @transform_3, window_bounds = array<i64: 1, 1, 9, 16>}, {transform_indices = @transform_4, window_bounds = array<i64: 1, 1, 9, 16>}, {transform_indices = @transform_5, window_bounds = array<i64: 1, 1, 9, 16>}, {pipeline_mode = #tpu.pipeline_mode<synchronous>, transform_indices = @transform_6, window_bounds = array<i64: 3, 3, 16, 32>}, {pipeline_mode = #tpu.pipeline_mode<synchronous>, transform_indices = @transform_7, window_bounds = array<i64: 1, 32>}, {transform_indices = @transform_8, window_bounds = array<i64: 1, 1, 8, 32>}]} {
    %cst = arith.constant 0.000000e+00 : f32
    %0 = vector.broadcast %cst : f32 to vector<8x32xf32>
    %c0 = arith.constant 0 : index
    %c0_0 = arith.constant 0 : index
    %c0_1 = arith.constant 0 : index
    %c0_2 = arith.constant 0 : index
    %1 = vector.load %arg2[%c0, %c0_0, %c0_1, %c0_2] : memref<1x1x9x16xbf16, #tpu.memory_space<vmem>>, vector<1x1x9x16xbf16>
    %2 = vector.shape_cast %1 : vector<1x1x9x16xbf16> to vector<9x16xbf16>
    %c0_3 = arith.constant 0 : index
    %c0_4 = arith.constant 0 : index
    %c0_5 = arith.constant 0 : index
    %c0_6 = arith.constant 0 : index
    %3 = vector.load %arg5[%c0_3, %c0_4, %c0_5, %c0_6] : memref<1x1x9x16xbf16, #tpu.memory_space<vmem>>, vector<1x1x9x16xbf16>
    %4 = vector.shape_cast %3 : vector<1x1x9x16xbf16> to vector<9x16xbf16>
    %5 = vector.extract_strided_slice %2 {offsets = [0, 0], sizes = [8, 16], strides = [1, 1]} : vector<9x16xbf16> to vector<8x16xbf16>
    %c0_7 = arith.constant 0 : index
    %c0_8 = arith.constant 0 : index
    %c0_9 = arith.constant 0 : index
    %c0_10 = arith.constant 0 : index
    %6 = vector.load %arg8[%c0_7, %c0_8, %c0_9, %c0_10] : memref<3x3x16x32xbf16, #tpu.memory_space<vmem>>, vector<1x1x16x32xbf16>
    %7 = vector.shape_cast %6 : vector<1x1x16x32xbf16> to vector<16x32xbf16>
    %cst_11 = arith.constant dense<0.000000e+00> : vector<8x32xf32>
    %8 = tpu.matmul %5, %7, %cst_11 {dimension_numbers = #tpu.dot_dimension_numbers<[1], [0], [0], [1], [0, 0, 1, 1], [], []>} : vector<8x16xbf16>, vector<16x32xbf16>, vector<8x32xf32> -> vector<8x32xf32>
    %9 = arith.addf %0, %8 : vector<8x32xf32>
    %10 = vector.extract_strided_slice %4 {offsets = [0, 0], sizes = [8, 16], strides = [1, 1]} : vector<9x16xbf16> to vector<8x16xbf16>
    %c0_12 = arith.constant 0 : index
    %c1 = arith.constant 1 : index
    %c0_13 = arith.constant 0 : index
    %c0_14 = arith.constant 0 : index
    %11 = vector.load %arg8[%c0_12, %c1, %c0_13, %c0_14] : memref<3x3x16x32xbf16, #tpu.memory_space<vmem>>, vector<1x1x16x32xbf16>
    %12 = vector.shape_cast %11 : vector<1x1x16x32xbf16> to vector<16x32xbf16>
    %cst_15 = arith.constant dense<0.000000e+00> : vector<8x32xf32>
    %13 = tpu.matmul %10, %12, %cst_15 {dimension_numbers = #tpu.dot_dimension_numbers<[1], [0], [0], [1], [0, 0, 1, 1], [], []>} : vector<8x16xbf16>, vector<16x32xbf16>, vector<8x32xf32> -> vector<8x32xf32>
    %14 = arith.addf %9, %13 : vector<8x32xf32>
    %15 = vector.extract_strided_slice %2 {offsets = [1, 0], sizes = [8, 16], strides = [1, 1]} : vector<9x16xbf16> to vector<8x16xbf16>
    %c0_16 = arith.constant 0 : index
    %c2 = arith.constant 2 : index
    %c0_17 = arith.constant 0 : index
    %c0_18 = arith.constant 0 : index
    %16 = vector.load %arg8[%c0_16, %c2, %c0_17, %c0_18] : memref<3x3x16x32xbf16, #tpu.memory_space<vmem>>, vector<1x1x16x32xbf16>
    %17 = vector.shape_cast %16 : vector<1x1x16x32xbf16> to vector<16x32xbf16>
    %cst_19 = arith.constant dense<0.000000e+00> : vector<8x32xf32>
    %18 = tpu.matmul %15, %17, %cst_19 {dimension_numbers = #tpu.dot_dimension_numbers<[1], [0], [0], [1], [0, 0, 1, 1], [], []>} : vector<8x16xbf16>, vector<16x32xbf16>, vector<8x32xf32> -> vector<8x32xf32>
    %19 = arith.addf %14, %18 : vector<8x32xf32>
    %c0_20 = arith.constant 0 : index
    %c0_21 = arith.constant 0 : index
    %c0_22 = arith.constant 0 : index
    %c0_23 = arith.constant 0 : index
    %20 = vector.load %arg3[%c0_20, %c0_21, %c0_22, %c0_23] : memref<1x1x9x16xbf16, #tpu.memory_space<vmem>>, vector<1x1x9x16xbf16>
    %21 = vector.shape_cast %20 : vector<1x1x9x16xbf16> to vector<9x16xbf16>
    %c0_24 = arith.constant 0 : index
    %c0_25 = arith.constant 0 : index
    %c0_26 = arith.constant 0 : index
    %c0_27 = arith.constant 0 : index
    %22 = vector.load %arg6[%c0_24, %c0_25, %c0_26, %c0_27] : memref<1x1x9x16xbf16, #tpu.memory_space<vmem>>, vector<1x1x9x16xbf16>
    %23 = vector.shape_cast %22 : vector<1x1x9x16xbf16> to vector<9x16xbf16>
    %24 = vector.extract_strided_slice %21 {offsets = [0, 0], sizes = [8, 16], strides = [1, 1]} : vector<9x16xbf16> to vector<8x16xbf16>
    %c1_28 = arith.constant 1 : index
    %c0_29 = arith.constant 0 : index
    %c0_30 = arith.constant 0 : index
    %c0_31 = arith.constant 0 : index
    %25 = vector.load %arg8[%c1_28, %c0_29, %c0_30, %c0_31] : memref<3x3x16x32xbf16, #tpu.memory_space<vmem>>, vector<1x1x16x32xbf16>
    %26 = vector.shape_cast %25 : vector<1x1x16x32xbf16> to vector<16x32xbf16>
    %cst_32 = arith.constant dense<0.000000e+00> : vector<8x32xf32>
    %27 = tpu.matmul %24, %26, %cst_32 {dimension_numbers = #tpu.dot_dimension_numbers<[1], [0], [0], [1], [0, 0, 1, 1], [], []>} : vector<8x16xbf16>, vector<16x32xbf16>, vector<8x32xf32> -> vector<8x32xf32>
    %28 = arith.addf %19, %27 : vector<8x32xf32>
    %29 = vector.extract_strided_slice %23 {offsets = [0, 0], sizes = [8, 16], strides = [1, 1]} : vector<9x16xbf16> to vector<8x16xbf16>
    %c1_33 = arith.constant 1 : index
    %c1_34 = arith.constant 1 : index
    %c0_35 = arith.constant 0 : index
    %c0_36 = arith.constant 0 : index
    %30 = vector.load %arg8[%c1_33, %c1_34, %c0_35, %c0_36] : memref<3x3x16x32xbf16, #tpu.memory_space<vmem>>, vector<1x1x16x32xbf16>
    %31 = vector.shape_cast %30 : vector<1x1x16x32xbf16> to vector<16x32xbf16>
    %cst_37 = arith.constant dense<0.000000e+00> : vector<8x32xf32>
    %32 = tpu.matmul %29, %31, %cst_37 {dimension_numbers = #tpu.dot_dimension_numbers<[1], [0], [0], [1], [0, 0, 1, 1], [], []>} : vector<8x16xbf16>, vector<16x32xbf16>, vector<8x32xf32> -> vector<8x32xf32>
    %33 = arith.addf %28, %32 : vector<8x32xf32>
    %34 = vector.extract_strided_slice %21 {offsets = [1, 0], sizes = [8, 16], strides = [1, 1]} : vector<9x16xbf16> to vector<8x16xbf16>
    %c1_38 = arith.constant 1 : index
    %c2_39 = arith.constant 2 : index
    %c0_40 = arith.constant 0 : index
    %c0_41 = arith.constant 0 : index
    %35 = vector.load %arg8[%c1_38, %c2_39, %c0_40, %c0_41] : memref<3x3x16x32xbf16, #tpu.memory_space<vmem>>, vector<1x1x16x32xbf16>
    %36 = vector.shape_cast %35 : vector<1x1x16x32xbf16> to vector<16x32xbf16>
    %cst_42 = arith.constant dense<0.000000e+00> : vector<8x32xf32>
    %37 = tpu.matmul %34, %36, %cst_42 {dimension_numbers = #tpu.dot_dimension_numbers<[1], [0], [0], [1], [0, 0, 1, 1], [], []>} : vector<8x16xbf16>, vector<16x32xbf16>, vector<8x32xf32> -> vector<8x32xf32>
    %38 = arith.addf %33, %37 : vector<8x32xf32>
    %c0_43 = arith.constant 0 : index
    %c0_44 = arith.constant 0 : index
    %c0_45 = arith.constant 0 : index
    %c0_46 = arith.constant 0 : index
    %39 = vector.load %arg4[%c0_43, %c0_44, %c0_45, %c0_46] : memref<1x1x9x16xbf16, #tpu.memory_space<vmem>>, vector<1x1x9x16xbf16>
    %40 = vector.shape_cast %39 : vector<1x1x9x16xbf16> to vector<9x16xbf16>
    %c0_47 = arith.constant 0 : index
    %c0_48 = arith.constant 0 : index
    %c0_49 = arith.constant 0 : index
    %c0_50 = arith.constant 0 : index
    %41 = vector.load %arg7[%c0_47, %c0_48, %c0_49, %c0_50] : memref<1x1x9x16xbf16, #tpu.memory_space<vmem>>, vector<1x1x9x16xbf16>
    %42 = vector.shape_cast %41 : vector<1x1x9x16xbf16> to vector<9x16xbf16>
    %43 = vector.extract_strided_slice %40 {offsets = [0, 0], sizes = [8, 16], strides = [1, 1]} : vector<9x16xbf16> to vector<8x16xbf16>
    %c2_51 = arith.constant 2 : index
    %c0_52 = arith.constant 0 : index
    %c0_53 = arith.constant 0 : index
    %c0_54 = arith.constant 0 : index
    %44 = vector.load %arg8[%c2_51, %c0_52, %c0_53, %c0_54] : memref<3x3x16x32xbf16, #tpu.memory_space<vmem>>, vector<1x1x16x32xbf16>
    %45 = vector.shape_cast %44 : vector<1x1x16x32xbf16> to vector<16x32xbf16>
    %cst_55 = arith.constant dense<0.000000e+00> : vector<8x32xf32>
    %46 = tpu.matmul %43, %45, %cst_55 {dimension_numbers = #tpu.dot_dimension_numbers<[1], [0], [0], [1], [0, 0, 1, 1], [], []>} : vector<8x16xbf16>, vector<16x32xbf16>, vector<8x32xf32> -> vector<8x32xf32>
    %47 = arith.addf %38, %46 : vector<8x32xf32>
    %48 = vector.extract_strided_slice %42 {offsets = [0, 0], sizes = [8, 16], strides = [1, 1]} : vector<9x16xbf16> to vector<8x16xbf16>
    %c2_56 = arith.constant 2 : index
    %c1_57 = arith.constant 1 : index
    %c0_58 = arith.constant 0 : index
    %c0_59 = arith.constant 0 : index
    %49 = vector.load %arg8[%c2_56, %c1_57, %c0_58, %c0_59] : memref<3x3x16x32xbf16, #tpu.memory_space<vmem>>, vector<1x1x16x32xbf16>
    %50 = vector.shape_cast %49 : vector<1x1x16x32xbf16> to vector<16x32xbf16>
    %cst_60 = arith.constant dense<0.000000e+00> : vector<8x32xf32>
    %51 = tpu.matmul %48, %50, %cst_60 {dimension_numbers = #tpu.dot_dimension_numbers<[1], [0], [0], [1], [0, 0, 1, 1], [], []>} : vector<8x16xbf16>, vector<16x32xbf16>, vector<8x32xf32> -> vector<8x32xf32>
    %52 = arith.addf %47, %51 : vector<8x32xf32>
    %53 = vector.extract_strided_slice %40 {offsets = [1, 0], sizes = [8, 16], strides = [1, 1]} : vector<9x16xbf16> to vector<8x16xbf16>
    %c2_61 = arith.constant 2 : index
    %c2_62 = arith.constant 2 : index
    %c0_63 = arith.constant 0 : index
    %c0_64 = arith.constant 0 : index
    %54 = vector.load %arg8[%c2_61, %c2_62, %c0_63, %c0_64] : memref<3x3x16x32xbf16, #tpu.memory_space<vmem>>, vector<1x1x16x32xbf16>
    %55 = vector.shape_cast %54 : vector<1x1x16x32xbf16> to vector<16x32xbf16>
    %cst_65 = arith.constant dense<0.000000e+00> : vector<8x32xf32>
    %56 = tpu.matmul %53, %55, %cst_65 {dimension_numbers = #tpu.dot_dimension_numbers<[1], [0], [0], [1], [0, 0, 1, 1], [], []>} : vector<8x16xbf16>, vector<16x32xbf16>, vector<8x32xf32> -> vector<8x32xf32>
    %57 = arith.addf %52, %56 : vector<8x32xf32>
    %c0_66 = arith.constant 0 : index
    %c0_67 = arith.constant 0 : index
    %58 = vector.load %arg9[%c0_66, %c0_67] : memref<1x32xf32, #tpu.memory_space<vmem>>, vector<1x32xf32>
    %59 = vector.broadcast %58 : vector<1x32xf32> to vector<8x32xf32>
    %60 = arith.addf %57, %59 : vector<8x32xf32>
    %cst_68 = arith.constant 0.000000e+00 : f32
    %61 = vector.broadcast %cst_68 : f32 to vector<8x32xf32>
    %62 = arith.maximumf %60, %61 : vector<8x32xf32>
    %63 = arith.truncf %62 : vector<8x32xf32> to vector<8x32xbf16>
    %c0_69 = arith.constant 0 : index
    %c0_70 = arith.constant 0 : index
    %c0_71 = arith.constant 0 : index
    %c0_72 = arith.constant 0 : index
    %64 = vector.load %arg10[%c0_69, %c0_70, %c0_71, %c0_72] : memref<1x1x8x32xbf16, #tpu.memory_space<vmem>>, vector<1x1x8x32xbf16>
    %65 = vector.shape_cast %64 : vector<1x1x8x32xbf16> to vector<8x32xbf16>
    %66 = vector.shape_cast %63 : vector<8x32xbf16> to vector<1x1x8x32xbf16>
    tpu.vector_store %arg10[%c0_69, %c0_70, %c0_71, %c0_72], %66 {strides = array<i32>} : memref<1x1x8x32xbf16, #tpu.memory_space<vmem>>, vector<1x1x8x32xbf16>,
    return
  }
  func.func @transform_0(%arg0: i32, %arg1: i32) -> (i32, i32, i32, i32) {
    %c2_i32 = arith.constant 2 : i32
    %0 = arith.muli %c2_i32, %arg1 : i32
    %c0_i32 = arith.constant 0 : i32
    %1 = arith.addi %0, %c0_i32 : i32
    %c0_i32_0 = arith.constant 0 : i32
    %c0_i32_1 = arith.constant 0 : i32
    %c0_i32_2 = arith.constant 0 : i32
    return %arg0, %1, %c0_i32_0, %c0_i32_1 : i32, i32, i32, i32
  }
  func.func @transform_1(%arg0: i32, %arg1: i32) -> (i32, i32, i32, i32) {
    %c2_i32 = arith.constant 2 : i32
    %0 = arith.muli %c2_i32, %arg1 : i32
    %c1_i32 = arith.constant 1 : i32
    %1 = arith.addi %0, %c1_i32 : i32
    %c0_i32 = arith.constant 0 : i32
    %c0_i32_0 = arith.constant 0 : i32
    %c0_i32_1 = arith.constant 0 : i32
    return %arg0, %1, %c0_i32, %c0_i32_0 : i32, i32, i32, i32
  }
  func.func @transform_2(%arg0: i32, %arg1: i32) -> (i32, i32, i32, i32) {
    %c2_i32 = arith.constant 2 : i32
    %0 = arith.muli %c2_i32, %arg1 : i32
    %c2_i32_0 = arith.constant 2 : i32
    %1 = arith.addi %0, %c2_i32_0 : i32
    %c0_i32 = arith.constant 0 : i32
    %c0_i32_1 = arith.constant 0 : i32
    %c0_i32_2 = arith.constant 0 : i32
    return %arg0, %1, %c0_i32, %c0_i32_1 : i32, i32, i32, i32
  }
  func.func @transform_3(%arg0: i32, %arg1: i32) -> (i32, i32, i32, i32) {
    %c2_i32 = arith.constant 2 : i32
    %0 = arith.muli %c2_i32, %arg1 : i32
    %c0_i32 = arith.constant 0 : i32
    %1 = arith.addi %0, %c0_i32 : i32
    %c0_i32_0 = arith.constant 0 : i32
    %c0_i32_1 = arith.constant 0 : i32
    %c0_i32_2 = arith.constant 0 : i32
    return %arg0, %1, %c0_i32_0, %c0_i32_1 : i32, i32, i32, i32
  }
  func.func @transform_4(%arg0: i32, %arg1: i32) -> (i32, i32, i32, i32) {
    %c2_i32 = arith.constant 2 : i32
    %0 = arith.muli %c2_i32, %arg1 : i32
    %c1_i32 = arith.constant 1 : i32
    %1 = arith.addi %0, %c1_i32 : i32
    %c0_i32 = arith.constant 0 : i32
    %c0_i32_0 = arith.constant 0 : i32
    %c0_i32_1 = arith.constant 0 : i32
    return %arg0, %1, %c0_i32, %c0_i32_0 : i32, i32, i32, i32
  }
  func.func @transform_5(%arg0: i32, %arg1: i32) -> (i32, i32, i32, i32) {
    %c2_i32 = arith.constant 2 : i32
    %0 = arith.muli %c2_i32, %arg1 : i32
    %c2_i32_0 = arith.constant 2 : i32
    %1 = arith.addi %0, %c2_i32_0 : i32
    %c0_i32 = arith.constant 0 : i32
    %c0_i32_1 = arith.constant 0 : i32
    %c0_i32_2 = arith.constant 0 : i32
    return %arg0, %1, %c0_i32, %c0_i32_1 : i32, i32, i32, i32
  }
  func.func @transform_6(%arg0: i32, %arg1: i32) -> (i32, i32, i32, i32) {
    %c0_i32 = arith.constant 0 : i32
    %c0_i32_0 = arith.constant 0 : i32
    %c0_i32_1 = arith.constant 0 : i32
    %c0_i32_2 = arith.constant 0 : i32
    %c0_i32_3 = arith.constant 0 : i32
    return %c0_i32, %c0_i32_0, %c0_i32_1, %c0_i32_2 : i32, i32, i32, i32
  }
  func.func @transform_7(%arg0: i32, %arg1: i32) -> (i32, i32) {
    %c0_i32 = arith.constant 0 : i32
    %c0_i32_0 = arith.constant 0 : i32
    %c0_i32_1 = arith.constant 0 : i32
    return %c0_i32, %c0_i32_0 : i32, i32
  }
  func.func @transform_8(%arg0: i32, %arg1: i32) -> (i32, i32, i32, i32) {
    %c0_i32 = arith.constant 0 : i32
    %c0_i32_0 = arith.constant 0 : i32
    %c0_i32_1 = arith.constant 0 : i32
    return %arg0, %arg1, %c0_i32, %c0_i32_0 : i32, i32, i32, i32
  }
}

module attributes {stable_mosaic.version = 11 : i64} {
  func.func @_cconv_up_kernel(%arg0: i32, %arg1: i32, %arg2: memref<1x1x6x64xbf16, #tpu.memory_space<vmem>>, %arg3: memref<1x1x6x64xbf16, #tpu.memory_space<vmem>>, %arg4: memref<1x1x6x64xbf16, #tpu.memory_space<vmem>>, %arg5: memref<4x4x64x32xbf16, #tpu.memory_space<vmem>>, %arg6: memref<1x32xf32, #tpu.memory_space<vmem>>, %arg7: memref<1x1x4x32xbf16, #tpu.memory_space<vmem>>, %arg8: memref<1x1x4x32xbf16, #tpu.memory_space<vmem>>, %arg9: memref<1x1x4x32xbf16, #tpu.memory_space<vmem>>, %arg10: memref<1x1x4x32xbf16, #tpu.memory_space<vmem>>) attributes {dimension_semantics = [#tpu.dimension_semantics<parallel>, #tpu.dimension_semantics<parallel>], iteration_bounds = array<i64: 2, 4>, scalar_prefetch = 0 : i64, scratch_operands = 0 : i64, tpu.core_type = #tpu.core_type<tc>, window_params = [{transform_indices = @transform_0, window_bounds = array<i64: 1, 1, 6, 64>}, {transform_indices = @transform_1, window_bounds = array<i64: 1, 1, 6, 64>}, {transform_indices = @transform_2, window_bounds = array<i64: 1, 1, 6, 64>}, {pipeline_mode = #tpu.pipeline_mode<synchronous>, transform_indices = @transform_3, window_bounds = array<i64: 4, 4, 64, 32>}, {pipeline_mode = #tpu.pipeline_mode<synchronous>, transform_indices = @transform_4, window_bounds = array<i64: 1, 32>}, {transform_indices = @transform_5, window_bounds = array<i64: 1, 1, 4, 32>}, {transform_indices = @transform_6, window_bounds = array<i64: 1, 1, 4, 32>}, {transform_indices = @transform_7, window_bounds = array<i64: 1, 1, 4, 32>}, {transform_indices = @transform_8, window_bounds = array<i64: 1, 1, 4, 32>}]} {
    %c0 = arith.constant 0 : index
    %c0_0 = arith.constant 0 : index
    %c0_1 = arith.constant 0 : index
    %c0_2 = arith.constant 0 : index
    %0 = vector.load %arg2[%c0, %c0_0, %c0_1, %c0_2] : memref<1x1x6x64xbf16, #tpu.memory_space<vmem>>, vector<1x1x6x64xbf16>
    %1 = vector.shape_cast %0 : vector<1x1x6x64xbf16> to vector<6x64xbf16>
    %c0_3 = arith.constant 0 : index
    %c0_4 = arith.constant 0 : index
    %c0_5 = arith.constant 0 : index
    %c0_6 = arith.constant 0 : index
    %2 = vector.load %arg3[%c0_3, %c0_4, %c0_5, %c0_6] : memref<1x1x6x64xbf16, #tpu.memory_space<vmem>>, vector<1x1x6x64xbf16>
    %3 = vector.shape_cast %2 : vector<1x1x6x64xbf16> to vector<6x64xbf16>
    %c0_7 = arith.constant 0 : index
    %c0_8 = arith.constant 0 : index
    %c0_9 = arith.constant 0 : index
    %c0_10 = arith.constant 0 : index
    %4 = vector.load %arg4[%c0_7, %c0_8, %c0_9, %c0_10] : memref<1x1x6x64xbf16, #tpu.memory_space<vmem>>, vector<1x1x6x64xbf16>
    %5 = vector.shape_cast %4 : vector<1x1x6x64xbf16> to vector<6x64xbf16>
    %c0_11 = arith.constant 0 : index
    %c0_12 = arith.constant 0 : index
    %6 = vector.load %arg6[%c0_11, %c0_12] : memref<1x32xf32, #tpu.memory_space<vmem>>, vector<1x32xf32>
    %cst = arith.constant 0.000000e+00 : f32
    %7 = vector.broadcast %cst : f32 to vector<4x32xf32>
    %8 = vector.extract_strided_slice %3 {offsets = [1, 0], sizes = [4, 64], strides = [1, 1]} : vector<6x64xbf16> to vector<4x64xbf16>
    %c1 = arith.constant 1 : index
    %c1_13 = arith.constant 1 : index
    %c0_14 = arith.constant 0 : index
    %c0_15 = arith.constant 0 : index
    %9 = vector.load %arg5[%c1, %c1_13, %c0_14, %c0_15] : memref<4x4x64x32xbf16, #tpu.memory_space<vmem>>, vector<1x1x64x32xbf16>
    %10 = vector.shape_cast %9 : vector<1x1x64x32xbf16> to vector<64x32xbf16>
    %cst_16 = arith.constant dense<0.000000e+00> : vector<4x32xf32>
    %11 = tpu.matmul %8, %10, %cst_16 {dimension_numbers = #tpu.dot_dimension_numbers<[1], [0], [0], [1], [0, 0, 1, 1], [], []>} : vector<4x64xbf16>, vector<64x32xbf16>, vector<4x32xf32> -> vector<4x32xf32>
    %12 = arith.addf %7, %11 : vector<4x32xf32>
    %13 = vector.extract_strided_slice %3 {offsets = [0, 0], sizes = [4, 64], strides = [1, 1]} : vector<6x64xbf16> to vector<4x64xbf16>
    %c1_17 = arith.constant 1 : index
    %c3 = arith.constant 3 : index
    %c0_18 = arith.constant 0 : index
    %c0_19 = arith.constant 0 : index
    %14 = vector.load %arg5[%c1_17, %c3, %c0_18, %c0_19] : memref<4x4x64x32xbf16, #tpu.memory_space<vmem>>, vector<1x1x64x32xbf16>
    %15 = vector.shape_cast %14 : vector<1x1x64x32xbf16> to vector<64x32xbf16>
    %cst_20 = arith.constant dense<0.000000e+00> : vector<4x32xf32>
    %16 = tpu.matmul %13, %15, %cst_20 {dimension_numbers = #tpu.dot_dimension_numbers<[1], [0], [0], [1], [0, 0, 1, 1], [], []>} : vector<4x64xbf16>, vector<64x32xbf16>, vector<4x32xf32> -> vector<4x32xf32>
    %17 = arith.addf %12, %16 : vector<4x32xf32>
    %18 = vector.extract_strided_slice %1 {offsets = [1, 0], sizes = [4, 64], strides = [1, 1]} : vector<6x64xbf16> to vector<4x64xbf16>
    %c3_21 = arith.constant 3 : index
    %c1_22 = arith.constant 1 : index
    %c0_23 = arith.constant 0 : index
    %c0_24 = arith.constant 0 : index
    %19 = vector.load %arg5[%c3_21, %c1_22, %c0_23, %c0_24] : memref<4x4x64x32xbf16, #tpu.memory_space<vmem>>, vector<1x1x64x32xbf16>
    %20 = vector.shape_cast %19 : vector<1x1x64x32xbf16> to vector<64x32xbf16>
    %cst_25 = arith.constant dense<0.000000e+00> : vector<4x32xf32>
    %21 = tpu.matmul %18, %20, %cst_25 {dimension_numbers = #tpu.dot_dimension_numbers<[1], [0], [0], [1], [0, 0, 1, 1], [], []>} : vector<4x64xbf16>, vector<64x32xbf16>, vector<4x32xf32> -> vector<4x32xf32>
    %22 = arith.addf %17, %21 : vector<4x32xf32>
    %23 = vector.extract_strided_slice %1 {offsets = [0, 0], sizes = [4, 64], strides = [1, 1]} : vector<6x64xbf16> to vector<4x64xbf16>
    %c3_26 = arith.constant 3 : index
    %c3_27 = arith.constant 3 : index
    %c0_28 = arith.constant 0 : index
    %c0_29 = arith.constant 0 : index
    %24 = vector.load %arg5[%c3_26, %c3_27, %c0_28, %c0_29] : memref<4x4x64x32xbf16, #tpu.memory_space<vmem>>, vector<1x1x64x32xbf16>
    %25 = vector.shape_cast %24 : vector<1x1x64x32xbf16> to vector<64x32xbf16>
    %cst_30 = arith.constant dense<0.000000e+00> : vector<4x32xf32>
    %26 = tpu.matmul %23, %25, %cst_30 {dimension_numbers = #tpu.dot_dimension_numbers<[1], [0], [0], [1], [0, 0, 1, 1], [], []>} : vector<4x64xbf16>, vector<64x32xbf16>, vector<4x32xf32> -> vector<4x32xf32>
    %27 = arith.addf %22, %26 : vector<4x32xf32>
    %28 = vector.broadcast %6 : vector<1x32xf32> to vector<4x32xf32>
    %29 = arith.addf %27, %28 : vector<4x32xf32>
    %cst_31 = arith.constant 0.000000e+00 : f32
    %30 = vector.broadcast %cst_31 : f32 to vector<4x32xf32>
    %31 = arith.maximumf %29, %30 : vector<4x32xf32>
    %32 = arith.truncf %31 : vector<4x32xf32> to vector<4x32xbf16>
    %c0_32 = arith.constant 0 : index
    %c0_33 = arith.constant 0 : index
    %c0_34 = arith.constant 0 : index
    %c0_35 = arith.constant 0 : index
    %33 = vector.load %arg7[%c0_32, %c0_33, %c0_34, %c0_35] : memref<1x1x4x32xbf16, #tpu.memory_space<vmem>>, vector<1x1x4x32xbf16>
    %34 = vector.shape_cast %33 : vector<1x1x4x32xbf16> to vector<4x32xbf16>
    %35 = vector.shape_cast %32 : vector<4x32xbf16> to vector<1x1x4x32xbf16>
    tpu.vector_store %arg7[%c0_32, %c0_33, %c0_34, %c0_35], %35 {strides = array<i32>} : memref<1x1x4x32xbf16, #tpu.memory_space<vmem>>, vector<1x1x4x32xbf16>,
    %cst_36 = arith.constant 0.000000e+00 : f32
    %36 = vector.broadcast %cst_36 : f32 to vector<4x32xf32>
    %37 = vector.extract_strided_slice %3 {offsets = [1, 0], sizes = [4, 64], strides = [1, 1]} : vector<6x64xbf16> to vector<4x64xbf16>
    %c1_37 = arith.constant 1 : index
    %c2 = arith.constant 2 : index
    %c0_38 = arith.constant 0 : index
    %c0_39 = arith.constant 0 : index
    %38 = vector.load %arg5[%c1_37, %c2, %c0_38, %c0_39] : memref<4x4x64x32xbf16, #tpu.memory_space<vmem>>, vector<1x1x64x32xbf16>
    %39 = vector.shape_cast %38 : vector<1x1x64x32xbf16> to vector<64x32xbf16>
    %cst_40 = arith.constant dense<0.000000e+00> : vector<4x32xf32>
    %40 = tpu.matmul %37, %39, %cst_40 {dimension_numbers = #tpu.dot_dimension_numbers<[1], [0], [0], [1], [0, 0, 1, 1], [], []>} : vector<4x64xbf16>, vector<64x32xbf16>, vector<4x32xf32> -> vector<4x32xf32>
    %41 = arith.addf %36, %40 : vector<4x32xf32>
    %42 = vector.extract_strided_slice %3 {offsets = [2, 0], sizes = [4, 64], strides = [1, 1]} : vector<6x64xbf16> to vector<4x64xbf16>
    %c1_41 = arith.constant 1 : index
    %c0_42 = arith.constant 0 : index
    %c0_43 = arith.constant 0 : index
    %c0_44 = arith.constant 0 : index
    %43 = vector.load %arg5[%c1_41, %c0_42, %c0_43, %c0_44] : memref<4x4x64x32xbf16, #tpu.memory_space<vmem>>, vector<1x1x64x32xbf16>
    %44 = vector.shape_cast %43 : vector<1x1x64x32xbf16> to vector<64x32xbf16>
    %cst_45 = arith.constant dense<0.000000e+00> : vector<4x32xf32>
    %45 = tpu.matmul %42, %44, %cst_45 {dimension_numbers = #tpu.dot_dimension_numbers<[1], [0], [0], [1], [0, 0, 1, 1], [], []>} : vector<4x64xbf16>, vector<64x32xbf16>, vector<4x32xf32> -> vector<4x32xf32>
    %46 = arith.addf %41, %45 : vector<4x32xf32>
    %47 = vector.extract_strided_slice %1 {offsets = [1, 0], sizes = [4, 64], strides = [1, 1]} : vector<6x64xbf16> to vector<4x64xbf16>
    %c3_46 = arith.constant 3 : index
    %c2_47 = arith.constant 2 : index
    %c0_48 = arith.constant 0 : index
    %c0_49 = arith.constant 0 : index
    %48 = vector.load %arg5[%c3_46, %c2_47, %c0_48, %c0_49] : memref<4x4x64x32xbf16, #tpu.memory_space<vmem>>, vector<1x1x64x32xbf16>
    %49 = vector.shape_cast %48 : vector<1x1x64x32xbf16> to vector<64x32xbf16>
    %cst_50 = arith.constant dense<0.000000e+00> : vector<4x32xf32>
    %50 = tpu.matmul %47, %49, %cst_50 {dimension_numbers = #tpu.dot_dimension_numbers<[1], [0], [0], [1], [0, 0, 1, 1], [], []>} : vector<4x64xbf16>, vector<64x32xbf16>, vector<4x32xf32> -> vector<4x32xf32>
    %51 = arith.addf %46, %50 : vector<4x32xf32>
    %52 = vector.extract_strided_slice %1 {offsets = [2, 0], sizes = [4, 64], strides = [1, 1]} : vector<6x64xbf16> to vector<4x64xbf16>
    %c3_51 = arith.constant 3 : index
    %c0_52 = arith.constant 0 : index
    %c0_53 = arith.constant 0 : index
    %c0_54 = arith.constant 0 : index
    %53 = vector.load %arg5[%c3_51, %c0_52, %c0_53, %c0_54] : memref<4x4x64x32xbf16, #tpu.memory_space<vmem>>, vector<1x1x64x32xbf16>
    %54 = vector.shape_cast %53 : vector<1x1x64x32xbf16> to vector<64x32xbf16>
    %cst_55 = arith.constant dense<0.000000e+00> : vector<4x32xf32>
    %55 = tpu.matmul %52, %54, %cst_55 {dimension_numbers = #tpu.dot_dimension_numbers<[1], [0], [0], [1], [0, 0, 1, 1], [], []>} : vector<4x64xbf16>, vector<64x32xbf16>, vector<4x32xf32> -> vector<4x32xf32>
    %56 = arith.addf %51, %55 : vector<4x32xf32>
    %57 = vector.broadcast %6 : vector<1x32xf32> to vector<4x32xf32>
    %58 = arith.addf %56, %57 : vector<4x32xf32>
    %cst_56 = arith.constant 0.000000e+00 : f32
    %59 = vector.broadcast %cst_56 : f32 to vector<4x32xf32>
    %60 = arith.maximumf %58, %59 : vector<4x32xf32>
    %61 = arith.truncf %60 : vector<4x32xf32> to vector<4x32xbf16>
    %c0_57 = arith.constant 0 : index
    %c0_58 = arith.constant 0 : index
    %c0_59 = arith.constant 0 : index
    %c0_60 = arith.constant 0 : index
    %62 = vector.load %arg8[%c0_57, %c0_58, %c0_59, %c0_60] : memref<1x1x4x32xbf16, #tpu.memory_space<vmem>>, vector<1x1x4x32xbf16>
    %63 = vector.shape_cast %62 : vector<1x1x4x32xbf16> to vector<4x32xbf16>
    %64 = vector.shape_cast %61 : vector<4x32xbf16> to vector<1x1x4x32xbf16>
    tpu.vector_store %arg8[%c0_57, %c0_58, %c0_59, %c0_60], %64 {strides = array<i32>} : memref<1x1x4x32xbf16, #tpu.memory_space<vmem>>, vector<1x1x4x32xbf16>,
    %cst_61 = arith.constant 0.000000e+00 : f32
    %65 = vector.broadcast %cst_61 : f32 to vector<4x32xf32>
    %66 = vector.extract_strided_slice %3 {offsets = [1, 0], sizes = [4, 64], strides = [1, 1]} : vector<6x64xbf16> to vector<4x64xbf16>
    %c2_62 = arith.constant 2 : index
    %c1_63 = arith.constant 1 : index
    %c0_64 = arith.constant 0 : index
    %c0_65 = arith.constant 0 : index
    %67 = vector.load %arg5[%c2_62, %c1_63, %c0_64, %c0_65] : memref<4x4x64x32xbf16, #tpu.memory_space<vmem>>, vector<1x1x64x32xbf16>
    %68 = vector.shape_cast %67 : vector<1x1x64x32xbf16> to vector<64x32xbf16>
    %cst_66 = arith.constant dense<0.000000e+00> : vector<4x32xf32>
    %69 = tpu.matmul %66, %68, %cst_66 {dimension_numbers = #tpu.dot_dimension_numbers<[1], [0], [0], [1], [0, 0, 1, 1], [], []>} : vector<4x64xbf16>, vector<64x32xbf16>, vector<4x32xf32> -> vector<4x32xf32>
    %70 = arith.addf %65, %69 : vector<4x32xf32>
    %71 = vector.extract_strided_slice %3 {offsets = [0, 0], sizes = [4, 64], strides = [1, 1]} : vector<6x64xbf16> to vector<4x64xbf16>
    %c2_67 = arith.constant 2 : index
    %c3_68 = arith.constant 3 : index
    %c0_69 = arith.constant 0 : index
    %c0_70 = arith.constant 0 : index
    %72 = vector.load %arg5[%c2_67, %c3_68, %c0_69, %c0_70] : memref<4x4x64x32xbf16, #tpu.memory_space<vmem>>, vector<1x1x64x32xbf16>
    %73 = vector.shape_cast %72 : vector<1x1x64x32xbf16> to vector<64x32xbf16>
    %cst_71 = arith.constant dense<0.000000e+00> : vector<4x32xf32>
    %74 = tpu.matmul %71, %73, %cst_71 {dimension_numbers = #tpu.dot_dimension_numbers<[1], [0], [0], [1], [0, 0, 1, 1], [], []>} : vector<4x64xbf16>, vector<64x32xbf16>, vector<4x32xf32> -> vector<4x32xf32>
    %75 = arith.addf %70, %74 : vector<4x32xf32>
    %76 = vector.extract_strided_slice %5 {offsets = [1, 0], sizes = [4, 64], strides = [1, 1]} : vector<6x64xbf16> to vector<4x64xbf16>
    %c0_72 = arith.constant 0 : index
    %c1_73 = arith.constant 1 : index
    %c0_74 = arith.constant 0 : index
    %c0_75 = arith.constant 0 : index
    %77 = vector.load %arg5[%c0_72, %c1_73, %c0_74, %c0_75] : memref<4x4x64x32xbf16, #tpu.memory_space<vmem>>, vector<1x1x64x32xbf16>
    %78 = vector.shape_cast %77 : vector<1x1x64x32xbf16> to vector<64x32xbf16>
    %cst_76 = arith.constant dense<0.000000e+00> : vector<4x32xf32>
    %79 = tpu.matmul %76, %78, %cst_76 {dimension_numbers = #tpu.dot_dimension_numbers<[1], [0], [0], [1], [0, 0, 1, 1], [], []>} : vector<4x64xbf16>, vector<64x32xbf16>, vector<4x32xf32> -> vector<4x32xf32>
    %80 = arith.addf %75, %79 : vector<4x32xf32>
    %81 = vector.extract_strided_slice %5 {offsets = [0, 0], sizes = [4, 64], strides = [1, 1]} : vector<6x64xbf16> to vector<4x64xbf16>
    %c0_77 = arith.constant 0 : index
    %c3_78 = arith.constant 3 : index
    %c0_79 = arith.constant 0 : index
    %c0_80 = arith.constant 0 : index
    %82 = vector.load %arg5[%c0_77, %c3_78, %c0_79, %c0_80] : memref<4x4x64x32xbf16, #tpu.memory_space<vmem>>, vector<1x1x64x32xbf16>
    %83 = vector.shape_cast %82 : vector<1x1x64x32xbf16> to vector<64x32xbf16>
    %cst_81 = arith.constant dense<0.000000e+00> : vector<4x32xf32>
    %84 = tpu.matmul %81, %83, %cst_81 {dimension_numbers = #tpu.dot_dimension_numbers<[1], [0], [0], [1], [0, 0, 1, 1], [], []>} : vector<4x64xbf16>, vector<64x32xbf16>, vector<4x32xf32> -> vector<4x32xf32>
    %85 = arith.addf %80, %84 : vector<4x32xf32>
    %86 = vector.broadcast %6 : vector<1x32xf32> to vector<4x32xf32>
    %87 = arith.addf %85, %86 : vector<4x32xf32>
    %cst_82 = arith.constant 0.000000e+00 : f32
    %88 = vector.broadcast %cst_82 : f32 to vector<4x32xf32>
    %89 = arith.maximumf %87, %88 : vector<4x32xf32>
    %90 = arith.truncf %89 : vector<4x32xf32> to vector<4x32xbf16>
    %c0_83 = arith.constant 0 : index
    %c0_84 = arith.constant 0 : index
    %c0_85 = arith.constant 0 : index
    %c0_86 = arith.constant 0 : index
    %91 = vector.load %arg9[%c0_83, %c0_84, %c0_85, %c0_86] : memref<1x1x4x32xbf16, #tpu.memory_space<vmem>>, vector<1x1x4x32xbf16>
    %92 = vector.shape_cast %91 : vector<1x1x4x32xbf16> to vector<4x32xbf16>
    %93 = vector.shape_cast %90 : vector<4x32xbf16> to vector<1x1x4x32xbf16>
    tpu.vector_store %arg9[%c0_83, %c0_84, %c0_85, %c0_86], %93 {strides = array<i32>} : memref<1x1x4x32xbf16, #tpu.memory_space<vmem>>, vector<1x1x4x32xbf16>,
    %cst_87 = arith.constant 0.000000e+00 : f32
    %94 = vector.broadcast %cst_87 : f32 to vector<4x32xf32>
    %95 = vector.extract_strided_slice %3 {offsets = [1, 0], sizes = [4, 64], strides = [1, 1]} : vector<6x64xbf16> to vector<4x64xbf16>
    %c2_88 = arith.constant 2 : index
    %c2_89 = arith.constant 2 : index
    %c0_90 = arith.constant 0 : index
    %c0_91 = arith.constant 0 : index
    %96 = vector.load %arg5[%c2_88, %c2_89, %c0_90, %c0_91] : memref<4x4x64x32xbf16, #tpu.memory_space<vmem>>, vector<1x1x64x32xbf16>
    %97 = vector.shape_cast %96 : vector<1x1x64x32xbf16> to vector<64x32xbf16>
    %cst_92 = arith.constant dense<0.000000e+00> : vector<4x32xf32>
    %98 = tpu.matmul %95, %97, %cst_92 {dimension_numbers = #tpu.dot_dimension_numbers<[1], [0], [0], [1], [0, 0, 1, 1], [], []>} : vector<4x64xbf16>, vector<64x32xbf16>, vector<4x32xf32> -> vector<4x32xf32>
    %99 = arith.addf %94, %98 : vector<4x32xf32>
    %100 = vector.extract_strided_slice %3 {offsets = [2, 0], sizes = [4, 64], strides = [1, 1]} : vector<6x64xbf16> to vector<4x64xbf16>
    %c2_93 = arith.constant 2 : index
    %c0_94 = arith.constant 0 : index
    %c0_95 = arith.constant 0 : index
    %c0_96 = arith.constant 0 : index
    %101 = vector.load %arg5[%c2_93, %c0_94, %c0_95, %c0_96] : memref<4x4x64x32xbf16, #tpu.memory_space<vmem>>, vector<1x1x64x32xbf16>
    %102 = vector.shape_cast %101 : vector<1x1x64x32xbf16> to vector<64x32xbf16>
    %cst_97 = arith.constant dense<0.000000e+00> : vector<4x32xf32>
    %103 = tpu.matmul %100, %102, %cst_97 {dimension_numbers = #tpu.dot_dimension_numbers<[1], [0], [0], [1], [0, 0, 1, 1], [], []>} : vector<4x64xbf16>, vector<64x32xbf16>, vector<4x32xf32> -> vector<4x32xf32>
    %104 = arith.addf %99, %103 : vector<4x32xf32>
    %105 = vector.extract_strided_slice %5 {offsets = [1, 0], sizes = [4, 64], strides = [1, 1]} : vector<6x64xbf16> to vector<4x64xbf16>
    %c0_98 = arith.constant 0 : index
    %c2_99 = arith.constant 2 : index
    %c0_100 = arith.constant 0 : index
    %c0_101 = arith.constant 0 : index
    %106 = vector.load %arg5[%c0_98, %c2_99, %c0_100, %c0_101] : memref<4x4x64x32xbf16, #tpu.memory_space<vmem>>, vector<1x1x64x32xbf16>
    %107 = vector.shape_cast %106 : vector<1x1x64x32xbf16> to vector<64x32xbf16>
    %cst_102 = arith.constant dense<0.000000e+00> : vector<4x32xf32>
    %108 = tpu.matmul %105, %107, %cst_102 {dimension_numbers = #tpu.dot_dimension_numbers<[1], [0], [0], [1], [0, 0, 1, 1], [], []>} : vector<4x64xbf16>, vector<64x32xbf16>, vector<4x32xf32> -> vector<4x32xf32>
    %109 = arith.addf %104, %108 : vector<4x32xf32>
    %110 = vector.extract_strided_slice %5 {offsets = [2, 0], sizes = [4, 64], strides = [1, 1]} : vector<6x64xbf16> to vector<4x64xbf16>
    %c0_103 = arith.constant 0 : index
    %c0_104 = arith.constant 0 : index
    %c0_105 = arith.constant 0 : index
    %c0_106 = arith.constant 0 : index
    %111 = vector.load %arg5[%c0_103, %c0_104, %c0_105, %c0_106] : memref<4x4x64x32xbf16, #tpu.memory_space<vmem>>, vector<1x1x64x32xbf16>
    %112 = vector.shape_cast %111 : vector<1x1x64x32xbf16> to vector<64x32xbf16>
    %cst_107 = arith.constant dense<0.000000e+00> : vector<4x32xf32>
    %113 = tpu.matmul %110, %112, %cst_107 {dimension_numbers = #tpu.dot_dimension_numbers<[1], [0], [0], [1], [0, 0, 1, 1], [], []>} : vector<4x64xbf16>, vector<64x32xbf16>, vector<4x32xf32> -> vector<4x32xf32>
    %114 = arith.addf %109, %113 : vector<4x32xf32>
    %115 = vector.broadcast %6 : vector<1x32xf32> to vector<4x32xf32>
    %116 = arith.addf %114, %115 : vector<4x32xf32>
    %cst_108 = arith.constant 0.000000e+00 : f32
    %117 = vector.broadcast %cst_108 : f32 to vector<4x32xf32>
    %118 = arith.maximumf %116, %117 : vector<4x32xf32>
    %119 = arith.truncf %118 : vector<4x32xf32> to vector<4x32xbf16>
    %c0_109 = arith.constant 0 : index
    %c0_110 = arith.constant 0 : index
    %c0_111 = arith.constant 0 : index
    %c0_112 = arith.constant 0 : index
    %120 = vector.load %arg10[%c0_109, %c0_110, %c0_111, %c0_112] : memref<1x1x4x32xbf16, #tpu.memory_space<vmem>>, vector<1x1x4x32xbf16>
    %121 = vector.shape_cast %120 : vector<1x1x4x32xbf16> to vector<4x32xbf16>
    %122 = vector.shape_cast %119 : vector<4x32xbf16> to vector<1x1x4x32xbf16>
    tpu.vector_store %arg10[%c0_109, %c0_110, %c0_111, %c0_112], %122 {strides = array<i32>} : memref<1x1x4x32xbf16, #tpu.memory_space<vmem>>, vector<1x1x4x32xbf16>,
    return
  }
  func.func @transform_0(%arg0: i32, %arg1: i32) -> (i32, i32, i32, i32) {
    %c0_i32 = arith.constant 0 : i32
    %0 = arith.addi %arg1, %c0_i32 : i32
    %c0_i32_0 = arith.constant 0 : i32
    %c0_i32_1 = arith.constant 0 : i32
    %c0_i32_2 = arith.constant 0 : i32
    return %arg0, %0, %c0_i32_0, %c0_i32_1 : i32, i32, i32, i32
  }
  func.func @transform_1(%arg0: i32, %arg1: i32) -> (i32, i32, i32, i32) {
    %c1_i32 = arith.constant 1 : i32
    %0 = arith.addi %arg1, %c1_i32 : i32
    %c0_i32 = arith.constant 0 : i32
    %c0_i32_0 = arith.constant 0 : i32
    %c0_i32_1 = arith.constant 0 : i32
    return %arg0, %0, %c0_i32, %c0_i32_0 : i32, i32, i32, i32
  }
  func.func @transform_2(%arg0: i32, %arg1: i32) -> (i32, i32, i32, i32) {
    %c2_i32 = arith.constant 2 : i32
    %0 = arith.addi %arg1, %c2_i32 : i32
    %c0_i32 = arith.constant 0 : i32
    %c0_i32_0 = arith.constant 0 : i32
    %c0_i32_1 = arith.constant 0 : i32
    return %arg0, %0, %c0_i32, %c0_i32_0 : i32, i32, i32, i32
  }
  func.func @transform_3(%arg0: i32, %arg1: i32) -> (i32, i32, i32, i32) {
    %c0_i32 = arith.constant 0 : i32
    %c0_i32_0 = arith.constant 0 : i32
    %c0_i32_1 = arith.constant 0 : i32
    %c0_i32_2 = arith.constant 0 : i32
    %c0_i32_3 = arith.constant 0 : i32
    return %c0_i32, %c0_i32_0, %c0_i32_1, %c0_i32_2 : i32, i32, i32, i32
  }
  func.func @transform_4(%arg0: i32, %arg1: i32) -> (i32, i32) {
    %c0_i32 = arith.constant 0 : i32
    %c0_i32_0 = arith.constant 0 : i32
    %c0_i32_1 = arith.constant 0 : i32
    return %c0_i32, %c0_i32_0 : i32, i32
  }
  func.func @transform_5(%arg0: i32, %arg1: i32) -> (i32, i32, i32, i32) {
    %c0_i32 = arith.constant 0 : i32
    %c0_i32_0 = arith.constant 0 : i32
    %c0_i32_1 = arith.constant 0 : i32
    return %arg0, %arg1, %c0_i32, %c0_i32_0 : i32, i32, i32, i32
  }
  func.func @transform_6(%arg0: i32, %arg1: i32) -> (i32, i32, i32, i32) {
    %c0_i32 = arith.constant 0 : i32
    %c0_i32_0 = arith.constant 0 : i32
    %c0_i32_1 = arith.constant 0 : i32
    return %arg0, %arg1, %c0_i32, %c0_i32_0 : i32, i32, i32, i32
  }
  func.func @transform_7(%arg0: i32, %arg1: i32) -> (i32, i32, i32, i32) {
    %c0_i32 = arith.constant 0 : i32
    %c0_i32_0 = arith.constant 0 : i32
    %c0_i32_1 = arith.constant 0 : i32
    return %arg0, %arg1, %c0_i32, %c0_i32_0 : i32, i32, i32, i32
  }
  func.func @transform_8(%arg0: i32, %arg1: i32) -> (i32, i32, i32, i32) {
    %c0_i32 = arith.constant 0 : i32
    %c0_i32_0 = arith.constant 0 : i32
    %c0_i32_1 = arith.constant 0 : i32
    return %arg0, %arg1, %c0_i32, %c0_i32_0 : i32, i32, i32, i32
  }
}

module attributes {stable_mosaic.version = 11 : i64} {
  func.func @_cconv_down_kernel(%arg0: i32, %arg1: i32, %arg2: memref<1x1x5x32xbf16, #tpu.memory_space<vmem>>, %arg3: memref<1x1x5x32xbf16, #tpu.memory_space<vmem>>, %arg4: memref<1x1x5x32xbf16, #tpu.memory_space<vmem>>, %arg5: memref<1x1x5x32xbf16, #tpu.memory_space<vmem>>, %arg6: memref<1x1x5x32xbf16, #tpu.memory_space<vmem>>, %arg7: memref<1x1x5x32xbf16, #tpu.memory_space<vmem>>, %arg8: memref<3x3x32x64xbf16, #tpu.memory_space<vmem>>, %arg9: memref<1x64xf32, #tpu.memory_space<vmem>>, %arg10: memref<1x1x4x64xbf16, #tpu.memory_space<vmem>>) attributes {dimension_semantics = [#tpu.dimension_semantics<parallel>, #tpu.dimension_semantics<parallel>], iteration_bounds = array<i64: 2, 4>, scalar_prefetch = 0 : i64, scratch_operands = 0 : i64, tpu.core_type = #tpu.core_type<tc>, window_params = [{transform_indices = @transform_0, window_bounds = array<i64: 1, 1, 5, 32>}, {transform_indices = @transform_1, window_bounds = array<i64: 1, 1, 5, 32>}, {transform_indices = @transform_2, window_bounds = array<i64: 1, 1, 5, 32>}, {transform_indices = @transform_3, window_bounds = array<i64: 1, 1, 5, 32>}, {transform_indices = @transform_4, window_bounds = array<i64: 1, 1, 5, 32>}, {transform_indices = @transform_5, window_bounds = array<i64: 1, 1, 5, 32>}, {pipeline_mode = #tpu.pipeline_mode<synchronous>, transform_indices = @transform_6, window_bounds = array<i64: 3, 3, 32, 64>}, {pipeline_mode = #tpu.pipeline_mode<synchronous>, transform_indices = @transform_7, window_bounds = array<i64: 1, 64>}, {transform_indices = @transform_8, window_bounds = array<i64: 1, 1, 4, 64>}]} {
    %cst = arith.constant 0.000000e+00 : f32
    %0 = vector.broadcast %cst : f32 to vector<4x64xf32>
    %c0 = arith.constant 0 : index
    %c0_0 = arith.constant 0 : index
    %c0_1 = arith.constant 0 : index
    %c0_2 = arith.constant 0 : index
    %1 = vector.load %arg2[%c0, %c0_0, %c0_1, %c0_2] : memref<1x1x5x32xbf16, #tpu.memory_space<vmem>>, vector<1x1x5x32xbf16>
    %2 = vector.shape_cast %1 : vector<1x1x5x32xbf16> to vector<5x32xbf16>
    %c0_3 = arith.constant 0 : index
    %c0_4 = arith.constant 0 : index
    %c0_5 = arith.constant 0 : index
    %c0_6 = arith.constant 0 : index
    %3 = vector.load %arg5[%c0_3, %c0_4, %c0_5, %c0_6] : memref<1x1x5x32xbf16, #tpu.memory_space<vmem>>, vector<1x1x5x32xbf16>
    %4 = vector.shape_cast %3 : vector<1x1x5x32xbf16> to vector<5x32xbf16>
    %5 = vector.extract_strided_slice %2 {offsets = [0, 0], sizes = [4, 32], strides = [1, 1]} : vector<5x32xbf16> to vector<4x32xbf16>
    %c0_7 = arith.constant 0 : index
    %c0_8 = arith.constant 0 : index
    %c0_9 = arith.constant 0 : index
    %c0_10 = arith.constant 0 : index
    %6 = vector.load %arg8[%c0_7, %c0_8, %c0_9, %c0_10] : memref<3x3x32x64xbf16, #tpu.memory_space<vmem>>, vector<1x1x32x64xbf16>
    %7 = vector.shape_cast %6 : vector<1x1x32x64xbf16> to vector<32x64xbf16>
    %cst_11 = arith.constant dense<0.000000e+00> : vector<4x64xf32>
    %8 = tpu.matmul %5, %7, %cst_11 {dimension_numbers = #tpu.dot_dimension_numbers<[1], [0], [0], [1], [0, 0, 1, 1], [], []>} : vector<4x32xbf16>, vector<32x64xbf16>, vector<4x64xf32> -> vector<4x64xf32>
    %9 = arith.addf %0, %8 : vector<4x64xf32>
    %10 = vector.extract_strided_slice %4 {offsets = [0, 0], sizes = [4, 32], strides = [1, 1]} : vector<5x32xbf16> to vector<4x32xbf16>
    %c0_12 = arith.constant 0 : index
    %c1 = arith.constant 1 : index
    %c0_13 = arith.constant 0 : index
    %c0_14 = arith.constant 0 : index
    %11 = vector.load %arg8[%c0_12, %c1, %c0_13, %c0_14] : memref<3x3x32x64xbf16, #tpu.memory_space<vmem>>, vector<1x1x32x64xbf16>
    %12 = vector.shape_cast %11 : vector<1x1x32x64xbf16> to vector<32x64xbf16>
    %cst_15 = arith.constant dense<0.000000e+00> : vector<4x64xf32>
    %13 = tpu.matmul %10, %12, %cst_15 {dimension_numbers = #tpu.dot_dimension_numbers<[1], [0], [0], [1], [0, 0, 1, 1], [], []>} : vector<4x32xbf16>, vector<32x64xbf16>, vector<4x64xf32> -> vector<4x64xf32>
    %14 = arith.addf %9, %13 : vector<4x64xf32>
    %15 = vector.extract_strided_slice %2 {offsets = [1, 0], sizes = [4, 32], strides = [1, 1]} : vector<5x32xbf16> to vector<4x32xbf16>
    %c0_16 = arith.constant 0 : index
    %c2 = arith.constant 2 : index
    %c0_17 = arith.constant 0 : index
    %c0_18 = arith.constant 0 : index
    %16 = vector.load %arg8[%c0_16, %c2, %c0_17, %c0_18] : memref<3x3x32x64xbf16, #tpu.memory_space<vmem>>, vector<1x1x32x64xbf16>
    %17 = vector.shape_cast %16 : vector<1x1x32x64xbf16> to vector<32x64xbf16>
    %cst_19 = arith.constant dense<0.000000e+00> : vector<4x64xf32>
    %18 = tpu.matmul %15, %17, %cst_19 {dimension_numbers = #tpu.dot_dimension_numbers<[1], [0], [0], [1], [0, 0, 1, 1], [], []>} : vector<4x32xbf16>, vector<32x64xbf16>, vector<4x64xf32> -> vector<4x64xf32>
    %19 = arith.addf %14, %18 : vector<4x64xf32>
    %c0_20 = arith.constant 0 : index
    %c0_21 = arith.constant 0 : index
    %c0_22 = arith.constant 0 : index
    %c0_23 = arith.constant 0 : index
    %20 = vector.load %arg3[%c0_20, %c0_21, %c0_22, %c0_23] : memref<1x1x5x32xbf16, #tpu.memory_space<vmem>>, vector<1x1x5x32xbf16>
    %21 = vector.shape_cast %20 : vector<1x1x5x32xbf16> to vector<5x32xbf16>
    %c0_24 = arith.constant 0 : index
    %c0_25 = arith.constant 0 : index
    %c0_26 = arith.constant 0 : index
    %c0_27 = arith.constant 0 : index
    %22 = vector.load %arg6[%c0_24, %c0_25, %c0_26, %c0_27] : memref<1x1x5x32xbf16, #tpu.memory_space<vmem>>, vector<1x1x5x32xbf16>
    %23 = vector.shape_cast %22 : vector<1x1x5x32xbf16> to vector<5x32xbf16>
    %24 = vector.extract_strided_slice %21 {offsets = [0, 0], sizes = [4, 32], strides = [1, 1]} : vector<5x32xbf16> to vector<4x32xbf16>
    %c1_28 = arith.constant 1 : index
    %c0_29 = arith.constant 0 : index
    %c0_30 = arith.constant 0 : index
    %c0_31 = arith.constant 0 : index
    %25 = vector.load %arg8[%c1_28, %c0_29, %c0_30, %c0_31] : memref<3x3x32x64xbf16, #tpu.memory_space<vmem>>, vector<1x1x32x64xbf16>
    %26 = vector.shape_cast %25 : vector<1x1x32x64xbf16> to vector<32x64xbf16>
    %cst_32 = arith.constant dense<0.000000e+00> : vector<4x64xf32>
    %27 = tpu.matmul %24, %26, %cst_32 {dimension_numbers = #tpu.dot_dimension_numbers<[1], [0], [0], [1], [0, 0, 1, 1], [], []>} : vector<4x32xbf16>, vector<32x64xbf16>, vector<4x64xf32> -> vector<4x64xf32>
    %28 = arith.addf %19, %27 : vector<4x64xf32>
    %29 = vector.extract_strided_slice %23 {offsets = [0, 0], sizes = [4, 32], strides = [1, 1]} : vector<5x32xbf16> to vector<4x32xbf16>
    %c1_33 = arith.constant 1 : index
    %c1_34 = arith.constant 1 : index
    %c0_35 = arith.constant 0 : index
    %c0_36 = arith.constant 0 : index
    %30 = vector.load %arg8[%c1_33, %c1_34, %c0_35, %c0_36] : memref<3x3x32x64xbf16, #tpu.memory_space<vmem>>, vector<1x1x32x64xbf16>
    %31 = vector.shape_cast %30 : vector<1x1x32x64xbf16> to vector<32x64xbf16>
    %cst_37 = arith.constant dense<0.000000e+00> : vector<4x64xf32>
    %32 = tpu.matmul %29, %31, %cst_37 {dimension_numbers = #tpu.dot_dimension_numbers<[1], [0], [0], [1], [0, 0, 1, 1], [], []>} : vector<4x32xbf16>, vector<32x64xbf16>, vector<4x64xf32> -> vector<4x64xf32>
    %33 = arith.addf %28, %32 : vector<4x64xf32>
    %34 = vector.extract_strided_slice %21 {offsets = [1, 0], sizes = [4, 32], strides = [1, 1]} : vector<5x32xbf16> to vector<4x32xbf16>
    %c1_38 = arith.constant 1 : index
    %c2_39 = arith.constant 2 : index
    %c0_40 = arith.constant 0 : index
    %c0_41 = arith.constant 0 : index
    %35 = vector.load %arg8[%c1_38, %c2_39, %c0_40, %c0_41] : memref<3x3x32x64xbf16, #tpu.memory_space<vmem>>, vector<1x1x32x64xbf16>
    %36 = vector.shape_cast %35 : vector<1x1x32x64xbf16> to vector<32x64xbf16>
    %cst_42 = arith.constant dense<0.000000e+00> : vector<4x64xf32>
    %37 = tpu.matmul %34, %36, %cst_42 {dimension_numbers = #tpu.dot_dimension_numbers<[1], [0], [0], [1], [0, 0, 1, 1], [], []>} : vector<4x32xbf16>, vector<32x64xbf16>, vector<4x64xf32> -> vector<4x64xf32>
    %38 = arith.addf %33, %37 : vector<4x64xf32>
    %c0_43 = arith.constant 0 : index
    %c0_44 = arith.constant 0 : index
    %c0_45 = arith.constant 0 : index
    %c0_46 = arith.constant 0 : index
    %39 = vector.load %arg4[%c0_43, %c0_44, %c0_45, %c0_46] : memref<1x1x5x32xbf16, #tpu.memory_space<vmem>>, vector<1x1x5x32xbf16>
    %40 = vector.shape_cast %39 : vector<1x1x5x32xbf16> to vector<5x32xbf16>
    %c0_47 = arith.constant 0 : index
    %c0_48 = arith.constant 0 : index
    %c0_49 = arith.constant 0 : index
    %c0_50 = arith.constant 0 : index
    %41 = vector.load %arg7[%c0_47, %c0_48, %c0_49, %c0_50] : memref<1x1x5x32xbf16, #tpu.memory_space<vmem>>, vector<1x1x5x32xbf16>
    %42 = vector.shape_cast %41 : vector<1x1x5x32xbf16> to vector<5x32xbf16>
    %43 = vector.extract_strided_slice %40 {offsets = [0, 0], sizes = [4, 32], strides = [1, 1]} : vector<5x32xbf16> to vector<4x32xbf16>
    %c2_51 = arith.constant 2 : index
    %c0_52 = arith.constant 0 : index
    %c0_53 = arith.constant 0 : index
    %c0_54 = arith.constant 0 : index
    %44 = vector.load %arg8[%c2_51, %c0_52, %c0_53, %c0_54] : memref<3x3x32x64xbf16, #tpu.memory_space<vmem>>, vector<1x1x32x64xbf16>
    %45 = vector.shape_cast %44 : vector<1x1x32x64xbf16> to vector<32x64xbf16>
    %cst_55 = arith.constant dense<0.000000e+00> : vector<4x64xf32>
    %46 = tpu.matmul %43, %45, %cst_55 {dimension_numbers = #tpu.dot_dimension_numbers<[1], [0], [0], [1], [0, 0, 1, 1], [], []>} : vector<4x32xbf16>, vector<32x64xbf16>, vector<4x64xf32> -> vector<4x64xf32>
    %47 = arith.addf %38, %46 : vector<4x64xf32>
    %48 = vector.extract_strided_slice %42 {offsets = [0, 0], sizes = [4, 32], strides = [1, 1]} : vector<5x32xbf16> to vector<4x32xbf16>
    %c2_56 = arith.constant 2 : index
    %c1_57 = arith.constant 1 : index
    %c0_58 = arith.constant 0 : index
    %c0_59 = arith.constant 0 : index
    %49 = vector.load %arg8[%c2_56, %c1_57, %c0_58, %c0_59] : memref<3x3x32x64xbf16, #tpu.memory_space<vmem>>, vector<1x1x32x64xbf16>
    %50 = vector.shape_cast %49 : vector<1x1x32x64xbf16> to vector<32x64xbf16>
    %cst_60 = arith.constant dense<0.000000e+00> : vector<4x64xf32>
    %51 = tpu.matmul %48, %50, %cst_60 {dimension_numbers = #tpu.dot_dimension_numbers<[1], [0], [0], [1], [0, 0, 1, 1], [], []>} : vector<4x32xbf16>, vector<32x64xbf16>, vector<4x64xf32> -> vector<4x64xf32>
    %52 = arith.addf %47, %51 : vector<4x64xf32>
    %53 = vector.extract_strided_slice %40 {offsets = [1, 0], sizes = [4, 32], strides = [1, 1]} : vector<5x32xbf16> to vector<4x32xbf16>
    %c2_61 = arith.constant 2 : index
    %c2_62 = arith.constant 2 : index
    %c0_63 = arith.constant 0 : index
    %c0_64 = arith.constant 0 : index
    %54 = vector.load %arg8[%c2_61, %c2_62, %c0_63, %c0_64] : memref<3x3x32x64xbf16, #tpu.memory_space<vmem>>, vector<1x1x32x64xbf16>
    %55 = vector.shape_cast %54 : vector<1x1x32x64xbf16> to vector<32x64xbf16>
    %cst_65 = arith.constant dense<0.000000e+00> : vector<4x64xf32>
    %56 = tpu.matmul %53, %55, %cst_65 {dimension_numbers = #tpu.dot_dimension_numbers<[1], [0], [0], [1], [0, 0, 1, 1], [], []>} : vector<4x32xbf16>, vector<32x64xbf16>, vector<4x64xf32> -> vector<4x64xf32>
    %57 = arith.addf %52, %56 : vector<4x64xf32>
    %c0_66 = arith.constant 0 : index
    %c0_67 = arith.constant 0 : index
    %58 = vector.load %arg9[%c0_66, %c0_67] : memref<1x64xf32, #tpu.memory_space<vmem>>, vector<1x64xf32>
    %59 = vector.broadcast %58 : vector<1x64xf32> to vector<4x64xf32>
    %60 = arith.addf %57, %59 : vector<4x64xf32>
    %cst_68 = arith.constant 0.000000e+00 : f32
    %61 = vector.broadcast %cst_68 : f32 to vector<4x64xf32>
    %62 = arith.maximumf %60, %61 : vector<4x64xf32>
    %63 = arith.truncf %62 : vector<4x64xf32> to vector<4x64xbf16>
    %c0_69 = arith.constant 0 : index
    %c0_70 = arith.constant 0 : index
    %c0_71 = arith.constant 0 : index
    %c0_72 = arith.constant 0 : index
    %64 = vector.load %arg10[%c0_69, %c0_70, %c0_71, %c0_72] : memref<1x1x4x64xbf16, #tpu.memory_space<vmem>>, vector<1x1x4x64xbf16>
    %65 = vector.shape_cast %64 : vector<1x1x4x64xbf16> to vector<4x64xbf16>
    %66 = vector.shape_cast %63 : vector<4x64xbf16> to vector<1x1x4x64xbf16>
    tpu.vector_store %arg10[%c0_69, %c0_70, %c0_71, %c0_72], %66 {strides = array<i32>} : memref<1x1x4x64xbf16, #tpu.memory_space<vmem>>, vector<1x1x4x64xbf16>,
    return
  }
  func.func @transform_0(%arg0: i32, %arg1: i32) -> (i32, i32, i32, i32) {
    %c2_i32 = arith.constant 2 : i32
    %0 = arith.muli %c2_i32, %arg1 : i32
    %c0_i32 = arith.constant 0 : i32
    %1 = arith.addi %0, %c0_i32 : i32
    %c0_i32_0 = arith.constant 0 : i32
    %c0_i32_1 = arith.constant 0 : i32
    %c0_i32_2 = arith.constant 0 : i32
    return %arg0, %1, %c0_i32_0, %c0_i32_1 : i32, i32, i32, i32
  }
  func.func @transform_1(%arg0: i32, %arg1: i32) -> (i32, i32, i32, i32) {
    %c2_i32 = arith.constant 2 : i32
    %0 = arith.muli %c2_i32, %arg1 : i32
    %c1_i32 = arith.constant 1 : i32
    %1 = arith.addi %0, %c1_i32 : i32
    %c0_i32 = arith.constant 0 : i32
    %c0_i32_0 = arith.constant 0 : i32
    %c0_i32_1 = arith.constant 0 : i32
    return %arg0, %1, %c0_i32, %c0_i32_0 : i32, i32, i32, i32
  }
  func.func @transform_2(%arg0: i32, %arg1: i32) -> (i32, i32, i32, i32) {
    %c2_i32 = arith.constant 2 : i32
    %0 = arith.muli %c2_i32, %arg1 : i32
    %c2_i32_0 = arith.constant 2 : i32
    %1 = arith.addi %0, %c2_i32_0 : i32
    %c0_i32 = arith.constant 0 : i32
    %c0_i32_1 = arith.constant 0 : i32
    %c0_i32_2 = arith.constant 0 : i32
    return %arg0, %1, %c0_i32, %c0_i32_1 : i32, i32, i32, i32
  }
  func.func @transform_3(%arg0: i32, %arg1: i32) -> (i32, i32, i32, i32) {
    %c2_i32 = arith.constant 2 : i32
    %0 = arith.muli %c2_i32, %arg1 : i32
    %c0_i32 = arith.constant 0 : i32
    %1 = arith.addi %0, %c0_i32 : i32
    %c0_i32_0 = arith.constant 0 : i32
    %c0_i32_1 = arith.constant 0 : i32
    %c0_i32_2 = arith.constant 0 : i32
    return %arg0, %1, %c0_i32_0, %c0_i32_1 : i32, i32, i32, i32
  }
  func.func @transform_4(%arg0: i32, %arg1: i32) -> (i32, i32, i32, i32) {
    %c2_i32 = arith.constant 2 : i32
    %0 = arith.muli %c2_i32, %arg1 : i32
    %c1_i32 = arith.constant 1 : i32
    %1 = arith.addi %0, %c1_i32 : i32
    %c0_i32 = arith.constant 0 : i32
    %c0_i32_0 = arith.constant 0 : i32
    %c0_i32_1 = arith.constant 0 : i32
    return %arg0, %1, %c0_i32, %c0_i32_0 : i32, i32, i32, i32
  }
  func.func @transform_5(%arg0: i32, %arg1: i32) -> (i32, i32, i32, i32) {
    %c2_i32 = arith.constant 2 : i32
    %0 = arith.muli %c2_i32, %arg1 : i32
    %c2_i32_0 = arith.constant 2 : i32
    %1 = arith.addi %0, %c2_i32_0 : i32
    %c0_i32 = arith.constant 0 : i32
    %c0_i32_1 = arith.constant 0 : i32
    %c0_i32_2 = arith.constant 0 : i32
    return %arg0, %1, %c0_i32, %c0_i32_1 : i32, i32, i32, i32
  }
  func.func @transform_6(%arg0: i32, %arg1: i32) -> (i32, i32, i32, i32) {
    %c0_i32 = arith.constant 0 : i32
    %c0_i32_0 = arith.constant 0 : i32
    %c0_i32_1 = arith.constant 0 : i32
    %c0_i32_2 = arith.constant 0 : i32
    %c0_i32_3 = arith.constant 0 : i32
    return %c0_i32, %c0_i32_0, %c0_i32_1, %c0_i32_2 : i32, i32, i32, i32
  }
  func.func @transform_7(%arg0: i32, %arg1: i32) -> (i32, i32) {
    %c0_i32 = arith.constant 0 : i32
    %c0_i32_0 = arith.constant 0 : i32
    %c0_i32_1 = arith.constant 0 : i32
    return %c0_i32, %c0_i32_0 : i32, i32
  }
  func.func @transform_8(%arg0: i32, %arg1: i32) -> (i32, i32, i32, i32) {
    %c0_i32 = arith.constant 0 : i32
    %c0_i32_0 = arith.constant 0 : i32
    %c0_i32_1 = arith.constant 0 : i32
    return %arg0, %arg1, %c0_i32, %c0_i32_0 : i32, i32, i32, i32
  }
}

module attributes {stable_mosaic.version = 11 : i64} {
  func.func @_cconv_up_kernel(%arg0: i32, %arg1: i32, %arg2: memref<1x1x10x32xbf16, #tpu.memory_space<vmem>>, %arg3: memref<1x1x10x32xbf16, #tpu.memory_space<vmem>>, %arg4: memref<1x1x10x32xbf16, #tpu.memory_space<vmem>>, %arg5: memref<4x4x32x16xbf16, #tpu.memory_space<vmem>>, %arg6: memref<1x16xf32, #tpu.memory_space<vmem>>, %arg7: memref<1x1x8x16xbf16, #tpu.memory_space<vmem>>, %arg8: memref<1x1x8x16xbf16, #tpu.memory_space<vmem>>, %arg9: memref<1x1x8x16xbf16, #tpu.memory_space<vmem>>, %arg10: memref<1x1x8x16xbf16, #tpu.memory_space<vmem>>) attributes {dimension_semantics = [#tpu.dimension_semantics<parallel>, #tpu.dimension_semantics<parallel>], iteration_bounds = array<i64: 2, 8>, scalar_prefetch = 0 : i64, scratch_operands = 0 : i64, tpu.core_type = #tpu.core_type<tc>, window_params = [{transform_indices = @transform_0, window_bounds = array<i64: 1, 1, 10, 32>}, {transform_indices = @transform_1, window_bounds = array<i64: 1, 1, 10, 32>}, {transform_indices = @transform_2, window_bounds = array<i64: 1, 1, 10, 32>}, {pipeline_mode = #tpu.pipeline_mode<synchronous>, transform_indices = @transform_3, window_bounds = array<i64: 4, 4, 32, 16>}, {pipeline_mode = #tpu.pipeline_mode<synchronous>, transform_indices = @transform_4, window_bounds = array<i64: 1, 16>}, {transform_indices = @transform_5, window_bounds = array<i64: 1, 1, 8, 16>}, {transform_indices = @transform_6, window_bounds = array<i64: 1, 1, 8, 16>}, {transform_indices = @transform_7, window_bounds = array<i64: 1, 1, 8, 16>}, {transform_indices = @transform_8, window_bounds = array<i64: 1, 1, 8, 16>}]} {
    %c0 = arith.constant 0 : index
    %c0_0 = arith.constant 0 : index
    %c0_1 = arith.constant 0 : index
    %c0_2 = arith.constant 0 : index
    %0 = vector.load %arg2[%c0, %c0_0, %c0_1, %c0_2] : memref<1x1x10x32xbf16, #tpu.memory_space<vmem>>, vector<1x1x10x32xbf16>
    %1 = vector.shape_cast %0 : vector<1x1x10x32xbf16> to vector<10x32xbf16>
    %c0_3 = arith.constant 0 : index
    %c0_4 = arith.constant 0 : index
    %c0_5 = arith.constant 0 : index
    %c0_6 = arith.constant 0 : index
    %2 = vector.load %arg3[%c0_3, %c0_4, %c0_5, %c0_6] : memref<1x1x10x32xbf16, #tpu.memory_space<vmem>>, vector<1x1x10x32xbf16>
    %3 = vector.shape_cast %2 : vector<1x1x10x32xbf16> to vector<10x32xbf16>
    %c0_7 = arith.constant 0 : index
    %c0_8 = arith.constant 0 : index
    %c0_9 = arith.constant 0 : index
    %c0_10 = arith.constant 0 : index
    %4 = vector.load %arg4[%c0_7, %c0_8, %c0_9, %c0_10] : memref<1x1x10x32xbf16, #tpu.memory_space<vmem>>, vector<1x1x10x32xbf16>
    %5 = vector.shape_cast %4 : vector<1x1x10x32xbf16> to vector<10x32xbf16>
    %c0_11 = arith.constant 0 : index
    %c0_12 = arith.constant 0 : index
    %6 = vector.load %arg6[%c0_11, %c0_12] : memref<1x16xf32, #tpu.memory_space<vmem>>, vector<1x16xf32>
    %cst = arith.constant 0.000000e+00 : f32
    %7 = vector.broadcast %cst : f32 to vector<8x16xf32>
    %8 = vector.extract_strided_slice %3 {offsets = [1, 0], sizes = [8, 32], strides = [1, 1]} : vector<10x32xbf16> to vector<8x32xbf16>
    %c1 = arith.constant 1 : index
    %c1_13 = arith.constant 1 : index
    %c0_14 = arith.constant 0 : index
    %c0_15 = arith.constant 0 : index
    %9 = vector.load %arg5[%c1, %c1_13, %c0_14, %c0_15] : memref<4x4x32x16xbf16, #tpu.memory_space<vmem>>, vector<1x1x32x16xbf16>
    %10 = vector.shape_cast %9 : vector<1x1x32x16xbf16> to vector<32x16xbf16>
    %cst_16 = arith.constant dense<0.000000e+00> : vector<8x16xf32>
    %11 = tpu.matmul %8, %10, %cst_16 {dimension_numbers = #tpu.dot_dimension_numbers<[1], [0], [0], [1], [0, 0, 1, 1], [], []>} : vector<8x32xbf16>, vector<32x16xbf16>, vector<8x16xf32> -> vector<8x16xf32>
    %12 = arith.addf %7, %11 : vector<8x16xf32>
    %13 = vector.extract_strided_slice %3 {offsets = [0, 0], sizes = [8, 32], strides = [1, 1]} : vector<10x32xbf16> to vector<8x32xbf16>
    %c1_17 = arith.constant 1 : index
    %c3 = arith.constant 3 : index
    %c0_18 = arith.constant 0 : index
    %c0_19 = arith.constant 0 : index
    %14 = vector.load %arg5[%c1_17, %c3, %c0_18, %c0_19] : memref<4x4x32x16xbf16, #tpu.memory_space<vmem>>, vector<1x1x32x16xbf16>
    %15 = vector.shape_cast %14 : vector<1x1x32x16xbf16> to vector<32x16xbf16>
    %cst_20 = arith.constant dense<0.000000e+00> : vector<8x16xf32>
    %16 = tpu.matmul %13, %15, %cst_20 {dimension_numbers = #tpu.dot_dimension_numbers<[1], [0], [0], [1], [0, 0, 1, 1], [], []>} : vector<8x32xbf16>, vector<32x16xbf16>, vector<8x16xf32> -> vector<8x16xf32>
    %17 = arith.addf %12, %16 : vector<8x16xf32>
    %18 = vector.extract_strided_slice %1 {offsets = [1, 0], sizes = [8, 32], strides = [1, 1]} : vector<10x32xbf16> to vector<8x32xbf16>
    %c3_21 = arith.constant 3 : index
    %c1_22 = arith.constant 1 : index
    %c0_23 = arith.constant 0 : index
    %c0_24 = arith.constant 0 : index
    %19 = vector.load %arg5[%c3_21, %c1_22, %c0_23, %c0_24] : memref<4x4x32x16xbf16, #tpu.memory_space<vmem>>, vector<1x1x32x16xbf16>
    %20 = vector.shape_cast %19 : vector<1x1x32x16xbf16> to vector<32x16xbf16>
    %cst_25 = arith.constant dense<0.000000e+00> : vector<8x16xf32>
    %21 = tpu.matmul %18, %20, %cst_25 {dimension_numbers = #tpu.dot_dimension_numbers<[1], [0], [0], [1], [0, 0, 1, 1], [], []>} : vector<8x32xbf16>, vector<32x16xbf16>, vector<8x16xf32> -> vector<8x16xf32>
    %22 = arith.addf %17, %21 : vector<8x16xf32>
    %23 = vector.extract_strided_slice %1 {offsets = [0, 0], sizes = [8, 32], strides = [1, 1]} : vector<10x32xbf16> to vector<8x32xbf16>
    %c3_26 = arith.constant 3 : index
    %c3_27 = arith.constant 3 : index
    %c0_28 = arith.constant 0 : index
    %c0_29 = arith.constant 0 : index
    %24 = vector.load %arg5[%c3_26, %c3_27, %c0_28, %c0_29] : memref<4x4x32x16xbf16, #tpu.memory_space<vmem>>, vector<1x1x32x16xbf16>
    %25 = vector.shape_cast %24 : vector<1x1x32x16xbf16> to vector<32x16xbf16>
    %cst_30 = arith.constant dense<0.000000e+00> : vector<8x16xf32>
    %26 = tpu.matmul %23, %25, %cst_30 {dimension_numbers = #tpu.dot_dimension_numbers<[1], [0], [0], [1], [0, 0, 1, 1], [], []>} : vector<8x32xbf16>, vector<32x16xbf16>, vector<8x16xf32> -> vector<8x16xf32>
    %27 = arith.addf %22, %26 : vector<8x16xf32>
    %28 = vector.broadcast %6 : vector<1x16xf32> to vector<8x16xf32>
    %29 = arith.addf %27, %28 : vector<8x16xf32>
    %cst_31 = arith.constant 0.000000e+00 : f32
    %30 = vector.broadcast %cst_31 : f32 to vector<8x16xf32>
    %31 = arith.maximumf %29, %30 : vector<8x16xf32>
    %32 = arith.truncf %31 : vector<8x16xf32> to vector<8x16xbf16>
    %c0_32 = arith.constant 0 : index
    %c0_33 = arith.constant 0 : index
    %c0_34 = arith.constant 0 : index
    %c0_35 = arith.constant 0 : index
    %33 = vector.load %arg7[%c0_32, %c0_33, %c0_34, %c0_35] : memref<1x1x8x16xbf16, #tpu.memory_space<vmem>>, vector<1x1x8x16xbf16>
    %34 = vector.shape_cast %33 : vector<1x1x8x16xbf16> to vector<8x16xbf16>
    %35 = vector.shape_cast %32 : vector<8x16xbf16> to vector<1x1x8x16xbf16>
    tpu.vector_store %arg7[%c0_32, %c0_33, %c0_34, %c0_35], %35 {strides = array<i32>} : memref<1x1x8x16xbf16, #tpu.memory_space<vmem>>, vector<1x1x8x16xbf16>,
    %cst_36 = arith.constant 0.000000e+00 : f32
    %36 = vector.broadcast %cst_36 : f32 to vector<8x16xf32>
    %37 = vector.extract_strided_slice %3 {offsets = [1, 0], sizes = [8, 32], strides = [1, 1]} : vector<10x32xbf16> to vector<8x32xbf16>
    %c1_37 = arith.constant 1 : index
    %c2 = arith.constant 2 : index
    %c0_38 = arith.constant 0 : index
    %c0_39 = arith.constant 0 : index
    %38 = vector.load %arg5[%c1_37, %c2, %c0_38, %c0_39] : memref<4x4x32x16xbf16, #tpu.memory_space<vmem>>, vector<1x1x32x16xbf16>
    %39 = vector.shape_cast %38 : vector<1x1x32x16xbf16> to vector<32x16xbf16>
    %cst_40 = arith.constant dense<0.000000e+00> : vector<8x16xf32>
    %40 = tpu.matmul %37, %39, %cst_40 {dimension_numbers = #tpu.dot_dimension_numbers<[1], [0], [0], [1], [0, 0, 1, 1], [], []>} : vector<8x32xbf16>, vector<32x16xbf16>, vector<8x16xf32> -> vector<8x16xf32>
    %41 = arith.addf %36, %40 : vector<8x16xf32>
    %42 = vector.extract_strided_slice %3 {offsets = [2, 0], sizes = [8, 32], strides = [1, 1]} : vector<10x32xbf16> to vector<8x32xbf16>
    %c1_41 = arith.constant 1 : index
    %c0_42 = arith.constant 0 : index
    %c0_43 = arith.constant 0 : index
    %c0_44 = arith.constant 0 : index
    %43 = vector.load %arg5[%c1_41, %c0_42, %c0_43, %c0_44] : memref<4x4x32x16xbf16, #tpu.memory_space<vmem>>, vector<1x1x32x16xbf16>
    %44 = vector.shape_cast %43 : vector<1x1x32x16xbf16> to vector<32x16xbf16>
    %cst_45 = arith.constant dense<0.000000e+00> : vector<8x16xf32>
    %45 = tpu.matmul %42, %44, %cst_45 {dimension_numbers = #tpu.dot_dimension_numbers<[1], [0], [0], [1], [0, 0, 1, 1], [], []>} : vector<8x32xbf16>, vector<32x16xbf16>, vector<8x16xf32> -> vector<8x16xf32>
    %46 = arith.addf %41, %45 : vector<8x16xf32>
    %47 = vector.extract_strided_slice %1 {offsets = [1, 0], sizes = [8, 32], strides = [1, 1]} : vector<10x32xbf16> to vector<8x32xbf16>
    %c3_46 = arith.constant 3 : index
    %c2_47 = arith.constant 2 : index
    %c0_48 = arith.constant 0 : index
    %c0_49 = arith.constant 0 : index
    %48 = vector.load %arg5[%c3_46, %c2_47, %c0_48, %c0_49] : memref<4x4x32x16xbf16, #tpu.memory_space<vmem>>, vector<1x1x32x16xbf16>
    %49 = vector.shape_cast %48 : vector<1x1x32x16xbf16> to vector<32x16xbf16>
    %cst_50 = arith.constant dense<0.000000e+00> : vector<8x16xf32>
    %50 = tpu.matmul %47, %49, %cst_50 {dimension_numbers = #tpu.dot_dimension_numbers<[1], [0], [0], [1], [0, 0, 1, 1], [], []>} : vector<8x32xbf16>, vector<32x16xbf16>, vector<8x16xf32> -> vector<8x16xf32>
    %51 = arith.addf %46, %50 : vector<8x16xf32>
    %52 = vector.extract_strided_slice %1 {offsets = [2, 0], sizes = [8, 32], strides = [1, 1]} : vector<10x32xbf16> to vector<8x32xbf16>
    %c3_51 = arith.constant 3 : index
    %c0_52 = arith.constant 0 : index
    %c0_53 = arith.constant 0 : index
    %c0_54 = arith.constant 0 : index
    %53 = vector.load %arg5[%c3_51, %c0_52, %c0_53, %c0_54] : memref<4x4x32x16xbf16, #tpu.memory_space<vmem>>, vector<1x1x32x16xbf16>
    %54 = vector.shape_cast %53 : vector<1x1x32x16xbf16> to vector<32x16xbf16>
    %cst_55 = arith.constant dense<0.000000e+00> : vector<8x16xf32>
    %55 = tpu.matmul %52, %54, %cst_55 {dimension_numbers = #tpu.dot_dimension_numbers<[1], [0], [0], [1], [0, 0, 1, 1], [], []>} : vector<8x32xbf16>, vector<32x16xbf16>, vector<8x16xf32> -> vector<8x16xf32>
    %56 = arith.addf %51, %55 : vector<8x16xf32>
    %57 = vector.broadcast %6 : vector<1x16xf32> to vector<8x16xf32>
    %58 = arith.addf %56, %57 : vector<8x16xf32>
    %cst_56 = arith.constant 0.000000e+00 : f32
    %59 = vector.broadcast %cst_56 : f32 to vector<8x16xf32>
    %60 = arith.maximumf %58, %59 : vector<8x16xf32>
    %61 = arith.truncf %60 : vector<8x16xf32> to vector<8x16xbf16>
    %c0_57 = arith.constant 0 : index
    %c0_58 = arith.constant 0 : index
    %c0_59 = arith.constant 0 : index
    %c0_60 = arith.constant 0 : index
    %62 = vector.load %arg8[%c0_57, %c0_58, %c0_59, %c0_60] : memref<1x1x8x16xbf16, #tpu.memory_space<vmem>>, vector<1x1x8x16xbf16>
    %63 = vector.shape_cast %62 : vector<1x1x8x16xbf16> to vector<8x16xbf16>
    %64 = vector.shape_cast %61 : vector<8x16xbf16> to vector<1x1x8x16xbf16>
    tpu.vector_store %arg8[%c0_57, %c0_58, %c0_59, %c0_60], %64 {strides = array<i32>} : memref<1x1x8x16xbf16, #tpu.memory_space<vmem>>, vector<1x1x8x16xbf16>,
    %cst_61 = arith.constant 0.000000e+00 : f32
    %65 = vector.broadcast %cst_61 : f32 to vector<8x16xf32>
    %66 = vector.extract_strided_slice %3 {offsets = [1, 0], sizes = [8, 32], strides = [1, 1]} : vector<10x32xbf16> to vector<8x32xbf16>
    %c2_62 = arith.constant 2 : index
    %c1_63 = arith.constant 1 : index
    %c0_64 = arith.constant 0 : index
    %c0_65 = arith.constant 0 : index
    %67 = vector.load %arg5[%c2_62, %c1_63, %c0_64, %c0_65] : memref<4x4x32x16xbf16, #tpu.memory_space<vmem>>, vector<1x1x32x16xbf16>
    %68 = vector.shape_cast %67 : vector<1x1x32x16xbf16> to vector<32x16xbf16>
    %cst_66 = arith.constant dense<0.000000e+00> : vector<8x16xf32>
    %69 = tpu.matmul %66, %68, %cst_66 {dimension_numbers = #tpu.dot_dimension_numbers<[1], [0], [0], [1], [0, 0, 1, 1], [], []>} : vector<8x32xbf16>, vector<32x16xbf16>, vector<8x16xf32> -> vector<8x16xf32>
    %70 = arith.addf %65, %69 : vector<8x16xf32>
    %71 = vector.extract_strided_slice %3 {offsets = [0, 0], sizes = [8, 32], strides = [1, 1]} : vector<10x32xbf16> to vector<8x32xbf16>
    %c2_67 = arith.constant 2 : index
    %c3_68 = arith.constant 3 : index
    %c0_69 = arith.constant 0 : index
    %c0_70 = arith.constant 0 : index
    %72 = vector.load %arg5[%c2_67, %c3_68, %c0_69, %c0_70] : memref<4x4x32x16xbf16, #tpu.memory_space<vmem>>, vector<1x1x32x16xbf16>
    %73 = vector.shape_cast %72 : vector<1x1x32x16xbf16> to vector<32x16xbf16>
    %cst_71 = arith.constant dense<0.000000e+00> : vector<8x16xf32>
    %74 = tpu.matmul %71, %73, %cst_71 {dimension_numbers = #tpu.dot_dimension_numbers<[1], [0], [0], [1], [0, 0, 1, 1], [], []>} : vector<8x32xbf16>, vector<32x16xbf16>, vector<8x16xf32> -> vector<8x16xf32>
    %75 = arith.addf %70, %74 : vector<8x16xf32>
    %76 = vector.extract_strided_slice %5 {offsets = [1, 0], sizes = [8, 32], strides = [1, 1]} : vector<10x32xbf16> to vector<8x32xbf16>
    %c0_72 = arith.constant 0 : index
    %c1_73 = arith.constant 1 : index
    %c0_74 = arith.constant 0 : index
    %c0_75 = arith.constant 0 : index
    %77 = vector.load %arg5[%c0_72, %c1_73, %c0_74, %c0_75] : memref<4x4x32x16xbf16, #tpu.memory_space<vmem>>, vector<1x1x32x16xbf16>
    %78 = vector.shape_cast %77 : vector<1x1x32x16xbf16> to vector<32x16xbf16>
    %cst_76 = arith.constant dense<0.000000e+00> : vector<8x16xf32>
    %79 = tpu.matmul %76, %78, %cst_76 {dimension_numbers = #tpu.dot_dimension_numbers<[1], [0], [0], [1], [0, 0, 1, 1], [], []>} : vector<8x32xbf16>, vector<32x16xbf16>, vector<8x16xf32> -> vector<8x16xf32>
    %80 = arith.addf %75, %79 : vector<8x16xf32>
    %81 = vector.extract_strided_slice %5 {offsets = [0, 0], sizes = [8, 32], strides = [1, 1]} : vector<10x32xbf16> to vector<8x32xbf16>
    %c0_77 = arith.constant 0 : index
    %c3_78 = arith.constant 3 : index
    %c0_79 = arith.constant 0 : index
    %c0_80 = arith.constant 0 : index
    %82 = vector.load %arg5[%c0_77, %c3_78, %c0_79, %c0_80] : memref<4x4x32x16xbf16, #tpu.memory_space<vmem>>, vector<1x1x32x16xbf16>
    %83 = vector.shape_cast %82 : vector<1x1x32x16xbf16> to vector<32x16xbf16>
    %cst_81 = arith.constant dense<0.000000e+00> : vector<8x16xf32>
    %84 = tpu.matmul %81, %83, %cst_81 {dimension_numbers = #tpu.dot_dimension_numbers<[1], [0], [0], [1], [0, 0, 1, 1], [], []>} : vector<8x32xbf16>, vector<32x16xbf16>, vector<8x16xf32> -> vector<8x16xf32>
    %85 = arith.addf %80, %84 : vector<8x16xf32>
    %86 = vector.broadcast %6 : vector<1x16xf32> to vector<8x16xf32>
    %87 = arith.addf %85, %86 : vector<8x16xf32>
    %cst_82 = arith.constant 0.000000e+00 : f32
    %88 = vector.broadcast %cst_82 : f32 to vector<8x16xf32>
    %89 = arith.maximumf %87, %88 : vector<8x16xf32>
    %90 = arith.truncf %89 : vector<8x16xf32> to vector<8x16xbf16>
    %c0_83 = arith.constant 0 : index
    %c0_84 = arith.constant 0 : index
    %c0_85 = arith.constant 0 : index
    %c0_86 = arith.constant 0 : index
    %91 = vector.load %arg9[%c0_83, %c0_84, %c0_85, %c0_86] : memref<1x1x8x16xbf16, #tpu.memory_space<vmem>>, vector<1x1x8x16xbf16>
    %92 = vector.shape_cast %91 : vector<1x1x8x16xbf16> to vector<8x16xbf16>
    %93 = vector.shape_cast %90 : vector<8x16xbf16> to vector<1x1x8x16xbf16>
    tpu.vector_store %arg9[%c0_83, %c0_84, %c0_85, %c0_86], %93 {strides = array<i32>} : memref<1x1x8x16xbf16, #tpu.memory_space<vmem>>, vector<1x1x8x16xbf16>,
    %cst_87 = arith.constant 0.000000e+00 : f32
    %94 = vector.broadcast %cst_87 : f32 to vector<8x16xf32>
    %95 = vector.extract_strided_slice %3 {offsets = [1, 0], sizes = [8, 32], strides = [1, 1]} : vector<10x32xbf16> to vector<8x32xbf16>
    %c2_88 = arith.constant 2 : index
    %c2_89 = arith.constant 2 : index
    %c0_90 = arith.constant 0 : index
    %c0_91 = arith.constant 0 : index
    %96 = vector.load %arg5[%c2_88, %c2_89, %c0_90, %c0_91] : memref<4x4x32x16xbf16, #tpu.memory_space<vmem>>, vector<1x1x32x16xbf16>
    %97 = vector.shape_cast %96 : vector<1x1x32x16xbf16> to vector<32x16xbf16>
    %cst_92 = arith.constant dense<0.000000e+00> : vector<8x16xf32>
    %98 = tpu.matmul %95, %97, %cst_92 {dimension_numbers = #tpu.dot_dimension_numbers<[1], [0], [0], [1], [0, 0, 1, 1], [], []>} : vector<8x32xbf16>, vector<32x16xbf16>, vector<8x16xf32> -> vector<8x16xf32>
    %99 = arith.addf %94, %98 : vector<8x16xf32>
    %100 = vector.extract_strided_slice %3 {offsets = [2, 0], sizes = [8, 32], strides = [1, 1]} : vector<10x32xbf16> to vector<8x32xbf16>
    %c2_93 = arith.constant 2 : index
    %c0_94 = arith.constant 0 : index
    %c0_95 = arith.constant 0 : index
    %c0_96 = arith.constant 0 : index
    %101 = vector.load %arg5[%c2_93, %c0_94, %c0_95, %c0_96] : memref<4x4x32x16xbf16, #tpu.memory_space<vmem>>, vector<1x1x32x16xbf16>
    %102 = vector.shape_cast %101 : vector<1x1x32x16xbf16> to vector<32x16xbf16>
    %cst_97 = arith.constant dense<0.000000e+00> : vector<8x16xf32>
    %103 = tpu.matmul %100, %102, %cst_97 {dimension_numbers = #tpu.dot_dimension_numbers<[1], [0], [0], [1], [0, 0, 1, 1], [], []>} : vector<8x32xbf16>, vector<32x16xbf16>, vector<8x16xf32> -> vector<8x16xf32>
    %104 = arith.addf %99, %103 : vector<8x16xf32>
    %105 = vector.extract_strided_slice %5 {offsets = [1, 0], sizes = [8, 32], strides = [1, 1]} : vector<10x32xbf16> to vector<8x32xbf16>
    %c0_98 = arith.constant 0 : index
    %c2_99 = arith.constant 2 : index
    %c0_100 = arith.constant 0 : index
    %c0_101 = arith.constant 0 : index
    %106 = vector.load %arg5[%c0_98, %c2_99, %c0_100, %c0_101] : memref<4x4x32x16xbf16, #tpu.memory_space<vmem>>, vector<1x1x32x16xbf16>
    %107 = vector.shape_cast %106 : vector<1x1x32x16xbf16> to vector<32x16xbf16>
    %cst_102 = arith.constant dense<0.000000e+00> : vector<8x16xf32>
    %108 = tpu.matmul %105, %107, %cst_102 {dimension_numbers = #tpu.dot_dimension_numbers<[1], [0], [0], [1], [0, 0, 1, 1], [], []>} : vector<8x32xbf16>, vector<32x16xbf16>, vector<8x16xf32> -> vector<8x16xf32>
    %109 = arith.addf %104, %108 : vector<8x16xf32>
    %110 = vector.extract_strided_slice %5 {offsets = [2, 0], sizes = [8, 32], strides = [1, 1]} : vector<10x32xbf16> to vector<8x32xbf16>
    %c0_103 = arith.constant 0 : index
    %c0_104 = arith.constant 0 : index
    %c0_105 = arith.constant 0 : index
    %c0_106 = arith.constant 0 : index
    %111 = vector.load %arg5[%c0_103, %c0_104, %c0_105, %c0_106] : memref<4x4x32x16xbf16, #tpu.memory_space<vmem>>, vector<1x1x32x16xbf16>
    %112 = vector.shape_cast %111 : vector<1x1x32x16xbf16> to vector<32x16xbf16>
    %cst_107 = arith.constant dense<0.000000e+00> : vector<8x16xf32>
    %113 = tpu.matmul %110, %112, %cst_107 {dimension_numbers = #tpu.dot_dimension_numbers<[1], [0], [0], [1], [0, 0, 1, 1], [], []>} : vector<8x32xbf16>, vector<32x16xbf16>, vector<8x16xf32> -> vector<8x16xf32>
    %114 = arith.addf %109, %113 : vector<8x16xf32>
    %115 = vector.broadcast %6 : vector<1x16xf32> to vector<8x16xf32>
    %116 = arith.addf %114, %115 : vector<8x16xf32>
    %cst_108 = arith.constant 0.000000e+00 : f32
    %117 = vector.broadcast %cst_108 : f32 to vector<8x16xf32>
    %118 = arith.maximumf %116, %117 : vector<8x16xf32>
    %119 = arith.truncf %118 : vector<8x16xf32> to vector<8x16xbf16>
    %c0_109 = arith.constant 0 : index
    %c0_110 = arith.constant 0 : index
    %c0_111 = arith.constant 0 : index
    %c0_112 = arith.constant 0 : index
    %120 = vector.load %arg10[%c0_109, %c0_110, %c0_111, %c0_112] : memref<1x1x8x16xbf16, #tpu.memory_space<vmem>>, vector<1x1x8x16xbf16>
    %121 = vector.shape_cast %120 : vector<1x1x8x16xbf16> to vector<8x16xbf16>
    %122 = vector.shape_cast %119 : vector<8x16xbf16> to vector<1x1x8x16xbf16>
    tpu.vector_store %arg10[%c0_109, %c0_110, %c0_111, %c0_112], %122 {strides = array<i32>} : memref<1x1x8x16xbf16, #tpu.memory_space<vmem>>, vector<1x1x8x16xbf16>,
    return
  }
  func.func @transform_0(%arg0: i32, %arg1: i32) -> (i32, i32, i32, i32) {
    %c0_i32 = arith.constant 0 : i32
    %0 = arith.addi %arg1, %c0_i32 : i32
    %c0_i32_0 = arith.constant 0 : i32
    %c0_i32_1 = arith.constant 0 : i32
    %c0_i32_2 = arith.constant 0 : i32
    return %arg0, %0, %c0_i32_0, %c0_i32_1 : i32, i32, i32, i32
  }
  func.func @transform_1(%arg0: i32, %arg1: i32) -> (i32, i32, i32, i32) {
    %c1_i32 = arith.constant 1 : i32
    %0 = arith.addi %arg1, %c1_i32 : i32
    %c0_i32 = arith.constant 0 : i32
    %c0_i32_0 = arith.constant 0 : i32
    %c0_i32_1 = arith.constant 0 : i32
    return %arg0, %0, %c0_i32, %c0_i32_0 : i32, i32, i32, i32
  }
  func.func @transform_2(%arg0: i32, %arg1: i32) -> (i32, i32, i32, i32) {
    %c2_i32 = arith.constant 2 : i32
    %0 = arith.addi %arg1, %c2_i32 : i32
    %c0_i32 = arith.constant 0 : i32
    %c0_i32_0 = arith.constant 0 : i32
    %c0_i32_1 = arith.constant 0 : i32
    return %arg0, %0, %c0_i32, %c0_i32_0 : i32, i32, i32, i32
  }
  func.func @transform_3(%arg0: i32, %arg1: i32) -> (i32, i32, i32, i32) {
    %c0_i32 = arith.constant 0 : i32
    %c0_i32_0 = arith.constant 0 : i32
    %c0_i32_1 = arith.constant 0 : i32
    %c0_i32_2 = arith.constant 0 : i32
    %c0_i32_3 = arith.constant 0 : i32
    return %c0_i32, %c0_i32_0, %c0_i32_1, %c0_i32_2 : i32, i32, i32, i32
  }
  func.func @transform_4(%arg0: i32, %arg1: i32) -> (i32, i32) {
    %c0_i32 = arith.constant 0 : i32
    %c0_i32_0 = arith.constant 0 : i32
    %c0_i32_1 = arith.constant 0 : i32
    return %c0_i32, %c0_i32_0 : i32, i32
  }
  func.func @transform_5(%arg0: i32, %arg1: i32) -> (i32, i32, i32, i32) {
    %c0_i32 = arith.constant 0 : i32
    %c0_i32_0 = arith.constant 0 : i32
    %c0_i32_1 = arith.constant 0 : i32
    return %arg0, %arg1, %c0_i32, %c0_i32_0 : i32, i32, i32, i32
  }
  func.func @transform_6(%arg0: i32, %arg1: i32) -> (i32, i32, i32, i32) {
    %c0_i32 = arith.constant 0 : i32
    %c0_i32_0 = arith.constant 0 : i32
    %c0_i32_1 = arith.constant 0 : i32
    return %arg0, %arg1, %c0_i32, %c0_i32_0 : i32, i32, i32, i32
  }
  func.func @transform_7(%arg0: i32, %arg1: i32) -> (i32, i32, i32, i32) {
    %c0_i32 = arith.constant 0 : i32
    %c0_i32_0 = arith.constant 0 : i32
    %c0_i32_1 = arith.constant 0 : i32
    return %arg0, %arg1, %c0_i32, %c0_i32_0 : i32, i32, i32, i32
  }
  func.func @transform_8(%arg0: i32, %arg1: i32) -> (i32, i32, i32, i32) {
    %c0_i32 = arith.constant 0 : i32
    %c0_i32_0 = arith.constant 0 : i32
    %c0_i32_1 = arith.constant 0 : i32
    return %arg0, %arg1, %c0_i32, %c0_i32_0 : i32, i32, i32, i32
  }
}

module attributes {stable_mosaic.version = 11 : i64} {
  func.func @_cconv_up_kernel(%arg0: i32, %arg1: i32, %arg2: memref<1x1x18x16xbf16, #tpu.memory_space<vmem>>, %arg3: memref<1x1x18x16xbf16, #tpu.memory_space<vmem>>, %arg4: memref<1x1x18x16xbf16, #tpu.memory_space<vmem>>, %arg5: memref<4x4x16x8xbf16, #tpu.memory_space<vmem>>, %arg6: memref<1x8xf32, #tpu.memory_space<vmem>>, %arg7: memref<1x1x16x8xbf16, #tpu.memory_space<vmem>>, %arg8: memref<1x1x16x8xbf16, #tpu.memory_space<vmem>>, %arg9: memref<1x1x16x8xbf16, #tpu.memory_space<vmem>>, %arg10: memref<1x1x16x8xbf16, #tpu.memory_space<vmem>>) attributes {dimension_semantics = [#tpu.dimension_semantics<parallel>, #tpu.dimension_semantics<parallel>], iteration_bounds = array<i64: 2, 16>, scalar_prefetch = 0 : i64, scratch_operands = 0 : i64, tpu.core_type = #tpu.core_type<tc>, window_params = [{transform_indices = @transform_0, window_bounds = array<i64: 1, 1, 18, 16>}, {transform_indices = @transform_1, window_bounds = array<i64: 1, 1, 18, 16>}, {transform_indices = @transform_2, window_bounds = array<i64: 1, 1, 18, 16>}, {pipeline_mode = #tpu.pipeline_mode<synchronous>, transform_indices = @transform_3, window_bounds = array<i64: 4, 4, 16, 8>}, {pipeline_mode = #tpu.pipeline_mode<synchronous>, transform_indices = @transform_4, window_bounds = array<i64: 1, 8>}, {transform_indices = @transform_5, window_bounds = array<i64: 1, 1, 16, 8>}, {transform_indices = @transform_6, window_bounds = array<i64: 1, 1, 16, 8>}, {transform_indices = @transform_7, window_bounds = array<i64: 1, 1, 16, 8>}, {transform_indices = @transform_8, window_bounds = array<i64: 1, 1, 16, 8>}]} {
    %c0 = arith.constant 0 : index
    %c0_0 = arith.constant 0 : index
    %c0_1 = arith.constant 0 : index
    %c0_2 = arith.constant 0 : index
    %0 = vector.load %arg2[%c0, %c0_0, %c0_1, %c0_2] : memref<1x1x18x16xbf16, #tpu.memory_space<vmem>>, vector<1x1x18x16xbf16>
    %1 = vector.shape_cast %0 : vector<1x1x18x16xbf16> to vector<18x16xbf16>
    %c0_3 = arith.constant 0 : index
    %c0_4 = arith.constant 0 : index
    %c0_5 = arith.constant 0 : index
    %c0_6 = arith.constant 0 : index
    %2 = vector.load %arg3[%c0_3, %c0_4, %c0_5, %c0_6] : memref<1x1x18x16xbf16, #tpu.memory_space<vmem>>, vector<1x1x18x16xbf16>
    %3 = vector.shape_cast %2 : vector<1x1x18x16xbf16> to vector<18x16xbf16>
    %c0_7 = arith.constant 0 : index
    %c0_8 = arith.constant 0 : index
    %c0_9 = arith.constant 0 : index
    %c0_10 = arith.constant 0 : index
    %4 = vector.load %arg4[%c0_7, %c0_8, %c0_9, %c0_10] : memref<1x1x18x16xbf16, #tpu.memory_space<vmem>>, vector<1x1x18x16xbf16>
    %5 = vector.shape_cast %4 : vector<1x1x18x16xbf16> to vector<18x16xbf16>
    %c0_11 = arith.constant 0 : index
    %c0_12 = arith.constant 0 : index
    %6 = vector.load %arg6[%c0_11, %c0_12] : memref<1x8xf32, #tpu.memory_space<vmem>>, vector<1x8xf32>
    %cst = arith.constant 0.000000e+00 : f32
    %7 = vector.broadcast %cst : f32 to vector<16x8xf32>
    %8 = vector.extract_strided_slice %3 {offsets = [1, 0], sizes = [16, 16], strides = [1, 1]} : vector<18x16xbf16> to vector<16x16xbf16>
    %c1 = arith.constant 1 : index
    %c1_13 = arith.constant 1 : index
    %c0_14 = arith.constant 0 : index
    %c0_15 = arith.constant 0 : index
    %9 = vector.load %arg5[%c1, %c1_13, %c0_14, %c0_15] : memref<4x4x16x8xbf16, #tpu.memory_space<vmem>>, vector<1x1x16x8xbf16>
    %10 = vector.shape_cast %9 : vector<1x1x16x8xbf16> to vector<16x8xbf16>
    %cst_16 = arith.constant dense<0.000000e+00> : vector<16x8xf32>
    %11 = tpu.matmul %8, %10, %cst_16 {dimension_numbers = #tpu.dot_dimension_numbers<[1], [0], [0], [1], [0, 0, 1, 1], [], []>} : vector<16x16xbf16>, vector<16x8xbf16>, vector<16x8xf32> -> vector<16x8xf32>
    %12 = arith.addf %7, %11 : vector<16x8xf32>
    %13 = vector.extract_strided_slice %3 {offsets = [0, 0], sizes = [16, 16], strides = [1, 1]} : vector<18x16xbf16> to vector<16x16xbf16>
    %c1_17 = arith.constant 1 : index
    %c3 = arith.constant 3 : index
    %c0_18 = arith.constant 0 : index
    %c0_19 = arith.constant 0 : index
    %14 = vector.load %arg5[%c1_17, %c3, %c0_18, %c0_19] : memref<4x4x16x8xbf16, #tpu.memory_space<vmem>>, vector<1x1x16x8xbf16>
    %15 = vector.shape_cast %14 : vector<1x1x16x8xbf16> to vector<16x8xbf16>
    %cst_20 = arith.constant dense<0.000000e+00> : vector<16x8xf32>
    %16 = tpu.matmul %13, %15, %cst_20 {dimension_numbers = #tpu.dot_dimension_numbers<[1], [0], [0], [1], [0, 0, 1, 1], [], []>} : vector<16x16xbf16>, vector<16x8xbf16>, vector<16x8xf32> -> vector<16x8xf32>
    %17 = arith.addf %12, %16 : vector<16x8xf32>
    %18 = vector.extract_strided_slice %1 {offsets = [1, 0], sizes = [16, 16], strides = [1, 1]} : vector<18x16xbf16> to vector<16x16xbf16>
    %c3_21 = arith.constant 3 : index
    %c1_22 = arith.constant 1 : index
    %c0_23 = arith.constant 0 : index
    %c0_24 = arith.constant 0 : index
    %19 = vector.load %arg5[%c3_21, %c1_22, %c0_23, %c0_24] : memref<4x4x16x8xbf16, #tpu.memory_space<vmem>>, vector<1x1x16x8xbf16>
    %20 = vector.shape_cast %19 : vector<1x1x16x8xbf16> to vector<16x8xbf16>
    %cst_25 = arith.constant dense<0.000000e+00> : vector<16x8xf32>
    %21 = tpu.matmul %18, %20, %cst_25 {dimension_numbers = #tpu.dot_dimension_numbers<[1], [0], [0], [1], [0, 0, 1, 1], [], []>} : vector<16x16xbf16>, vector<16x8xbf16>, vector<16x8xf32> -> vector<16x8xf32>
    %22 = arith.addf %17, %21 : vector<16x8xf32>
    %23 = vector.extract_strided_slice %1 {offsets = [0, 0], sizes = [16, 16], strides = [1, 1]} : vector<18x16xbf16> to vector<16x16xbf16>
    %c3_26 = arith.constant 3 : index
    %c3_27 = arith.constant 3 : index
    %c0_28 = arith.constant 0 : index
    %c0_29 = arith.constant 0 : index
    %24 = vector.load %arg5[%c3_26, %c3_27, %c0_28, %c0_29] : memref<4x4x16x8xbf16, #tpu.memory_space<vmem>>, vector<1x1x16x8xbf16>
    %25 = vector.shape_cast %24 : vector<1x1x16x8xbf16> to vector<16x8xbf16>
    %cst_30 = arith.constant dense<0.000000e+00> : vector<16x8xf32>
    %26 = tpu.matmul %23, %25, %cst_30 {dimension_numbers = #tpu.dot_dimension_numbers<[1], [0], [0], [1], [0, 0, 1, 1], [], []>} : vector<16x16xbf16>, vector<16x8xbf16>, vector<16x8xf32> -> vector<16x8xf32>
    %27 = arith.addf %22, %26 : vector<16x8xf32>
    %28 = vector.broadcast %6 : vector<1x8xf32> to vector<16x8xf32>
    %29 = arith.addf %27, %28 : vector<16x8xf32>
    %cst_31 = arith.constant 0.000000e+00 : f32
    %30 = vector.broadcast %cst_31 : f32 to vector<16x8xf32>
    %31 = arith.maximumf %29, %30 : vector<16x8xf32>
    %32 = arith.truncf %31 : vector<16x8xf32> to vector<16x8xbf16>
    %c0_32 = arith.constant 0 : index
    %c0_33 = arith.constant 0 : index
    %c0_34 = arith.constant 0 : index
    %c0_35 = arith.constant 0 : index
    %33 = vector.load %arg7[%c0_32, %c0_33, %c0_34, %c0_35] : memref<1x1x16x8xbf16, #tpu.memory_space<vmem>>, vector<1x1x16x8xbf16>
    %34 = vector.shape_cast %33 : vector<1x1x16x8xbf16> to vector<16x8xbf16>
    %35 = vector.shape_cast %32 : vector<16x8xbf16> to vector<1x1x16x8xbf16>
    tpu.vector_store %arg7[%c0_32, %c0_33, %c0_34, %c0_35], %35 {strides = array<i32>} : memref<1x1x16x8xbf16, #tpu.memory_space<vmem>>, vector<1x1x16x8xbf16>,
    %cst_36 = arith.constant 0.000000e+00 : f32
    %36 = vector.broadcast %cst_36 : f32 to vector<16x8xf32>
    %37 = vector.extract_strided_slice %3 {offsets = [1, 0], sizes = [16, 16], strides = [1, 1]} : vector<18x16xbf16> to vector<16x16xbf16>
    %c1_37 = arith.constant 1 : index
    %c2 = arith.constant 2 : index
    %c0_38 = arith.constant 0 : index
    %c0_39 = arith.constant 0 : index
    %38 = vector.load %arg5[%c1_37, %c2, %c0_38, %c0_39] : memref<4x4x16x8xbf16, #tpu.memory_space<vmem>>, vector<1x1x16x8xbf16>
    %39 = vector.shape_cast %38 : vector<1x1x16x8xbf16> to vector<16x8xbf16>
    %cst_40 = arith.constant dense<0.000000e+00> : vector<16x8xf32>
    %40 = tpu.matmul %37, %39, %cst_40 {dimension_numbers = #tpu.dot_dimension_numbers<[1], [0], [0], [1], [0, 0, 1, 1], [], []>} : vector<16x16xbf16>, vector<16x8xbf16>, vector<16x8xf32> -> vector<16x8xf32>
    %41 = arith.addf %36, %40 : vector<16x8xf32>
    %42 = vector.extract_strided_slice %3 {offsets = [2, 0], sizes = [16, 16], strides = [1, 1]} : vector<18x16xbf16> to vector<16x16xbf16>
    %c1_41 = arith.constant 1 : index
    %c0_42 = arith.constant 0 : index
    %c0_43 = arith.constant 0 : index
    %c0_44 = arith.constant 0 : index
    %43 = vector.load %arg5[%c1_41, %c0_42, %c0_43, %c0_44] : memref<4x4x16x8xbf16, #tpu.memory_space<vmem>>, vector<1x1x16x8xbf16>
    %44 = vector.shape_cast %43 : vector<1x1x16x8xbf16> to vector<16x8xbf16>
    %cst_45 = arith.constant dense<0.000000e+00> : vector<16x8xf32>
    %45 = tpu.matmul %42, %44, %cst_45 {dimension_numbers = #tpu.dot_dimension_numbers<[1], [0], [0], [1], [0, 0, 1, 1], [], []>} : vector<16x16xbf16>, vector<16x8xbf16>, vector<16x8xf32> -> vector<16x8xf32>
    %46 = arith.addf %41, %45 : vector<16x8xf32>
    %47 = vector.extract_strided_slice %1 {offsets = [1, 0], sizes = [16, 16], strides = [1, 1]} : vector<18x16xbf16> to vector<16x16xbf16>
    %c3_46 = arith.constant 3 : index
    %c2_47 = arith.constant 2 : index
    %c0_48 = arith.constant 0 : index
    %c0_49 = arith.constant 0 : index
    %48 = vector.load %arg5[%c3_46, %c2_47, %c0_48, %c0_49] : memref<4x4x16x8xbf16, #tpu.memory_space<vmem>>, vector<1x1x16x8xbf16>
    %49 = vector.shape_cast %48 : vector<1x1x16x8xbf16> to vector<16x8xbf16>
    %cst_50 = arith.constant dense<0.000000e+00> : vector<16x8xf32>
    %50 = tpu.matmul %47, %49, %cst_50 {dimension_numbers = #tpu.dot_dimension_numbers<[1], [0], [0], [1], [0, 0, 1, 1], [], []>} : vector<16x16xbf16>, vector<16x8xbf16>, vector<16x8xf32> -> vector<16x8xf32>
    %51 = arith.addf %46, %50 : vector<16x8xf32>
    %52 = vector.extract_strided_slice %1 {offsets = [2, 0], sizes = [16, 16], strides = [1, 1]} : vector<18x16xbf16> to vector<16x16xbf16>
    %c3_51 = arith.constant 3 : index
    %c0_52 = arith.constant 0 : index
    %c0_53 = arith.constant 0 : index
    %c0_54 = arith.constant 0 : index
    %53 = vector.load %arg5[%c3_51, %c0_52, %c0_53, %c0_54] : memref<4x4x16x8xbf16, #tpu.memory_space<vmem>>, vector<1x1x16x8xbf16>
    %54 = vector.shape_cast %53 : vector<1x1x16x8xbf16> to vector<16x8xbf16>
    %cst_55 = arith.constant dense<0.000000e+00> : vector<16x8xf32>
    %55 = tpu.matmul %52, %54, %cst_55 {dimension_numbers = #tpu.dot_dimension_numbers<[1], [0], [0], [1], [0, 0, 1, 1], [], []>} : vector<16x16xbf16>, vector<16x8xbf16>, vector<16x8xf32> -> vector<16x8xf32>
    %56 = arith.addf %51, %55 : vector<16x8xf32>
    %57 = vector.broadcast %6 : vector<1x8xf32> to vector<16x8xf32>
    %58 = arith.addf %56, %57 : vector<16x8xf32>
    %cst_56 = arith.constant 0.000000e+00 : f32
    %59 = vector.broadcast %cst_56 : f32 to vector<16x8xf32>
    %60 = arith.maximumf %58, %59 : vector<16x8xf32>
    %61 = arith.truncf %60 : vector<16x8xf32> to vector<16x8xbf16>
    %c0_57 = arith.constant 0 : index
    %c0_58 = arith.constant 0 : index
    %c0_59 = arith.constant 0 : index
    %c0_60 = arith.constant 0 : index
    %62 = vector.load %arg8[%c0_57, %c0_58, %c0_59, %c0_60] : memref<1x1x16x8xbf16, #tpu.memory_space<vmem>>, vector<1x1x16x8xbf16>
    %63 = vector.shape_cast %62 : vector<1x1x16x8xbf16> to vector<16x8xbf16>
    %64 = vector.shape_cast %61 : vector<16x8xbf16> to vector<1x1x16x8xbf16>
    tpu.vector_store %arg8[%c0_57, %c0_58, %c0_59, %c0_60], %64 {strides = array<i32>} : memref<1x1x16x8xbf16, #tpu.memory_space<vmem>>, vector<1x1x16x8xbf16>,
    %cst_61 = arith.constant 0.000000e+00 : f32
    %65 = vector.broadcast %cst_61 : f32 to vector<16x8xf32>
    %66 = vector.extract_strided_slice %3 {offsets = [1, 0], sizes = [16, 16], strides = [1, 1]} : vector<18x16xbf16> to vector<16x16xbf16>
    %c2_62 = arith.constant 2 : index
    %c1_63 = arith.constant 1 : index
    %c0_64 = arith.constant 0 : index
    %c0_65 = arith.constant 0 : index
    %67 = vector.load %arg5[%c2_62, %c1_63, %c0_64, %c0_65] : memref<4x4x16x8xbf16, #tpu.memory_space<vmem>>, vector<1x1x16x8xbf16>
    %68 = vector.shape_cast %67 : vector<1x1x16x8xbf16> to vector<16x8xbf16>
    %cst_66 = arith.constant dense<0.000000e+00> : vector<16x8xf32>
    %69 = tpu.matmul %66, %68, %cst_66 {dimension_numbers = #tpu.dot_dimension_numbers<[1], [0], [0], [1], [0, 0, 1, 1], [], []>} : vector<16x16xbf16>, vector<16x8xbf16>, vector<16x8xf32> -> vector<16x8xf32>
    %70 = arith.addf %65, %69 : vector<16x8xf32>
    %71 = vector.extract_strided_slice %3 {offsets = [0, 0], sizes = [16, 16], strides = [1, 1]} : vector<18x16xbf16> to vector<16x16xbf16>
    %c2_67 = arith.constant 2 : index
    %c3_68 = arith.constant 3 : index
    %c0_69 = arith.constant 0 : index
    %c0_70 = arith.constant 0 : index
    %72 = vector.load %arg5[%c2_67, %c3_68, %c0_69, %c0_70] : memref<4x4x16x8xbf16, #tpu.memory_space<vmem>>, vector<1x1x16x8xbf16>
    %73 = vector.shape_cast %72 : vector<1x1x16x8xbf16> to vector<16x8xbf16>
    %cst_71 = arith.constant dense<0.000000e+00> : vector<16x8xf32>
    %74 = tpu.matmul %71, %73, %cst_71 {dimension_numbers = #tpu.dot_dimension_numbers<[1], [0], [0], [1], [0, 0, 1, 1], [], []>} : vector<16x16xbf16>, vector<16x8xbf16>, vector<16x8xf32> -> vector<16x8xf32>
    %75 = arith.addf %70, %74 : vector<16x8xf32>
    %76 = vector.extract_strided_slice %5 {offsets = [1, 0], sizes = [16, 16], strides = [1, 1]} : vector<18x16xbf16> to vector<16x16xbf16>
    %c0_72 = arith.constant 0 : index
    %c1_73 = arith.constant 1 : index
    %c0_74 = arith.constant 0 : index
    %c0_75 = arith.constant 0 : index
    %77 = vector.load %arg5[%c0_72, %c1_73, %c0_74, %c0_75] : memref<4x4x16x8xbf16, #tpu.memory_space<vmem>>, vector<1x1x16x8xbf16>
    %78 = vector.shape_cast %77 : vector<1x1x16x8xbf16> to vector<16x8xbf16>
    %cst_76 = arith.constant dense<0.000000e+00> : vector<16x8xf32>
    %79 = tpu.matmul %76, %78, %cst_76 {dimension_numbers = #tpu.dot_dimension_numbers<[1], [0], [0], [1], [0, 0, 1, 1], [], []>} : vector<16x16xbf16>, vector<16x8xbf16>, vector<16x8xf32> -> vector<16x8xf32>
    %80 = arith.addf %75, %79 : vector<16x8xf32>
    %81 = vector.extract_strided_slice %5 {offsets = [0, 0], sizes = [16, 16], strides = [1, 1]} : vector<18x16xbf16> to vector<16x16xbf16>
    %c0_77 = arith.constant 0 : index
    %c3_78 = arith.constant 3 : index
    %c0_79 = arith.constant 0 : index
    %c0_80 = arith.constant 0 : index
    %82 = vector.load %arg5[%c0_77, %c3_78, %c0_79, %c0_80] : memref<4x4x16x8xbf16, #tpu.memory_space<vmem>>, vector<1x1x16x8xbf16>
    %83 = vector.shape_cast %82 : vector<1x1x16x8xbf16> to vector<16x8xbf16>
    %cst_81 = arith.constant dense<0.000000e+00> : vector<16x8xf32>
    %84 = tpu.matmul %81, %83, %cst_81 {dimension_numbers = #tpu.dot_dimension_numbers<[1], [0], [0], [1], [0, 0, 1, 1], [], []>} : vector<16x16xbf16>, vector<16x8xbf16>, vector<16x8xf32> -> vector<16x8xf32>
    %85 = arith.addf %80, %84 : vector<16x8xf32>
    %86 = vector.broadcast %6 : vector<1x8xf32> to vector<16x8xf32>
    %87 = arith.addf %85, %86 : vector<16x8xf32>
    %cst_82 = arith.constant 0.000000e+00 : f32
    %88 = vector.broadcast %cst_82 : f32 to vector<16x8xf32>
    %89 = arith.maximumf %87, %88 : vector<16x8xf32>
    %90 = arith.truncf %89 : vector<16x8xf32> to vector<16x8xbf16>
    %c0_83 = arith.constant 0 : index
    %c0_84 = arith.constant 0 : index
    %c0_85 = arith.constant 0 : index
    %c0_86 = arith.constant 0 : index
    %91 = vector.load %arg9[%c0_83, %c0_84, %c0_85, %c0_86] : memref<1x1x16x8xbf16, #tpu.memory_space<vmem>>, vector<1x1x16x8xbf16>
    %92 = vector.shape_cast %91 : vector<1x1x16x8xbf16> to vector<16x8xbf16>
    %93 = vector.shape_cast %90 : vector<16x8xbf16> to vector<1x1x16x8xbf16>
    tpu.vector_store %arg9[%c0_83, %c0_84, %c0_85, %c0_86], %93 {strides = array<i32>} : memref<1x1x16x8xbf16, #tpu.memory_space<vmem>>, vector<1x1x16x8xbf16>,
    %cst_87 = arith.constant 0.000000e+00 : f32
    %94 = vector.broadcast %cst_87 : f32 to vector<16x8xf32>
    %95 = vector.extract_strided_slice %3 {offsets = [1, 0], sizes = [16, 16], strides = [1, 1]} : vector<18x16xbf16> to vector<16x16xbf16>
    %c2_88 = arith.constant 2 : index
    %c2_89 = arith.constant 2 : index
    %c0_90 = arith.constant 0 : index
    %c0_91 = arith.constant 0 : index
    %96 = vector.load %arg5[%c2_88, %c2_89, %c0_90, %c0_91] : memref<4x4x16x8xbf16, #tpu.memory_space<vmem>>, vector<1x1x16x8xbf16>
    %97 = vector.shape_cast %96 : vector<1x1x16x8xbf16> to vector<16x8xbf16>
    %cst_92 = arith.constant dense<0.000000e+00> : vector<16x8xf32>
    %98 = tpu.matmul %95, %97, %cst_92 {dimension_numbers = #tpu.dot_dimension_numbers<[1], [0], [0], [1], [0, 0, 1, 1], [], []>} : vector<16x16xbf16>, vector<16x8xbf16>, vector<16x8xf32> -> vector<16x8xf32>
    %99 = arith.addf %94, %98 : vector<16x8xf32>
    %100 = vector.extract_strided_slice %3 {offsets = [2, 0], sizes = [16, 16], strides = [1, 1]} : vector<18x16xbf16> to vector<16x16xbf16>
    %c2_93 = arith.constant 2 : index
    %c0_94 = arith.constant 0 : index
    %c0_95 = arith.constant 0 : index
    %c0_96 = arith.constant 0 : index
    %101 = vector.load %arg5[%c2_93, %c0_94, %c0_95, %c0_96] : memref<4x4x16x8xbf16, #tpu.memory_space<vmem>>, vector<1x1x16x8xbf16>
    %102 = vector.shape_cast %101 : vector<1x1x16x8xbf16> to vector<16x8xbf16>
    %cst_97 = arith.constant dense<0.000000e+00> : vector<16x8xf32>
    %103 = tpu.matmul %100, %102, %cst_97 {dimension_numbers = #tpu.dot_dimension_numbers<[1], [0], [0], [1], [0, 0, 1, 1], [], []>} : vector<16x16xbf16>, vector<16x8xbf16>, vector<16x8xf32> -> vector<16x8xf32>
    %104 = arith.addf %99, %103 : vector<16x8xf32>
    %105 = vector.extract_strided_slice %5 {offsets = [1, 0], sizes = [16, 16], strides = [1, 1]} : vector<18x16xbf16> to vector<16x16xbf16>
    %c0_98 = arith.constant 0 : index
    %c2_99 = arith.constant 2 : index
    %c0_100 = arith.constant 0 : index
    %c0_101 = arith.constant 0 : index
    %106 = vector.load %arg5[%c0_98, %c2_99, %c0_100, %c0_101] : memref<4x4x16x8xbf16, #tpu.memory_space<vmem>>, vector<1x1x16x8xbf16>
    %107 = vector.shape_cast %106 : vector<1x1x16x8xbf16> to vector<16x8xbf16>
    %cst_102 = arith.constant dense<0.000000e+00> : vector<16x8xf32>
    %108 = tpu.matmul %105, %107, %cst_102 {dimension_numbers = #tpu.dot_dimension_numbers<[1], [0], [0], [1], [0, 0, 1, 1], [], []>} : vector<16x16xbf16>, vector<16x8xbf16>, vector<16x8xf32> -> vector<16x8xf32>
    %109 = arith.addf %104, %108 : vector<16x8xf32>
    %110 = vector.extract_strided_slice %5 {offsets = [2, 0], sizes = [16, 16], strides = [1, 1]} : vector<18x16xbf16> to vector<16x16xbf16>
    %c0_103 = arith.constant 0 : index
    %c0_104 = arith.constant 0 : index
    %c0_105 = arith.constant 0 : index
    %c0_106 = arith.constant 0 : index
    %111 = vector.load %arg5[%c0_103, %c0_104, %c0_105, %c0_106] : memref<4x4x16x8xbf16, #tpu.memory_space<vmem>>, vector<1x1x16x8xbf16>
    %112 = vector.shape_cast %111 : vector<1x1x16x8xbf16> to vector<16x8xbf16>
    %cst_107 = arith.constant dense<0.000000e+00> : vector<16x8xf32>
    %113 = tpu.matmul %110, %112, %cst_107 {dimension_numbers = #tpu.dot_dimension_numbers<[1], [0], [0], [1], [0, 0, 1, 1], [], []>} : vector<16x16xbf16>, vector<16x8xbf16>, vector<16x8xf32> -> vector<16x8xf32>
    %114 = arith.addf %109, %113 : vector<16x8xf32>
    %115 = vector.broadcast %6 : vector<1x8xf32> to vector<16x8xf32>
    %116 = arith.addf %114, %115 : vector<16x8xf32>
    %cst_108 = arith.constant 0.000000e+00 : f32
    %117 = vector.broadcast %cst_108 : f32 to vector<16x8xf32>
    %118 = arith.maximumf %116, %117 : vector<16x8xf32>
    %119 = arith.truncf %118 : vector<16x8xf32> to vector<16x8xbf16>
    %c0_109 = arith.constant 0 : index
    %c0_110 = arith.constant 0 : index
    %c0_111 = arith.constant 0 : index
    %c0_112 = arith.constant 0 : index
    %120 = vector.load %arg10[%c0_109, %c0_110, %c0_111, %c0_112] : memref<1x1x16x8xbf16, #tpu.memory_space<vmem>>, vector<1x1x16x8xbf16>
    %121 = vector.shape_cast %120 : vector<1x1x16x8xbf16> to vector<16x8xbf16>
    %122 = vector.shape_cast %119 : vector<16x8xbf16> to vector<1x1x16x8xbf16>
    tpu.vector_store %arg10[%c0_109, %c0_110, %c0_111, %c0_112], %122 {strides = array<i32>} : memref<1x1x16x8xbf16, #tpu.memory_space<vmem>>, vector<1x1x16x8xbf16>,
    return
  }
  func.func @transform_0(%arg0: i32, %arg1: i32) -> (i32, i32, i32, i32) {
    %c0_i32 = arith.constant 0 : i32
    %0 = arith.addi %arg1, %c0_i32 : i32
    %c0_i32_0 = arith.constant 0 : i32
    %c0_i32_1 = arith.constant 0 : i32
    %c0_i32_2 = arith.constant 0 : i32
    return %arg0, %0, %c0_i32_0, %c0_i32_1 : i32, i32, i32, i32
  }
  func.func @transform_1(%arg0: i32, %arg1: i32) -> (i32, i32, i32, i32) {
    %c1_i32 = arith.constant 1 : i32
    %0 = arith.addi %arg1, %c1_i32 : i32
    %c0_i32 = arith.constant 0 : i32
    %c0_i32_0 = arith.constant 0 : i32
    %c0_i32_1 = arith.constant 0 : i32
    return %arg0, %0, %c0_i32, %c0_i32_0 : i32, i32, i32, i32
  }
  func.func @transform_2(%arg0: i32, %arg1: i32) -> (i32, i32, i32, i32) {
    %c2_i32 = arith.constant 2 : i32
    %0 = arith.addi %arg1, %c2_i32 : i32
    %c0_i32 = arith.constant 0 : i32
    %c0_i32_0 = arith.constant 0 : i32
    %c0_i32_1 = arith.constant 0 : i32
    return %arg0, %0, %c0_i32, %c0_i32_0 : i32, i32, i32, i32
  }
  func.func @transform_3(%arg0: i32, %arg1: i32) -> (i32, i32, i32, i32) {
    %c0_i32 = arith.constant 0 : i32
    %c0_i32_0 = arith.constant 0 : i32
    %c0_i32_1 = arith.constant 0 : i32
    %c0_i32_2 = arith.constant 0 : i32
    %c0_i32_3 = arith.constant 0 : i32
    return %c0_i32, %c0_i32_0, %c0_i32_1, %c0_i32_2 : i32, i32, i32, i32
  }
  func.func @transform_4(%arg0: i32, %arg1: i32) -> (i32, i32) {
    %c0_i32 = arith.constant 0 : i32
    %c0_i32_0 = arith.constant 0 : i32
    %c0_i32_1 = arith.constant 0 : i32
    return %c0_i32, %c0_i32_0 : i32, i32
  }
  func.func @transform_5(%arg0: i32, %arg1: i32) -> (i32, i32, i32, i32) {
    %c0_i32 = arith.constant 0 : i32
    %c0_i32_0 = arith.constant 0 : i32
    %c0_i32_1 = arith.constant 0 : i32
    return %arg0, %arg1, %c0_i32, %c0_i32_0 : i32, i32, i32, i32
  }
  func.func @transform_6(%arg0: i32, %arg1: i32) -> (i32, i32, i32, i32) {
    %c0_i32 = arith.constant 0 : i32
    %c0_i32_0 = arith.constant 0 : i32
    %c0_i32_1 = arith.constant 0 : i32
    return %arg0, %arg1, %c0_i32, %c0_i32_0 : i32, i32, i32, i32
  }
  func.func @transform_7(%arg0: i32, %arg1: i32) -> (i32, i32, i32, i32) {
    %c0_i32 = arith.constant 0 : i32
    %c0_i32_0 = arith.constant 0 : i32
    %c0_i32_1 = arith.constant 0 : i32
    return %arg0, %arg1, %c0_i32, %c0_i32_0 : i32, i32, i32, i32
  }
  func.func @transform_8(%arg0: i32, %arg1: i32) -> (i32, i32, i32, i32) {
    %c0_i32 = arith.constant 0 : i32
    %c0_i32_0 = arith.constant 0 : i32
    %c0_i32_1 = arith.constant 0 : i32
    return %arg0, %arg1, %c0_i32, %c0_i32_0 : i32, i32, i32, i32
  }
}

module attributes {stable_mosaic.version = 11 : i64} {
  func.func @_cconv_up_kernel(%arg0: i32, %arg1: i32, %arg2: memref<1x1x34x8xbf16, #tpu.memory_space<vmem>>, %arg3: memref<1x1x34x8xbf16, #tpu.memory_space<vmem>>, %arg4: memref<1x1x34x8xbf16, #tpu.memory_space<vmem>>, %arg5: memref<4x4x8x2xbf16, #tpu.memory_space<vmem>>, %arg6: memref<1x2xf32, #tpu.memory_space<vmem>>, %arg7: memref<1x1x32x2xf32, #tpu.memory_space<vmem>>, %arg8: memref<1x1x32x2xf32, #tpu.memory_space<vmem>>, %arg9: memref<1x1x32x2xf32, #tpu.memory_space<vmem>>, %arg10: memref<1x1x32x2xf32, #tpu.memory_space<vmem>>) attributes {dimension_semantics = [#tpu.dimension_semantics<parallel>, #tpu.dimension_semantics<parallel>], iteration_bounds = array<i64: 2, 32>, scalar_prefetch = 0 : i64, scratch_operands = 0 : i64, tpu.core_type = #tpu.core_type<tc>, window_params = [{transform_indices = @transform_0, window_bounds = array<i64: 1, 1, 34, 8>}, {transform_indices = @transform_1, window_bounds = array<i64: 1, 1, 34, 8>}, {transform_indices = @transform_2, window_bounds = array<i64: 1, 1, 34, 8>}, {pipeline_mode = #tpu.pipeline_mode<synchronous>, transform_indices = @transform_3, window_bounds = array<i64: 4, 4, 8, 2>}, {pipeline_mode = #tpu.pipeline_mode<synchronous>, transform_indices = @transform_4, window_bounds = array<i64: 1, 2>}, {transform_indices = @transform_5, window_bounds = array<i64: 1, 1, 32, 2>}, {transform_indices = @transform_6, window_bounds = array<i64: 1, 1, 32, 2>}, {transform_indices = @transform_7, window_bounds = array<i64: 1, 1, 32, 2>}, {transform_indices = @transform_8, window_bounds = array<i64: 1, 1, 32, 2>}]} {
    %c0 = arith.constant 0 : index
    %c0_0 = arith.constant 0 : index
    %c0_1 = arith.constant 0 : index
    %c0_2 = arith.constant 0 : index
    %0 = vector.load %arg2[%c0, %c0_0, %c0_1, %c0_2] : memref<1x1x34x8xbf16, #tpu.memory_space<vmem>>, vector<1x1x34x8xbf16>
    %1 = vector.shape_cast %0 : vector<1x1x34x8xbf16> to vector<34x8xbf16>
    %c0_3 = arith.constant 0 : index
    %c0_4 = arith.constant 0 : index
    %c0_5 = arith.constant 0 : index
    %c0_6 = arith.constant 0 : index
    %2 = vector.load %arg3[%c0_3, %c0_4, %c0_5, %c0_6] : memref<1x1x34x8xbf16, #tpu.memory_space<vmem>>, vector<1x1x34x8xbf16>
    %3 = vector.shape_cast %2 : vector<1x1x34x8xbf16> to vector<34x8xbf16>
    %c0_7 = arith.constant 0 : index
    %c0_8 = arith.constant 0 : index
    %c0_9 = arith.constant 0 : index
    %c0_10 = arith.constant 0 : index
    %4 = vector.load %arg4[%c0_7, %c0_8, %c0_9, %c0_10] : memref<1x1x34x8xbf16, #tpu.memory_space<vmem>>, vector<1x1x34x8xbf16>
    %5 = vector.shape_cast %4 : vector<1x1x34x8xbf16> to vector<34x8xbf16>
    %c0_11 = arith.constant 0 : index
    %c0_12 = arith.constant 0 : index
    %6 = vector.load %arg6[%c0_11, %c0_12] : memref<1x2xf32, #tpu.memory_space<vmem>>, vector<1x2xf32>
    %cst = arith.constant 0.000000e+00 : f32
    %7 = vector.broadcast %cst : f32 to vector<32x2xf32>
    %8 = vector.extract_strided_slice %3 {offsets = [1, 0], sizes = [32, 8], strides = [1, 1]} : vector<34x8xbf16> to vector<32x8xbf16>
    %c1 = arith.constant 1 : index
    %c1_13 = arith.constant 1 : index
    %c0_14 = arith.constant 0 : index
    %c0_15 = arith.constant 0 : index
    %9 = vector.load %arg5[%c1, %c1_13, %c0_14, %c0_15] : memref<4x4x8x2xbf16, #tpu.memory_space<vmem>>, vector<1x1x8x2xbf16>
    %10 = vector.shape_cast %9 : vector<1x1x8x2xbf16> to vector<8x2xbf16>
    %cst_16 = arith.constant dense<0.000000e+00> : vector<32x2xf32>
    %11 = tpu.matmul %8, %10, %cst_16 {dimension_numbers = #tpu.dot_dimension_numbers<[1], [0], [0], [1], [0, 0, 1, 1], [], []>} : vector<32x8xbf16>, vector<8x2xbf16>, vector<32x2xf32> -> vector<32x2xf32>
    %12 = arith.addf %7, %11 : vector<32x2xf32>
    %13 = vector.extract_strided_slice %3 {offsets = [0, 0], sizes = [32, 8], strides = [1, 1]} : vector<34x8xbf16> to vector<32x8xbf16>
    %c1_17 = arith.constant 1 : index
    %c3 = arith.constant 3 : index
    %c0_18 = arith.constant 0 : index
    %c0_19 = arith.constant 0 : index
    %14 = vector.load %arg5[%c1_17, %c3, %c0_18, %c0_19] : memref<4x4x8x2xbf16, #tpu.memory_space<vmem>>, vector<1x1x8x2xbf16>
    %15 = vector.shape_cast %14 : vector<1x1x8x2xbf16> to vector<8x2xbf16>
    %cst_20 = arith.constant dense<0.000000e+00> : vector<32x2xf32>
    %16 = tpu.matmul %13, %15, %cst_20 {dimension_numbers = #tpu.dot_dimension_numbers<[1], [0], [0], [1], [0, 0, 1, 1], [], []>} : vector<32x8xbf16>, vector<8x2xbf16>, vector<32x2xf32> -> vector<32x2xf32>
    %17 = arith.addf %12, %16 : vector<32x2xf32>
    %18 = vector.extract_strided_slice %1 {offsets = [1, 0], sizes = [32, 8], strides = [1, 1]} : vector<34x8xbf16> to vector<32x8xbf16>
    %c3_21 = arith.constant 3 : index
    %c1_22 = arith.constant 1 : index
    %c0_23 = arith.constant 0 : index
    %c0_24 = arith.constant 0 : index
    %19 = vector.load %arg5[%c3_21, %c1_22, %c0_23, %c0_24] : memref<4x4x8x2xbf16, #tpu.memory_space<vmem>>, vector<1x1x8x2xbf16>
    %20 = vector.shape_cast %19 : vector<1x1x8x2xbf16> to vector<8x2xbf16>
    %cst_25 = arith.constant dense<0.000000e+00> : vector<32x2xf32>
    %21 = tpu.matmul %18, %20, %cst_25 {dimension_numbers = #tpu.dot_dimension_numbers<[1], [0], [0], [1], [0, 0, 1, 1], [], []>} : vector<32x8xbf16>, vector<8x2xbf16>, vector<32x2xf32> -> vector<32x2xf32>
    %22 = arith.addf %17, %21 : vector<32x2xf32>
    %23 = vector.extract_strided_slice %1 {offsets = [0, 0], sizes = [32, 8], strides = [1, 1]} : vector<34x8xbf16> to vector<32x8xbf16>
    %c3_26 = arith.constant 3 : index
    %c3_27 = arith.constant 3 : index
    %c0_28 = arith.constant 0 : index
    %c0_29 = arith.constant 0 : index
    %24 = vector.load %arg5[%c3_26, %c3_27, %c0_28, %c0_29] : memref<4x4x8x2xbf16, #tpu.memory_space<vmem>>, vector<1x1x8x2xbf16>
    %25 = vector.shape_cast %24 : vector<1x1x8x2xbf16> to vector<8x2xbf16>
    %cst_30 = arith.constant dense<0.000000e+00> : vector<32x2xf32>
    %26 = tpu.matmul %23, %25, %cst_30 {dimension_numbers = #tpu.dot_dimension_numbers<[1], [0], [0], [1], [0, 0, 1, 1], [], []>} : vector<32x8xbf16>, vector<8x2xbf16>, vector<32x2xf32> -> vector<32x2xf32>
    %27 = arith.addf %22, %26 : vector<32x2xf32>
    %28 = vector.broadcast %6 : vector<1x2xf32> to vector<32x2xf32>
    %29 = arith.addf %27, %28 : vector<32x2xf32>
    %c0_31 = arith.constant 0 : index
    %c0_32 = arith.constant 0 : index
    %c0_33 = arith.constant 0 : index
    %c0_34 = arith.constant 0 : index
    %30 = vector.load %arg7[%c0_31, %c0_32, %c0_33, %c0_34] : memref<1x1x32x2xf32, #tpu.memory_space<vmem>>, vector<1x1x32x2xf32>
    %31 = vector.shape_cast %30 : vector<1x1x32x2xf32> to vector<32x2xf32>
    %32 = vector.shape_cast %29 : vector<32x2xf32> to vector<1x1x32x2xf32>
    tpu.vector_store %arg7[%c0_31, %c0_32, %c0_33, %c0_34], %32 {strides = array<i32>} : memref<1x1x32x2xf32, #tpu.memory_space<vmem>>, vector<1x1x32x2xf32>,
    %cst_35 = arith.constant 0.000000e+00 : f32
    %33 = vector.broadcast %cst_35 : f32 to vector<32x2xf32>
    %34 = vector.extract_strided_slice %3 {offsets = [1, 0], sizes = [32, 8], strides = [1, 1]} : vector<34x8xbf16> to vector<32x8xbf16>
    %c1_36 = arith.constant 1 : index
    %c2 = arith.constant 2 : index
    %c0_37 = arith.constant 0 : index
    %c0_38 = arith.constant 0 : index
    %35 = vector.load %arg5[%c1_36, %c2, %c0_37, %c0_38] : memref<4x4x8x2xbf16, #tpu.memory_space<vmem>>, vector<1x1x8x2xbf16>
    %36 = vector.shape_cast %35 : vector<1x1x8x2xbf16> to vector<8x2xbf16>
    %cst_39 = arith.constant dense<0.000000e+00> : vector<32x2xf32>
    %37 = tpu.matmul %34, %36, %cst_39 {dimension_numbers = #tpu.dot_dimension_numbers<[1], [0], [0], [1], [0, 0, 1, 1], [], []>} : vector<32x8xbf16>, vector<8x2xbf16>, vector<32x2xf32> -> vector<32x2xf32>
    %38 = arith.addf %33, %37 : vector<32x2xf32>
    %39 = vector.extract_strided_slice %3 {offsets = [2, 0], sizes = [32, 8], strides = [1, 1]} : vector<34x8xbf16> to vector<32x8xbf16>
    %c1_40 = arith.constant 1 : index
    %c0_41 = arith.constant 0 : index
    %c0_42 = arith.constant 0 : index
    %c0_43 = arith.constant 0 : index
    %40 = vector.load %arg5[%c1_40, %c0_41, %c0_42, %c0_43] : memref<4x4x8x2xbf16, #tpu.memory_space<vmem>>, vector<1x1x8x2xbf16>
    %41 = vector.shape_cast %40 : vector<1x1x8x2xbf16> to vector<8x2xbf16>
    %cst_44 = arith.constant dense<0.000000e+00> : vector<32x2xf32>
    %42 = tpu.matmul %39, %41, %cst_44 {dimension_numbers = #tpu.dot_dimension_numbers<[1], [0], [0], [1], [0, 0, 1, 1], [], []>} : vector<32x8xbf16>, vector<8x2xbf16>, vector<32x2xf32> -> vector<32x2xf32>
    %43 = arith.addf %38, %42 : vector<32x2xf32>
    %44 = vector.extract_strided_slice %1 {offsets = [1, 0], sizes = [32, 8], strides = [1, 1]} : vector<34x8xbf16> to vector<32x8xbf16>
    %c3_45 = arith.constant 3 : index
    %c2_46 = arith.constant 2 : index
    %c0_47 = arith.constant 0 : index
    %c0_48 = arith.constant 0 : index
    %45 = vector.load %arg5[%c3_45, %c2_46, %c0_47, %c0_48] : memref<4x4x8x2xbf16, #tpu.memory_space<vmem>>, vector<1x1x8x2xbf16>
    %46 = vector.shape_cast %45 : vector<1x1x8x2xbf16> to vector<8x2xbf16>
    %cst_49 = arith.constant dense<0.000000e+00> : vector<32x2xf32>
    %47 = tpu.matmul %44, %46, %cst_49 {dimension_numbers = #tpu.dot_dimension_numbers<[1], [0], [0], [1], [0, 0, 1, 1], [], []>} : vector<32x8xbf16>, vector<8x2xbf16>, vector<32x2xf32> -> vector<32x2xf32>
    %48 = arith.addf %43, %47 : vector<32x2xf32>
    %49 = vector.extract_strided_slice %1 {offsets = [2, 0], sizes = [32, 8], strides = [1, 1]} : vector<34x8xbf16> to vector<32x8xbf16>
    %c3_50 = arith.constant 3 : index
    %c0_51 = arith.constant 0 : index
    %c0_52 = arith.constant 0 : index
    %c0_53 = arith.constant 0 : index
    %50 = vector.load %arg5[%c3_50, %c0_51, %c0_52, %c0_53] : memref<4x4x8x2xbf16, #tpu.memory_space<vmem>>, vector<1x1x8x2xbf16>
    %51 = vector.shape_cast %50 : vector<1x1x8x2xbf16> to vector<8x2xbf16>
    %cst_54 = arith.constant dense<0.000000e+00> : vector<32x2xf32>
    %52 = tpu.matmul %49, %51, %cst_54 {dimension_numbers = #tpu.dot_dimension_numbers<[1], [0], [0], [1], [0, 0, 1, 1], [], []>} : vector<32x8xbf16>, vector<8x2xbf16>, vector<32x2xf32> -> vector<32x2xf32>
    %53 = arith.addf %48, %52 : vector<32x2xf32>
    %54 = vector.broadcast %6 : vector<1x2xf32> to vector<32x2xf32>
    %55 = arith.addf %53, %54 : vector<32x2xf32>
    %c0_55 = arith.constant 0 : index
    %c0_56 = arith.constant 0 : index
    %c0_57 = arith.constant 0 : index
    %c0_58 = arith.constant 0 : index
    %56 = vector.load %arg8[%c0_55, %c0_56, %c0_57, %c0_58] : memref<1x1x32x2xf32, #tpu.memory_space<vmem>>, vector<1x1x32x2xf32>
    %57 = vector.shape_cast %56 : vector<1x1x32x2xf32> to vector<32x2xf32>
    %58 = vector.shape_cast %55 : vector<32x2xf32> to vector<1x1x32x2xf32>
    tpu.vector_store %arg8[%c0_55, %c0_56, %c0_57, %c0_58], %58 {strides = array<i32>} : memref<1x1x32x2xf32, #tpu.memory_space<vmem>>, vector<1x1x32x2xf32>,
    %cst_59 = arith.constant 0.000000e+00 : f32
    %59 = vector.broadcast %cst_59 : f32 to vector<32x2xf32>
    %60 = vector.extract_strided_slice %3 {offsets = [1, 0], sizes = [32, 8], strides = [1, 1]} : vector<34x8xbf16> to vector<32x8xbf16>
    %c2_60 = arith.constant 2 : index
    %c1_61 = arith.constant 1 : index
    %c0_62 = arith.constant 0 : index
    %c0_63 = arith.constant 0 : index
    %61 = vector.load %arg5[%c2_60, %c1_61, %c0_62, %c0_63] : memref<4x4x8x2xbf16, #tpu.memory_space<vmem>>, vector<1x1x8x2xbf16>
    %62 = vector.shape_cast %61 : vector<1x1x8x2xbf16> to vector<8x2xbf16>
    %cst_64 = arith.constant dense<0.000000e+00> : vector<32x2xf32>
    %63 = tpu.matmul %60, %62, %cst_64 {dimension_numbers = #tpu.dot_dimension_numbers<[1], [0], [0], [1], [0, 0, 1, 1], [], []>} : vector<32x8xbf16>, vector<8x2xbf16>, vector<32x2xf32> -> vector<32x2xf32>
    %64 = arith.addf %59, %63 : vector<32x2xf32>
    %65 = vector.extract_strided_slice %3 {offsets = [0, 0], sizes = [32, 8], strides = [1, 1]} : vector<34x8xbf16> to vector<32x8xbf16>
    %c2_65 = arith.constant 2 : index
    %c3_66 = arith.constant 3 : index
    %c0_67 = arith.constant 0 : index
    %c0_68 = arith.constant 0 : index
    %66 = vector.load %arg5[%c2_65, %c3_66, %c0_67, %c0_68] : memref<4x4x8x2xbf16, #tpu.memory_space<vmem>>, vector<1x1x8x2xbf16>
    %67 = vector.shape_cast %66 : vector<1x1x8x2xbf16> to vector<8x2xbf16>
    %cst_69 = arith.constant dense<0.000000e+00> : vector<32x2xf32>
    %68 = tpu.matmul %65, %67, %cst_69 {dimension_numbers = #tpu.dot_dimension_numbers<[1], [0], [0], [1], [0, 0, 1, 1], [], []>} : vector<32x8xbf16>, vector<8x2xbf16>, vector<32x2xf32> -> vector<32x2xf32>
    %69 = arith.addf %64, %68 : vector<32x2xf32>
    %70 = vector.extract_strided_slice %5 {offsets = [1, 0], sizes = [32, 8], strides = [1, 1]} : vector<34x8xbf16> to vector<32x8xbf16>
    %c0_70 = arith.constant 0 : index
    %c1_71 = arith.constant 1 : index
    %c0_72 = arith.constant 0 : index
    %c0_73 = arith.constant 0 : index
    %71 = vector.load %arg5[%c0_70, %c1_71, %c0_72, %c0_73] : memref<4x4x8x2xbf16, #tpu.memory_space<vmem>>, vector<1x1x8x2xbf16>
    %72 = vector.shape_cast %71 : vector<1x1x8x2xbf16> to vector<8x2xbf16>
    %cst_74 = arith.constant dense<0.000000e+00> : vector<32x2xf32>
    %73 = tpu.matmul %70, %72, %cst_74 {dimension_numbers = #tpu.dot_dimension_numbers<[1], [0], [0], [1], [0, 0, 1, 1], [], []>} : vector<32x8xbf16>, vector<8x2xbf16>, vector<32x2xf32> -> vector<32x2xf32>
    %74 = arith.addf %69, %73 : vector<32x2xf32>
    %75 = vector.extract_strided_slice %5 {offsets = [0, 0], sizes = [32, 8], strides = [1, 1]} : vector<34x8xbf16> to vector<32x8xbf16>
    %c0_75 = arith.constant 0 : index
    %c3_76 = arith.constant 3 : index
    %c0_77 = arith.constant 0 : index
    %c0_78 = arith.constant 0 : index
    %76 = vector.load %arg5[%c0_75, %c3_76, %c0_77, %c0_78] : memref<4x4x8x2xbf16, #tpu.memory_space<vmem>>, vector<1x1x8x2xbf16>
    %77 = vector.shape_cast %76 : vector<1x1x8x2xbf16> to vector<8x2xbf16>
    %cst_79 = arith.constant dense<0.000000e+00> : vector<32x2xf32>
    %78 = tpu.matmul %75, %77, %cst_79 {dimension_numbers = #tpu.dot_dimension_numbers<[1], [0], [0], [1], [0, 0, 1, 1], [], []>} : vector<32x8xbf16>, vector<8x2xbf16>, vector<32x2xf32> -> vector<32x2xf32>
    %79 = arith.addf %74, %78 : vector<32x2xf32>
    %80 = vector.broadcast %6 : vector<1x2xf32> to vector<32x2xf32>
    %81 = arith.addf %79, %80 : vector<32x2xf32>
    %c0_80 = arith.constant 0 : index
    %c0_81 = arith.constant 0 : index
    %c0_82 = arith.constant 0 : index
    %c0_83 = arith.constant 0 : index
    %82 = vector.load %arg9[%c0_80, %c0_81, %c0_82, %c0_83] : memref<1x1x32x2xf32, #tpu.memory_space<vmem>>, vector<1x1x32x2xf32>
    %83 = vector.shape_cast %82 : vector<1x1x32x2xf32> to vector<32x2xf32>
    %84 = vector.shape_cast %81 : vector<32x2xf32> to vector<1x1x32x2xf32>
    tpu.vector_store %arg9[%c0_80, %c0_81, %c0_82, %c0_83], %84 {strides = array<i32>} : memref<1x1x32x2xf32, #tpu.memory_space<vmem>>, vector<1x1x32x2xf32>,
    %cst_84 = arith.constant 0.000000e+00 : f32
    %85 = vector.broadcast %cst_84 : f32 to vector<32x2xf32>
    %86 = vector.extract_strided_slice %3 {offsets = [1, 0], sizes = [32, 8], strides = [1, 1]} : vector<34x8xbf16> to vector<32x8xbf16>
    %c2_85 = arith.constant 2 : index
    %c2_86 = arith.constant 2 : index
    %c0_87 = arith.constant 0 : index
    %c0_88 = arith.constant 0 : index
    %87 = vector.load %arg5[%c2_85, %c2_86, %c0_87, %c0_88] : memref<4x4x8x2xbf16, #tpu.memory_space<vmem>>, vector<1x1x8x2xbf16>
    %88 = vector.shape_cast %87 : vector<1x1x8x2xbf16> to vector<8x2xbf16>
    %cst_89 = arith.constant dense<0.000000e+00> : vector<32x2xf32>
    %89 = tpu.matmul %86, %88, %cst_89 {dimension_numbers = #tpu.dot_dimension_numbers<[1], [0], [0], [1], [0, 0, 1, 1], [], []>} : vector<32x8xbf16>, vector<8x2xbf16>, vector<32x2xf32> -> vector<32x2xf32>
    %90 = arith.addf %85, %89 : vector<32x2xf32>
    %91 = vector.extract_strided_slice %3 {offsets = [2, 0], sizes = [32, 8], strides = [1, 1]} : vector<34x8xbf16> to vector<32x8xbf16>
    %c2_90 = arith.constant 2 : index
    %c0_91 = arith.constant 0 : index
    %c0_92 = arith.constant 0 : index
    %c0_93 = arith.constant 0 : index
    %92 = vector.load %arg5[%c2_90, %c0_91, %c0_92, %c0_93] : memref<4x4x8x2xbf16, #tpu.memory_space<vmem>>, vector<1x1x8x2xbf16>
    %93 = vector.shape_cast %92 : vector<1x1x8x2xbf16> to vector<8x2xbf16>
    %cst_94 = arith.constant dense<0.000000e+00> : vector<32x2xf32>
    %94 = tpu.matmul %91, %93, %cst_94 {dimension_numbers = #tpu.dot_dimension_numbers<[1], [0], [0], [1], [0, 0, 1, 1], [], []>} : vector<32x8xbf16>, vector<8x2xbf16>, vector<32x2xf32> -> vector<32x2xf32>
    %95 = arith.addf %90, %94 : vector<32x2xf32>
    %96 = vector.extract_strided_slice %5 {offsets = [1, 0], sizes = [32, 8], strides = [1, 1]} : vector<34x8xbf16> to vector<32x8xbf16>
    %c0_95 = arith.constant 0 : index
    %c2_96 = arith.constant 2 : index
    %c0_97 = arith.constant 0 : index
    %c0_98 = arith.constant 0 : index
    %97 = vector.load %arg5[%c0_95, %c2_96, %c0_97, %c0_98] : memref<4x4x8x2xbf16, #tpu.memory_space<vmem>>, vector<1x1x8x2xbf16>
    %98 = vector.shape_cast %97 : vector<1x1x8x2xbf16> to vector<8x2xbf16>
    %cst_99 = arith.constant dense<0.000000e+00> : vector<32x2xf32>
    %99 = tpu.matmul %96, %98, %cst_99 {dimension_numbers = #tpu.dot_dimension_numbers<[1], [0], [0], [1], [0, 0, 1, 1], [], []>} : vector<32x8xbf16>, vector<8x2xbf16>, vector<32x2xf32> -> vector<32x2xf32>
    %100 = arith.addf %95, %99 : vector<32x2xf32>
    %101 = vector.extract_strided_slice %5 {offsets = [2, 0], sizes = [32, 8], strides = [1, 1]} : vector<34x8xbf16> to vector<32x8xbf16>
    %c0_100 = arith.constant 0 : index
    %c0_101 = arith.constant 0 : index
    %c0_102 = arith.constant 0 : index
    %c0_103 = arith.constant 0 : index
    %102 = vector.load %arg5[%c0_100, %c0_101, %c0_102, %c0_103] : memref<4x4x8x2xbf16, #tpu.memory_space<vmem>>, vector<1x1x8x2xbf16>
    %103 = vector.shape_cast %102 : vector<1x1x8x2xbf16> to vector<8x2xbf16>
    %cst_104 = arith.constant dense<0.000000e+00> : vector<32x2xf32>
    %104 = tpu.matmul %101, %103, %cst_104 {dimension_numbers = #tpu.dot_dimension_numbers<[1], [0], [0], [1], [0, 0, 1, 1], [], []>} : vector<32x8xbf16>, vector<8x2xbf16>, vector<32x2xf32> -> vector<32x2xf32>
    %105 = arith.addf %100, %104 : vector<32x2xf32>
    %106 = vector.broadcast %6 : vector<1x2xf32> to vector<32x2xf32>
    %107 = arith.addf %105, %106 : vector<32x2xf32>
    %c0_105 = arith.constant 0 : index
    %c0_106 = arith.constant 0 : index
    %c0_107 = arith.constant 0 : index
    %c0_108 = arith.constant 0 : index
    %108 = vector.load %arg10[%c0_105, %c0_106, %c0_107, %c0_108] : memref<1x1x32x2xf32, #tpu.memory_space<vmem>>, vector<1x1x32x2xf32>
    %109 = vector.shape_cast %108 : vector<1x1x32x2xf32> to vector<32x2xf32>
    %110 = vector.shape_cast %107 : vector<32x2xf32> to vector<1x1x32x2xf32>
    tpu.vector_store %arg10[%c0_105, %c0_106, %c0_107, %c0_108], %110 {strides = array<i32>} : memref<1x1x32x2xf32, #tpu.memory_space<vmem>>, vector<1x1x32x2xf32>,
    return
  }
  func.func @transform_0(%arg0: i32, %arg1: i32) -> (i32, i32, i32, i32) {
    %c0_i32 = arith.constant 0 : i32
    %0 = arith.addi %arg1, %c0_i32 : i32
    %c0_i32_0 = arith.constant 0 : i32
    %c0_i32_1 = arith.constant 0 : i32
    %c0_i32_2 = arith.constant 0 : i32
    return %arg0, %0, %c0_i32_0, %c0_i32_1 : i32, i32, i32, i32
  }
  func.func @transform_1(%arg0: i32, %arg1: i32) -> (i32, i32, i32, i32) {
    %c1_i32 = arith.constant 1 : i32
    %0 = arith.addi %arg1, %c1_i32 : i32
    %c0_i32 = arith.constant 0 : i32
    %c0_i32_0 = arith.constant 0 : i32
    %c0_i32_1 = arith.constant 0 : i32
    return %arg0, %0, %c0_i32, %c0_i32_0 : i32, i32, i32, i32
  }
  func.func @transform_2(%arg0: i32, %arg1: i32) -> (i32, i32, i32, i32) {
    %c2_i32 = arith.constant 2 : i32
    %0 = arith.addi %arg1, %c2_i32 : i32
    %c0_i32 = arith.constant 0 : i32
    %c0_i32_0 = arith.constant 0 : i32
    %c0_i32_1 = arith.constant 0 : i32
    return %arg0, %0, %c0_i32, %c0_i32_0 : i32, i32, i32, i32
  }
  func.func @transform_3(%arg0: i32, %arg1: i32) -> (i32, i32, i32, i32) {
    %c0_i32 = arith.constant 0 : i32
    %c0_i32_0 = arith.constant 0 : i32
    %c0_i32_1 = arith.constant 0 : i32
    %c0_i32_2 = arith.constant 0 : i32
    %c0_i32_3 = arith.constant 0 : i32
    return %c0_i32, %c0_i32_0, %c0_i32_1, %c0_i32_2 : i32, i32, i32, i32
  }
  func.func @transform_4(%arg0: i32, %arg1: i32) -> (i32, i32) {
    %c0_i32 = arith.constant 0 : i32
    %c0_i32_0 = arith.constant 0 : i32
    %c0_i32_1 = arith.constant 0 : i32
    return %c0_i32, %c0_i32_0 : i32, i32
  }
  func.func @transform_5(%arg0: i32, %arg1: i32) -> (i32, i32, i32, i32) {
    %c0_i32 = arith.constant 0 : i32
    %c0_i32_0 = arith.constant 0 : i32
    %c0_i32_1 = arith.constant 0 : i32
    return %arg0, %arg1, %c0_i32, %c0_i32_0 : i32, i32, i32, i32
  }
  func.func @transform_6(%arg0: i32, %arg1: i32) -> (i32, i32, i32, i32) {
    %c0_i32 = arith.constant 0 : i32
    %c0_i32_0 = arith.constant 0 : i32
    %c0_i32_1 = arith.constant 0 : i32
    return %arg0, %arg1, %c0_i32, %c0_i32_0 : i32, i32, i32, i32
  }
  func.func @transform_7(%arg0: i32, %arg1: i32) -> (i32, i32, i32, i32) {
    %c0_i32 = arith.constant 0 : i32
    %c0_i32_0 = arith.constant 0 : i32
    %c0_i32_1 = arith.constant 0 : i32
    return %arg0, %arg1, %c0_i32, %c0_i32_0 : i32, i32, i32, i32
  }
  func.func @transform_8(%arg0: i32, %arg1: i32) -> (i32, i32, i32, i32) {
    %c0_i32 = arith.constant 0 : i32
    %c0_i32_0 = arith.constant 0 : i32
    %c0_i32_1 = arith.constant 0 : i32
    return %arg0, %arg1, %c0_i32, %c0_i32_0 : i32, i32, i32, i32
  }
}

</mosaic_0001>

<bundles_post_ra>
// kernel: fwd.14
= control target key start
LH: loop header
LB: loop body
LE: loop exit
PB: predicated region body
PF: predicated region fallthrough
CT: control target
= control target key end

     0   :  { %s1889_s27 = smov 0   ;;  %s1891_s28 = smov 0   ;;  %s2067_s0 = inlined_call_operand.vmem [shape: bf16[2,66,33,2], index: 0, kind: input, shape index: {}, may-alias: {0,1,2}]   ;;  %s2068_s1 = inlined_call_operand.vmem [shape: bf16[2,66,33,2], index: 1, kind: input, shape index: {}, may-alias: {0,1,2}]   ;;  %s2069_s2 = inlined_call_operand.vmem [shape: bf16[2,66,33,2], index: 2, kind: input, shape index: {}, may-alias: {0,1,2}]   ;;  %s2070_s3 = inlined_call_operand.vmem [shape: bf16[2,66,33,2], index: 3, kind: input, shape index: {}, may-alias: {3,4,5}]   ;;  %s2071_s4 = inlined_call_operand.vmem [shape: bf16[2,66,33,2], index: 4, kind: input, shape index: {}, may-alias: {3,4,5}]   ;;  %s2072_s5 = inlined_call_operand.vmem [shape: bf16[2,66,33,2], index: 5, kind: input, shape index: {}, may-alias: {3,4,5}]   ;;  %s2073_s6 = inlined_call_operand.vmem [shape: bf16[3,3,2,8], index: 6, kind: input, shape index: {}]   ;;  %s2074_s7 = inlined_call_operand.vmem [shape: f32[1,8], index: 7, kind: input, shape index: {}]   ;;  %s2075_s8 = inlined_call_operand.vmem [shape: bf16[2,32,32,8], index: 8, kind: output, shape index: {}]  }
   0x1   :  { %s1893_s29 = smov 0   ;;  %s1895_s30 = smov 0  }
   0x2   :  { %s1897_s9 = smov 0  }
   0x3 LB: > { %s27_s10 = sadd.s32 1, %s1834_s29  ;;  %s30_s11 = sadd.s32 1, %s1838_s30  ;;  %s1842_s9 = sphi %s1897_s9, %s18_s9   ;;  %s1838_s30 = sphi %s1895_s30, %s2079_s30   ;;  %s1834_s29 = sphi %s1893_s29, %s2078_s29   ;;  %s1830_s28 = sphi %s1891_s28, %s2077_s28   ;;  %s1826_s27 = sphi %s1889_s27, %s2076_s27  }
   0x4   : > { %p28_p0 = scmp.ge.s32.totalorder %s27_s10, 32  ;;  %p1555_p1 = scmp.ge.s32.totalorder %s1842_s9, 1 }
   0x5   : > { %p402_p2 = scmp.lt.s32.totalorder %s1842_s9, 65 }
   0x6   : > { %s2081_s10 = smov (%p28_p0, %s27_s10), 0  ;;  %s2083_s11 = smov (!%p28_p0, %s30_s11), %s1838_s30 }
   0x7   : > { %p403_p3 = pnand %p1555_p1, %p402_p2  ;;  %p32_p4 = scmp.ge.s32.totalorder %s2083_s11, 2 }
   0x8   : > { %v1571_v0 = vld [vmem:[%s2073_s6 + $0x1] sm:$0x1] (!%p403_p3)  ;;  %vm612_vm0 = vcmask (!%p403_p3), 1040384   ;;  %v1589_v1 = vld [vmem:[%s2073_s6 + $0x4] sm:$0x1] (!%p403_p3)  ;;  %s1930_s16 = sshll.u32 (!%p403_p3), %s1826_s27, 1 }
   0x9   : > { %s2085_s11 = smov (%p32_p4, %s2083_s11), 0  ;;  %406 = sbr.rel (%p403_p3) target bundleno = 300 (0x12c), region = 52 }
   0xa   : > { %1736 = vmatprep.subr.msk.bf16.mxu1 (!%p403_p3), %vm612_vm0, %v1571_v0  ;;  %1740 = vmatprep.subr.msk.bf16.mxu0 (!%p403_p3), %vm612_vm0, %v1589_v1  ;;  %v614_v2 = vsel (!%p403_p3), %vm612_vm0, %v1571_v0, 0  ;;  %v921_v3 = vsel (!%p403_p3), %vm612_vm0, %v1589_v1, 0  ;;  %p500_p5 = scmp.lt.s32.totalorder (!%p403_p3), %s1830_s28, 1  ;;  %p502_p6 = scmp.lt.s32.totalorder (!%p403_p3), %s1930_s16, 65  ;;  %v1594_v4 = vld [vmem:[%s2073_s6 + $0x5] sm:$0x1] (!%p403_p3) }
   0xb   : > { %1651 = vmatpush3.bf16.msra.mxu1 (!%p403_p3), %v614_v2  ;;  %1675 = vmatpush3.bf16.msra.mxu0 (!%p403_p3), %v921_v3  ;;  %s524_s17 = sadd.s32 (!%p403_p3), 2, %s1930_s16  ;;  %s511_s18 = sadd.s32 (!%p403_p3), 1, %s1930_s16  ;;  %v592_v5 = vld [vmem:[%s2073_s6] sm:$0x1] (!%p403_p3)  ;;  %vm605_vm1 = vcmask (!%p403_p3), 15360   ;;  %v1006_v17 = vsel (!%p403_p3), %vm612_vm0, %v1594_v4, 0 }
   0xc   : > { %1741 = vmatprep.subr.msk.bf16.mxu0 (!%p403_p3), %vm612_vm0, %v1594_v4  ;;  %1737 = vmatprep.subr.msk.bf16.mxu1 (!%p403_p3), %vm612_vm0, %v592_v5  ;;  %p527_p7 = scmp.lt.s32.totalorder (!%p403_p3), %s524_s17, 65  ;;  %p514_p8 = scmp.lt.s32.totalorder (!%p403_p3), %s511_s18, 65  ;;  %v1580_v7 = vld [vmem:[%s2073_s6 + $0x2] sm:$0x1] (!%p403_p3)  ;;  %v682_v9 = vsel (!%p403_p3), %vm612_vm0, %v592_v5, 0  ;;  %vm1334_vm3 = vcmask (!%p403_p3), 60416  }
   0xd   : > { %v1598_v18 = vld [vmem:[%s2073_s6 + $0x6] sm:$0x1] (!%p403_p3)  ;;  %vm738_vm2 = vsmask.f32 (!%p403_p3), 7424  ;;  %v764_v31 = vsel (!%p403_p3), %vm612_vm0, %v1580_v7, 0  ;;  %p575_p9 = scmp.lt.s32.totalorder (!%p403_p3), %s1826_s27, 31 }
   0xe   : > { %v1584_v35 = vld [vmem:[%s2073_s6 + $0x3] sm:$0x1] (!%p403_p3)  ;;  %v1089_v46 = vsel (!%p403_p3), %vm612_vm0, %v1598_v18, 0  ;;  %v1603_v47 = vld [vmem:[%s2073_s6 + $0x7] sm:$0x1] (!%p403_p3) }
   0xf   : > { %v847_v49 = vsel (!%p403_p3), %vm612_vm0, %v1584_v35, 0  ;;  %v1163_v52 = vsel (!%p403_p3), %vm612_vm0, %v1603_v47, 0  ;;  %v1608_v54 = vld [vmem:[%s2073_s6 + $0x8] sm:$0x1] (!%p403_p3) }
  0x10   : > { %s2087_s28 = smov (!%p500_p5, %s1830_s28), 1  ;;  %s2089_s16 = smov (!%p502_p6, %s1930_s16), 65  ;;  %v1248_v62 = vsel %vm612_vm0, %v1608_v54, 0 }
  0x11   : > { %s1746_s23 = smul.u32 330, %s2087_s28  ;;  %s2091_s17 = smov (!%p527_p7, %s524_s17), 65 }
  0x12   : > { %s1745_s24 = smul.u32 5, %s2089_s16  ;;  %s2093_s18 = smov (!%p514_p8, %s511_s18), 65 }
  0x13   : > { %s1748_s12 = smul.u32 5, %s2091_s17  ;;  %s2095_s27 = smov (!%p575_p9, %s1826_s27), 31 }
  0x14   : > { %s506_s25 = sadd.s32 %s1746_s23, %s1745_s24  ;;  %s1747_s24 = smul.u32 5, %s2093_s18 }
  0x15   : > { %s1557_s26 = sshll.u32 %s506_s25, 2  ;;  %s1965_s17 = sadd.s32 %s1748_s12, %s1746_s23 }
  0x16   : > { %s1956_s15 = scalar_lea.vmem %s2067_s0, %s1557_s26  ;;  %s545_s21 = scalar_lea.vmem %s2070_s3, %s1557_s26 }
  0x17   : > { %v1789_v6 = vld [vmem:[%s545_s21] sm:$0xff]   ;;  %v1790_v8 = vld [vmem:[%s545_s21 + $0x8] sm:$0xff]   ;;  %s1561_s25 = sshll.u32 %s1965_s17, 2  ;;  %s518_s26 = sadd.s32 %s1747_s24, %s1746_s23  ;;  %v1798_v24 = vld [vmem:[%s1956_s15 + $0x10] ss:$0 sps:$4 sm:$0x11]  }
  0x18   : > { %1652 = vmatprep.mubr.msk.bf16.mxu1 %vm605_vm1, %v1789_v6  ;;  %v1793_v10 = vld [vmem:[%s1956_s15] sm:$0xff]   ;;  %v1794_v11 = vld [vmem:[%s1956_s15 + $0x8] sm:$0xff]   ;;  %s1559_s13 = sshll.u32 %s518_s26, 2  ;;  %s1979_s18 = scalar_lea.vmem %s2069_s2, %s1561_s25  ;;  %v753_v40 = vshll.u32 %v1798_v24, 16 }
  0x19   : > { %1653 = vmatmul.mubr.msk.bf16.vlgmr.msra.gmra.mrb[0].mxu1 %vm605_vm1, %v1790_v8  ;;  %v741_v12 = vshll.u32 %v1793_v10, 16  ;;  %v739_v13 = vshrl.u32 %v1793_v10, 16  ;;  %v745_v14 = vshll.u32 %v1794_v11, 16  ;;  %s520_s23 = scalar_lea.vmem %s2068_s1, %s1559_s13  ;;  %s557_s22 = scalar_lea.vmem %s2071_s4, %s1559_s13  ;;  %v749_v36 = vshrl.u32 %v1794_v11, 16  ;;  %v1799_v45 = vld [vmem:[%s1979_s18] sm:$0xff]   ;;  %v1800_v50 = vld [vmem:[%s1979_s18 + $0x8] sm:$0xff]  }
  0x1a   : > { %1657 = vmatpush3.bf16.msra.mxu1 %v682_v9  ;;  %1658 = vmatprep.mubr.msk.bf16.mxu1 %vm605_vm1, %v1793_v10  ;;  %v1791_v16 = vld [vmem:[%s557_s22] sm:$0xff]   ;;  %v1792_v19 = vld [vmem:[%s557_s22 + $0x8] sm:$0xff]   ;;  %v1797_v25 = vld [vmem:[%s520_s23 + $0x10] ss:$0 sps:$4 sm:$0x11]   ;;  %s1999_s14 = scalar_lea.vmem %s2072_s5, %s1561_s25  ;;  %v755_v44 = vrot.slane %v753_v40, 1 }
  0x1b   : > { %1738 = vmatprep.subr.msk.bf16.mxu1 %vm612_vm0, %v1580_v7  ;;  %v743_v15 = vrot.slane %v741_v12, 1  ;;  %v747_v21 = vrot.slane %v745_v14, 1  ;;  %1676 = vmatprep.mubr.msk.bf16.mxu0 %vm605_vm1, %v1791_v16  ;;  %v1795_v22 = vld [vmem:[%s520_s23] sm:$0xff]   ;;  %v1796_v23 = vld [vmem:[%s520_s23 + $0x8] sm:$0xff]   ;;  %v995_v30 = vshll.u32 %v1797_v25, 16  ;;  %v1225_v53 = vshll.u32 %v1799_v45, 16 }
  0x1c   : > { %1677 = vmatmul.mubr.msk.bf16.vlgmr.msra.gmra.mrb[0].mxu0 %vm605_vm1, %v1792_v19  ;;  %v981_v26 = vshrl.u32 %v1795_v22, 16  ;;  %v983_v27 = vshll.u32 %v1795_v22, 16  ;;  %v987_v28 = vshll.u32 %v1796_v23, 16  ;;  %v991_v29 = vshrl.u32 %v1796_v23, 16  ;;  %v1801_v51 = vld [vmem:[%s1999_s14] sm:$0xff]   ;;  %v1802_v60 = vld [vmem:[%s1999_s14 + $0x8] sm:$0xff]  }
  0x1d   : > { %v744_v20 = vor.u32 %v743_v15, %v739_v13  ;;  %1681 = vmatpush3.bf16.msra.mxu0 %v1006_v17  ;;  %v997_v39 = vrot.slane %v995_v30, 1  ;;  %v751_v43 = vor.u32 %v749_v36, %v747_v21  ;;  %v1223_v55 = vshrl.u32 %v1799_v45, 16  ;;  %v1803_v61 = vld [vmem:[%s1979_s18 + $0x10] ss:$0 sps:$4 sm:$0x11]   ;;  %s1568_s18 = sshll.u32 %s2095_s27, 2 }
  0x1e   : > { %1742 = vmatprep.subr.msk.bf16.mxu0 %vm612_vm0, %v1598_v18  ;;  %v985_v33 = vrot.slane %v983_v27, 1  ;;  %v989_v34 = vrot.slane %v987_v28, 1  ;;  %v1227_v56 = vrot.slane %v1225_v53, 1  ;;  %v1229_v57 = vshll.u32 %v1800_v50, 16  ;;  %s1569_s21 = sshll.u32 %s2087_s28, 7 }
  0x1f   : > { %v748_v32 = vsel %vm738_vm2, %v744_v20, %v747_v21  ;;  %v756_v48 = vsel %vm738_vm2, %v751_v43, %v755_v44  ;;  %v1233_v0 = vshrl.u32 %v1800_v50, 16  ;;  %v1237_v1 = vshll.u32 %v1803_v61, 16  ;;  %s579_s16 = sadd.s32 %s1569_s21, %s1568_s18  ;;  %v1612_v10 = vld [vmem:[%s2074_s7] ss:$0 sm:$0xff] }
  0x20   : > { %v986_v37 = vor.u32 %v985_v33, %v981_v26  ;;  %v993_v38 = vor.u32 %v991_v29, %v989_v34  ;;  %v1228_v58 = vor.u32 %v1227_v56, %v1223_v55  ;;  %v1231_v59 = vrot.slane %v1229_v57, 1  ;;  %s1570_s26 = sshll.u32 %s579_s16, 2 }
  0x21   : > { %v1239_v3 = vrot.slane %v1237_v1, 1  ;;  %s581_s13 = scalar_lea.vmem %s2075_s8, %s1570_s26 }
  0x22   : > { %v990_v41 = vsel %vm738_vm2, %v986_v37, %v989_v34  ;;  %v998_v42 = vsel %vm738_vm2, %v993_v38, %v997_v39  ;;  %v1232_v63 = vsel %vm738_vm2, %v1228_v58, %v1231_v59  ;;  %v1235_v2 = vor.u32 %v1233_v0, %v1231_v59 }
  0x23   : > { %1682 = vmatprep.mubr.msk.bf16.mxu0 %vm605_vm1, %v990_v41 }
  0x24   : > { %v1240_v4 = vsel %vm738_vm2, %v1235_v2, %v1239_v3 }
  0x25   : > { %1659 = vmatmul.mubr.msk.bf16.vlgmr.msra.gmra.mrb[0].mxu1 %vm605_vm1, %v1794_v11 }
  0x26   : > { %1663 = vmatpush3.bf16.msra.mxu1 %v764_v31  ;;  %1664 = vmatprep.mubr.msk.bf16.mxu1 %vm605_vm1, %v748_v32 }
  0x27   : > { %1739 = vmatprep.subr.msk.bf16.mxu1 %vm612_vm0, %v1584_v35 }
  0x28   : > { %1683 = vmatmul.mubr.msk.bf16.vlgmr.msra.gmra.mrb[0].mxu0 %vm605_vm1, %v998_v42 }
  0x29   : > { %1687 = vmatpush3.bf16.msra.mxu0 %v1089_v46  ;;  %1688 = vmatprep.mubr.msk.bf16.mxu0 %vm605_vm1, %v1799_v45 }
  0x2a   : > { %1743 = vmatprep.subr.msk.bf16.mxu0 %vm612_vm0, %v1603_v47 }
  0x31   : > { %1665 = vmatmul.mubr.msk.bf16.vlgmr.msra.gmra.mrb[0].mxu1 %vm605_vm1, %v756_v48 }
  0x32   : > { %1669 = vmatpush3.bf16.msra.mxu1 %v847_v49  ;;  %1670 = vmatprep.mubr.msk.bf16.mxu1 %vm605_vm1, %v1795_v22 }
  0x34   : > { %1689 = vmatmul.mubr.msk.bf16.vlgmr.msra.gmra.mrb[0].mxu0 %vm605_vm1, %v1800_v50 }
  0x35   : > { %1693 = vmatpush3.bf16.msra.mxu0 %v1163_v52  ;;  %1694 = vmatprep.mubr.msk.bf16.mxu0 %vm605_vm1, %v1801_v51 }
  0x36   : > { %1744 = vmatprep.subr.msk.bf16.mxu0 %vm612_vm0, %v1608_v54 }
  0x3d   : > { %1671 = vmatmul.mubr.msk.bf16.vlgmr.msra.gmra.mrb[0].mxu1 %vm605_vm1, %v1796_v23 }
  0x40   : > { %1695 = vmatmul.mubr.msk.bf16.vlgmr.msra.gmra.mrb[0].mxu0 %vm605_vm1, %v1802_v60 }
  0x41   : > { %1699 = vmatpush3.bf16.msra.mxu0 %v1248_v62  ;;  %1700 = vmatprep.mubr.msk.bf16.mxu0 %vm605_vm1, %v1232_v63 }
  0x4c   : > { %1701 = vmatmul.mubr.msk.bf16.vlgmr.msra.gmra.mrb[0].mxu0 %vm605_vm1, %v1240_v4 }
 0x110   : > { %v1672_v5 = vpop.f32.mrb[0].mxu1 }
 0x111   : > { %v883_v6 = vpop.f32.mrb[1].mxu1 }
 0x112   : > { %v1673_v7 = vpop.f32.mrb[2].mxu1 }
 0x113   : > { %v886_v8 = vpop.f32.mrb[3].mxu1 }
 0x11f   : > { %v1702_v9 = vpop.f32.mrb[0].mxu0 }
 0x120   : > { %v1704_v11 = vadd.f32 %v1702_v9, %v1672_v5  ;;  %v1284_v12 = vpop.f32.mrb[1].mxu0 }
 0x121   : > { %v1705_v13 = vadd.f32 %v1284_v12, %v883_v6  ;;  %v1703_v14 = vpop.f32.mrb[2].mxu0 }
 0x122   : > { %v1312_v15 = vadd.f32 %v1704_v11, %v1612_v10  ;;  %v1706_v16 = vadd.f32 %v1703_v14, %v1673_v7  ;;  %v1287_v17 = vpop.f32.mrb[3].mxu0 }
 0x123   : > { %v1310_v18 = vadd.f32 %v1705_v13, %v1612_v10  ;;  %v1707_v19 = vadd.f32 %v1287_v17, %v886_v8 }
 0x124   : > { %v1316_v20 = vmax.f32 %v1312_v15, 0.0  ;;  %v1313_v21 = vadd.f32 %v1706_v16, %v1612_v10 }
 0x125   : > { %v1314_v22 = vmax.f32 %v1310_v18, 0.0  ;;  %v1311_v23 = vadd.f32 %v1707_v19, %v1612_v10 }
 0x126   : > { %v1621_v24 = vpack.c.bf16 %v1316_v20, %v1316_v20  ;;  %v1317_v25 = vmax.f32 %v1313_v21, 0.0 }
 0x127   : > { %v1619_v26 = vpack.c.bf16 %v1314_v22, %v1314_v22  ;;  %v1315_v27 = vmax.f32 %v1311_v23, 0.0 }
 0x128   : > { %1337 = vst.msk [vmem:[%s581_s13 + $0x8] sm:$0xf] %vm1334_vm3, %v1621_v24  ;;  %v1622_v28 = vpack.c.bf16 %v1317_v25, %v1317_v25 }
 0x129   : > { %1335 = vst.msk [vmem:[%s581_s13] sm:$0xf] %vm1334_vm3, %v1619_v26  ;;  %v1620_v29 = vpack.c.bf16 %v1315_v27, %v1315_v27 }
 0x12a   : > { %1338 = vst.msk [vmem:[%s581_s13 + $0xc] sm:$0xf] %vm1334_vm3, %v1622_v28 }
 0x12b   : > { %1336 = vst.msk [vmem:[%s581_s13 + $0x4] sm:$0xf] %vm1334_vm3, %v1620_v29 }
 0x12c PF: > { %s18_s9 = sadd.s32 1, %s1842_s9   ;;  %s2076_s27 = smov %s1834_s29 }
 0x12d   : > { %p15_p10 = scmp.ge.s32.totalorder %s18_s9, 66   ;;  %s2077_s28 = smov %s1838_s30 }
 0x12e   : > { %s2078_s29 = smov %s2081_s10  ;;  %s2079_s30 = smov %s2085_s11 }
 0x12f   :  { %17 = sbr.rel (!%p15_p10) target bundleno = 3 (0x3), region = 105 }

// kernel: fwd.15
= control target key start
LH: loop header
LB: loop body
LE: loop exit
PB: predicated region body
PF: predicated region fallthrough
CT: control target
= control target key end

     0   :  { %s1628_s27 = smov 0   ;;  %s1630_s28 = smov 0   ;;  %s1809_s0 = inlined_call_operand.vmem [shape: bf16[2,34,17,8], index: 0, kind: input, shape index: {}, may-alias: {0,1,2}]   ;;  %s1810_s1 = inlined_call_operand.vmem [shape: bf16[2,34,17,8], index: 1, kind: input, shape index: {}, may-alias: {0,1,2}]   ;;  %s1811_s2 = inlined_call_operand.vmem [shape: bf16[2,34,17,8], index: 2, kind: input, shape index: {}, may-alias: {0,1,2}]   ;;  %s1812_s3 = inlined_call_operand.vmem [shape: bf16[2,34,17,8], index: 3, kind: input, shape index: {}, may-alias: {3,4,5}]   ;;  %s1813_s4 = inlined_call_operand.vmem [shape: bf16[2,34,17,8], index: 4, kind: input, shape index: {}, may-alias: {3,4,5}]   ;;  %s1814_s5 = inlined_call_operand.vmem [shape: bf16[2,34,17,8], index: 5, kind: input, shape index: {}, may-alias: {3,4,5}]   ;;  %s1815_s6 = inlined_call_operand.vmem [shape: bf16[3,3,8,16], index: 6, kind: input, shape index: {}]   ;;  %s1816_s7 = inlined_call_operand.vmem [shape: f32[1,16], index: 7, kind: input, shape index: {}]   ;;  %s1817_s8 = inlined_call_operand.vmem [shape: bf16[2,16,16,16], index: 8, kind: output, shape index: {}]  }
   0x1   :  { %s1632_s29 = smov 0   ;;  %s1634_s30 = smov 0  }
   0x2   :  { %s1636_s9 = smov 0  }
   0x3 LB: > { %s27_s10 = sadd.s32 1, %s1571_s29  ;;  %s30_s11 = sadd.s32 1, %s1575_s30  ;;  %s1579_s9 = sphi %s1636_s9, %s18_s9   ;;  %s1575_s30 = sphi %s1634_s30, %s1826_s30   ;;  %s1571_s29 = sphi %s1632_s29, %s1825_s29   ;;  %s1567_s28 = sphi %s1630_s28, %s1824_s28   ;;  %s1563_s27 = sphi %s1628_s27, %s1823_s27  }
   0x4   : > { %p28_p0 = scmp.ge.s32.totalorder %s27_s10, 16  ;;  %p1365_p1 = scmp.ge.s32.totalorder %s1579_s9, 1 }
   0x5   : > { %p402_p2 = scmp.lt.s32.totalorder %s1579_s9, 33 }
   0x6   : > { %s1828_s10 = smov (%p28_p0, %s27_s10), 0  ;;  %s1830_s11 = smov (!%p28_p0, %s30_s11), %s1575_s30 }
   0x7   : > { %1818 = sst [smem:[#allocation2_spill]] %s1828_s10  ;;  %p403_p3 = pnand %p1365_p1, %p402_p2 }
   0x8   : > { %p32_p4 = scmp.ge.s32.totalorder %s1830_s11, 2  ;;  %v1381_v0 = vld [vmem:[%s1815_s6 + $0x4] sm:$0xf] (!%p403_p3)  ;;  %vm600_vm0 = vcmask (!%p403_p3), 1043456   ;;  %v588_v1 = vld [vmem:[%s1815_s6] sm:$0xf] (!%p403_p3) }
   0x9   : > { %406 = sbr.rel (%p403_p3) target bundleno = 280 (0x118), region = 52  ;;  %v1581_v2 = vmov (!%p403_p3), 0.0   ;;  %v602_v3 = vsel (!%p403_p3), %vm600_vm0, %v1381_v0, 0  ;;  %v654_v4 = vsel (!%p403_p3), %vm600_vm0, %v588_v1, 0  ;;  %s1673_s16 = sshll.u32 (!%p403_p3), %s1563_s27, 1  ;;  %vm1582_vm1 = vmmov (!%p403_p3), 0  }
   0xa   : > { %s1832_s11 = smov (%p32_p4, %s1830_s11), 0  ;;  %1432 = vmatprep.subr.bf16.mxu0 (!%p403_p3), %v1581_v2  ;;  %1438 = vmatprep.subr.bf16.mxu1 (!%p403_p3), %v1581_v2  ;;  %p500_p5 = scmp.lt.s32.totalorder (!%p403_p3), %s1567_s28, 1  ;;  %v1386_v5 = vld [vmem:[%s1815_s6 + $0x8] sm:$0xf] (!%p403_p3)  ;;  %v1389_v6 = vld [vmem:[%s1815_s6 + $0xc] sm:$0xf] (!%p403_p3) }
   0xb   : > { %1819 = sst [smem:[#allocation3_spill]] %s1832_s11  ;;  %1433 = vmatpush3.bf16.msra.mxu0 (!%p403_p3), %v602_v3  ;;  %1439 = vmatpush3.bf16.msra.mxu1 (!%p403_p3), %v654_v4  ;;  %p502_p6 = scmp.lt.s32.totalorder (!%p403_p3), %s1673_s16, 33  ;;  %vm596_vm2 = vcmask (!%p403_p3), 64512   ;;  %v718_v7 = vsel (!%p403_p3), %vm600_vm0, %v1386_v5, 0  ;;  %v779_v8 = vsel (!%p403_p3), %vm600_vm0, %v1389_v6, 0  ;;  %vm1146_vm4 = vcmask (!%p403_p3), 125952  }
   0xc   : > { %s511_s17 = sadd.s32 (!%p403_p3), 1, %s1673_s16  ;;  %1434 = vmatprep.mubr.msk.bf16.mxu0 (!%p403_p3), %vm1582_vm1, %v1581_v2  ;;  %1440 = vmatprep.mubr.msk.bf16.mxu1 (!%p403_p3), %vm1582_vm1, %v1581_v2  ;;  %s524_s26 = sadd.s32 (!%p403_p3), 2, %s1673_s16  ;;  %vm702_vm3 = vsmask.f32 (!%p403_p3), 7424  ;;  %v1392_v14 = vld [vmem:[%s1815_s6 + $0x10] sm:$0xf] (!%p403_p3) }
   0xd   : > { %1444 = vmatprep.subr.bf16.mxu0 (!%p403_p3), %v1581_v2  ;;  %1450 = vmatprep.subr.bf16.mxu1 (!%p403_p3), %v1581_v2  ;;  %p514_p7 = scmp.lt.s32.totalorder (!%p403_p3), %s511_s17, 33  ;;  %p1710_p8 = scmp.lt.s32.totalorder (!%p403_p3), %s524_s26, 33  ;;  %v1395_v18 = vld [vmem:[%s1815_s6 + $0x14] sm:$0xf] (!%p403_p3)  ;;  %v835_v23 = vsel (!%p403_p3), %vm600_vm0, %v1392_v14, 0 }
   0xe   : > { %v900_v28 = vsel (!%p403_p3), %vm600_vm0, %v1395_v18, 0  ;;  %v1398_v31 = vld [vmem:[%s1815_s6 + $0x18] sm:$0xf] (!%p403_p3)  ;;  %v1401_v33 = vld [vmem:[%s1815_s6 + $0x1c] sm:$0xf] (!%p403_p3)  ;;  %p575_p9 = scmp.lt.s32.totalorder (!%p403_p3), %s1563_s27, 15 }
   0xf   : > { %v961_v35 = vsel (!%p403_p3), %vm600_vm0, %v1398_v31, 0  ;;  %v1017_v37 = vsel (!%p403_p3), %vm600_vm0, %v1401_v33, 0  ;;  %v1404_v40 = vld [vmem:[%s1815_s6 + $0x20] sm:$0xf] (!%p403_p3) }
  0x10   : > { %s1834_s28 = smov (!%p500_p5, %s1567_s28), 1  ;;  %s1836_s17 = smov (!%p514_p7, %s511_s17), 33  ;;  %v1082_v45 = vsel %vm600_vm0, %v1404_v40, 0 }
  0x11   : > { %s503_s18 = scalar_select %p502_p6, %s1673_s16, 33 }
  0x12   : > { %s1689_s19 = smul.u32 102, %s1834_s28  ;;  %s1838_s26 = smov (!%p1710_p8, %s524_s26), 33 }
  0x13   : > { %s1486_s20 = smul.u32 3, %s503_s18  ;;  %s1840_s27 = smov (!%p575_p9, %s1563_s27), 15 }
  0x14   : > { %s1488_s13 = smul.u32 3, %s1836_s17  ;;  %s1378_s15 = sshll.u32 %s1840_s27, 1 }
  0x15   : > { %s506_s25 = sadd.s32 %s1689_s19, %s1486_s20  ;;  %s1379_s18 = sshll.u32 %s1834_s28, 5 }
  0x16   : > { %s1367_s12 = sshll.u32 %s506_s25, 2  ;;  %s518_s22 = sadd.s32 %s1488_s13, %s1689_s19 }
  0x17   : > { %s545_s11 = scalar_lea.vmem %s1812_s3, %s1367_s12  ;;  %s508_s21 = scalar_lea.vmem %s1809_s0, %s1367_s12 }
  0x18   : > { %v1532_v9 = vld [vmem:[%s545_s11] sm:$0xff]   ;;  %s1369_s17 = sshll.u32 %s518_s22, 2  ;;  %v1534_v11 = vld [vmem:[%s508_s21 + $0x8] ss:$0 sps:$4 sm:$0x11]  }
  0x19   : > { %v1533_v10 = vld [vmem:[%s508_s21] sm:$0xff]   ;;  %1435 = vmatmul.mubr.msk.bf16.vlgmr.msra.gmra.mrb[0].mxu0 %vm596_vm2, %v1532_v9  ;;  %s520_s24 = scalar_lea.vmem %s1810_s1, %s1369_s17  ;;  %s1725_s14 = scalar_lea.vmem %s1813_s4, %s1369_s17  ;;  %v710_v15 = vshll.u32 %v1534_v11, 16 }
  0x1a   : > { %1441 = vmatmul.mubr.msk.bf16.vlgmr.msra.gmra.mrb[0].mxu1 %vm596_vm2, %v1533_v10  ;;  %v703_v12 = vshrl.u32 %v1533_v10, 16  ;;  %v705_v13 = vshll.u32 %v1533_v10, 16  ;;  %1445 = vmatpush3.bf16.msra.mxu0 %v718_v7  ;;  %v1535_v16 = vld [vmem:[%s520_s24] sm:$0xff]   ;;  %v1537_v20 = vld [vmem:[%s520_s24 + $0x8] ss:$0 sps:$4 sm:$0x11]  }
  0x1b   : > { %1451 = vmatpush3.bf16.msra.mxu1 %v779_v8  ;;  %1446 = vmatprep.mubr.msk.bf16.mxu0 %vm1582_vm1, %v1581_v2  ;;  %v712_v19 = vrot.slane %v710_v15, 1  ;;  %v887_v21 = vshll.u32 %v1535_v16, 16  ;;  %s1489_s21 = smul.u32 3, %s1838_s26  ;;  %v885_v24 = vshrl.u32 %v1535_v16, 16  ;;  %v892_v26 = vshll.u32 %v1537_v20, 16  ;;  %v1536_v32 = vld [vmem:[%s1725_s14] sm:$0xff]  }
  0x1c   : > { %1456 = vmatprep.subr.bf16.mxu0 %v1581_v2  ;;  %v707_v17 = vrot.slane %v705_v13, 1  ;;  %1452 = vmatprep.mubr.msk.bf16.mxu1 %vm1582_vm1, %v1581_v2 }
  0x1d   : > { %1462 = vmatprep.subr.bf16.mxu1 %v1581_v2  ;;  %v889_v25 = vrot.slane %v887_v21, 1  ;;  %s531_s16 = sadd.s32 %s1489_s21, %s1689_s19  ;;  %v894_v30 = vrot.slane %v892_v26, 1  ;;  %s579_s21 = sadd.s32 %s1379_s18, %s1378_s15 }
  0x1e   : > { %v708_v22 = vor.u32 %v707_v17, %v703_v12  ;;  %s1371_s22 = sshll.u32 %s531_s16, 2  ;;  %s1380_s20 = sshll.u32 %s579_s21, 2 }
  0x1f   : > { %s533_s26 = scalar_lea.vmem %s1811_s2, %s1371_s22  ;;  %v890_v29 = vor.u32 %v889_v25, %v885_v24  ;;  %s570_s19 = scalar_lea.vmem %s1814_s5, %s1371_s22 }
  0x20   : > { %v713_v27 = vsel %vm702_vm3, %v708_v22, %v712_v19  ;;  %v1538_v34 = vld [vmem:[%s533_s26] sm:$0xff]   ;;  %v1540_v38 = vld [vmem:[%s533_s26 + $0x8] ss:$0 sps:$4 sm:$0x11]   ;;  %s581_s27 = scalar_lea.vmem %s1817_s8, %s1380_s20 }
  0x21   : > { %1447 = vmatmul.mubr.msk.bf16.vlgmr.msra.gmra.mrb[4].mxu0 %vm596_vm2, %v713_v27  ;;  %v895_v36 = vsel %vm702_vm3, %v890_v29, %v894_v30  ;;  %v1069_v39 = vshll.u32 %v1538_v34, 16  ;;  %v1539_v41 = vld [vmem:[%s570_s19] sm:$0xff]   ;;  %v1067_v42 = vshrl.u32 %v1538_v34, 16  ;;  %v1074_v44 = vshll.u32 %v1540_v38, 16 }
  0x22   : > { %1457 = vmatpush3.bf16.msra.mxu0 %v835_v23  ;;  %1453 = vmatmul.mubr.msk.bf16.vlgmr.msra.gmra.mrb[4].mxu1 %vm596_vm2, %v1535_v16 }
  0x23   : > { %1463 = vmatpush3.bf16.msra.mxu1 %v900_v28  ;;  %1458 = vmatprep.mubr.msk.bf16.mxu0 %vm1582_vm1, %v1581_v2  ;;  %v1071_v43 = vrot.slane %v1069_v39, 1  ;;  %v1076_v47 = vrot.slane %v1074_v44, 1 }
  0x24   : > { %1468 = vmatprep.subr.bf16.mxu0 %v1581_v2  ;;  %1464 = vmatprep.mubr.msk.bf16.mxu1 %vm1582_vm1, %v1581_v2 }
  0x25   : > { %1474 = vmatprep.subr.bf16.mxu1 %v1581_v2  ;;  %v1072_v46 = vor.u32 %v1071_v43, %v1067_v42 }
  0x27   : > { %v1077_v48 = vsel %vm702_vm3, %v1072_v46, %v1076_v47 }
  0x29   : > { %1459 = vmatmul.mubr.msk.bf16.vlgmr.msra.gmra.mrb[8].mxu0 %vm596_vm2, %v1536_v32  ;;  %v1407_v32 = vld [vmem:[%s1816_s7] ss:$0 sm:$0xff] }
  0x2a   : > { %1469 = vmatpush3.bf16.msra.mxu0 %v961_v35  ;;  %1465 = vmatmul.mubr.msk.bf16.vlgmr.msra.gmra.mrb[8].mxu1 %vm596_vm2, %v895_v36 }
  0x2b   : > { %1475 = vmatpush3.bf16.msra.mxu1 %v1017_v37  ;;  %1470 = vmatprep.mubr.msk.bf16.mxu0 %vm1582_vm1, %v1581_v2 }
  0x2c   : > { %1480 = vmatprep.subr.bf16.mxu0 %v1581_v2  ;;  %1476 = vmatprep.mubr.msk.bf16.mxu1 %vm1582_vm1, %v1581_v2 }
  0x31   : > { %1471 = vmatmul.mubr.msk.bf16.vlgmr.msra.gmra.mrb[12].mxu0 %vm596_vm2, %v1538_v34 }
  0x32   : > { %1481 = vmatpush3.bf16.msra.mxu0 %v1082_v45  ;;  %1477 = vmatmul.mubr.msk.bf16.vlgmr.msra.gmra.mrb[12].mxu1 %vm596_vm2, %v1539_v41 }
  0x33   : > { %1482 = vmatprep.mubr.msk.bf16.mxu0 %vm1582_vm1, %v1581_v2 }
  0x39   : > { %1483 = vmatmul.mubr.msk.bf16.vlgmr.msra.gmra.mrb[16].mxu0 %vm596_vm2, %v1077_v48 }
  0xec   : > { %v638_v49 = vpop.f32.mrb[0].mxu0 }
  0xed   : > { %v690_v50 = vpop.f32.mrb[0].mxu1  ;;  %v1436_v51 = vpop.f32.mrb[1].mxu0 }
  0xee   : > { %v691_v52 = vadd.f32 %v690_v50, %v638_v49  ;;  %v1442_v53 = vpop.f32.mrb[1].mxu1  ;;  %v641_v54 = vpop.f32.mrb[2].mxu0 }
  0xef   : > { %v693_v55 = vpop.f32.mrb[2].mxu1  ;;  %v1437_v56 = vpop.f32.mrb[3].mxu0 }
  0xf0   : > { %v694_v57 = vadd.f32 %v693_v55, %v641_v54  ;;  %v1443_v58 = vpop.f32.mrb[3].mxu1 }
  0xf4   : > { %v754_v59 = vpop.f32.mrb[4].mxu0 }
  0xf5   : > { %v761_v60 = vadd.f32 %v754_v59, %v691_v52  ;;  %v1448_v61 = vpop.f32.mrb[5].mxu0  ;;  %v815_v62 = vpop.f32.mrb[4].mxu1 }
  0xf6   : > { %v757_v63 = vpop.f32.mrb[6].mxu0  ;;  %v1454_v0 = vpop.f32.mrb[5].mxu1 }
  0xf7   : > { %v762_v1 = vadd.f32 %v757_v63, %v694_v57  ;;  %v822_v2 = vadd.f32 %v815_v62, %v761_v60  ;;  %v1449_v3 = vpop.f32.mrb[7].mxu0  ;;  %v818_v4 = vpop.f32.mrb[6].mxu1 }
  0xf8   : > { %v1455_v5 = vpop.f32.mrb[7].mxu1 }
  0xf9   : > { %v823_v6 = vadd.f32 %v818_v4, %v762_v1 }
  0xfc   : > { %v871_v7 = vpop.f32.mrb[8].mxu0 }
  0xfd   : > { %v878_v8 = vadd.f32 %v871_v7, %v822_v2  ;;  %v1460_v9 = vpop.f32.mrb[9].mxu0  ;;  %v936_v10 = vpop.f32.mrb[8].mxu1 }
  0xfe   : > { %v874_v11 = vpop.f32.mrb[10].mxu0  ;;  %v1466_v12 = vpop.f32.mrb[9].mxu1 }
  0xff   : > { %v879_v13 = vadd.f32 %v874_v11, %v823_v6  ;;  %v943_v14 = vadd.f32 %v936_v10, %v878_v8  ;;  %v1461_v15 = vpop.f32.mrb[11].mxu0  ;;  %v939_v16 = vpop.f32.mrb[10].mxu1 }
 0x100   : > { %v1467_v17 = vpop.f32.mrb[11].mxu1 }
 0x101   : > { %v944_v18 = vadd.f32 %v939_v16, %v879_v13 }
 0x104   : > { %v997_v19 = vpop.f32.mrb[12].mxu0 }
 0x105   : > { %v1004_v20 = vadd.f32 %v997_v19, %v943_v14  ;;  %v1472_v21 = vpop.f32.mrb[13].mxu0  ;;  %v1053_v22 = vpop.f32.mrb[12].mxu1 }
 0x106   : > { %v1000_v23 = vpop.f32.mrb[14].mxu0  ;;  %v1478_v24 = vpop.f32.mrb[13].mxu1 }
 0x107   : > { %v1005_v25 = vadd.f32 %v1000_v23, %v944_v18  ;;  %v1060_v26 = vadd.f32 %v1053_v22, %v1004_v20  ;;  %v1473_v27 = vpop.f32.mrb[15].mxu0  ;;  %v1056_v28 = vpop.f32.mrb[14].mxu1 }
 0x108   : > { %v1479_v29 = vpop.f32.mrb[15].mxu1 }
 0x109   : > { %v1061_v30 = vadd.f32 %v1056_v28, %v1005_v25 }
 0x10c   : > { %v1118_v31 = vpop.f32.mrb[16].mxu0 }
 0x10d   : > { %v1125_v33 = vadd.f32 %v1118_v31, %v1060_v26  ;;  %v1484_v34 = vpop.f32.mrb[17].mxu0 }
 0x10e   : > { %v1121_v35 = vpop.f32.mrb[18].mxu0 }
 0x10f   : > { %v1134_v36 = vadd.f32 %v1407_v32, %v1125_v33  ;;  %v1126_v37 = vadd.f32 %v1121_v35, %v1061_v30  ;;  %v1485_v38 = vpop.f32.mrb[19].mxu0 }
 0x111   : > { %v1136_v39 = vmax.f32 %v1134_v36, 0.0  ;;  %v1135_v40 = vadd.f32 %v1407_v32, %v1126_v37 }
 0x113   : > { %v1412_v41 = vpack.c.bf16 %v1136_v39, %v1136_v39  ;;  %v1137_v42 = vmax.f32 %v1135_v40, 0.0 }
 0x115   : > { %1147 = vst.msk [vmem:[%s581_s27] sm:$0xf] %vm1146_vm4, %v1412_v41  ;;  %v1413_v43 = vpack.c.bf16 %v1137_v42, %v1137_v42 }
 0x117   : > { %1148 = vst.msk [vmem:[%s581_s27 + $0x4] sm:$0xf] %vm1146_vm4, %v1413_v43 }
 0x118 PF: > { %s18_s9 = sadd.s32 1, %s1579_s9   ;;  %s1821_s23 = sld [smem:[#allocation2_spill]] }
 0x119   : > { %p15_p10 = scmp.ge.s32.totalorder %s18_s9, 34   ;;  %s1822_s10 = sld [smem:[#allocation3_spill]] }
 0x11a   : > { %s1823_s27 = smov %s1571_s29  ;;  %s1824_s28 = smov %s1575_s30 }
 0x11b   :  { %17 = sbr.rel (!%p15_p10) target bundleno = 3 (0x3), region = 105 }
 0x11e   : > { %s1825_s29 = smov %s1821_s23 }
 0x11f   : > { %s1826_s30 = smov %s1822_s10 }

// kernel: fwd.16
= control target key start
LH: loop header
LB: loop body
LE: loop exit
PB: predicated region body
PF: predicated region fallthrough
CT: control target
= control target key end

     0   :  { %s1598_s27 = smov 0   ;;  %s1600_s28 = smov 0   ;;  %s1759_s0 = inlined_call_operand.vmem [shape: bf16[2,18,9,16], index: 0, kind: input, shape index: {}, may-alias: {0,1,2}]   ;;  %s1760_s1 = inlined_call_operand.vmem [shape: bf16[2,18,9,16], index: 1, kind: input, shape index: {}, may-alias: {0,1,2}]   ;;  %s1761_s2 = inlined_call_operand.vmem [shape: bf16[2,18,9,16], index: 2, kind: input, shape index: {}, may-alias: {0,1,2}]   ;;  %s1762_s3 = inlined_call_operand.vmem [shape: bf16[2,18,9,16], index: 3, kind: input, shape index: {}, may-alias: {3,4,5}]   ;;  %s1763_s4 = inlined_call_operand.vmem [shape: bf16[2,18,9,16], index: 4, kind: input, shape index: {}, may-alias: {3,4,5}]   ;;  %s1764_s5 = inlined_call_operand.vmem [shape: bf16[2,18,9,16], index: 5, kind: input, shape index: {}, may-alias: {3,4,5}]   ;;  %s1765_s6 = inlined_call_operand.vmem [shape: bf16[3,3,16,32], index: 6, kind: input, shape index: {}]   ;;  %s1766_s7 = inlined_call_operand.vmem [shape: f32[1,32], index: 7, kind: input, shape index: {}]   ;;  %s1767_s8 = inlined_call_operand.vmem [shape: bf16[2,8,8,32], index: 8, kind: output, shape index: {}]  }
   0x1   :  { %s1602_s29 = smov 0   ;;  %s1604_s30 = smov 0  }
   0x2   :  { %s1606_s9 = smov 0  }
   0x3 LB: > { %s27_s10 = sadd.s32 1, %s1541_s29  ;;  %s30_s11 = sadd.s32 1, %s1545_s30  ;;  %s1549_s9 = sphi %s1606_s9, %s18_s9   ;;  %s1545_s30 = sphi %s1604_s30, %s1774_s30   ;;  %s1541_s29 = sphi %s1602_s29, %s1773_s29   ;;  %s1537_s28 = sphi %s1600_s28, %s1772_s28   ;;  %s1533_s27 = sphi %s1598_s27, %s1771_s27  }
   0x4   : > { %p28_p0 = scmp.ge.s32.totalorder %s27_s10, 8  ;;  %p1323_p1 = scmp.ge.s32.totalorder %s1549_s9, 1 }
   0x5   : > { %p402_p2 = scmp.lt.s32.totalorder %s1549_s9, 17 }
   0x6   : > { %s1776_s10 = smov (%p28_p0, %s27_s10), 0  ;;  %s1778_s11 = smov (!%p28_p0, %s30_s11), %s1545_s30 }
   0x7   : > { %p403_p3 = pnand %p1323_p1, %p402_p2  ;;  %p32_p4 = scmp.ge.s32.totalorder %s1778_s11, 2 }
   0x8   : > { %v1499_v0 = vld [vmem:[%s1765_s6 + $0x8] sm:$0xff] (!%p403_p3)   ;;  %v1551_v1 = vmov (!%p403_p3), 0.0   ;;  %v1500_v2 = vld [vmem:[%s1765_s6] sm:$0xff] (!%p403_p3)   ;;  %vm1552_vm0 = vmmov (!%p403_p3), 0   ;;  %s1641_s16 = sshll.u32 (!%p403_p3), %s1533_s27, 1  ;;  %p499_p5 = scmp.lt.s32.totalorder (!%p403_p3), %s1537_s28, 1 }
   0x9   : > { %s1780_s11 = smov (%p32_p4, %s1778_s11), 0  ;;  %406 = sbr.rel (%p403_p3) target bundleno = 278 (0x116), region = 52 }
   0xa   : > { %1768 = sst [smem:[#allocation2_spill]] %s1780_s11  ;;  %1402 = vmatprep.subr.bf16.mxu0 (!%p403_p3), %v1551_v1  ;;  %1408 = vmatprep.subr.bf16.mxu1 (!%p403_p3), %v1551_v1  ;;  %p501_p6 = scmp.lt.s32.totalorder (!%p403_p3), %s1641_s16, 17  ;;  %vm595_vm1 = vcmask (!%p403_p3), 130048   ;;  %v1502_v3 = vld [vmem:[%s1765_s6 + $0x10] sm:$0xff] (!%p403_p3)   ;;  %v1503_v4 = vld [vmem:[%s1765_s6 + $0x18] sm:$0xff] (!%p403_p3)   ;;  %v1504_v12 = vld [vmem:[%s1765_s6 + $0x20] sm:$0xff] (!%p403_p3)  }
   0xb   : > { %1403 = vmatpush3.bf16.msra.mxu0 (!%p403_p3), %v1499_v0  ;;  %1404 = vmatprep.mubr.msk.bf16.mxu0 (!%p403_p3), %vm1552_vm0, %v1551_v1  ;;  %s510_s19 = sadd.s32 (!%p403_p3), 1, %s1641_s16  ;;  %s523_s12 = sadd.s32 (!%p403_p3), 2, %s1641_s16  ;;  %v1506_v13 = vld [vmem:[%s1765_s6 + $0x28] sm:$0xff] (!%p403_p3)   ;;  %v1507_v21 = vld [vmem:[%s1765_s6 + $0x30] sm:$0xff] (!%p403_p3)   ;;  %v1508_v22 = vld [vmem:[%s1765_s6 + $0x38] sm:$0xff] (!%p403_p3)   ;;  %vm1111_vm2 = vcmask (!%p403_p3), 257024  }
   0xc   : > { %1409 = vmatpush3.bf16.msra.mxu1 (!%p403_p3), %v1500_v2  ;;  %1410 = vmatprep.mubr.msk.bf16.mxu1 (!%p403_p3), %vm1552_vm0, %v1551_v1  ;;  %p1658_p7 = scmp.lt.s32.totalorder (!%p403_p3), %s510_s19, 17  ;;  %p526_p8 = scmp.lt.s32.totalorder (!%p403_p3), %s523_s12, 17  ;;  %v1510_v29 = vld [vmem:[%s1765_s6 + $0x40] sm:$0xff] (!%p403_p3)  }
   0xd   : > { %1414 = vmatprep.subr.bf16.mxu0 (!%p403_p3), %v1551_v1  ;;  %1420 = vmatprep.subr.bf16.mxu1 (!%p403_p3), %v1551_v1  ;;  %p574_p9 = scmp.lt.s32.totalorder (!%p403_p3), %s1533_s27, 7 }
  0x10   : > { %s1782_s28 = smov (!%p499_p5, %s1537_s28), 1  ;;  %s1784_s19 = smov (!%p1658_p7, %s510_s19), 17 }
  0x11   : > { %s502_s17 = scalar_select %p501_p6, %s1641_s16, 17 }
  0x12   : > { %s1652_s18 = smul.u32 36, %s1782_s28  ;;  %s1786_s12 = smov (!%p526_p8, %s523_s12), 17 }
  0x13   : > { %s1325_s20 = sshll.u32 %s502_s17, 1  ;;  %s1328_s11 = sshll.u32 %s1784_s19, 1 }
  0x14   : > { %s505_s24 = sadd.s32 %s1652_s18, %s1325_s20  ;;  %s517_s16 = sadd.s32 %s1652_s18, %s1328_s11 }
  0x15   : > { %s1326_s13 = sshll.u32 %s505_s24, 2  ;;  %s1331_s20 = sshll.u32 %s1786_s12, 1 }
  0x16   : > { %s544_s17 = scalar_lea.vmem %s1762_s3, %s1326_s13  ;;  %s507_s22 = scalar_lea.vmem %s1759_s0, %s1326_s13 }
  0x17   : > { %v583_v5 = vld [vmem:[%s544_s17] sm:$0xf]  ;;  %v582_v7 = vld [vmem:[%s507_s22 + $0x4] sm:$0x1]  ;;  %s1329_s23 = sshll.u32 %s517_s16, 2  ;;  %s1685_s24 = sadd.s32 %s1652_s18, %s1331_s20 }
  0x18   : > { %v581_v6 = vld [vmem:[%s507_s22] sm:$0xf]  ;;  %1405 = vmatmul.mubr.msk.bf16.vlgmr.msra.gmra.mrb[0].mxu0 %vm595_vm1, %v583_v5  ;;  %s519_s19 = scalar_lea.vmem %s1760_s1, %s1329_s23  ;;  %s1332_s12 = sshll.u32 %s1685_s24, 2 }
  0x19   : > { %1411 = vmatmul.mubr.msk.bf16.vlgmr.msra.gmra.mrb[0].mxu1 %vm595_vm1, %v581_v6  ;;  %v1352_v8 = vcombine.low %v581_v6, %v582_v7  ;;  %1415 = vmatpush3.bf16.msra.mxu0 %v1502_v3  ;;  %v753_v15 = vld [vmem:[%s519_s19] sm:$0xf]  ;;  %v754_v16 = vld [vmem:[%s519_s19 + $0x4] sm:$0x1]  ;;  %s556_s22 = scalar_lea.vmem %s1763_s4, %s1329_s23  ;;  %s532_s20 = scalar_lea.vmem %s1761_s2, %s1332_s12 }
  0x1a   : > { %1421 = vmatpush3.bf16.msra.mxu1 %v1503_v4  ;;  %1416 = vmatprep.mubr.msk.bf16.mxu0 %vm1552_vm0, %v1551_v1  ;;  %v1365_v17 = vcombine.low %v753_v15, %v754_v16  ;;  %v755_v24 = vld [vmem:[%s556_s22] sm:$0xf]  ;;  %v928_v26 = vld [vmem:[%s532_s20 + $0x4] sm:$0x1]  ;;  %s569_s19 = scalar_lea.vmem %s1764_s5, %s1332_s12  ;;  %s1788_s27 = smov (!%p574_p9, %s1533_s27), 7 }
  0x1b   : > { %v697_v9 = vshrl.u32 %v1352_v8, 16  ;;  %v699_v10 = vshll.u32 %v1352_v8, 16  ;;  %1426 = vmatprep.subr.bf16.mxu0 %v1551_v1  ;;  %1422 = vmatprep.mubr.msk.bf16.mxu1 %vm1552_vm0, %v1551_v1  ;;  %v927_v25 = vld [vmem:[%s532_s20] sm:$0xf]  ;;  %s1342_s12 = sshll.u32 %s1782_s28, 3 }
  0x1c   : > { %1432 = vmatprep.subr.bf16.mxu1 %v1551_v1  ;;  %v871_v18 = vshrl.u32 %v1365_v17, 16  ;;  %v873_v19 = vshll.u32 %v1365_v17, 16  ;;  %v1378_v27 = vcombine.low %v927_v25, %v928_v26  ;;  %v929_v30 = vld [vmem:[%s569_s19] sm:$0xf]  ;;  %s577_s18 = sadd.s32 %s1342_s12, %s1788_s27 }
  0x1d   : > { %v701_v11 = vrot.slane %v699_v10, 1  ;;  %v1381_v10 = vld [vmem:[%s1766_s7] ss:$0 sm:$0xff]  ;;  %s1343_s11 = sshll.u32 %s577_s18, 2 }
  0x1e   : > { %v875_v20 = vrot.slane %v873_v19, 1  ;;  %v1047_v28 = vshll.u32 %v1378_v27, 16  ;;  %v1045_v31 = vshrl.u32 %v1378_v27, 16  ;;  %s579_s24 = scalar_lea.vmem %s1767_s8, %s1343_s11 }
  0x1f   : > { %v702_v14 = vor.u32 %v701_v11, %v697_v9 }
  0x20   : > { %v876_v23 = vor.u32 %v875_v20, %v871_v18  ;;  %v1049_v32 = vrot.slane %v1047_v28, 1 }
  0x21   : > { %1417 = vmatmul.mubr.msk.bf16.vlgmr.msra.gmra.mrb[4].mxu0 %vm595_vm1, %v702_v14  ;;  %1423 = vmatmul.mubr.msk.bf16.vlgmr.msra.gmra.mrb[4].mxu1 %vm595_vm1, %v753_v15 }
  0x22   : > { %1427 = vmatpush3.bf16.msra.mxu0 %v1504_v12  ;;  %1433 = vmatpush3.bf16.msra.mxu1 %v1506_v13  ;;  %v1050_v33 = vor.u32 %v1049_v32, %v1045_v31 }
  0x23   : > { %1428 = vmatprep.mubr.msk.bf16.mxu0 %vm1552_vm0, %v1551_v1  ;;  %1438 = vmatprep.subr.bf16.mxu0 %v1551_v1 }
  0x24   : > { %1434 = vmatprep.mubr.msk.bf16.mxu1 %vm1552_vm0, %v1551_v1  ;;  %1444 = vmatprep.subr.bf16.mxu1 %v1551_v1 }
  0x29   : > { %1429 = vmatmul.mubr.msk.bf16.vlgmr.msra.gmra.mrb[8].mxu0 %vm595_vm1, %v755_v24  ;;  %1435 = vmatmul.mubr.msk.bf16.vlgmr.msra.gmra.mrb[8].mxu1 %vm595_vm1, %v876_v23 }
  0x2a   : > { %1439 = vmatpush3.bf16.msra.mxu0 %v1507_v21  ;;  %1445 = vmatpush3.bf16.msra.mxu1 %v1508_v22 }
  0x2b   : > { %1440 = vmatprep.mubr.msk.bf16.mxu0 %vm1552_vm0, %v1551_v1  ;;  %1450 = vmatprep.subr.bf16.mxu0 %v1551_v1 }
  0x2c   : > { %1446 = vmatprep.mubr.msk.bf16.mxu1 %vm1552_vm0, %v1551_v1 }
  0x31   : > { %1441 = vmatmul.mubr.msk.bf16.vlgmr.msra.gmra.mrb[12].mxu0 %vm595_vm1, %v927_v25  ;;  %1447 = vmatmul.mubr.msk.bf16.vlgmr.msra.gmra.mrb[12].mxu1 %vm595_vm1, %v929_v30 }
  0x32   : > { %1451 = vmatpush3.bf16.msra.mxu0 %v1510_v29  ;;  %1452 = vmatprep.mubr.msk.bf16.mxu0 %vm1552_vm0, %v1551_v1 }
  0x39   : > { %1453 = vmatmul.mubr.msk.bf16.vlgmr.msra.gmra.mrb[16].mxu0 %vm595_vm1, %v1050_v33 }
  0xeb   : > { %v633_v34 = vpop.f32.mrb[0].mxu0 }
  0xec   : > { %v682_v35 = vpop.f32.mrb[0].mxu1  ;;  %v1406_v37 = vpop.f32.mrb[1].mxu0 }
  0xed   : > { %v683_v36 = vadd.f32 %v682_v35, %v633_v34  ;;  %v1412_v38 = vpop.f32.mrb[1].mxu1  ;;  %v636_v39 = vpop.f32.mrb[2].mxu0 }
  0xee   : > { %v685_v40 = vpop.f32.mrb[2].mxu1  ;;  %v1407_v41 = vpop.f32.mrb[3].mxu0 }
  0xef   : > { %v1413_v42 = vpop.f32.mrb[3].mxu1 }
  0xf4   : > { %v746_v43 = vpop.f32.mrb[4].mxu0  ;;  %v802_v44 = vpop.f32.mrb[4].mxu1 }
  0xf5   : > { %v752_v45 = vadd.f32 %v746_v43, %v683_v36  ;;  %v1418_v46 = vpop.f32.mrb[5].mxu0  ;;  %v1424_v47 = vpop.f32.mrb[5].mxu1 }
  0xf6   : > { %v749_v48 = vpop.f32.mrb[6].mxu0  ;;  %v805_v49 = vpop.f32.mrb[6].mxu1 }
  0xf7   : > { %v808_v50 = vadd.f32 %v802_v44, %v752_v45  ;;  %v1419_v51 = vpop.f32.mrb[7].mxu0  ;;  %v1425_v52 = vpop.f32.mrb[7].mxu1 }
  0xfc   : > { %v855_v53 = vpop.f32.mrb[8].mxu0  ;;  %v920_v54 = vpop.f32.mrb[8].mxu1 }
  0xfd   : > { %v861_v55 = vadd.f32 %v855_v53, %v808_v50  ;;  %v1430_v56 = vpop.f32.mrb[9].mxu0  ;;  %v1436_v57 = vpop.f32.mrb[9].mxu1 }
  0xfe   : > { %v858_v58 = vpop.f32.mrb[10].mxu0  ;;  %v923_v59 = vpop.f32.mrb[10].mxu1 }
  0xff   : > { %v926_v60 = vadd.f32 %v920_v54, %v861_v55  ;;  %v1431_v61 = vpop.f32.mrb[11].mxu0  ;;  %v1437_v62 = vpop.f32.mrb[11].mxu1 }
 0x104   : > { %v976_v63 = vpop.f32.mrb[12].mxu0  ;;  %v1029_v0 = vpop.f32.mrb[12].mxu1 }
 0x105   : > { %v982_v1 = vadd.f32 %v976_v63, %v926_v60  ;;  %v1442_v2 = vpop.f32.mrb[13].mxu0  ;;  %v1448_v3 = vpop.f32.mrb[13].mxu1 }
 0x106   : > { %v979_v4 = vpop.f32.mrb[14].mxu0  ;;  %v1032_v5 = vpop.f32.mrb[14].mxu1 }
 0x107   : > { %v1035_v6 = vadd.f32 %v1029_v0, %v982_v1  ;;  %v1443_v7 = vpop.f32.mrb[15].mxu0  ;;  %v1449_v8 = vpop.f32.mrb[15].mxu1 }
 0x10c   : > { %v1094_v9 = vpop.f32.mrb[16].mxu0 }
 0x10d   : > { %v1100_v11 = vadd.f32 %v1094_v9, %v1035_v6  ;;  %v1454_v12 = vpop.f32.mrb[17].mxu0 }
 0x10e   : > { %v1097_v13 = vpop.f32.mrb[18].mxu0 }
 0x10f   : > { %v1108_v14 = vadd.f32 %v1381_v10, %v1100_v11  ;;  %v1455_v15 = vpop.f32.mrb[19].mxu0 }
 0x111   : > { %v1109_v16 = vmax.f32 %v1108_v14, 0.0 }
 0x113   : > { %v1110_v17 = vpack.c.bf16 %v1109_v16, %v1109_v16 }
 0x115   : > { %1112 = vst.msk [vmem:[%s579_s24] sm:$0xf] %vm1111_vm2, %v1110_v17 }
 0x116 PF: > { %s18_s9 = sadd.s32 1, %s1549_s9   ;;  %s1770_s25 = sld [smem:[#allocation2_spill]] }
 0x117   : > { %p15_p10 = scmp.ge.s32.totalorder %s18_s9, 18   ;;  %s1771_s27 = smov %s1541_s29 }
 0x118   : > { %s1772_s28 = smov %s1545_s30  ;;  %s1773_s29 = smov %s1776_s10 }
 0x119   :  { %17 = sbr.rel (!%p15_p10) target bundleno = 3 (0x3), region = 105 }
 0x11c   : > { %s1774_s30 = smov %s1770_s25 }

// kernel: fwd.17
= control target key start
LH: loop header
LB: loop body
LE: loop exit
PB: predicated region body
PF: predicated region fallthrough
CT: control target
= control target key end

     0   :  { %s1680_s27 = smov 0   ;;  %s1682_s28 = smov 0   ;;  %s1886_s0 = inlined_call_operand.vmem [shape: bf16[2,10,5,32], index: 0, kind: input, shape index: {}, may-alias: {0,1,2}]   ;;  %s1887_s1 = inlined_call_operand.vmem [shape: bf16[2,10,5,32], index: 1, kind: input, shape index: {}, may-alias: {0,1,2}]   ;;  %s1888_s2 = inlined_call_operand.vmem [shape: bf16[2,10,5,32], index: 2, kind: input, shape index: {}, may-alias: {0,1,2}]   ;;  %s1889_s3 = inlined_call_operand.vmem [shape: bf16[2,10,5,32], index: 3, kind: input, shape index: {}, may-alias: {3,4,5}]   ;;  %s1890_s4 = inlined_call_operand.vmem [shape: bf16[2,10,5,32], index: 4, kind: input, shape index: {}, may-alias: {3,4,5}]   ;;  %s1891_s5 = inlined_call_operand.vmem [shape: bf16[2,10,5,32], index: 5, kind: input, shape index: {}, may-alias: {3,4,5}]   ;;  %s1892_s6 = inlined_call_operand.vmem [shape: bf16[3,3,32,64], index: 6, kind: input, shape index: {}]   ;;  %s1893_s7 = inlined_call_operand.vmem [shape: f32[1,64], index: 7, kind: input, shape index: {}]   ;;  %s1894_s8 = inlined_call_operand.vmem [shape: bf16[2,4,4,64], index: 8, kind: output, shape index: {}]  }
   0x1   :  { %s1684_s29 = smov 0   ;;  %s1686_s30 = smov 0  }
   0x2   :  { %s1688_s9 = smov 0  }
   0x3 LB: > { %s27_s10 = sadd.s32 1, %s1623_s29  ;;  %s30_s11 = sadd.s32 1, %s1627_s30  ;;  %s1631_s9 = sphi %s1688_s9, %s18_s9   ;;  %s1627_s30 = sphi %s1686_s30, %s1901_s30   ;;  %s1623_s29 = sphi %s1684_s29, %s1900_s29   ;;  %s1619_s28 = sphi %s1682_s28, %s1899_s28   ;;  %s1615_s27 = sphi %s1680_s27, %s1898_s27  }
   0x4   : > { %p28_p0 = scmp.ge.s32.totalorder %s27_s10, 4  ;;  %p1350_p1 = scmp.ge.s32.totalorder %s1631_s9, 1 }
   0x5   : > { %p396_p2 = scmp.lt.s32.totalorder %s1631_s9, 9 }
   0x6   : > { %s1903_s10 = smov (%p28_p0, %s27_s10), 0  ;;  %s1905_s11 = smov (!%p28_p0, %s30_s11), %s1627_s30 }
   0x7   : > { %p397_p3 = pnand %p1350_p1, %p396_p2  ;;  %p32_p4 = scmp.ge.s32.totalorder %s1905_s11, 2 }
   0x8   : > { %v1572_v0 = vld [vmem:[%s1892_s6 + $0x10] sm:$0xff] (!%p397_p3)   ;;  %v1633_v1 = vmov (!%p397_p3), 0.0   ;;  %v1573_v2 = vld [vmem:[%s1892_s6] sm:$0xff] (!%p397_p3)   ;;  %v1574_v3 = vld [vmem:[%s1892_s6 + $0x18] sm:$0xff] (!%p397_p3)   ;;  %vm1634_vm0 = vmmov (!%p397_p3), 0   ;;  %s1728_s18 = sshll.u32 (!%p397_p3), %s1615_s27, 1 }
   0x9   : > { %s1907_s11 = smov (%p32_p4, %s1905_s11), 0  ;;  %400 = sbr.rel (%p397_p3) target bundleno = 278 (0x116), region = 52 }
   0xa   : > { %1895 = sst [smem:[#allocation2_spill]] %s1907_s11  ;;  %1457 = vmatprep.subr.bf16.mxu0 (!%p397_p3), %v1633_v1  ;;  %1465 = vmatprep.subr.bf16.mxu1 (!%p397_p3), %v1633_v1  ;;  %v1575_v4 = vld [vmem:[%s1892_s6 + $0x8] sm:$0xff] (!%p397_p3)   ;;  %p487_p5 = scmp.lt.s32.totalorder (!%p397_p3), %s1619_s28, 1  ;;  %vm586_vm1 = vcmask (!%p397_p3), 261120   ;;  %v1577_v5 = vld [vmem:[%s1892_s6 + $0x20] sm:$0xff] (!%p397_p3)   ;;  %v1578_v6 = vld [vmem:[%s1892_s6 + $0x30] sm:$0xff] (!%p397_p3)  }
   0xb   : > { %1458 = vmatpush3.bf16.msra.mxu0 (!%p397_p3), %v1572_v0  ;;  %1461 = vmatprep.mubr.msk.bf16.mxu0 (!%p397_p3), %vm1634_vm0, %v1633_v1  ;;  %p489_p6 = scmp.lt.s32.totalorder (!%p397_p3), %s1728_s18, 9  ;;  %s497_s23 = sadd.s32 (!%p397_p3), 1, %s1728_s18  ;;  %v1579_v10 = vld [vmem:[%s1892_s6 + $0x28] sm:$0xff] (!%p397_p3)   ;;  %v1580_v11 = vld [vmem:[%s1892_s6 + $0x38] sm:$0xff] (!%p397_p3)   ;;  %v1581_v15 = vld [vmem:[%s1892_s6 + $0x40] sm:$0xff] (!%p397_p3)   ;;  %vm1156_vm2 = vcmask (!%p397_p3), 517120  }
   0xc   : > { %1466 = vmatpush3.bf16.msra.mxu1 (!%p397_p3), %v1573_v2  ;;  %1459 = vmatprep.subr.bf16.mxu0 (!%p397_p3), %v1633_v1  ;;  %p500_p7 = scmp.lt.s32.totalorder (!%p397_p3), %s497_s23, 9  ;;  %s509_s25 = sadd.s32 (!%p397_p3), 2, %s1728_s18  ;;  %v1583_v18 = vld [vmem:[%s1892_s6 + $0x50] sm:$0xff] (!%p397_p3)   ;;  %v1584_v23 = vld [vmem:[%s1892_s6 + $0x48] sm:$0xff] (!%p397_p3)   ;;  %v1585_v24 = vld [vmem:[%s1892_s6 + $0x58] sm:$0xff] (!%p397_p3)  }
   0xd   : > { %1467 = vmatprep.subr.bf16.mxu1 (!%p397_p3), %v1633_v1  ;;  %1469 = vmatprep.mubr.msk.bf16.mxu1 (!%p397_p3), %vm1634_vm0, %v1633_v1  ;;  %p1772_p8 = scmp.lt.s32.totalorder (!%p397_p3), %s509_s25, 9  ;;  %v1586_v26 = vld [vmem:[%s1892_s6 + $0x60] sm:$0xff] (!%p397_p3)   ;;  %v1587_v28 = vld [vmem:[%s1892_s6 + $0x70] sm:$0xff] (!%p397_p3)   ;;  %v1588_v31 = vld [vmem:[%s1892_s6 + $0x68] sm:$0xff] (!%p397_p3)   ;;  %p556_p9 = scmp.lt.s32.totalorder (!%p397_p3), %s1615_s27, 3 }
   0xe   : > { %v1589_v32 = vld [vmem:[%s1892_s6 + $0x78] sm:$0xff] (!%p397_p3)   ;;  %v1591_v34 = vld [vmem:[%s1892_s6 + $0x80] sm:$0xff] (!%p397_p3)   ;;  %v1592_v38 = vld [vmem:[%s1892_s6 + $0x88] sm:$0xff] (!%p397_p3)  }
   0xf   : > { %1460 = vmatpush3.bf16.msra.mxu0 (!%p397_p3), %v1574_v3 }
  0x10   : > { %s1909_s28 = smov (!%p487_p5, %s1619_s28), 1  ;;  %1468 = vmatpush3.bf16.msra.mxu1 %v1575_v4  ;;  %1473 = vmatprep.subr.bf16.mxu0 %v1633_v1  ;;  %s1911_s23 = smov (!%p500_p7, %s497_s23), 9 }
  0x11   : > { %s490_s21 = scalar_select %p489_p6, %s1728_s18, 9  ;;  %1481 = vmatprep.subr.bf16.mxu1 %v1633_v1 }
  0x12   : > { %s1744_s22 = smul.u32 10, %s1909_s28  ;;  %s1913_s25 = smov (!%p1772_p8, %s509_s25), 9 }
  0x13   : > { %s1915_s27 = smov (!%p556_p9, %s1615_s27), 3 }
  0x14   : > { %s492_s24 = sadd.s32 %s1744_s22, %s490_s21  ;;  %s515_s21 = sadd.s32 %s1744_s22, %s1913_s25 }
  0x15   : > { %s1352_s12 = sshll.u32 %s492_s24, 2  ;;  %s1801_s24 = sshll.u32 %s515_s21, 2 }
  0x16   : > { %s528_s17 = scalar_lea.vmem %s1889_s3, %s1352_s12  ;;  %s494_s11 = scalar_lea.vmem %s1886_s0, %s1352_s12 }
  0x17   : > { %v564_v7 = vld [vmem:[%s528_s17] sm:$0x7]  ;;  %s503_s12 = sadd.s32 %s1744_s22, %s1911_s23  ;;  %s517_s16 = scalar_lea.vmem %s1888_s2, %s1801_s24 }
  0x18   : > { %v563_v8 = vld [vmem:[%s494_s11] sm:$0x7]  ;;  %1462 = vmatmul.mubr.msk.bf16.vlgmr.msra.gmra.mrb[0].mxu0 %vm586_vm1, %v564_v7  ;;  %s1778_s14 = sshll.u32 %s503_s12, 2  ;;  %s551_s25 = scalar_lea.vmem %s1891_s5, %s1801_s24 }
  0x19   : > { %1470 = vmatmul.mubr.msk.bf16.vlgmr.msra.gmra.mrb[0].mxu1 %vm586_vm1, %v563_v8  ;;  %v1379_v9 = vcombine.low %v563_v8, %v563_v8  ;;  %1474 = vmatpush3.bf16.msra.mxu0 %v1577_v5  ;;  %s505_s15 = scalar_lea.vmem %s1887_s1, %s1778_s14  ;;  %s539_s18 = scalar_lea.vmem %s1890_s4, %s1778_s14  ;;  %v951_v29 = vld [vmem:[%s517_s16] sm:$0x7] }
  0x1a   : > { %1482 = vmatpush3.bf16.msra.mxu1 %v1578_v6  ;;  %1475 = vmatprep.subr.bf16.mxu0 %v1633_v1  ;;  %v756_v16 = vld [vmem:[%s505_s15] sm:$0x7]  ;;  %v1423_v30 = vcombine.low %v951_v29, %v951_v29  ;;  %s1363_s16 = sshll.u32 %s1909_s28, 2 }
  0x1b   : > { %v694_v12 = vshrl.u32 %v1379_v9, 16  ;;  %v696_v13 = vshll.u32 %v1379_v9, 16  ;;  %1483 = vmatprep.subr.bf16.mxu1 %v1633_v1  ;;  %1477 = vmatprep.mubr.msk.bf16.mxu0 %vm1634_vm0, %v1633_v1  ;;  %v1401_v17 = vcombine.low %v756_v16, %v756_v16  ;;  %v757_v27 = vld [vmem:[%s539_s18] sm:$0x7]  ;;  %s559_s17 = sadd.s32 %s1363_s16, %s1915_s27 }
  0x1c   : > { %1485 = vmatprep.mubr.msk.bf16.mxu1 %vm1634_vm0, %v1633_v1  ;;  %v1086_v33 = vshll.u32 %v1423_v30, 16  ;;  %v952_v35 = vld [vmem:[%s551_s25] sm:$0x7]  ;;  %v1084_v36 = vshrl.u32 %v1423_v30, 16  ;;  %s1364_s20 = sshll.u32 %s559_s17, 1 }
  0x1d   : > { %v698_v14 = vrot.slane %v696_v13, 1  ;;  %1476 = vmatpush3.bf16.msra.mxu0 %v1579_v10  ;;  %v891_v20 = vshll.u32 %v1401_v17, 16  ;;  %v889_v21 = vshrl.u32 %v1401_v17, 16  ;;  %s561_s13 = scalar_lea.vmem %s1894_s8, %s1364_s20 }
  0x1e   : > { %1484 = vmatpush3.bf16.msra.mxu1 %v1580_v11  ;;  %1489 = vmatprep.subr.bf16.mxu0 %v1633_v1  ;;  %v1088_v37 = vrot.slane %v1086_v33, 1 }
  0x1f   : > { %v699_v19 = vor.u32 %v698_v14, %v694_v12  ;;  %1497 = vmatprep.subr.bf16.mxu1 %v1633_v1  ;;  %v893_v22 = vrot.slane %v891_v20, 1 }
  0x20   : > { %v1089_v39 = vor.u32 %v1088_v37, %v1084_v36 }
  0x21   : > { %1478 = vmatmul.mubr.msk.bf16.vlgmr.msra.gmra.mrb[4].mxu0 %vm586_vm1, %v699_v19  ;;  %1486 = vmatmul.mubr.msk.bf16.vlgmr.msra.gmra.mrb[4].mxu1 %vm586_vm1, %v756_v16  ;;  %v894_v25 = vor.u32 %v893_v22, %v889_v21  ;;  %v1427_v16 = vld [vmem:[%s1893_s7] ss:$0 sm:$0xff] }
  0x22   : > { %1490 = vmatpush3.bf16.msra.mxu0 %v1581_v15  ;;  %1498 = vmatpush3.bf16.msra.mxu1 %v1583_v18 }
  0x23   : > { %1491 = vmatprep.subr.bf16.mxu0 %v1633_v1  ;;  %1499 = vmatprep.subr.bf16.mxu1 %v1633_v1 }
  0x24   : > { %1493 = vmatprep.mubr.msk.bf16.mxu0 %vm1634_vm0, %v1633_v1  ;;  %1501 = vmatprep.mubr.msk.bf16.mxu1 %vm1634_vm0, %v1633_v1 }
  0x26   : > { %1492 = vmatpush3.bf16.msra.mxu0 %v1584_v23  ;;  %1500 = vmatpush3.bf16.msra.mxu1 %v1585_v24 }
  0x27   : > { %1505 = vmatprep.subr.bf16.mxu0 %v1633_v1  ;;  %1513 = vmatprep.subr.bf16.mxu1 %v1633_v1 }
  0x29   : > { %1494 = vmatmul.mubr.msk.bf16.vlgmr.msra.gmra.mrb[8].mxu0 %vm586_vm1, %v757_v27  ;;  %1502 = vmatmul.mubr.msk.bf16.vlgmr.msra.gmra.mrb[8].mxu1 %vm586_vm1, %v894_v25 }
  0x2a   : > { %1506 = vmatpush3.bf16.msra.mxu0 %v1586_v26  ;;  %1514 = vmatpush3.bf16.msra.mxu1 %v1587_v28 }
  0x2b   : > { %1507 = vmatprep.subr.bf16.mxu0 %v1633_v1  ;;  %1515 = vmatprep.subr.bf16.mxu1 %v1633_v1 }
  0x2c   : > { %1509 = vmatprep.mubr.msk.bf16.mxu0 %vm1634_vm0, %v1633_v1  ;;  %1517 = vmatprep.mubr.msk.bf16.mxu1 %vm1634_vm0, %v1633_v1 }
  0x2e   : > { %1508 = vmatpush3.bf16.msra.mxu0 %v1588_v31  ;;  %1516 = vmatpush3.bf16.msra.mxu1 %v1589_v32 }
  0x2f   : > { %1521 = vmatprep.subr.bf16.mxu0 %v1633_v1 }
  0x31   : > { %1510 = vmatmul.mubr.msk.bf16.vlgmr.msra.gmra.mrb[12].mxu0 %vm586_vm1, %v951_v29  ;;  %1518 = vmatmul.mubr.msk.bf16.vlgmr.msra.gmra.mrb[12].mxu1 %vm586_vm1, %v952_v35 }
  0x32   : > { %1522 = vmatpush3.bf16.msra.mxu0 %v1591_v34  ;;  %1525 = vmatprep.mubr.msk.bf16.mxu0 %vm1634_vm0, %v1633_v1 }
  0x33   : > { %1523 = vmatprep.subr.bf16.mxu0 %v1633_v1 }
  0x36   : > { %1524 = vmatpush3.bf16.msra.mxu0 %v1592_v38 }
  0x39   : > { %1526 = vmatmul.mubr.msk.bf16.vlgmr.msra.gmra.mrb[16].mxu0 %vm586_vm1, %v1089_v39 }
  0xeb   : > { %v624_v40 = vpop.f32.mrb[0].mxu0 }
  0xec   : > { %v679_v41 = vpop.f32.mrb[0].mxu1  ;;  %v1463_v42 = vpop.f32.mrb[1].mxu0 }
  0xed   : > { %v680_v43 = vadd.f32 %v679_v41, %v624_v40  ;;  %v1471_v44 = vpop.f32.mrb[1].mxu1  ;;  %v627_v45 = vpop.f32.mrb[2].mxu0 }
  0xee   : > { %v682_v46 = vpop.f32.mrb[2].mxu1  ;;  %v1464_v47 = vpop.f32.mrb[3].mxu0 }
  0xef   : > { %v1472_v48 = vpop.f32.mrb[3].mxu1 }
  0xf4   : > { %v749_v49 = vpop.f32.mrb[4].mxu0  ;;  %v812_v50 = vpop.f32.mrb[4].mxu1 }
  0xf5   : > { %v755_v51 = vadd.f32 %v749_v49, %v680_v43  ;;  %v1479_v52 = vpop.f32.mrb[5].mxu0  ;;  %v1487_v53 = vpop.f32.mrb[5].mxu1 }
  0xf6   : > { %v752_v54 = vpop.f32.mrb[6].mxu0  ;;  %v815_v55 = vpop.f32.mrb[6].mxu1 }
  0xf7   : > { %v818_v56 = vadd.f32 %v812_v50, %v755_v51  ;;  %v1480_v57 = vpop.f32.mrb[7].mxu0  ;;  %v1488_v58 = vpop.f32.mrb[7].mxu1 }
  0xfc   : > { %v873_v59 = vpop.f32.mrb[8].mxu0  ;;  %v944_v60 = vpop.f32.mrb[8].mxu1 }
  0xfd   : > { %v879_v61 = vadd.f32 %v873_v59, %v818_v56  ;;  %v1495_v62 = vpop.f32.mrb[9].mxu0  ;;  %v1503_v63 = vpop.f32.mrb[9].mxu1 }
  0xfe   : > { %v876_v0 = vpop.f32.mrb[10].mxu0  ;;  %v947_v1 = vpop.f32.mrb[10].mxu1 }
  0xff   : > { %v950_v2 = vadd.f32 %v944_v60, %v879_v61  ;;  %v1496_v3 = vpop.f32.mrb[11].mxu0  ;;  %v1504_v4 = vpop.f32.mrb[11].mxu1 }
 0x104   : > { %v1007_v5 = vpop.f32.mrb[12].mxu0  ;;  %v1068_v6 = vpop.f32.mrb[12].mxu1 }
 0x105   : > { %v1013_v7 = vadd.f32 %v1007_v5, %v950_v2  ;;  %v1511_v8 = vpop.f32.mrb[13].mxu0  ;;  %v1519_v9 = vpop.f32.mrb[13].mxu1 }
 0x106   : > { %v1010_v10 = vpop.f32.mrb[14].mxu0  ;;  %v1071_v11 = vpop.f32.mrb[14].mxu1 }
 0x107   : > { %v1074_v12 = vadd.f32 %v1068_v6, %v1013_v7  ;;  %v1512_v13 = vpop.f32.mrb[15].mxu0  ;;  %v1520_v14 = vpop.f32.mrb[15].mxu1 }
 0x10c   : > { %v1139_v15 = vpop.f32.mrb[16].mxu0 }
 0x10d   : > { %v1145_v17 = vadd.f32 %v1139_v15, %v1074_v12  ;;  %v1527_v18 = vpop.f32.mrb[17].mxu0 }
 0x10e   : > { %v1142_v19 = vpop.f32.mrb[18].mxu0 }
 0x10f   : > { %v1153_v20 = vadd.f32 %v1427_v16, %v1145_v17  ;;  %v1528_v21 = vpop.f32.mrb[19].mxu0 }
 0x111   : > { %v1154_v22 = vmax.f32 %v1153_v20, 0.0 }
 0x113   : > { %v1155_v23 = vpack.c.bf16 %v1154_v22, %v1154_v22 }
 0x115   : > { %1157 = vst.msk [vmem:[%s561_s13] sm:$0x3] %vm1156_vm2, %v1155_v23 }
 0x116 PF: > { %s18_s9 = sadd.s32 1, %s1631_s9   ;;  %s1897_s12 = sld [smem:[#allocation2_spill]] }
 0x117   : > { %p15_p10 = scmp.ge.s32.totalorder %s18_s9, 10   ;;  %s1898_s27 = smov %s1623_s29 }
 0x118   : > { %s1899_s28 = smov %s1627_s30  ;;  %s1900_s29 = smov %s1903_s10 }
 0x119   :  { %17 = sbr.rel (!%p15_p10) target bundleno = 3 (0x3), region = 105 }
 0x11c   : > { %s1901_s30 = smov %s1897_s12 }

// kernel: fwd.18
= control target key start
LH: loop header
LB: loop body
LE: loop exit
PB: predicated region body
PF: predicated region fallthrough
CT: control target
= control target key end

     0   :  { %s2692_s27 = smov 0   ;;  %s2694_s28 = smov 0   ;;  %s3137_s0 = inlined_call_operand.vmem [shape: bf16[2,6,6,64], index: 0, kind: input, shape index: {}, may-alias: {0,1,2}]   ;;  %s3138_s1 = inlined_call_operand.vmem [shape: bf16[2,6,6,64], index: 1, kind: input, shape index: {}, may-alias: {0,1,2}]   ;;  %s3139_s2 = inlined_call_operand.vmem [shape: bf16[2,6,6,64], index: 2, kind: input, shape index: {}, may-alias: {0,1,2}]   ;;  %s3140_s3 = inlined_call_operand.vmem [shape: bf16[4,4,64,32], index: 3, kind: input, shape index: {}]   ;;  %s3141_s4 = inlined_call_operand.vmem [shape: f32[1,32], index: 4, kind: input, shape index: {}]   ;;  %s3142_s5 = inlined_call_operand.vmem [shape: bf16[2,4,4,32], index: 5, kind: output, shape index: {0}]   ;;  %s3143_s6 = inlined_call_operand.vmem [shape: bf16[2,4,4,32], index: 6, kind: output, shape index: {1}]   ;;  %s3144_s7 = inlined_call_operand.vmem [shape: bf16[2,4,4,32], index: 7, kind: output, shape index: {2}]   ;;  %s3145_s8 = inlined_call_operand.vmem [shape: bf16[2,4,4,32], index: 8, kind: output, shape index: {3}]  }
   0x1   :  { %s2696_s29 = smov 0   ;;  %s2698_s30 = smov 0  }
   0x2   :  { %s2700_s9 = smov 0  }
   0x3 LB: > { %s28_s10 = sadd.s32 1, %s2635_s29  ;;  %s31_s11 = sadd.s32 1, %s2639_s30  ;;  %s2643_s9 = sphi %s2700_s9, %s19_s9   ;;  %s2639_s30 = sphi %s2698_s30, %s3149_s30   ;;  %s2635_s29 = sphi %s2696_s29, %s3148_s29   ;;  %s2631_s28 = sphi %s2694_s28, %s3147_s28   ;;  %s2627_s27 = sphi %s2692_s27, %s3146_s27  }
   0x4   : > { %p29_p0 = scmp.ge.s32.totalorder %s28_s10, 4  ;;  %p2005_p1 = scmp.ge.s32.totalorder %s2643_s9, 1 }
   0x5   : > { %p332_p2 = scmp.lt.s32.totalorder %s2643_s9, 9 }
   0x6   : > { %s3151_s10 = smov (%p29_p0, %s28_s10), 0  ;;  %s3153_s11 = smov (!%p29_p0, %s31_s11), %s2639_s30 }
   0x7   : > { %p333_p3 = pnand %p2005_p1, %p332_p2  ;;  %p33_p4 = scmp.ge.s32.totalorder %s3153_s11, 2 }
   0x8   : > { %v2538_v0 = vld [vmem:[%s3140_s3 + $0xe0] sm:$0xff] (!%p333_p3)   ;;  %v2645_v1 = vmov (!%p333_p3), 0.0   ;;  %v2540_v3 = vld [vmem:[%s3140_s3 + $0xe8] sm:$0xff] (!%p333_p3)   ;;  %vm2646_vm0 = vmmov (!%p333_p3), 0   ;;  %p414_p5 = scmp.lt.s32.totalorder (!%p333_p3), %s2631_s28, 1  ;;  %p416_p6 = scmp.lt.s32.totalorder (!%p333_p3), %s2627_s27, 5 }
   0x9   : > { %s3155_s11 = smov (%p33_p4, %s3153_s11), 0  ;;  %336 = sbr.rel (%p333_p3) target bundleno = 366 (0x16e), region = 40 }
   0xa   : > { %2303 = vmatprep.subr.bf16.mxu0 (!%p333_p3), %v2645_v1  ;;  %2315 = vmatprep.subr.bf16.mxu1 (!%p333_p3), %v2645_v1  ;;  %v2539_v2 = vld [vmem:[%s3140_s3 + $0xa0] sm:$0xff] (!%p333_p3)   ;;  %v2541_v4 = vld [vmem:[%s3140_s3 + $0xa8] sm:$0xff] (!%p333_p3)   ;;  %v2542_v5 = vld [vmem:[%s3140_s3 + $0xf0] sm:$0xff] (!%p333_p3)   ;;  %s422_s26 = sadd.s32 (!%p333_p3), 1, %s2627_s27  ;;  %vm521_vm1 = vcmask (!%p333_p3), 523264   ;;  %p444_p9 = scmp.lt.s32.totalorder (!%p333_p3), %s2627_s27, 3 }
   0xb   : > { %2304 = vmatpush3.bf16.msra.mxu0 (!%p333_p3), %v2538_v0  ;;  %2311 = vmatprep.mubr.msk.bf16.mxu0 (!%p333_p3), %vm2646_vm0, %v2645_v1  ;;  %v2543_v6 = vld [vmem:[%s3140_s3 + $0xb0] sm:$0xff] (!%p333_p3)   ;;  %p425_p7 = scmp.lt.s32.totalorder (!%p333_p3), %s422_s26, 5  ;;  %v2544_v7 = vld [vmem:[%s3140_s3 + $0xf8] sm:$0xff] (!%p333_p3)   ;;  %v2549_v10 = vld [vmem:[%s3140_s3 + $0x1a0] sm:$0xff] (!%p333_p3)   ;;  %vm815_vm2 = vcmask (!%p333_p3), 254976  }
   0xc   : > { %2316 = vmatpush3.bf16.msra.mxu1 (!%p333_p3), %v2539_v2  ;;  %2305 = vmatprep.subr.bf16.mxu0 (!%p333_p3), %v2645_v1  ;;  %v2545_v8 = vld [vmem:[%s3140_s3 + $0xb8] sm:$0xff] (!%p333_p3)   ;;  %v2551_v14 = vld [vmem:[%s3140_s3 + $0x1a8] sm:$0xff] (!%p333_p3)   ;;  %v2550_v17 = vld [vmem:[%s3140_s3 + $0x1e0] sm:$0xff] (!%p333_p3)  }
   0xd   : > { %2317 = vmatprep.subr.bf16.mxu1 (!%p333_p3), %v2645_v1  ;;  %2323 = vmatprep.mubr.msk.bf16.mxu1 (!%p333_p3), %vm2646_vm0, %v2645_v1  ;;  %v2553_v20 = vld [vmem:[%s3140_s3 + $0x1b0] sm:$0xff] (!%p333_p3)   ;;  %v2552_v22 = vld [vmem:[%s3140_s3 + $0x1e8] sm:$0xff] (!%p333_p3)   ;;  %v2555_v25 = vld [vmem:[%s3140_s3 + $0x1b8] sm:$0xff] (!%p333_p3)  }
   0xe   : > { %v2554_v26 = vld [vmem:[%s3140_s3 + $0x1f0] sm:$0xff] (!%p333_p3)   ;;  %v2557_v28 = vld [vmem:[%s3140_s3 + $0x80] sm:$0xff] (!%p333_p3)   ;;  %v2556_v29 = vld [vmem:[%s3140_s3 + $0x1f8] sm:$0xff] (!%p333_p3)  }
   0xf   : > { %2306 = vmatpush3.bf16.msra.mxu0 (!%p333_p3), %v2540_v3  ;;  %v2559_v30 = vld [vmem:[%s3140_s3 + $0x88] sm:$0xff] (!%p333_p3)   ;;  %v2558_v31 = vld [vmem:[%s3140_s3 + $0xc0] sm:$0xff] (!%p333_p3)   ;;  %v2561_v32 = vld [vmem:[%s3140_s3 + $0x90] sm:$0xff] (!%p333_p3)  }
  0x10   : > { %s3157_s28 = smov (!%p414_p5, %s2631_s28), 1  ;;  %2318 = vmatpush3.bf16.msra.mxu1 %v2541_v4  ;;  %2307 = vmatprep.subr.bf16.mxu0 %v2645_v1  ;;  %s3159_s26 = smov (!%p425_p7, %s422_s26), 5  ;;  %v2560_v33 = vld [vmem:[%s3140_s3 + $0xc8] sm:$0xff]   ;;  %v2563_v34 = vld [vmem:[%s3140_s3 + $0x98] sm:$0xff]   ;;  %v2562_v36 = vld [vmem:[%s3140_s3 + $0xd0] sm:$0xff]  }
  0x11   : > { %s417_s20 = scalar_select %p416_p6, %s2627_s27, 5  ;;  %2319 = vmatprep.subr.bf16.mxu1 %v2645_v1  ;;  %v2565_v37 = vld [vmem:[%s3140_s3 + $0x1c0] sm:$0xff]   ;;  %v2564_v38 = vld [vmem:[%s3140_s3 + $0xd8] sm:$0xff]   ;;  %v2567_v39 = vld [vmem:[%s3140_s3 + $0x1c8] sm:$0xff]  }
  0x12   : > { %s2756_s23 = smul.u32 6, %s3157_s28  ;;  %v2566_v40 = vld [vmem:[%s3140_s3 + $0x180] sm:$0xff]   ;;  %v2569_v41 = vld [vmem:[%s3140_s3 + $0x1d0] sm:$0xff]   ;;  %v2568_v42 = vld [vmem:[%s3140_s3 + $0x188] sm:$0xff]  }
  0x13   : > { %2308 = vmatpush3.bf16.msra.mxu0 %v2542_v5  ;;  %v2571_v43 = vld [vmem:[%s3140_s3 + $0x1d8] sm:$0xff]   ;;  %v2570_v44 = vld [vmem:[%s3140_s3 + $0x190] sm:$0xff]   ;;  %v2573_v45 = vld [vmem:[%s3140_s3 + $0x160] sm:$0xff]  }
  0x14   : > { %s419_s12 = sadd.s32 %s2756_s23, %s417_s20  ;;  %2320 = vmatpush3.bf16.msra.mxu1 %v2543_v6  ;;  %2309 = vmatprep.subr.bf16.mxu0 %v2645_v1  ;;  %s428_s20 = sadd.s32 %s2756_s23, %s3159_s26  ;;  %v2572_v46 = vld [vmem:[%s3140_s3 + $0x198] sm:$0xff]   ;;  %v2575_v47 = vld [vmem:[%s3140_s3 + $0x168] sm:$0xff]   ;;  %v2574_v49 = vld [vmem:[%s3140_s3 + $0x120] sm:$0xff]  }
  0x15   : > { %s2006_s13 = sshll.u32 %s419_s12, 2  ;;  %2321 = vmatprep.subr.bf16.mxu1 %v2645_v1  ;;  %s2007_s22 = sshll.u32 %s428_s20, 2  ;;  %v2577_v50 = vld [vmem:[%s3140_s3 + $0x170] sm:$0xff]   ;;  %v2576_v51 = vld [vmem:[%s3140_s3 + $0x128] sm:$0xff]   ;;  %v2579_v52 = vld [vmem:[%s3140_s3 + $0x178] sm:$0xff]  }
  0x16   : > { %s421_s18 = scalar_lea.vmem %s3137_s0, %s2006_s13  ;;  %s430_s14 = scalar_lea.vmem %s3138_s1, %s2007_s22  ;;  %v2578_v54 = vld [vmem:[%s3140_s3 + $0x130] sm:$0xff]   ;;  %v2581_v55 = vld [vmem:[%s3140_s3 + $0x20] sm:$0xff]   ;;  %v2580_v57 = vld [vmem:[%s3140_s3 + $0x138] sm:$0xff]  }
  0x17   : > { %v475_v9 = vld [vmem:[%s421_s18] sm:$0x7]  ;;  %2310 = vmatpush3.bf16.msra.mxu0 %v2544_v7  ;;  %s432_s13 = sadd.s32 2, %s2627_s27  ;;  %v2583_v58 = vld [vmem:[%s3140_s3 + $0x28] sm:$0xff]   ;;  %v2585_v61 = vld [vmem:[%s3140_s3 + $0x30] sm:$0xff]   ;;  %s3163_s27 = smov (!%p444_p9, %s2627_s27), 3 }
  0x18   : > { %2322 = vmatpush3.bf16.msra.mxu1 %v2545_v8  ;;  %2327 = vmatprep.subr.bf16.mxu0 %v2645_v1  ;;  %v2784_v11 = vld [vmem:[%s430_s14] sm:$0x7]  ;;  %v2793_v13 = vcombine.low %v475_v9, %v475_v9  ;;  %p435_p8 = scmp.lt.s32.totalorder %s432_s13, 5  ;;  %v2584_v0 = vld [vmem:[%s3140_s3 + $0x68] sm:$0xff]   ;;  %v2587_v2 = vld [vmem:[%s3140_s3 + $0x38] sm:$0xff]  }
  0x19   : > { %2339 = vmatprep.subr.bf16.mxu1 %v2645_v1  ;;  %v2791_v12 = vcombine.low %v2784_v11, %v2784_v11  ;;  %v2582_v60 = vld [vmem:[%s3140_s3 + $0x60] sm:$0xff]   ;;  %v2586_v4 = vld [vmem:[%s3140_s3 + $0x70] sm:$0xff]   ;;  %v2588_v6 = vld [vmem:[%s3140_s3 + $0x78] sm:$0xff]  }
  0x1a   : > { %2312 = vmatmul.mubr.msk.bf16.vlgmr.msra.gmra.mrb[0].mxu0 %vm521_vm1, %v2784_v11  ;;  %v657_v19 = vshll.u32 %v2793_v13, 16  ;;  %v655_v23 = vshrl.u32 %v2793_v13, 16  ;;  %s3161_s13 = smov (!%p435_p8, %s432_s13), 5  ;;  %v1050_v48 = vrot.slane %v2793_v13, 1  ;;  %v2589_v5 = vld [vmem:[%s3140_s3 + $0x100] sm:$0xff]   ;;  %v2591_v7 = vld [vmem:[%s3140_s3 + $0x108] sm:$0xff]  }
  0x1b   : > { %2328 = vmatpush3.bf16.msra.mxu0 %v2549_v10  ;;  %2335 = vmatprep.mubr.msk.bf16.mxu0 %vm2646_vm0, %v2645_v1  ;;  %v569_v15 = vshrl.u32 %v2791_v12, 16  ;;  %v571_v16 = vshll.u32 %v2791_v12, 16  ;;  %v835_v35 = vrot.slane %v2791_v12, 1  ;;  %s438_s24 = sadd.s32 %s2756_s23, %s3161_s13  ;;  %v2590_v8 = vld [vmem:[%s3140_s3 + $0x140] sm:$0xff]   ;;  %v2592_v10 = vld [vmem:[%s3140_s3 + $0x148] sm:$0xff]   ;;  %v2594_v13 = vld [vmem:[%s3140_s3 + $0x150] sm:$0xff]  }
  0x1c   : > { %2329 = vmatprep.subr.bf16.mxu0 %v2645_v1  ;;  %v659_v24 = vrot.slane %v657_v19, 1  ;;  %s2008_s15 = sshll.u32 %s438_s24, 2  ;;  %v2598_v12 = vld [vmem:[%s3140_s3] sm:$0xff]   ;;  %v2603_v19 = vld [vmem:[%s3140_s3 + $0x58] sm:$0xff]  }
  0x1d   : > { %v573_v18 = vrot.slane %v571_v16, 1  ;;  %s440_s21 = scalar_lea.vmem %s3139_s2, %s2008_s15  ;;  %v2599_v16 = vld [vmem:[%s3140_s3 + $0x48] sm:$0xff]   ;;  %s2009_s15 = sshll.u32 %s3157_s28, 2 }
  0x1e   : > { %v2829_v27 = vor.u32 %v659_v24, %v655_v23  ;;  %v477_v53 = vld [vmem:[%s440_s21] sm:$0x7]  ;;  %s447_s23 = sadd.s32 %s2009_s15, %s3163_s27 }
  0x1f   : > { %2330 = vmatpush3.bf16.msra.mxu0 %v2551_v14  ;;  %v2810_v21 = vor.u32 %v573_v18, %v569_v15  ;;  %v2962_v56 = vcombine.low %v477_v53, %v477_v53  ;;  %v2597_v14 = vld [vmem:[%s3140_s3 + $0x40] sm:$0xff]   ;;  %v2596_v15 = vld [vmem:[%s3140_s3 + $0x158] sm:$0xff]   ;;  %v2600_v18 = vld [vmem:[%s3140_s3 + $0x8] sm:$0xff]   ;;  %s3096_s17 = sshll.u32 %s447_s23, 1 }
  0x20   : > { %2331 = vmatprep.subr.bf16.mxu0 %v2645_v1  ;;  %s449_s27 = scalar_lea.vmem %s3142_s5, %s3096_s17  ;;  %s457_s20 = scalar_lea.vmem %s3143_s6, %s3096_s17 }
  0x21   : > { %2324 = vmatmul.mubr.msk.bf16.vlgmr.msra.gmra.mrb[0].mxu1 %vm521_vm1, %v2810_v21  ;;  %v1284_v59 = vshll.u32 %v2962_v56, 16  ;;  %v1282_v62 = vshrl.u32 %v2962_v56, 16  ;;  %s465_s25 = scalar_lea.vmem %s3144_s7, %s3096_s17  ;;  %s473_s26 = scalar_lea.vmem %s3145_s8, %s3096_s17 }
  0x22   : > { %2340 = vmatpush3.bf16.msra.mxu1 %v2550_v17  ;;  %2347 = vmatprep.mubr.msk.bf16.mxu1 %vm2646_vm0, %v2645_v1  ;;  %v2601_v17 = vld [vmem:[%s3140_s3 + $0x50] sm:$0xff]  }
  0x23   : > { %2332 = vmatpush3.bf16.msra.mxu0 %v2553_v20  ;;  %2341 = vmatprep.subr.bf16.mxu1 %v2645_v1  ;;  %v1286_v63 = vrot.slane %v1284_v59, 1  ;;  %v2602_v20 = vld [vmem:[%s3140_s3 + $0x10] sm:$0xff]  }
  0x24   : > { %2333 = vmatprep.subr.bf16.mxu0 %v2645_v1 }
  0x25   : > { %v1287_v3 = vor.u32 %v1286_v63, %v1282_v62 }
  0x26   : > { %2342 = vmatpush3.bf16.msra.mxu1 %v2552_v22  ;;  %v1665_v22 = vrot.slane %v2962_v56, 1 }
  0x27   : > { %2334 = vmatpush3.bf16.msra.mxu0 %v2555_v25  ;;  %2343 = vmatprep.subr.bf16.mxu1 %v2645_v1 }
  0x28   : > { %2351 = vmatprep.subr.bf16.mxu0 %v2645_v1 }
  0x2a   : > { %2336 = vmatmul.mubr.msk.bf16.vlgmr.msra.gmra.mrb[4].mxu0 %vm521_vm1, %v2829_v27  ;;  %2344 = vmatpush3.bf16.msra.mxu1 %v2554_v26 }
  0x2b   : > { %2352 = vmatpush3.bf16.msra.mxu0 %v2557_v28  ;;  %2345 = vmatprep.subr.bf16.mxu1 %v2645_v1 }
  0x2c   : > { %2353 = vmatprep.subr.bf16.mxu0 %v2645_v1  ;;  %2359 = vmatprep.mubr.msk.bf16.mxu0 %vm2646_vm0, %v2645_v1 }
  0x2e   : > { %2346 = vmatpush3.bf16.msra.mxu1 %v2556_v29 }
  0x2f   : > { %2354 = vmatpush3.bf16.msra.mxu0 %v2559_v30  ;;  %2363 = vmatprep.subr.bf16.mxu1 %v2645_v1 }
  0x30   : > { %2355 = vmatprep.subr.bf16.mxu0 %v2645_v1 }
  0x31   : > { %2348 = vmatmul.mubr.msk.bf16.vlgmr.msra.gmra.mrb[4].mxu1 %vm521_vm1, %v475_v9  ;;  %v2593_v9 = vld [vmem:[%s3140_s3 + $0x110] sm:$0xff]  }
  0x32   : > { %2364 = vmatpush3.bf16.msra.mxu1 %v2558_v31  ;;  %2371 = vmatprep.mubr.msk.bf16.mxu1 %vm2646_vm0, %v2645_v1 }
  0x33   : > { %2356 = vmatpush3.bf16.msra.mxu0 %v2561_v32  ;;  %2365 = vmatprep.subr.bf16.mxu1 %v2645_v1 }
  0x34   : > { %2357 = vmatprep.subr.bf16.mxu0 %v2645_v1 }
  0x36   : > { %2366 = vmatpush3.bf16.msra.mxu1 %v2560_v33 }
  0x37   : > { %2358 = vmatpush3.bf16.msra.mxu0 %v2563_v34  ;;  %2367 = vmatprep.subr.bf16.mxu1 %v2645_v1 }
  0x38   : > { %2375 = vmatprep.subr.bf16.mxu0 %v2645_v1 }
  0x3a   : > { %2360 = vmatmul.mubr.msk.bf16.vlgmr.msra.gmra.mrb[8].mxu0 %vm521_vm1, %v835_v35  ;;  %2368 = vmatpush3.bf16.msra.mxu1 %v2562_v36  ;;  %v3094_v36 = vld [vmem:[%s3141_s4] ss:$0 sm:$0xff] }
  0x3b   : > { %2376 = vmatpush3.bf16.msra.mxu0 %v2565_v37  ;;  %2369 = vmatprep.subr.bf16.mxu1 %v2645_v1 }
  0x3c   : > { %2377 = vmatprep.subr.bf16.mxu0 %v2645_v1  ;;  %2383 = vmatprep.mubr.msk.bf16.mxu0 %vm2646_vm0, %v2645_v1 }
  0x3e   : > { %2370 = vmatpush3.bf16.msra.mxu1 %v2564_v38 }
  0x3f   : > { %2378 = vmatpush3.bf16.msra.mxu0 %v2567_v39  ;;  %2387 = vmatprep.subr.bf16.mxu1 %v2645_v1 }
  0x40   : > { %2379 = vmatprep.subr.bf16.mxu0 %v2645_v1 }
  0x41   : > { %2372 = vmatmul.mubr.msk.bf16.vlgmr.msra.gmra.mrb[8].mxu1 %vm521_vm1, %v2810_v21 }
  0x42   : > { %2388 = vmatpush3.bf16.msra.mxu1 %v2566_v40  ;;  %2395 = vmatprep.mubr.msk.bf16.mxu1 %vm2646_vm0, %v2645_v1 }
  0x43   : > { %2380 = vmatpush3.bf16.msra.mxu0 %v2569_v41  ;;  %2389 = vmatprep.subr.bf16.mxu1 %v2645_v1 }
  0x44   : > { %2381 = vmatprep.subr.bf16.mxu0 %v2645_v1 }
  0x46   : > { %2390 = vmatpush3.bf16.msra.mxu1 %v2568_v42 }
  0x47   : > { %2382 = vmatpush3.bf16.msra.mxu0 %v2571_v43  ;;  %2391 = vmatprep.subr.bf16.mxu1 %v2645_v1 }
  0x48   : > { %2399 = vmatprep.subr.bf16.mxu0 %v2645_v1 }
  0x4a   : > { %2384 = vmatmul.mubr.msk.bf16.vlgmr.msra.gmra.mrb[12].mxu0 %vm521_vm1, %v2829_v27  ;;  %2392 = vmatpush3.bf16.msra.mxu1 %v2570_v44 }
  0x4b   : > { %2400 = vmatpush3.bf16.msra.mxu0 %v2573_v45  ;;  %2393 = vmatprep.subr.bf16.mxu1 %v2645_v1 }
  0x4c   : > { %2401 = vmatprep.subr.bf16.mxu0 %v2645_v1  ;;  %2407 = vmatprep.mubr.msk.bf16.mxu0 %vm2646_vm0, %v2645_v1 }
  0x4e   : > { %2394 = vmatpush3.bf16.msra.mxu1 %v2572_v46 }
  0x4f   : > { %2402 = vmatpush3.bf16.msra.mxu0 %v2575_v47  ;;  %2411 = vmatprep.subr.bf16.mxu1 %v2645_v1 }
  0x50   : > { %2403 = vmatprep.subr.bf16.mxu0 %v2645_v1 }
  0x51   : > { %2396 = vmatmul.mubr.msk.bf16.vlgmr.msra.gmra.mrb[12].mxu1 %vm521_vm1, %v1050_v48 }
  0x52   : > { %2412 = vmatpush3.bf16.msra.mxu1 %v2574_v49  ;;  %2419 = vmatprep.mubr.msk.bf16.mxu1 %vm2646_vm0, %v2645_v1 }
  0x53   : > { %2404 = vmatpush3.bf16.msra.mxu0 %v2577_v50  ;;  %2413 = vmatprep.subr.bf16.mxu1 %v2645_v1 }
  0x54   : > { %2405 = vmatprep.subr.bf16.mxu0 %v2645_v1 }
  0x56   : > { %2414 = vmatpush3.bf16.msra.mxu1 %v2576_v51 }
  0x57   : > { %2406 = vmatpush3.bf16.msra.mxu0 %v2579_v52  ;;  %2415 = vmatprep.subr.bf16.mxu1 %v2645_v1 }
  0x58   : > { %2423 = vmatprep.subr.bf16.mxu0 %v2645_v1 }
  0x5a   : > { %2408 = vmatmul.mubr.msk.bf16.vlgmr.msra.gmra.mrb[16].mxu0 %vm521_vm1, %v2784_v11  ;;  %2416 = vmatpush3.bf16.msra.mxu1 %v2578_v54  ;;  %v2595_v11 = vld [vmem:[%s3140_s3 + $0x118] sm:$0xff]  }
  0x5b   : > { %2424 = vmatpush3.bf16.msra.mxu0 %v2581_v55  ;;  %2417 = vmatprep.subr.bf16.mxu1 %v2645_v1 }
  0x5c   : > { %2425 = vmatprep.subr.bf16.mxu0 %v2645_v1  ;;  %2431 = vmatprep.mubr.msk.bf16.mxu0 %vm2646_vm0, %v2645_v1 }
  0x5e   : > { %2418 = vmatpush3.bf16.msra.mxu1 %v2580_v57 }
  0x5f   : > { %2426 = vmatpush3.bf16.msra.mxu0 %v2583_v58  ;;  %2435 = vmatprep.subr.bf16.mxu1 %v2645_v1 }
  0x60   : > { %2427 = vmatprep.subr.bf16.mxu0 %v2645_v1 }
  0x61   : > { %2420 = vmatmul.mubr.msk.bf16.vlgmr.msra.gmra.mrb[16].mxu1 %vm521_vm1, %v2810_v21 }
  0x62   : > { %2436 = vmatpush3.bf16.msra.mxu1 %v2582_v60  ;;  %2443 = vmatprep.mubr.msk.bf16.mxu1 %vm2646_vm0, %v2645_v1 }
  0x63   : > { %2428 = vmatpush3.bf16.msra.mxu0 %v2585_v61  ;;  %2437 = vmatprep.subr.bf16.mxu1 %v2645_v1 }
  0x64   : > { %2429 = vmatprep.subr.bf16.mxu0 %v2645_v1 }
  0x66   : > { %2438 = vmatpush3.bf16.msra.mxu1 %v2584_v0 }
  0x67   : > { %2430 = vmatpush3.bf16.msra.mxu0 %v2587_v2  ;;  %2439 = vmatprep.subr.bf16.mxu1 %v2645_v1 }
  0x68   : > { %2447 = vmatprep.subr.bf16.mxu0 %v2645_v1 }
  0x6a   : > { %2432 = vmatmul.mubr.msk.bf16.vlgmr.msra.gmra.mrb[20].mxu0 %vm521_vm1, %v1287_v3  ;;  %2440 = vmatpush3.bf16.msra.mxu1 %v2586_v4 }
  0x6b   : > { %2448 = vmatpush3.bf16.msra.mxu0 %v2589_v5  ;;  %2441 = vmatprep.subr.bf16.mxu1 %v2645_v1 }
  0x6c   : > { %2449 = vmatprep.subr.bf16.mxu0 %v2645_v1  ;;  %2455 = vmatprep.mubr.msk.bf16.mxu0 %vm2646_vm0, %v2645_v1 }
  0x6e   : > { %2442 = vmatpush3.bf16.msra.mxu1 %v2588_v6 }
  0x6f   : > { %2450 = vmatpush3.bf16.msra.mxu0 %v2591_v7  ;;  %2459 = vmatprep.subr.bf16.mxu1 %v2645_v1 }
  0x70   : > { %2451 = vmatprep.subr.bf16.mxu0 %v2645_v1 }
  0x71   : > { %2444 = vmatmul.mubr.msk.bf16.vlgmr.msra.gmra.mrb[20].mxu1 %vm521_vm1, %v477_v53 }
  0x72   : > { %2460 = vmatpush3.bf16.msra.mxu1 %v2590_v8  ;;  %2467 = vmatprep.mubr.msk.bf16.mxu1 %vm2646_vm0, %v2645_v1 }
  0x73   : > { %2452 = vmatpush3.bf16.msra.mxu0 %v2593_v9  ;;  %2461 = vmatprep.subr.bf16.mxu1 %v2645_v1 }
  0x74   : > { %2453 = vmatprep.subr.bf16.mxu0 %v2645_v1 }
  0x76   : > { %2462 = vmatpush3.bf16.msra.mxu1 %v2592_v10 }
  0x77   : > { %2454 = vmatpush3.bf16.msra.mxu0 %v2595_v11  ;;  %2463 = vmatprep.subr.bf16.mxu1 %v2645_v1 }
  0x78   : > { %2471 = vmatprep.subr.bf16.mxu0 %v2645_v1 }
  0x7a   : > { %2456 = vmatmul.mubr.msk.bf16.vlgmr.msra.gmra.mrb[24].mxu0 %vm521_vm1, %v835_v35  ;;  %2464 = vmatpush3.bf16.msra.mxu1 %v2594_v13 }
  0x7b   : > { %2472 = vmatpush3.bf16.msra.mxu0 %v2597_v14  ;;  %2465 = vmatprep.subr.bf16.mxu1 %v2645_v1 }
  0x7c   : > { %2473 = vmatprep.subr.bf16.mxu0 %v2645_v1  ;;  %2479 = vmatprep.mubr.msk.bf16.mxu0 %vm2646_vm0, %v2645_v1 }
  0x7e   : > { %2466 = vmatpush3.bf16.msra.mxu1 %v2596_v15 }
  0x7f   : > { %2474 = vmatpush3.bf16.msra.mxu0 %v2599_v16  ;;  %2483 = vmatprep.subr.bf16.mxu1 %v2645_v1 }
  0x80   : > { %2475 = vmatprep.subr.bf16.mxu0 %v2645_v1 }
  0x81   : > { %2468 = vmatmul.mubr.msk.bf16.vlgmr.msra.gmra.mrb[24].mxu1 %vm521_vm1, %v2810_v21  ;;  %v2604_v21 = vld [vmem:[%s3140_s3 + $0x18] sm:$0xff]  }
  0x82   : > { %2484 = vmatpush3.bf16.msra.mxu1 %v2598_v12  ;;  %2491 = vmatprep.mubr.msk.bf16.mxu1 %vm2646_vm0, %v2645_v1 }
  0x83   : > { %2476 = vmatpush3.bf16.msra.mxu0 %v2601_v17  ;;  %2485 = vmatprep.subr.bf16.mxu1 %v2645_v1 }
  0x84   : > { %2477 = vmatprep.subr.bf16.mxu0 %v2645_v1 }
  0x86   : > { %2486 = vmatpush3.bf16.msra.mxu1 %v2600_v18 }
  0x87   : > { %2478 = vmatpush3.bf16.msra.mxu0 %v2603_v19  ;;  %2487 = vmatprep.subr.bf16.mxu1 %v2645_v1 }
  0x8a   : > { %2480 = vmatmul.mubr.msk.bf16.vlgmr.msra.gmra.mrb[28].mxu0 %vm521_vm1, %v1287_v3  ;;  %2488 = vmatpush3.bf16.msra.mxu1 %v2602_v20 }
  0x8b   : > { %2489 = vmatprep.subr.bf16.mxu1 %v2645_v1 }
  0x8e   : > { %2490 = vmatpush3.bf16.msra.mxu1 %v2604_v21 }
  0x91   : > { %2492 = vmatmul.mubr.msk.bf16.vlgmr.msra.gmra.mrb[28].mxu1 %vm521_vm1, %v1665_v22 }
  0xed   : > { %v559_v23 = vpop.f32.mrb[0].mxu0 }
  0xee   : > { %v2313_v24 = vpop.f32.mrb[1].mxu0 }
  0xef   : > { %v562_v25 = vpop.f32.mrb[2].mxu0 }
  0xf0   : > { %v2314_v26 = vpop.f32.mrb[3].mxu0 }
  0xf4   : > { %v636_v27 = vpop.f32.mrb[0].mxu1 }
  0xf5   : > { %v637_v28 = vadd.f32 %v636_v27, %v559_v23  ;;  %v2325_v29 = vpop.f32.mrb[1].mxu1 }
  0xf6   : > { %v639_v30 = vpop.f32.mrb[2].mxu1 }
  0xf7   : > { %v2326_v31 = vpop.f32.mrb[3].mxu1 }
  0xfd   : > { %v722_v32 = vpop.f32.mrb[4].mxu0 }
  0xfe   : > { %v728_v33 = vadd.f32 %v722_v32, %v637_v28  ;;  %v2337_v1 = vpop.f32.mrb[5].mxu0 }
  0xff   : > { %v725_v34 = vpop.f32.mrb[6].mxu0 }
 0x100   : > { %v2338_v35 = vpop.f32.mrb[7].mxu0 }
 0x104   : > { %v799_v37 = vpop.f32.mrb[4].mxu1 }
 0x105   : > { %v805_v38 = vadd.f32 %v799_v37, %v728_v33  ;;  %v2349_v39 = vpop.f32.mrb[5].mxu1 }
 0x106   : > { %v802_v40 = vpop.f32.mrb[6].mxu1 }
 0x107   : > { %v812_v41 = vadd.f32 %v3094_v36, %v805_v38  ;;  %v2350_v42 = vpop.f32.mrb[7].mxu1 }
 0x109   : > { %v813_v43 = vmax.f32 %v812_v41, 0.0 }
 0x10b   : > { %v814_v44 = vpack.c.bf16 %v813_v43, %v813_v43 }
 0x10d   : > { %v897_v45 = vpop.f32.mrb[8].mxu0  ;;  %816 = vst.msk [vmem:[%s449_s27] sm:$0x3] %vm815_vm2, %v814_v44 }
 0x10e   : > { %v2361_v46 = vpop.f32.mrb[9].mxu0 }
 0x10f   : > { %v900_v47 = vpop.f32.mrb[10].mxu0 }
 0x110   : > { %v2362_v48 = vpop.f32.mrb[11].mxu0 }
 0x114   : > { %v961_v49 = vpop.f32.mrb[8].mxu1 }
 0x115   : > { %v962_v50 = vadd.f32 %v961_v49, %v897_v45  ;;  %v2373_v51 = vpop.f32.mrb[9].mxu1 }
 0x116   : > { %v964_v52 = vpop.f32.mrb[10].mxu1 }
 0x117   : > { %v2374_v53 = vpop.f32.mrb[11].mxu1 }
 0x11d   : > { %v1034_v54 = vpop.f32.mrb[12].mxu0 }
 0x11e   : > { %v1040_v55 = vadd.f32 %v1034_v54, %v962_v50  ;;  %v2385_v56 = vpop.f32.mrb[13].mxu0 }
 0x11f   : > { %v1037_v57 = vpop.f32.mrb[14].mxu0 }
 0x120   : > { %v2386_v58 = vpop.f32.mrb[15].mxu0 }
 0x124   : > { %v1112_v59 = vpop.f32.mrb[12].mxu1 }
 0x125   : > { %v1118_v60 = vadd.f32 %v1112_v59, %v1040_v55  ;;  %v2397_v61 = vpop.f32.mrb[13].mxu1 }
 0x126   : > { %v1115_v62 = vpop.f32.mrb[14].mxu1 }
 0x127   : > { %v1119_v63 = vadd.f32 %v3094_v36, %v1118_v60  ;;  %v2398_v0 = vpop.f32.mrb[15].mxu1 }
 0x129   : > { %v1120_v2 = vmax.f32 %v1119_v63, 0.0 }
 0x12b   : > { %v1121_v3 = vpack.c.bf16 %v1120_v2, %v1120_v2 }
 0x12d   : > { %v1199_v4 = vpop.f32.mrb[16].mxu0  ;;  %1122 = vst.msk [vmem:[%s457_s20] sm:$0x3] %vm815_vm2, %v1121_v3 }
 0x12e   : > { %v2409_v5 = vpop.f32.mrb[17].mxu0 }
 0x12f   : > { %v1202_v6 = vpop.f32.mrb[18].mxu0 }
 0x130   : > { %v2410_v7 = vpop.f32.mrb[19].mxu0 }
 0x134   : > { %v1263_v8 = vpop.f32.mrb[16].mxu1 }
 0x135   : > { %v1264_v9 = vadd.f32 %v1263_v8, %v1199_v4  ;;  %v2421_v10 = vpop.f32.mrb[17].mxu1 }
 0x136   : > { %v1266_v11 = vpop.f32.mrb[18].mxu1 }
 0x137   : > { %v2422_v13 = vpop.f32.mrb[19].mxu1 }
 0x13d   : > { %v1349_v14 = vpop.f32.mrb[20].mxu0 }
 0x13e   : > { %v1355_v15 = vadd.f32 %v1349_v14, %v1264_v9  ;;  %v2433_v16 = vpop.f32.mrb[21].mxu0 }
 0x13f   : > { %v1352_v12 = vpop.f32.mrb[22].mxu0 }
 0x140   : > { %v2434_v17 = vpop.f32.mrb[23].mxu0 }
 0x144   : > { %v1426_v18 = vpop.f32.mrb[20].mxu1 }
 0x145   : > { %v1432_v19 = vadd.f32 %v1426_v18, %v1355_v15  ;;  %v2445_v20 = vpop.f32.mrb[21].mxu1 }
 0x146   : > { %v1429_v21 = vpop.f32.mrb[22].mxu1 }
 0x147   : > { %v1433_v22 = vadd.f32 %v3094_v36, %v1432_v19  ;;  %v2446_v23 = vpop.f32.mrb[23].mxu1 }
 0x149   : > { %v1434_v24 = vmax.f32 %v1433_v22, 0.0 }
 0x14b   : > { %v1435_v25 = vpack.c.bf16 %v1434_v24, %v1434_v24 }
 0x14d   : > { %v1513_v26 = vpop.f32.mrb[24].mxu0  ;;  %1436 = vst.msk [vmem:[%s465_s25] sm:$0x3] %vm815_vm2, %v1435_v25 }
 0x14e   : > { %v2457_v27 = vpop.f32.mrb[25].mxu0 }
 0x14f   : > { %v1516_v28 = vpop.f32.mrb[26].mxu0 }
 0x150   : > { %v2458_v29 = vpop.f32.mrb[27].mxu0 }
 0x154   : > { %v1577_v30 = vpop.f32.mrb[24].mxu1 }
 0x155   : > { %v1578_v31 = vadd.f32 %v1577_v30, %v1513_v26  ;;  %v2469_v32 = vpop.f32.mrb[25].mxu1 }
 0x156   : > { %v1580_v33 = vpop.f32.mrb[26].mxu1 }
 0x157   : > { %v2470_v1 = vpop.f32.mrb[27].mxu1 }
 0x15d   : > { %v1650_v34 = vpop.f32.mrb[28].mxu0 }
 0x15e   : > { %v1656_v35 = vadd.f32 %v1650_v34, %v1578_v31  ;;  %v2481_v37 = vpop.f32.mrb[29].mxu0 }
 0x15f   : > { %v1653_v38 = vpop.f32.mrb[30].mxu0 }
 0x160   : > { %v2482_v39 = vpop.f32.mrb[31].mxu0 }
 0x164   : > { %v1727_v40 = vpop.f32.mrb[28].mxu1 }
 0x165   : > { %v1733_v41 = vadd.f32 %v1727_v40, %v1656_v35  ;;  %v2493_v42 = vpop.f32.mrb[29].mxu1 }
 0x166   : > { %v1730_v43 = vpop.f32.mrb[30].mxu1 }
 0x167   : > { %v1734_v44 = vadd.f32 %v3094_v36, %v1733_v41  ;;  %v2494_v45 = vpop.f32.mrb[31].mxu1 }
 0x169   : > { %v1735_v46 = vmax.f32 %v1734_v44, 0.0 }
 0x16b   : > { %v1736_v47 = vpack.c.bf16 %v1735_v46, %v1735_v46 }
 0x16d   : > { %1737 = vst.msk [vmem:[%s473_s26] sm:$0x3] %vm815_vm2, %v1736_v47 }
 0x16e PF: > { %s19_s9 = sadd.s32 1, %s2643_s9   ;;  %s3146_s27 = smov %s2635_s29 }
 0x16f   : > { %p16_p10 = scmp.ge.s32.totalorder %s19_s9, 10   ;;  %s3147_s28 = smov %s2639_s30 }
 0x170   : > { %s3148_s29 = smov %s3151_s10  ;;  %s3149_s30 = smov %s3155_s11 }
 0x171   :  { %18 = sbr.rel (!%p16_p10) target bundleno = 3 (0x3), region = 127 }

// kernel: fwd.19
= control target key start
LH: loop header
LB: loop body
LE: loop exit
PB: predicated region body
PF: predicated region fallthrough
CT: control target
= control target key end

     0   :  { %s2246_s27 = smov 0   ;;  %s2248_s28 = smov 0   ;;  %s2558_s0 = inlined_call_operand.vmem [shape: bf16[2,10,10,32], index: 0, kind: input, shape index: {}, may-alias: {0,1,2}]   ;;  %s2559_s1 = inlined_call_operand.vmem [shape: bf16[2,10,10,32], index: 1, kind: input, shape index: {}, may-alias: {0,1,2}]   ;;  %s2560_s2 = inlined_call_operand.vmem [shape: bf16[2,10,10,32], index: 2, kind: input, shape index: {}, may-alias: {0,1,2}]   ;;  %s2561_s3 = inlined_call_operand.vmem [shape: bf16[4,4,32,16], index: 3, kind: input, shape index: {}]   ;;  %s2562_s4 = inlined_call_operand.vmem [shape: f32[1,16], index: 4, kind: input, shape index: {}]   ;;  %s2563_s5 = inlined_call_operand.vmem [shape: bf16[2,8,8,16], index: 5, kind: output, shape index: {0}]   ;;  %s2564_s6 = inlined_call_operand.vmem [shape: bf16[2,8,8,16], index: 6, kind: output, shape index: {1}]   ;;  %s2565_s7 = inlined_call_operand.vmem [shape: bf16[2,8,8,16], index: 7, kind: output, shape index: {2}]   ;;  %s2566_s8 = inlined_call_operand.vmem [shape: bf16[2,8,8,16], index: 8, kind: output, shape index: {3}]  }
   0x1   :  { %s2250_s29 = smov 0   ;;  %s2252_s30 = smov 0  }
   0x2   :  { %s2254_s9 = smov 0  }
   0x3 LB: > { %s28_s10 = sadd.s32 1, %s2189_s29  ;;  %s31_s11 = sadd.s32 1, %s2193_s30  ;;  %s2197_s9 = sphi %s2254_s9, %s19_s9   ;;  %s2193_s30 = sphi %s2252_s30, %s2570_s30   ;;  %s2189_s29 = sphi %s2250_s29, %s2569_s29   ;;  %s2185_s28 = sphi %s2248_s28, %s2568_s28   ;;  %s2181_s27 = sphi %s2246_s27, %s2567_s27  }
   0x4   : > { %p29_p0 = scmp.ge.s32.totalorder %s28_s10, 8  ;;  %p1776_p1 = scmp.ge.s32.totalorder %s2197_s9, 1 }
   0x5   : > { %p335_p2 = scmp.lt.s32.totalorder %s2197_s9, 17 }
   0x6   : > { %s2572_s10 = smov (%p29_p0, %s28_s10), 0  ;;  %s2574_s11 = smov (!%p29_p0, %s31_s11), %s2193_s30 }
   0x7   : > { %p336_p3 = pnand %p1776_p1, %p335_p2  ;;  %p33_p4 = scmp.ge.s32.totalorder %s2574_s11, 2 }
   0x8   : > { %v2124_v0 = vld [vmem:[%s2561_s3 + $0x70] sm:$0xff] (!%p336_p3)   ;;  %v2199_v1 = vmov (!%p336_p3), 0.0   ;;  %v2125_v2 = vld [vmem:[%s2561_s3 + $0x78] sm:$0xff] (!%p336_p3)   ;;  %vm2200_vm0 = vmmov (!%p336_p3), 0   ;;  %p420_p5 = scmp.lt.s32.totalorder (!%p336_p3), %s2185_s28, 1  ;;  %p422_p6 = scmp.lt.s32.totalorder (!%p336_p3), %s2181_s27, 9 }
   0x9   : > { %s2576_s11 = smov (%p33_p4, %s2574_s11), 0  ;;  %339 = sbr.rel (%p336_p3) target bundleno = 310 (0x136), region = 40 }
   0xa   : > { %1953 = vmatprep.subr.bf16.mxu0 (!%p336_p3), %v2199_v1  ;;  %1961 = vmatprep.subr.bf16.mxu1 (!%p336_p3), %v2199_v1  ;;  %v2126_v3 = vld [vmem:[%s2561_s3 + $0x50] sm:$0xff] (!%p336_p3)   ;;  %s429_s18 = sadd.s32 (!%p336_p3), 1, %s2181_s27  ;;  %v2131_v4 = vld [vmem:[%s2561_s3 + $0x58] sm:$0xff] (!%p336_p3)   ;;  %vm513_vm1 = vcmask (!%p336_p3), 261120   ;;  %v2134_v21 = vld [vmem:[%s2561_s3 + $0x40] sm:$0xff] (!%p336_p3)   ;;  %p453_p9 = scmp.lt.s32.totalorder (!%p336_p3), %s2181_s27, 7 }
   0xb   : > { %1954 = vmatpush3.bf16.msra.mxu0 (!%p336_p3), %v2124_v0  ;;  %1957 = vmatprep.mubr.msk.bf16.mxu0 (!%p336_p3), %vm2200_vm0, %v2199_v1  ;;  %p432_p7 = scmp.lt.s32.totalorder (!%p336_p3), %s429_s18, 9  ;;  %v2130_v9 = vld [vmem:[%s2561_s3 + $0xd0] sm:$0xff] (!%p336_p3)   ;;  %v2132_v15 = vld [vmem:[%s2561_s3 + $0xd8] sm:$0xff] (!%p336_p3)   ;;  %v2136_v24 = vld [vmem:[%s2561_s3 + $0x48] sm:$0xff] (!%p336_p3)   ;;  %vm767_vm2 = vcmask (!%p336_p3), 125952  }
   0xc   : > { %1955 = vmatprep.subr.bf16.mxu0 (!%p336_p3), %v2199_v1  ;;  %1965 = vmatprep.mubr.msk.bf16.mxu1 (!%p336_p3), %vm2200_vm0, %v2199_v1  ;;  %v2133_v19 = vld [vmem:[%s2561_s3 + $0xf0] sm:$0xff] (!%p336_p3)   ;;  %v2135_v23 = vld [vmem:[%s2561_s3 + $0xf8] sm:$0xff] (!%p336_p3)   ;;  %v2137_v26 = vld [vmem:[%s2561_s3 + $0x60] sm:$0xff] (!%p336_p3)  }
   0xd   : > { %1962 = vmatpush3.bf16.msra.mxu1 (!%p336_p3), %v2126_v3  ;;  %v2138_v27 = vld [vmem:[%s2561_s3 + $0xe0] sm:$0xff] (!%p336_p3)   ;;  %v2139_v28 = vld [vmem:[%s2561_s3 + $0x68] sm:$0xff] (!%p336_p3)   ;;  %v2142_v33 = vld [vmem:[%s2561_s3 + $0xb0] sm:$0xff] (!%p336_p3)  }
   0xe   : > { %1963 = vmatprep.subr.bf16.mxu1 (!%p336_p3), %v2199_v1  ;;  %v2140_v29 = vld [vmem:[%s2561_s3 + $0xe8] sm:$0xff] (!%p336_p3)   ;;  %v2141_v30 = vld [vmem:[%s2561_s3 + $0xc0] sm:$0xff] (!%p336_p3)   ;;  %v2144_v36 = vld [vmem:[%s2561_s3 + $0xb8] sm:$0xff] (!%p336_p3)  }
   0xf   : > { %1956 = vmatpush3.bf16.msra.mxu0 (!%p336_p3), %v2125_v2  ;;  %v2143_v35 = vld [vmem:[%s2561_s3 + $0xc8] sm:$0xff] (!%p336_p3)   ;;  %v2145_v39 = vld [vmem:[%s2561_s3 + $0x90] sm:$0xff] (!%p336_p3)   ;;  %v2147_v43 = vld [vmem:[%s2561_s3 + $0x98] sm:$0xff] (!%p336_p3)  }
  0x10   : > { %s2578_s28 = smov (!%p420_p5, %s2185_s28), 1  ;;  %1969 = vmatprep.subr.bf16.mxu0 %v2199_v1  ;;  %s2580_s18 = smov (!%p432_p7, %s429_s18), 9  ;;  %v2146_v40 = vld [vmem:[%s2561_s3 + $0x10] sm:$0xff]   ;;  %v2148_v44 = vld [vmem:[%s2561_s3 + $0x18] sm:$0xff]   ;;  %v2150_v47 = vld [vmem:[%s2561_s3 + $0x80] sm:$0xff]  }
  0x11   : > { %s423_s21 = scalar_select %p422_p6, %s2181_s27, 9  ;;  %1964 = vmatpush3.bf16.msra.mxu1 %v2131_v4  ;;  %v2149_v46 = vld [vmem:[%s2561_s3 + $0x30] sm:$0xff]   ;;  %v2151_v48 = vld [vmem:[%s2561_s3 + $0x38] sm:$0xff]   ;;  %v2152_v49 = vld [vmem:[%s2561_s3 + $0x88] sm:$0xff]  }
  0x12   : > { %s2308_s22 = smul.u32 20, %s2578_s28  ;;  %1977 = vmatprep.subr.bf16.mxu1 %v2199_v1  ;;  %s1779_s14 = sshll.u32 %s2580_s18, 1  ;;  %v2153_v50 = vld [vmem:[%s2561_s3 + $0xa0] sm:$0xff]   ;;  %v2155_v52 = vld [vmem:[%s2561_s3 + $0xa8] sm:$0xff]  }
  0x13   : > { %s1777_s23 = sshll.u32 %s423_s21, 1  ;;  %v2154_v51 = vld [vmem:[%s2561_s3 + $0x20] sm:$0xff]   ;;  %v2156_v53 = vld [vmem:[%s2561_s3 + $0x28] sm:$0xff]  }
  0x14   : > { %s426_s24 = sadd.s32 %s2308_s22, %s1777_s23  ;;  %s436_s15 = sadd.s32 %s2308_s22, %s1779_s14  ;;  %v2157_v54 = vld [vmem:[%s2561_s3] sm:$0xff]   ;;  %v2158_v55 = vld [vmem:[%s2561_s3 + $0x8] sm:$0xff]  }
  0x15   : > { %s1778_s25 = sshll.u32 %s426_s24, 2  ;;  %s1780_s16 = sshll.u32 %s436_s15, 2 }
  0x16   : > { %s428_s13 = scalar_lea.vmem %s2558_s0, %s1778_s25  ;;  %s438_s23 = scalar_lea.vmem %s2559_s1, %s1780_s16 }
  0x17   : > { %v484_v5 = vld [vmem:[%s428_s13] sm:$0xf]  ;;  %v485_v6 = vld [vmem:[%s428_s13 + $0x4] sm:$0x1]  ;;  %s440_s24 = sadd.s32 2, %s2181_s27  ;;  %s2584_s27 = smov (!%p453_p9, %s2181_s27), 7 }
  0x18   : > { %v2316_v7 = vcombine.low %v484_v5, %v485_v6  ;;  %v2327_v10 = vld [vmem:[%s438_s23] sm:$0xf]  ;;  %v487_v11 = vld [vmem:[%s438_s23 + $0x4] sm:$0x1]  ;;  %p443_p8 = scmp.lt.s32.totalorder %s440_s24, 9  ;;  %s1783_s25 = sshll.u32 %s2578_s28, 3 }
  0x19   : > { %1958 = vmatmul.mubr.msk.bf16.vlgmr.msra.gmra.mrb[0].mxu0 %vm513_vm1, %v2327_v10  ;;  %v2332_v12 = vcombine.low %v2327_v10, %v487_v11 }
  0x1a   : > { %v637_v8 = vshll.u32 %v2316_v7, 16  ;;  %v635_v13 = vshrl.u32 %v2316_v7, 16  ;;  %1970 = vmatpush3.bf16.msra.mxu0 %v2130_v9  ;;  %1973 = vmatprep.mubr.msk.bf16.mxu0 %vm2200_vm0, %v2199_v1  ;;  %s2582_s24 = smov (!%p443_p8, %s440_s24), 9  ;;  %v950_v37 = vrot.slane %v2316_v7, 1  ;;  %v2515_v7 = vld [vmem:[%s2562_s4] ss:$0 sm:$0xff] }
  0x1b   : > { %1971 = vmatprep.subr.bf16.mxu0 %v2199_v1  ;;  %v563_v16 = vshrl.u32 %v2332_v12, 16  ;;  %v565_v17 = vshll.u32 %v2332_v12, 16  ;;  %s1781_s17 = sshll.u32 %s2582_s24, 1  ;;  %v779_v25 = vrot.slane %v2332_v12, 1 }
  0x1c   : > { %v639_v14 = vrot.slane %v637_v8, 1  ;;  %s447_s21 = sadd.s32 %s2308_s22, %s1781_s17 }
  0x1d   : > { %v567_v18 = vrot.slane %v565_v17, 1  ;;  %s1782_s26 = sshll.u32 %s447_s21, 2 }
  0x1e   : > { %v640_v20 = vor.u32 %v639_v14, %v635_v13  ;;  %1972 = vmatpush3.bf16.msra.mxu0 %v2132_v15  ;;  %s449_s17 = scalar_lea.vmem %s2560_s2, %s1782_s26  ;;  %s456_s26 = sadd.s32 %s1783_s25, %s2584_s27 }
  0x1f   : > { %v2349_v22 = vor.u32 %v567_v18, %v563_v16  ;;  %1985 = vmatprep.subr.bf16.mxu0 %v2199_v1  ;;  %v488_v31 = vld [vmem:[%s449_s17] sm:$0xf]  ;;  %v489_v32 = vld [vmem:[%s449_s17 + $0x4] sm:$0x1]  ;;  %s2517_s13 = sshll.u32 %s456_s26, 2 }
  0x20   : > { %v2404_v34 = vcombine.low %v488_v31, %v489_v32  ;;  %s458_s14 = scalar_lea.vmem %s2563_s5, %s2517_s13  ;;  %s466_s17 = scalar_lea.vmem %s2564_s6, %s2517_s13 }
  0x21   : > { %1966 = vmatmul.mubr.msk.bf16.vlgmr.msra.gmra.mrb[0].mxu1 %vm513_vm1, %v2349_v22  ;;  %1974 = vmatmul.mubr.msk.bf16.vlgmr.msra.gmra.mrb[4].mxu0 %vm513_vm1, %v640_v20  ;;  %s474_s21 = scalar_lea.vmem %s2565_s7, %s2517_s13  ;;  %s482_s18 = scalar_lea.vmem %s2566_s8, %s2517_s13 }
  0x22   : > { %1978 = vmatpush3.bf16.msra.mxu1 %v2133_v19  ;;  %1986 = vmatpush3.bf16.msra.mxu0 %v2134_v21  ;;  %v1138_v38 = vshll.u32 %v2404_v34, 16  ;;  %v1136_v41 = vshrl.u32 %v2404_v34, 16  ;;  %v1439_v56 = vrot.slane %v2404_v34, 1 }
  0x23   : > { %1979 = vmatprep.subr.bf16.mxu1 %v2199_v1  ;;  %1987 = vmatprep.subr.bf16.mxu0 %v2199_v1 }
  0x24   : > { %1981 = vmatprep.mubr.msk.bf16.mxu1 %vm2200_vm0, %v2199_v1  ;;  %1989 = vmatprep.mubr.msk.bf16.mxu0 %vm2200_vm0, %v2199_v1  ;;  %v1140_v42 = vrot.slane %v1138_v38, 1 }
  0x26   : > { %1980 = vmatpush3.bf16.msra.mxu1 %v2135_v23  ;;  %1988 = vmatpush3.bf16.msra.mxu0 %v2136_v24  ;;  %v1141_v45 = vor.u32 %v1140_v42, %v1136_v41 }
  0x27   : > { %1993 = vmatprep.subr.bf16.mxu1 %v2199_v1  ;;  %2001 = vmatprep.subr.bf16.mxu0 %v2199_v1 }
  0x29   : > { %1982 = vmatmul.mubr.msk.bf16.vlgmr.msra.gmra.mrb[4].mxu1 %vm513_vm1, %v484_v5  ;;  %1990 = vmatmul.mubr.msk.bf16.vlgmr.msra.gmra.mrb[8].mxu0 %vm513_vm1, %v779_v25 }
  0x2a   : > { %1994 = vmatpush3.bf16.msra.mxu1 %v2137_v26  ;;  %2002 = vmatpush3.bf16.msra.mxu0 %v2138_v27 }
  0x2b   : > { %1995 = vmatprep.subr.bf16.mxu1 %v2199_v1  ;;  %2003 = vmatprep.subr.bf16.mxu0 %v2199_v1 }
  0x2c   : > { %1997 = vmatprep.mubr.msk.bf16.mxu1 %vm2200_vm0, %v2199_v1  ;;  %2005 = vmatprep.mubr.msk.bf16.mxu0 %vm2200_vm0, %v2199_v1 }
  0x2e   : > { %1996 = vmatpush3.bf16.msra.mxu1 %v2139_v28  ;;  %2004 = vmatpush3.bf16.msra.mxu0 %v2140_v29 }
  0x2f   : > { %2009 = vmatprep.subr.bf16.mxu1 %v2199_v1  ;;  %2017 = vmatprep.subr.bf16.mxu0 %v2199_v1 }
  0x31   : > { %1998 = vmatmul.mubr.msk.bf16.vlgmr.msra.gmra.mrb[8].mxu1 %vm513_vm1, %v2349_v22  ;;  %2006 = vmatmul.mubr.msk.bf16.vlgmr.msra.gmra.mrb[12].mxu0 %vm513_vm1, %v640_v20 }
  0x32   : > { %2010 = vmatpush3.bf16.msra.mxu1 %v2141_v30  ;;  %2018 = vmatpush3.bf16.msra.mxu0 %v2142_v33 }
  0x33   : > { %2011 = vmatprep.subr.bf16.mxu1 %v2199_v1  ;;  %2019 = vmatprep.subr.bf16.mxu0 %v2199_v1 }
  0x34   : > { %2013 = vmatprep.mubr.msk.bf16.mxu1 %vm2200_vm0, %v2199_v1  ;;  %2021 = vmatprep.mubr.msk.bf16.mxu0 %vm2200_vm0, %v2199_v1 }
  0x36   : > { %2012 = vmatpush3.bf16.msra.mxu1 %v2143_v35  ;;  %2020 = vmatpush3.bf16.msra.mxu0 %v2144_v36 }
  0x37   : > { %2025 = vmatprep.subr.bf16.mxu1 %v2199_v1  ;;  %2033 = vmatprep.subr.bf16.mxu0 %v2199_v1 }
  0x39   : > { %2014 = vmatmul.mubr.msk.bf16.vlgmr.msra.gmra.mrb[12].mxu1 %vm513_vm1, %v950_v37  ;;  %2022 = vmatmul.mubr.msk.bf16.vlgmr.msra.gmra.mrb[16].mxu0 %vm513_vm1, %v2327_v10 }
  0x3a   : > { %2026 = vmatpush3.bf16.msra.mxu1 %v2145_v39  ;;  %2034 = vmatpush3.bf16.msra.mxu0 %v2146_v40 }
  0x3b   : > { %2027 = vmatprep.subr.bf16.mxu1 %v2199_v1  ;;  %2035 = vmatprep.subr.bf16.mxu0 %v2199_v1 }
  0x3c   : > { %2029 = vmatprep.mubr.msk.bf16.mxu1 %vm2200_vm0, %v2199_v1  ;;  %2037 = vmatprep.mubr.msk.bf16.mxu0 %vm2200_vm0, %v2199_v1 }
  0x3e   : > { %2028 = vmatpush3.bf16.msra.mxu1 %v2147_v43  ;;  %2036 = vmatpush3.bf16.msra.mxu0 %v2148_v44 }
  0x3f   : > { %2041 = vmatprep.subr.bf16.mxu1 %v2199_v1  ;;  %2049 = vmatprep.subr.bf16.mxu0 %v2199_v1 }
  0x41   : > { %2030 = vmatmul.mubr.msk.bf16.vlgmr.msra.gmra.mrb[16].mxu1 %vm513_vm1, %v2349_v22  ;;  %2038 = vmatmul.mubr.msk.bf16.vlgmr.msra.gmra.mrb[20].mxu0 %vm513_vm1, %v1141_v45 }
  0x42   : > { %2042 = vmatpush3.bf16.msra.mxu1 %v2149_v46  ;;  %2050 = vmatpush3.bf16.msra.mxu0 %v2150_v47 }
  0x43   : > { %2043 = vmatprep.subr.bf16.mxu1 %v2199_v1  ;;  %2051 = vmatprep.subr.bf16.mxu0 %v2199_v1 }
  0x44   : > { %2045 = vmatprep.mubr.msk.bf16.mxu1 %vm2200_vm0, %v2199_v1  ;;  %2053 = vmatprep.mubr.msk.bf16.mxu0 %vm2200_vm0, %v2199_v1 }
  0x46   : > { %2044 = vmatpush3.bf16.msra.mxu1 %v2151_v48  ;;  %2052 = vmatpush3.bf16.msra.mxu0 %v2152_v49 }
  0x47   : > { %2057 = vmatprep.subr.bf16.mxu1 %v2199_v1  ;;  %2065 = vmatprep.subr.bf16.mxu0 %v2199_v1 }
  0x49   : > { %2046 = vmatmul.mubr.msk.bf16.vlgmr.msra.gmra.mrb[20].mxu1 %vm513_vm1, %v488_v31  ;;  %2054 = vmatmul.mubr.msk.bf16.vlgmr.msra.gmra.mrb[24].mxu0 %vm513_vm1, %v779_v25 }
  0x4a   : > { %2058 = vmatpush3.bf16.msra.mxu1 %v2153_v50  ;;  %2066 = vmatpush3.bf16.msra.mxu0 %v2154_v51 }
  0x4b   : > { %2059 = vmatprep.subr.bf16.mxu1 %v2199_v1  ;;  %2067 = vmatprep.subr.bf16.mxu0 %v2199_v1 }
  0x4c   : > { %2061 = vmatprep.mubr.msk.bf16.mxu1 %vm2200_vm0, %v2199_v1  ;;  %2069 = vmatprep.mubr.msk.bf16.mxu0 %vm2200_vm0, %v2199_v1 }
  0x4e   : > { %2060 = vmatpush3.bf16.msra.mxu1 %v2155_v52  ;;  %2068 = vmatpush3.bf16.msra.mxu0 %v2156_v53 }
  0x4f   : > { %2073 = vmatprep.subr.bf16.mxu1 %v2199_v1 }
  0x51   : > { %2062 = vmatmul.mubr.msk.bf16.vlgmr.msra.gmra.mrb[24].mxu1 %vm513_vm1, %v2349_v22  ;;  %2070 = vmatmul.mubr.msk.bf16.vlgmr.msra.gmra.mrb[28].mxu0 %vm513_vm1, %v1141_v45 }
  0x52   : > { %2074 = vmatpush3.bf16.msra.mxu1 %v2157_v54  ;;  %2077 = vmatprep.mubr.msk.bf16.mxu1 %vm2200_vm0, %v2199_v1 }
  0x53   : > { %2075 = vmatprep.subr.bf16.mxu1 %v2199_v1 }
  0x56   : > { %2076 = vmatpush3.bf16.msra.mxu1 %v2158_v55 }
  0x59   : > { %2078 = vmatmul.mubr.msk.bf16.vlgmr.msra.gmra.mrb[28].mxu1 %vm513_vm1, %v1439_v56 }
  0xec   : > { %v551_v57 = vpop.f32.mrb[0].mxu0 }
  0xed   : > { %v1959_v58 = vpop.f32.mrb[1].mxu0 }
  0xee   : > { %v554_v59 = vpop.f32.mrb[2].mxu0 }
  0xef   : > { %v1960_v60 = vpop.f32.mrb[3].mxu0 }
  0xf4   : > { %v618_v61 = vpop.f32.mrb[0].mxu1  ;;  %v690_v62 = vpop.f32.mrb[4].mxu0 }
  0xf5   : > { %v619_v63 = vadd.f32 %v618_v61, %v551_v57  ;;  %v1967_v0 = vpop.f32.mrb[1].mxu1  ;;  %v1975_v2 = vpop.f32.mrb[5].mxu0 }
  0xf6   : > { %v621_v3 = vpop.f32.mrb[2].mxu1  ;;  %v693_v4 = vpop.f32.mrb[6].mxu0 }
  0xf7   : > { %v696_v1 = vadd.f32 %v690_v62, %v619_v63  ;;  %v1968_v5 = vpop.f32.mrb[3].mxu1  ;;  %v1976_v6 = vpop.f32.mrb[7].mxu0 }
  0xfc   : > { %v751_v8 = vpop.f32.mrb[4].mxu1  ;;  %v829_v9 = vpop.f32.mrb[8].mxu0 }
  0xfd   : > { %v757_v10 = vadd.f32 %v751_v8, %v696_v1  ;;  %v1983_v11 = vpop.f32.mrb[5].mxu1  ;;  %v1991_v12 = vpop.f32.mrb[9].mxu0 }
  0xfe   : > { %v754_v13 = vpop.f32.mrb[6].mxu1  ;;  %v832_v14 = vpop.f32.mrb[10].mxu0 }
  0xff   : > { %v764_v15 = vadd.f32 %v2515_v7, %v757_v10  ;;  %v1984_v16 = vpop.f32.mrb[7].mxu1  ;;  %v1992_v17 = vpop.f32.mrb[11].mxu0 }
 0x101   : > { %v765_v18 = vmax.f32 %v764_v15, 0.0 }
 0x103   : > { %v766_v19 = vpack.c.bf16 %v765_v18, %v765_v18 }
 0x104   : > { %v881_v20 = vpop.f32.mrb[8].mxu1  ;;  %v938_v21 = vpop.f32.mrb[12].mxu0 }
 0x105   : > { %768 = vst.msk [vmem:[%s458_s14] sm:$0xf] %vm767_vm2, %v766_v19  ;;  %v882_v22 = vadd.f32 %v881_v20, %v829_v9  ;;  %v1999_v23 = vpop.f32.mrb[9].mxu1  ;;  %v2007_v24 = vpop.f32.mrb[13].mxu0 }
 0x106   : > { %v884_v25 = vpop.f32.mrb[10].mxu1  ;;  %v941_v26 = vpop.f32.mrb[14].mxu0 }
 0x107   : > { %v944_v27 = vadd.f32 %v938_v21, %v882_v22  ;;  %v2000_v28 = vpop.f32.mrb[11].mxu1  ;;  %v2008_v29 = vpop.f32.mrb[15].mxu0 }
 0x10c   : > { %v1000_v30 = vpop.f32.mrb[12].mxu1  ;;  %v1067_v31 = vpop.f32.mrb[16].mxu0 }
 0x10d   : > { %v1006_v32 = vadd.f32 %v1000_v30, %v944_v27  ;;  %v2015_v33 = vpop.f32.mrb[13].mxu1  ;;  %v2023_v34 = vpop.f32.mrb[17].mxu0 }
 0x10e   : > { %v1003_v35 = vpop.f32.mrb[14].mxu1  ;;  %v1070_v36 = vpop.f32.mrb[18].mxu0 }
 0x10f   : > { %v1007_v37 = vadd.f32 %v2515_v7, %v1006_v32  ;;  %v2016_v38 = vpop.f32.mrb[15].mxu1  ;;  %v2024_v39 = vpop.f32.mrb[19].mxu0 }
 0x111   : > { %v1008_v40 = vmax.f32 %v1007_v37, 0.0 }
 0x113   : > { %v1009_v41 = vpack.c.bf16 %v1008_v40, %v1008_v40 }
 0x114   : > { %v1119_v42 = vpop.f32.mrb[16].mxu1  ;;  %v1191_v43 = vpop.f32.mrb[20].mxu0 }
 0x115   : > { %1010 = vst.msk [vmem:[%s466_s17] sm:$0xf] %vm767_vm2, %v1009_v41  ;;  %v1120_v44 = vadd.f32 %v1119_v42, %v1067_v31  ;;  %v2031_v45 = vpop.f32.mrb[17].mxu1  ;;  %v2039_v46 = vpop.f32.mrb[21].mxu0 }
 0x116   : > { %v1122_v47 = vpop.f32.mrb[18].mxu1  ;;  %v1194_v48 = vpop.f32.mrb[22].mxu0 }
 0x117   : > { %v1197_v49 = vadd.f32 %v1191_v43, %v1120_v44  ;;  %v2032_v50 = vpop.f32.mrb[19].mxu1  ;;  %v2040_v51 = vpop.f32.mrb[23].mxu0 }
 0x11c   : > { %v1252_v52 = vpop.f32.mrb[20].mxu1  ;;  %v1319_v53 = vpop.f32.mrb[24].mxu0 }
 0x11d   : > { %v1258_v54 = vadd.f32 %v1252_v52, %v1197_v49  ;;  %v2047_v55 = vpop.f32.mrb[21].mxu1  ;;  %v2055_v56 = vpop.f32.mrb[25].mxu0 }
 0x11e   : > { %v1255_v57 = vpop.f32.mrb[22].mxu1  ;;  %v1322_v58 = vpop.f32.mrb[26].mxu0 }
 0x11f   : > { %v1259_v59 = vadd.f32 %v2515_v7, %v1258_v54  ;;  %v2048_v60 = vpop.f32.mrb[23].mxu1  ;;  %v2056_v61 = vpop.f32.mrb[27].mxu0 }
 0x121   : > { %v1260_v62 = vmax.f32 %v1259_v59, 0.0 }
 0x123   : > { %v1261_v63 = vpack.c.bf16 %v1260_v62, %v1260_v62 }
 0x124   : > { %v1371_v0 = vpop.f32.mrb[24].mxu1  ;;  %v1428_v2 = vpop.f32.mrb[28].mxu0 }
 0x125   : > { %1262 = vst.msk [vmem:[%s474_s21] sm:$0xf] %vm767_vm2, %v1261_v63  ;;  %v1372_v3 = vadd.f32 %v1371_v0, %v1319_v53  ;;  %v2063_v4 = vpop.f32.mrb[25].mxu1  ;;  %v2071_v1 = vpop.f32.mrb[29].mxu0 }
 0x126   : > { %v1374_v5 = vpop.f32.mrb[26].mxu1  ;;  %v1431_v6 = vpop.f32.mrb[30].mxu0 }
 0x127   : > { %v1434_v8 = vadd.f32 %v1428_v2, %v1372_v3  ;;  %v2064_v9 = vpop.f32.mrb[27].mxu1  ;;  %v2072_v10 = vpop.f32.mrb[31].mxu0 }
 0x12c   : > { %v1489_v11 = vpop.f32.mrb[28].mxu1 }
 0x12d   : > { %v1495_v12 = vadd.f32 %v1489_v11, %v1434_v8  ;;  %v2079_v13 = vpop.f32.mrb[29].mxu1 }
 0x12e   : > { %v1492_v14 = vpop.f32.mrb[30].mxu1 }
 0x12f   : > { %v1496_v15 = vadd.f32 %v2515_v7, %v1495_v12  ;;  %v2080_v16 = vpop.f32.mrb[31].mxu1 }
 0x131   : > { %v1497_v17 = vmax.f32 %v1496_v15, 0.0 }
 0x133   : > { %v1498_v18 = vpack.c.bf16 %v1497_v17, %v1497_v17 }
 0x135   : > { %1499 = vst.msk [vmem:[%s482_s18] sm:$0xf] %vm767_vm2, %v1498_v18 }
 0x136 PF: > { %s19_s9 = sadd.s32 1, %s2197_s9   ;;  %s2567_s27 = smov %s2189_s29 }
 0x137   : > { %p16_p10 = scmp.ge.s32.totalorder %s19_s9, 18   ;;  %s2568_s28 = smov %s2193_s30 }
 0x138   : > { %s2569_s29 = smov %s2572_s10  ;;  %s2570_s30 = smov %s2576_s11 }
 0x139   :  { %18 = sbr.rel (!%p16_p10) target bundleno = 3 (0x3), region = 127 }

// kernel: fwd.20
= control target key start
LH: loop header
LB: loop body
LE: loop exit
PB: predicated region body
PF: predicated region fallthrough
CT: control target
= control target key end

     0   :  { %s2162_s27 = smov 0   ;;  %s2164_s28 = smov 0   ;;  %s2403_s0 = inlined_call_operand.vmem [shape: bf16[2,18,18,16], index: 0, kind: input, shape index: {}, may-alias: {0,1,2}]   ;;  %s2404_s1 = inlined_call_operand.vmem [shape: bf16[2,18,18,16], index: 1, kind: input, shape index: {}, may-alias: {0,1,2}]   ;;  %s2405_s2 = inlined_call_operand.vmem [shape: bf16[2,18,18,16], index: 2, kind: input, shape index: {}, may-alias: {0,1,2}]   ;;  %s2406_s3 = inlined_call_operand.vmem [shape: bf16[4,4,16,8], index: 3, kind: input, shape index: {}]   ;;  %s2407_s4 = inlined_call_operand.vmem [shape: f32[1,8], index: 4, kind: input, shape index: {}]   ;;  %s2408_s5 = inlined_call_operand.vmem [shape: bf16[2,16,16,8], index: 5, kind: output, shape index: {0}]   ;;  %s2409_s6 = inlined_call_operand.vmem [shape: bf16[2,16,16,8], index: 6, kind: output, shape index: {1}]   ;;  %s2410_s7 = inlined_call_operand.vmem [shape: bf16[2,16,16,8], index: 7, kind: output, shape index: {2}]   ;;  %s2411_s8 = inlined_call_operand.vmem [shape: bf16[2,16,16,8], index: 8, kind: output, shape index: {3}]  }
   0x1   :  { %s2166_s29 = smov 0   ;;  %s2168_s30 = smov 0  }
   0x2   :  { %s2170_s9 = smov 0  }
   0x3 LB: > { %s28_s10 = sadd.s32 1, %s2105_s29  ;;  %s31_s11 = sadd.s32 1, %s2109_s30  ;;  %s2113_s9 = sphi %s2170_s9, %s19_s9   ;;  %s2109_s30 = sphi %s2168_s30, %s2415_s30   ;;  %s2105_s29 = sphi %s2166_s29, %s2414_s29   ;;  %s2101_s28 = sphi %s2164_s28, %s2413_s28   ;;  %s2097_s27 = sphi %s2162_s27, %s2412_s27  }
   0x4   : > { %p29_p0 = scmp.ge.s32.totalorder %s28_s10, 16  ;;  %p1776_p1 = scmp.ge.s32.totalorder %s2113_s9, 1 }
   0x5   : > { %p335_p2 = scmp.lt.s32.totalorder %s2113_s9, 33 }
   0x6   : > { %s2417_s10 = smov (%p29_p0, %s28_s10), 0  ;;  %s2419_s11 = smov (!%p29_p0, %s31_s11), %s2109_s30 }
   0x7   : > { %p336_p3 = pnand %p1776_p1, %p335_p2  ;;  %p33_p4 = scmp.ge.s32.totalorder %s2419_s11, 2 }
   0x8   : > { %v2053_v0 = vld [vmem:[%s2406_s3 + $0x38] sm:$0xff] (!%p336_p3)   ;;  %v2115_v1 = vmov (!%p336_p3), 0.0   ;;  %p424_p5 = scmp.lt.s32.totalorder (!%p336_p3), %s2101_s28, 1  ;;  %s433_s14 = sadd.s32 (!%p336_p3), 1, %s2097_s27  ;;  %vm2116_vm0 = vmmov (!%p336_p3), 0   ;;  %v2055_v2 = vld [vmem:[%s2406_s3 + $0x28] sm:$0xff] (!%p336_p3)  }
   0x9   : > { %s2421_s11 = smov (%p33_p4, %s2419_s11), 0  ;;  %339 = sbr.rel (%p336_p3) target bundleno = 310 (0x136), region = 40 }
   0xa   : > { %1911 = vmatprep.subr.bf16.mxu0 (!%p336_p3), %v2115_v1  ;;  %1917 = vmatprep.subr.bf16.mxu1 (!%p336_p3), %v2115_v1  ;;  %p436_p6 = scmp.lt.s32.totalorder (!%p336_p3), %s433_s14, 17  ;;  %p426_p7 = scmp.lt.s32.totalorder (!%p336_p3), %s2097_s27, 17  ;;  %vm519_vm1 = vcmask (!%p336_p3), 130048   ;;  %v2056_v3 = vld [vmem:[%s2406_s3 + $0x68] sm:$0xff] (!%p336_p3)   ;;  %vm567_vm2 = vsmask.f32 (!%p336_p3), 7424 }
   0xb   : > { %1912 = vmatpush3.bf16.msra.mxu0 (!%p336_p3), %v2053_v0  ;;  %1913 = vmatprep.mubr.msk.bf16.mxu0 (!%p336_p3), %vm2116_vm0, %v2115_v1  ;;  %v2058_v16 = vld [vmem:[%s2406_s3 + $0x78] sm:$0xff] (!%p336_p3)   ;;  %v2061_v22 = vld [vmem:[%s2406_s3 + $0x20] sm:$0xff] (!%p336_p3)   ;;  %v2062_v26 = vld [vmem:[%s2406_s3 + $0x30] sm:$0xff] (!%p336_p3)   ;;  %vm785_vm3 = vcmask (!%p336_p3), 1046528   ;;  %p457_p9 = scmp.lt.s32.totalorder (!%p336_p3), %s2097_s27, 15  ;;  %vm776_vm4 = vcmask (!%p336_p3), 60416  }
   0xc   : > { %1923 = vmatprep.subr.bf16.mxu0 (!%p336_p3), %v2115_v1  ;;  %1919 = vmatprep.mubr.msk.bf16.mxu1 (!%p336_p3), %vm2116_vm0, %v2115_v1  ;;  %v2063_v28 = vld [vmem:[%s2406_s3 + $0x70] sm:$0xff] (!%p336_p3)   ;;  %v2064_v29 = vld [vmem:[%s2406_s3 + $0x60] sm:$0xff] (!%p336_p3)   ;;  %v2065_v30 = vld [vmem:[%s2406_s3 + $0x58] sm:$0xff] (!%p336_p3)  }
   0xd   : > { %1918 = vmatpush3.bf16.msra.mxu1 (!%p336_p3), %v2055_v2  ;;  %v2066_v37 = vld [vmem:[%s2406_s3 + $0x48] sm:$0xff] (!%p336_p3)   ;;  %v2068_v44 = vld [vmem:[%s2406_s3 + $0x18] sm:$0xff] (!%p336_p3)   ;;  %v2071_v46 = vld [vmem:[%s2406_s3 + $0x40] sm:$0xff] (!%p336_p3)  }
   0xe   : > { %1929 = vmatprep.subr.bf16.mxu1 (!%p336_p3), %v2115_v1  ;;  %v2067_v38 = vld [vmem:[%s2406_s3 + $0x8] sm:$0xff] (!%p336_p3)   ;;  %v2072_v47 = vld [vmem:[%s2406_s3 + $0x50] sm:$0xff] (!%p336_p3)   ;;  %v2074_v49 = vld [vmem:[%s2406_s3] sm:$0xff] (!%p336_p3)  }
   0xf   : > { %v2073_v48 = vld [vmem:[%s2406_s3 + $0x10] sm:$0xff] (!%p336_p3)  }
  0x10   : > { %s2423_s28 = smov (!%p424_p5, %s2101_s28), 1  ;;  %s2425_s14 = smov (!%p436_p6, %s433_s14), 17 }
  0x11   : > { %s2211_s17 = smul.u32 54, %s2423_s28 }
  0x12   : > { %s2009_s18 = smul.u32 3, %s2425_s14 }
  0x13   : > { %s427_s19 = scalar_select %p426_p7, %s2097_s27, 17 }
  0x14   : > { %s440_s20 = sadd.s32 %s2009_s18, %s2211_s17 }
  0x15   : > { %s1778_s23 = sshll.u32 %s440_s20, 2  ;;  %s2007_s24 = smul.u32 3, %s427_s19 }
  0x16   : > { %s442_s12 = scalar_lea.vmem %s2404_s1, %s1778_s23  ;;  %s444_s19 = sadd.s32 2, %s2097_s27 }
  0x17   : > { %v2223_v4 = vld [vmem:[%s442_s12] sm:$0xff]   ;;  %s430_s13 = sadd.s32 %s2211_s17, %s2007_s24  ;;  %v2057_v5 = vld [vmem:[%s442_s12 + $0x8] ss:$0 sps:$4 sm:$0x11]   ;;  %p447_p8 = scmp.lt.s32.totalorder %s444_s19, 17 }
  0x18   : > { %s1777_s14 = sshll.u32 %s430_s13, 2  ;;  %1914 = vmatmul.mubr.msk.bf16.vlgmr.msra.gmra.mrb[0].mxu0 %vm519_vm1, %v2223_v4  ;;  %v568_v6 = vshrl.u32 %v2223_v4, 16  ;;  %v570_v7 = vshll.u32 %v2223_v4, 16  ;;  %v575_v8 = vshll.u32 %v2057_v5, 16  ;;  %v786_v24 = vrot.slane %v2223_v4, 1  ;;  %s2429_s27 = smov (!%p457_p9, %s2097_s27), 15 }
  0x19   : > { %s432_s18 = scalar_lea.vmem %s2403_s0, %s1777_s14  ;;  %1924 = vmatpush3.bf16.msra.mxu0 %v2056_v3  ;;  %1925 = vmatprep.mubr.msk.bf16.mxu0 %vm2116_vm0, %v2115_v1  ;;  %s2427_s19 = smov (!%p447_p8, %s444_s19), 17  ;;  %v787_v25 = vrot.slane %v2057_v5, 1  ;;  %v2352_v5 = vld [vmem:[%s2407_s4] ss:$0 sm:$0xff] }
  0x1a   : > { %v2059_v9 = vld [vmem:[%s432_s18] sm:$0xff]   ;;  %v572_v10 = vrot.slane %v570_v7, 1  ;;  %v2060_v11 = vld [vmem:[%s432_s18 + $0x8] ss:$0 sps:$4 sm:$0x11]   ;;  %1935 = vmatprep.subr.bf16.mxu0 %v2115_v1  ;;  %v577_v12 = vrot.slane %v575_v8, 1 }
  0x1b   : > { %v641_v13 = vshrl.u32 %v2059_v9, 16  ;;  %v643_v14 = vshll.u32 %v2059_v9, 16  ;;  %v648_v17 = vshll.u32 %v2060_v11, 16  ;;  %s2010_s24 = smul.u32 3, %s2427_s19  ;;  %v788_v27 = vsel %vm785_vm3, %v786_v24, %v787_v25  ;;  %s1780_s22 = sshll.u32 %s2429_s27, 1 }
  0x1c   : > { %v573_v15 = vor.u32 %v572_v10, %v568_v6  ;;  %v941_v32 = vrot.slane %v2059_v9, 1  ;;  %v942_v33 = vrot.slane %v2060_v11, 1  ;;  %s1781_s23 = sshll.u32 %s2423_s28, 5 }
  0x1d   : > { %v645_v18 = vrot.slane %v643_v14, 1  ;;  %v650_v20 = vrot.slane %v648_v17, 1  ;;  %s451_s25 = sadd.s32 %s2010_s24, %s2211_s17  ;;  %s461_s24 = sadd.s32 %s1781_s23, %s1780_s22 }
  0x1e   : > { %v2241_v19 = vsel %vm567_vm2, %v573_v15, %v577_v12  ;;  %s1779_s13 = sshll.u32 %s451_s25, 2  ;;  %v943_v36 = vsel %vm785_vm3, %v941_v32, %v942_v33  ;;  %s2354_s12 = sshll.u32 %s461_s24, 2 }
  0x1f   : > { %1920 = vmatmul.mubr.msk.bf16.vlgmr.msra.gmra.mrb[0].mxu1 %vm519_vm1, %v2241_v19  ;;  %v646_v21 = vor.u32 %v645_v18, %v641_v13  ;;  %s453_s16 = scalar_lea.vmem %s2405_s2, %s1779_s13  ;;  %s463_s13 = scalar_lea.vmem %s2408_s5, %s2354_s12 }
  0x20   : > { %1930 = vmatpush3.bf16.msra.mxu1 %v2058_v16  ;;  %1931 = vmatprep.mubr.msk.bf16.mxu1 %vm2116_vm0, %v2115_v1  ;;  %v2069_v31 = vld [vmem:[%s453_s16] sm:$0xff]   ;;  %v2070_v34 = vld [vmem:[%s453_s16 + $0x8] ss:$0 sps:$4 sm:$0x11]   ;;  %s472_s16 = scalar_lea.vmem %s2409_s6, %s2354_s12  ;;  %s481_s17 = scalar_lea.vmem %s2410_s7, %s2354_s12 }
  0x21   : > { %v651_v23 = vsel %vm567_vm2, %v646_v21, %v650_v20  ;;  %1941 = vmatprep.subr.bf16.mxu1 %v2115_v1  ;;  %v1124_v35 = vshll.u32 %v2069_v31, 16  ;;  %v1122_v39 = vshrl.u32 %v2069_v31, 16  ;;  %v1129_v41 = vshll.u32 %v2070_v34, 16  ;;  %s490_s22 = scalar_lea.vmem %s2411_s8, %s2354_s12 }
  0x22   : > { %1926 = vmatmul.mubr.msk.bf16.vlgmr.msra.gmra.mrb[4].mxu0 %vm519_vm1, %v651_v23  ;;  %v1407_v50 = vrot.slane %v2069_v31, 1  ;;  %v1408_v51 = vrot.slane %v2070_v34, 1 }
  0x23   : > { %1936 = vmatpush3.bf16.msra.mxu0 %v2061_v22  ;;  %1937 = vmatprep.mubr.msk.bf16.mxu0 %vm2116_vm0, %v2115_v1  ;;  %v1126_v40 = vrot.slane %v1124_v35, 1  ;;  %v1131_v43 = vrot.slane %v1129_v41, 1 }
  0x24   : > { %1947 = vmatprep.subr.bf16.mxu0 %v2115_v1  ;;  %v1409_v52 = vsel %vm785_vm3, %v1407_v50, %v1408_v51 }
  0x25   : > { %v1127_v42 = vor.u32 %v1126_v40, %v1122_v39 }
  0x27   : > { %1932 = vmatmul.mubr.msk.bf16.vlgmr.msra.gmra.mrb[4].mxu1 %vm519_vm1, %v2059_v9  ;;  %v1132_v45 = vsel %vm567_vm2, %v1127_v42, %v1131_v43 }
  0x28   : > { %1942 = vmatpush3.bf16.msra.mxu1 %v2062_v26  ;;  %1943 = vmatprep.mubr.msk.bf16.mxu1 %vm2116_vm0, %v2115_v1 }
  0x29   : > { %1953 = vmatprep.subr.bf16.mxu1 %v2115_v1 }
  0x2a   : > { %1938 = vmatmul.mubr.msk.bf16.vlgmr.msra.gmra.mrb[8].mxu0 %vm519_vm1, %v788_v27 }
  0x2b   : > { %1948 = vmatpush3.bf16.msra.mxu0 %v2063_v28  ;;  %1949 = vmatprep.mubr.msk.bf16.mxu0 %vm2116_vm0, %v2115_v1 }
  0x2c   : > { %1959 = vmatprep.subr.bf16.mxu0 %v2115_v1 }
  0x2f   : > { %1944 = vmatmul.mubr.msk.bf16.vlgmr.msra.gmra.mrb[8].mxu1 %vm519_vm1, %v2241_v19 }
  0x30   : > { %1954 = vmatpush3.bf16.msra.mxu1 %v2064_v29  ;;  %1955 = vmatprep.mubr.msk.bf16.mxu1 %vm2116_vm0, %v2115_v1 }
  0x31   : > { %1965 = vmatprep.subr.bf16.mxu1 %v2115_v1 }
  0x32   : > { %1950 = vmatmul.mubr.msk.bf16.vlgmr.msra.gmra.mrb[12].mxu0 %vm519_vm1, %v651_v23 }
  0x33   : > { %1960 = vmatpush3.bf16.msra.mxu0 %v2065_v30  ;;  %1961 = vmatprep.mubr.msk.bf16.mxu0 %vm2116_vm0, %v2115_v1 }
  0x34   : > { %1971 = vmatprep.subr.bf16.mxu0 %v2115_v1 }
  0x37   : > { %1956 = vmatmul.mubr.msk.bf16.vlgmr.msra.gmra.mrb[12].mxu1 %vm519_vm1, %v943_v36 }
  0x38   : > { %1966 = vmatpush3.bf16.msra.mxu1 %v2066_v37  ;;  %1967 = vmatprep.mubr.msk.bf16.mxu1 %vm2116_vm0, %v2115_v1 }
  0x39   : > { %1977 = vmatprep.subr.bf16.mxu1 %v2115_v1 }
  0x3a   : > { %1962 = vmatmul.mubr.msk.bf16.vlgmr.msra.gmra.mrb[16].mxu0 %vm519_vm1, %v2223_v4 }
  0x3b   : > { %1972 = vmatpush3.bf16.msra.mxu0 %v2067_v38  ;;  %1973 = vmatprep.mubr.msk.bf16.mxu0 %vm2116_vm0, %v2115_v1 }
  0x3c   : > { %1983 = vmatprep.subr.bf16.mxu0 %v2115_v1 }
  0x3f   : > { %1968 = vmatmul.mubr.msk.bf16.vlgmr.msra.gmra.mrb[16].mxu1 %vm519_vm1, %v2241_v19 }
  0x40   : > { %1978 = vmatpush3.bf16.msra.mxu1 %v2068_v44  ;;  %1979 = vmatprep.mubr.msk.bf16.mxu1 %vm2116_vm0, %v2115_v1 }
  0x41   : > { %1989 = vmatprep.subr.bf16.mxu1 %v2115_v1 }
  0x42   : > { %1974 = vmatmul.mubr.msk.bf16.vlgmr.msra.gmra.mrb[20].mxu0 %vm519_vm1, %v1132_v45 }
  0x43   : > { %1984 = vmatpush3.bf16.msra.mxu0 %v2071_v46  ;;  %1985 = vmatprep.mubr.msk.bf16.mxu0 %vm2116_vm0, %v2115_v1 }
  0x44   : > { %1995 = vmatprep.subr.bf16.mxu0 %v2115_v1 }
  0x47   : > { %1980 = vmatmul.mubr.msk.bf16.vlgmr.msra.gmra.mrb[20].mxu1 %vm519_vm1, %v2069_v31 }
  0x48   : > { %1990 = vmatpush3.bf16.msra.mxu1 %v2072_v47  ;;  %1991 = vmatprep.mubr.msk.bf16.mxu1 %vm2116_vm0, %v2115_v1 }
  0x49   : > { %2001 = vmatprep.subr.bf16.mxu1 %v2115_v1 }
  0x4a   : > { %1986 = vmatmul.mubr.msk.bf16.vlgmr.msra.gmra.mrb[24].mxu0 %vm519_vm1, %v788_v27 }
  0x4b   : > { %1996 = vmatpush3.bf16.msra.mxu0 %v2073_v48  ;;  %1997 = vmatprep.mubr.msk.bf16.mxu0 %vm2116_vm0, %v2115_v1 }
  0x4f   : > { %1992 = vmatmul.mubr.msk.bf16.vlgmr.msra.gmra.mrb[24].mxu1 %vm519_vm1, %v2241_v19 }
  0x50   : > { %2002 = vmatpush3.bf16.msra.mxu1 %v2074_v49  ;;  %2003 = vmatprep.mubr.msk.bf16.mxu1 %vm2116_vm0, %v2115_v1 }
  0x52   : > { %1998 = vmatmul.mubr.msk.bf16.vlgmr.msra.gmra.mrb[28].mxu0 %vm519_vm1, %v1132_v45 }
  0x57   : > { %2004 = vmatmul.mubr.msk.bf16.vlgmr.msra.gmra.mrb[28].mxu1 %vm519_vm1, %v1409_v52 }
  0xeb   : > { %v557_v53 = vpop.f32.mrb[0].mxu0 }
  0xec   : > { %v1915_v54 = vpop.f32.mrb[1].mxu0 }
  0xed   : > { %v560_v55 = vpop.f32.mrb[2].mxu0 }
  0xee   : > { %v1916_v56 = vpop.f32.mrb[3].mxu0 }
  0xf2   : > { %v622_v57 = vpop.f32.mrb[0].mxu1 }
  0xf3   : > { %v623_v58 = vadd.f32 %v622_v57, %v557_v53  ;;  %v1921_v59 = vpop.f32.mrb[1].mxu1 }
  0xf4   : > { %v625_v60 = vpop.f32.mrb[2].mxu1 }
  0xf5   : > { %v626_v61 = vadd.f32 %v625_v60, %v560_v55  ;;  %v695_v62 = vpop.f32.mrb[4].mxu0  ;;  %v1922_v63 = vpop.f32.mrb[3].mxu1 }
  0xf6   : > { %v702_v0 = vadd.f32 %v695_v62, %v623_v58  ;;  %v1927_v1 = vpop.f32.mrb[5].mxu0 }
  0xf7   : > { %v698_v2 = vpop.f32.mrb[6].mxu0 }
  0xf8   : > { %v703_v3 = vadd.f32 %v698_v2, %v626_v61  ;;  %v1928_v4 = vpop.f32.mrb[7].mxu0 }
  0xfa   : > { %v749_v6 = vpop.f32.mrb[4].mxu1 }
  0xfb   : > { %v756_v7 = vadd.f32 %v749_v6, %v702_v0  ;;  %v1933_v8 = vpop.f32.mrb[5].mxu1 }
  0xfc   : > { %v752_v9 = vpop.f32.mrb[6].mxu1 }
  0xfd   : > { %v764_v10 = vadd.f32 %v2352_v5, %v756_v7  ;;  %v757_v11 = vadd.f32 %v752_v9, %v703_v3  ;;  %v1934_v12 = vpop.f32.mrb[7].mxu1  ;;  %v832_v13 = vpop.f32.mrb[8].mxu0 }
  0xfe   : > { %v1939_v14 = vpop.f32.mrb[9].mxu0 }
  0xff   : > { %v766_v15 = vmax.f32 %v764_v10, 0.0  ;;  %v765_v16 = vadd.f32 %v2352_v5, %v757_v11  ;;  %v835_v17 = vpop.f32.mrb[10].mxu0 }
 0x100   : > { %v1940_v18 = vpop.f32.mrb[11].mxu0 }
 0x101   : > { %v1871_v19 = vpack.c.bf16 %v766_v15, %v766_v15  ;;  %v767_v20 = vmax.f32 %v765_v16, 0.0 }
 0x102   : > { %v879_v21 = vpop.f32.mrb[8].mxu1 }
 0x103   : > { %777 = vst.msk [vmem:[%s463_s13] sm:$0xf] %vm776_vm4, %v1871_v19  ;;  %v1872_v22 = vpack.c.bf16 %v767_v20, %v767_v20  ;;  %v880_v23 = vadd.f32 %v879_v21, %v832_v13  ;;  %v1945_v24 = vpop.f32.mrb[9].mxu1 }
 0x104   : > { %v882_v25 = vpop.f32.mrb[10].mxu1 }
 0x105   : > { %778 = vst.msk [vmem:[%s463_s13 + $0x4] sm:$0xf] %vm776_vm4, %v1872_v22  ;;  %v883_v26 = vadd.f32 %v882_v25, %v835_v17  ;;  %v929_v27 = vpop.f32.mrb[12].mxu0  ;;  %v1946_v28 = vpop.f32.mrb[11].mxu1 }
 0x106   : > { %v936_v29 = vadd.f32 %v929_v27, %v880_v23  ;;  %v1951_v30 = vpop.f32.mrb[13].mxu0 }
 0x107   : > { %v932_v31 = vpop.f32.mrb[14].mxu0 }
 0x108   : > { %v937_v32 = vadd.f32 %v932_v31, %v883_v26  ;;  %v1952_v33 = vpop.f32.mrb[15].mxu0 }
 0x10a   : > { %v987_v34 = vpop.f32.mrb[12].mxu1 }
 0x10b   : > { %v994_v35 = vadd.f32 %v987_v34, %v936_v29  ;;  %v1957_v36 = vpop.f32.mrb[13].mxu1 }
 0x10c   : > { %v990_v37 = vpop.f32.mrb[14].mxu1 }
 0x10d   : > { %v996_v38 = vadd.f32 %v2352_v5, %v994_v35  ;;  %v995_v39 = vadd.f32 %v990_v37, %v937_v32  ;;  %v1958_v40 = vpop.f32.mrb[15].mxu1  ;;  %v1056_v41 = vpop.f32.mrb[16].mxu0 }
 0x10e   : > { %v1963_v42 = vpop.f32.mrb[17].mxu0 }
 0x10f   : > { %v998_v43 = vmax.f32 %v996_v38, 0.0  ;;  %v997_v44 = vadd.f32 %v2352_v5, %v995_v39  ;;  %v1059_v45 = vpop.f32.mrb[18].mxu0 }
 0x110   : > { %v1964_v46 = vpop.f32.mrb[19].mxu0 }
 0x111   : > { %v1873_v47 = vpack.c.bf16 %v998_v43, %v998_v43  ;;  %v999_v48 = vmax.f32 %v997_v44, 0.0 }
 0x112   : > { %v1103_v49 = vpop.f32.mrb[16].mxu1 }
 0x113   : > { %1008 = vst.msk [vmem:[%s472_s16] sm:$0xf] %vm776_vm4, %v1873_v47  ;;  %v1874_v50 = vpack.c.bf16 %v999_v48, %v999_v48  ;;  %v1104_v51 = vadd.f32 %v1103_v49, %v1056_v41  ;;  %v1969_v52 = vpop.f32.mrb[17].mxu1 }
 0x114   : > { %v1106_v53 = vpop.f32.mrb[18].mxu1 }
 0x115   : > { %1009 = vst.msk [vmem:[%s472_s16 + $0x4] sm:$0xf] %vm776_vm4, %v1874_v50  ;;  %v1107_v54 = vadd.f32 %v1106_v53, %v1059_v45  ;;  %v1176_v55 = vpop.f32.mrb[20].mxu0  ;;  %v1970_v56 = vpop.f32.mrb[19].mxu1 }
 0x116   : > { %v1183_v57 = vadd.f32 %v1176_v55, %v1104_v51  ;;  %v1975_v58 = vpop.f32.mrb[21].mxu0 }
 0x117   : > { %v1179_v59 = vpop.f32.mrb[22].mxu0 }
 0x118   : > { %v1184_v60 = vadd.f32 %v1179_v59, %v1107_v54  ;;  %v1976_v61 = vpop.f32.mrb[23].mxu0 }
 0x11a   : > { %v1230_v62 = vpop.f32.mrb[20].mxu1 }
 0x11b   : > { %v1237_v63 = vadd.f32 %v1230_v62, %v1183_v57  ;;  %v1981_v0 = vpop.f32.mrb[21].mxu1 }
 0x11c   : > { %v1233_v1 = vpop.f32.mrb[22].mxu1 }
 0x11d   : > { %v1239_v2 = vadd.f32 %v2352_v5, %v1237_v63  ;;  %v1238_v3 = vadd.f32 %v1233_v1, %v1184_v60  ;;  %v1982_v4 = vpop.f32.mrb[23].mxu1  ;;  %v1299_v6 = vpop.f32.mrb[24].mxu0 }
 0x11e   : > { %v1987_v7 = vpop.f32.mrb[25].mxu0 }
 0x11f   : > { %v1241_v8 = vmax.f32 %v1239_v2, 0.0  ;;  %v1240_v9 = vadd.f32 %v2352_v5, %v1238_v3  ;;  %v1302_v10 = vpop.f32.mrb[26].mxu0 }
 0x120   : > { %v1988_v11 = vpop.f32.mrb[27].mxu0 }
 0x121   : > { %v1875_v12 = vpack.c.bf16 %v1241_v8, %v1241_v8  ;;  %v1242_v13 = vmax.f32 %v1240_v9, 0.0 }
 0x122   : > { %v1346_v14 = vpop.f32.mrb[24].mxu1 }
 0x123   : > { %1251 = vst.msk [vmem:[%s481_s17] sm:$0xf] %vm776_vm4, %v1875_v12  ;;  %v1876_v15 = vpack.c.bf16 %v1242_v13, %v1242_v13  ;;  %v1347_v16 = vadd.f32 %v1346_v14, %v1299_v6  ;;  %v1993_v17 = vpop.f32.mrb[25].mxu1 }
 0x124   : > { %v1349_v18 = vpop.f32.mrb[26].mxu1 }
 0x125   : > { %1252 = vst.msk [vmem:[%s481_s17 + $0x4] sm:$0xf] %vm776_vm4, %v1876_v15  ;;  %v1350_v19 = vadd.f32 %v1349_v18, %v1302_v10  ;;  %v1396_v20 = vpop.f32.mrb[28].mxu0  ;;  %v1994_v21 = vpop.f32.mrb[27].mxu1 }
 0x126   : > { %v1403_v22 = vadd.f32 %v1396_v20, %v1347_v16  ;;  %v1999_v23 = vpop.f32.mrb[29].mxu0 }
 0x127   : > { %v1399_v24 = vpop.f32.mrb[30].mxu0 }
 0x128   : > { %v1404_v25 = vadd.f32 %v1399_v24, %v1350_v19  ;;  %v2000_v26 = vpop.f32.mrb[31].mxu0 }
 0x12a   : > { %v1453_v27 = vpop.f32.mrb[28].mxu1 }
 0x12b   : > { %v1460_v28 = vadd.f32 %v1453_v27, %v1403_v22  ;;  %v2005_v29 = vpop.f32.mrb[29].mxu1 }
 0x12c   : > { %v1456_v30 = vpop.f32.mrb[30].mxu1 }
 0x12d   : > { %v1462_v31 = vadd.f32 %v2352_v5, %v1460_v28  ;;  %v1461_v32 = vadd.f32 %v1456_v30, %v1404_v25  ;;  %v2006_v33 = vpop.f32.mrb[31].mxu1 }
 0x12f   : > { %v1464_v34 = vmax.f32 %v1462_v31, 0.0  ;;  %v1463_v35 = vadd.f32 %v2352_v5, %v1461_v32 }
 0x131   : > { %v1877_v36 = vpack.c.bf16 %v1464_v34, %v1464_v34  ;;  %v1465_v37 = vmax.f32 %v1463_v35, 0.0 }
 0x133   : > { %1474 = vst.msk [vmem:[%s490_s22] sm:$0xf] %vm776_vm4, %v1877_v36  ;;  %v1878_v38 = vpack.c.bf16 %v1465_v37, %v1465_v37 }
 0x135   : > { %1475 = vst.msk [vmem:[%s490_s22 + $0x4] sm:$0xf] %vm776_vm4, %v1878_v38 }
 0x136 PF: > { %s19_s9 = sadd.s32 1, %s2113_s9   ;;  %s2412_s27 = smov %s2105_s29 }
 0x137   : > { %p16_p10 = scmp.ge.s32.totalorder %s19_s9, 34   ;;  %s2413_s28 = smov %s2109_s30 }
 0x138   : > { %s2414_s29 = smov %s2417_s10  ;;  %s2415_s30 = smov %s2421_s11 }
 0x139   :  { %18 = sbr.rel (!%p16_p10) target bundleno = 3 (0x3), region = 127 }

// kernel: fwd.21
= control target key start
LH: loop header
LB: loop body
LE: loop exit
PB: predicated region body
PF: predicated region fallthrough
CT: control target
= control target key end

     0   :  { %s2329_s27 = smov 0   ;;  %s2331_s28 = smov 0   ;;  %s2614_s0 = inlined_call_operand.vmem [shape: bf16[2,34,34,8], index: 0, kind: input, shape index: {}, may-alias: {0,1,2}]   ;;  %s2615_s1 = inlined_call_operand.vmem [shape: bf16[2,34,34,8], index: 1, kind: input, shape index: {}, may-alias: {0,1,2}]   ;;  %s2616_s2 = inlined_call_operand.vmem [shape: bf16[2,34,34,8], index: 2, kind: input, shape index: {}, may-alias: {0,1,2}]   ;;  %s2617_s3 = inlined_call_operand.vmem [shape: bf16[4,4,8,2], index: 3, kind: input, shape index: {}]   ;;  %s2618_s4 = inlined_call_operand.vmem [shape: f32[1,2], index: 4, kind: input, shape index: {}]   ;;  %s2619_s5 = inlined_call_operand.vmem [shape: f32[2,32,32,2], index: 5, kind: output, shape index: {0}]   ;;  %s2620_s6 = inlined_call_operand.vmem [shape: f32[2,32,32,2], index: 6, kind: output, shape index: {1}]   ;;  %s2621_s7 = inlined_call_operand.vmem [shape: f32[2,32,32,2], index: 7, kind: output, shape index: {2}]   ;;  %s2622_s8 = inlined_call_operand.vmem [shape: f32[2,32,32,2], index: 8, kind: output, shape index: {3}]  }
   0x1   :  { %s2333_s29 = smov 0   ;;  %s2335_s30 = smov 0  }
   0x2   :  { %s2337_s9 = smov 0  }
   0x3 LB: > { %s28_s10 = sadd.s32 1, %s2274_s29  ;;  %s31_s11 = sadd.s32 1, %s2278_s30  ;;  %s2282_s9 = sphi %s2337_s9, %s19_s9   ;;  %s2278_s30 = sphi %s2335_s30, %s2627_s30   ;;  %s2274_s29 = sphi %s2333_s29, %s2626_s29   ;;  %s2270_s28 = sphi %s2331_s28, %s2625_s28   ;;  %s2266_s27 = sphi %s2329_s27, %s2624_s27  }
   0x4   : > { %p29_p0 = scmp.ge.s32.totalorder %s28_s10, 32  ;;  %p1908_p1 = scmp.ge.s32.totalorder %s2282_s9, 1 }
   0x5   : > { %p335_p2 = scmp.lt.s32.totalorder %s2282_s9, 65 }
   0x6   : > { %s2629_s10 = smov (%p29_p0, %s28_s10), 0  ;;  %s2631_s11 = smov (!%p29_p0, %s31_s11), %s2278_s30 }
   0x7   : > { %p336_p3 = pnand %p1908_p1, %p335_p2  ;;  %p33_p4 = scmp.ge.s32.totalorder %s2631_s11, 2 }
   0x8   : > { %v1925_v0 = vld [vmem:[%s2617_s3 + $0x1c] sm:$0xf] (!%p336_p3)  ;;  %vm529_vm0 = vcmask (!%p336_p3), 1043456   ;;  %v1944_v1 = vld [vmem:[%s2617_s3 + $0x10] sm:$0xf] (!%p336_p3)  ;;  %p424_p5 = scmp.lt.s32.totalorder (!%p336_p3), %s2270_s28, 1 }
   0x9   : > { %s2633_s11 = smov (%p33_p4, %s2631_s11), 0  ;;  %339 = sbr.rel (%p336_p3) target bundleno = 327 (0x147), region = 40 }
   0xa   : > { %2175 = vmatprep.subr.msk.bf16.mxu0 (!%p336_p3), %vm529_vm0, %v1925_v0  ;;  %v531_v2 = vsel (!%p336_p3), %vm529_vm0, %v1925_v0, 0  ;;  %2179 = vmatprep.subr.msk.bf16.mxu1 (!%p336_p3), %vm529_vm0, %v1944_v1  ;;  %s433_s16 = sadd.s32 (!%p336_p3), 1, %s2266_s27  ;;  %v853_v3 = vsel (!%p336_p3), %vm529_vm0, %v1944_v1, 0  ;;  %v1924_v4 = vld [vmem:[%s2617_s3 + $0x14] sm:$0xf] (!%p336_p3)  ;;  %p426_p7 = scmp.lt.s32.totalorder (!%p336_p3), %s2266_s27, 33 }
   0xb   : > { %2032 = vmatpush3.bf16.msra.mxu0 (!%p336_p3), %v531_v2  ;;  %2056 = vmatpush3.bf16.msra.mxu1 (!%p336_p3), %v853_v3  ;;  %v1943_v5 = vld [vmem:[%s2617_s3 + $0x18] sm:$0xf] (!%p336_p3)  ;;  %p436_p6 = scmp.lt.s32.totalorder (!%p336_p3), %s433_s16, 33  ;;  %s444_s25 = sadd.s32 (!%p336_p3), 2, %s2266_s27  ;;  %vm522_vm1 = vcmask (!%p336_p3), 64512   ;;  %vm840_vm2 = vcmask (!%p336_p3), 1046528  }
   0xc   : > { %2176 = vmatprep.subr.msk.bf16.mxu0 (!%p336_p3), %vm529_vm0, %v1924_v4  ;;  %2180 = vmatprep.subr.msk.bf16.mxu1 (!%p336_p3), %vm529_vm0, %v1943_v5  ;;  %p2389_p8 = scmp.lt.s32.totalorder (!%p336_p3), %s444_s25, 33  ;;  %v611_v6 = vsel (!%p336_p3), %vm529_vm0, %v1924_v4, 0  ;;  %vm585_vm3 = vsmask.f32 (!%p336_p3), 7424  ;;  %v905_v8 = vsel (!%p336_p3), %vm529_vm0, %v1943_v5, 0  ;;  %p457_p9 = scmp.lt.s32.totalorder (!%p336_p3), %s2266_s27, 31 }
   0xd   : > { %v1933_v9 = vld [vmem:[%s2617_s3 + $0x34] sm:$0xf] (!%p336_p3)  ;;  %v1949_v20 = vld [vmem:[%s2617_s3 + $0x38] sm:$0xf] (!%p336_p3)  ;;  %v1939_v41 = vld [vmem:[%s2617_s3 + $0x3c] sm:$0xf] (!%p336_p3) }
   0xe   : > { %v704_v39 = vsel (!%p336_p3), %vm529_vm0, %v1933_v9, 0  ;;  %v959_v44 = vsel (!%p336_p3), %vm529_vm0, %v1949_v20, 0  ;;  %v1952_v45 = vld [vmem:[%s2617_s3 + $0x30] sm:$0xf] (!%p336_p3)  ;;  %v766_v49 = vsel (!%p336_p3), %vm529_vm0, %v1939_v41, 0  ;;  %vm831_vm4 = vcmask (!%p336_p3), 15360  }
   0xf   : > { %v1956_v52 = vld [vmem:[%s2617_s3 + $0x2c] sm:$0xf] (!%p336_p3)  ;;  %v1028_v53 = vsel (!%p336_p3), %vm529_vm0, %v1952_v45, 0  ;;  %v1971_v55 = vld [vmem:[%s2617_s3 + $0x20] sm:$0xf] (!%p336_p3) }
  0x10   : > { %s2635_s28 = smov (!%p424_p5, %s2270_s28), 1  ;;  %s2637_s16 = smov (!%p436_p6, %s433_s16), 33  ;;  %v1096_v57 = vsel %vm529_vm0, %v1956_v52, 0  ;;  %v1955_v58 = vld [vmem:[%s2617_s3 + $0x24] sm:$0xf]  ;;  %v1371_v60 = vsel %vm529_vm0, %v1971_v55, 0 }
  0x11   : > { %s2383_s21 = smul.u32 170, %s2635_s28  ;;  %s2639_s25 = smov (!%p2389_p8, %s444_s25), 33  ;;  %v1970_v62 = vld [vmem:[%s2617_s3 + $0x28] sm:$0xf]  ;;  %v1148_v63 = vsel %vm529_vm0, %v1955_v58, 0 }
  0x12   : > { %s427_s22 = scalar_select %p426_p7, %s2266_s27, 33  ;;  %v1961_v2 = vld [vmem:[%s2617_s3 + $0x4] sm:$0xf]  ;;  %v1423_v3 = vsel %vm529_vm0, %v1970_v62, 0 }
  0x13   : > { %s2193_s23 = smul.u32 5, %s2637_s16  ;;  %s2641_s27 = smov (!%p457_p9, %s2266_s27), 31 }
  0x14   : > { %s2191_s24 = smul.u32 5, %s427_s22 }
  0x15   : > { %s440_s26 = sadd.s32 %s2193_s23, %s2383_s21  ;;  %s1912_s23 = sshll.u32 %s2641_s27, 2 }
  0x16   : > { %s1910_s13 = sshll.u32 %s440_s26, 2  ;;  %s430_s14 = sadd.s32 %s2383_s21, %s2191_s24 }
  0x17   : > { %s442_s18 = scalar_lea.vmem %s2615_s1, %s1910_s13  ;;  %s1909_s16 = sshll.u32 %s430_s14, 2 }
  0x18   : > { %v2398_v7 = vld [vmem:[%s442_s18] sm:$0xff]   ;;  %s2407_s24 = scalar_lea.vmem %s2614_s0, %s1909_s16  ;;  %v2409_v10 = vld [vmem:[%s442_s18 + $0x8] sm:$0xff]   ;;  %v2237_v12 = vld [vmem:[%s442_s18 + $0x10] ss:$0 sps:$4 sm:$0x11]   ;;  %s2194_s13 = smul.u32 5, %s2639_s25 }
  0x19   : > { %2033 = vmatprep.mubr.msk.bf16.mxu0 %vm522_vm1, %v2398_v7  ;;  %v841_v11 = vrot.slane %v2398_v7, 1  ;;  %v842_v13 = vrot.slane %v2409_v10, 1  ;;  %v586_v14 = vshrl.u32 %v2398_v7, 16  ;;  %v588_v15 = vshll.u32 %v2398_v7, 16  ;;  %v2238_v21 = vld [vmem:[%s2407_s24] sm:$0xff]   ;;  %v2239_v26 = vld [vmem:[%s2407_s24 + $0x8] sm:$0xff]  }
  0x1a   : > { %2034 = vmatmul.mubr.msk.bf16.vlgmr.msra.gmra.mrb[0].mxu0 %vm522_vm1, %v2409_v10  ;;  %v592_v16 = vshll.u32 %v2409_v10, 16  ;;  %v844_v17 = vrot.slane %v2237_v12, 1  ;;  %v596_v18 = vshrl.u32 %v2409_v10, 16  ;;  %v600_v19 = vshll.u32 %v2237_v12, 16  ;;  %s451_s14 = sadd.s32 %s2194_s13, %s2383_s21 }
  0x1b   : > { %2038 = vmatpush3.bf16.msra.mxu0 %v611_v6  ;;  %v2430_v22 = vsel %vm840_vm2, %v841_v11, %v842_v13  ;;  %v590_v23 = vrot.slane %v588_v15, 1  ;;  %v678_v27 = vshrl.u32 %v2238_v21, 16  ;;  %v680_v28 = vshll.u32 %v2238_v21, 16  ;;  %s1911_s25 = sshll.u32 %s451_s14, 2 }
  0x1c   : > { %v594_v24 = vrot.slane %v592_v16, 1  ;;  %2177 = vmatprep.subr.msk.bf16.mxu0 %vm529_vm0, %v1933_v9  ;;  %2057 = vmatprep.mubr.msk.bf16.mxu1 %vm522_vm1, %v2430_v22  ;;  %v2436_v25 = vsel %vm840_vm2, %v842_v13, %v844_v17  ;;  %v602_v31 = vrot.slane %v600_v19, 1  ;;  %v685_v33 = vshll.u32 %v2239_v26, 16  ;;  %v2240_v37 = vld [vmem:[%s2407_s24 + $0x10] ss:$0 sps:$4 sm:$0x11]   ;;  %s2455_s18 = scalar_lea.vmem %s2616_s2, %s1911_s25 }
  0x1d   : > { %2058 = vmatmul.mubr.msk.bf16.vlgmr.msra.gmra.mrb[0].mxu1 %vm522_vm1, %v2436_v25  ;;  %v591_v29 = vor.u32 %v590_v23, %v586_v14  ;;  %v682_v32 = vrot.slane %v680_v28, 1  ;;  %v689_v42 = vshrl.u32 %v2239_v26, 16  ;;  %v693_v43 = vshll.u32 %v2240_v37, 16  ;;  %v2241_v61 = vld [vmem:[%s2455_s18] sm:$0xff]   ;;  %v2242_v0 = vld [vmem:[%s2455_s18 + $0x8] sm:$0xff]   ;;  %s1913_s24 = sshll.u32 %s2635_s28, 7 }
  0x1e   : > { %2062 = vmatpush3.bf16.msra.mxu1 %v905_v8  ;;  %v598_v30 = vor.u32 %v596_v18, %v594_v24  ;;  %v687_v36 = vrot.slane %v685_v33, 1  ;;  %v1016_v50 = vrot.slane %v2238_v21, 1  ;;  %v1017_v51 = vrot.slane %v2239_v26, 1  ;;  %v1967_v13 = vld [vmem:[%s2617_s3 + $0xc] sm:$0xf]  ;;  %s461_s26 = sadd.s32 %s1913_s24, %s1912_s23 }
  0x1f   : > { %v2443_v34 = vsel %vm585_vm3, %v591_v29, %v594_v24  ;;  %2181 = vmatprep.subr.msk.bf16.mxu1 %vm529_vm0, %v1949_v20  ;;  %v683_v35 = vor.u32 %v682_v32, %v678_v27  ;;  %v695_v47 = vrot.slane %v693_v43, 1  ;;  %v1019_v56 = vrot.slane %v2240_v37, 1  ;;  %v1532_v17 = vld [vmem:[%s2617_s3] sm:$0xf]  ;;  %s2562_s12 = sshll.u32 %s461_s26, 3 }
  0x20   : > { %2039 = vmatprep.mubr.msk.bf16.mxu0 %vm522_vm1, %v2443_v34  ;;  %2063 = vmatprep.mubr.msk.bf16.mxu1 %vm522_vm1, %v2443_v34  ;;  %v2458_v38 = vsel %vm585_vm3, %v598_v30, %v602_v31  ;;  %v691_v46 = vor.u32 %v689_v42, %v687_v36  ;;  %v1018_v54 = vsel %vm840_vm2, %v1016_v50, %v1017_v51  ;;  %v1217_v1 = vshll.u32 %v2241_v61, 16  ;;  %v1942_v28 = vld [vmem:[%s2618_s4] ss:$0 sm:$0xff]  ;;  %s463_s17 = scalar_lea.vmem %s2619_s5, %s2562_s12  ;;  %s472_s21 = scalar_lea.vmem %s2620_s6, %s2562_s12 }
  0x21   : > { %v688_v40 = vsel %vm585_vm3, %v683_v35, %v687_v36  ;;  %v1020_v59 = vsel %vm840_vm2, %v1017_v51, %v1019_v56  ;;  %v1215_v4 = vshrl.u32 %v2241_v61, 16  ;;  %v1222_v6 = vshll.u32 %v2242_v0, 16  ;;  %s481_s20 = scalar_lea.vmem %s2621_s7, %s2562_s12  ;;  %s490_s23 = scalar_lea.vmem %s2622_s8, %s2562_s12 }
  0x22   : > { %v696_v48 = vsel %vm585_vm3, %v691_v46, %v695_v47  ;;  %v1219_v5 = vrot.slane %v1217_v1, 1  ;;  %v1241_v11 = vsel %vm529_vm0, %v1961_v2, 0  ;;  %v1226_v14 = vshrl.u32 %v2242_v0, 16 }
  0x23   : > { %v1224_v9 = vrot.slane %v1222_v6, 1  ;;  %v1534_v23 = vrot.slane %v2242_v0, 1  ;;  %v1545_v24 = vsel %vm529_vm0, %v1532_v17, 0 }
  0x24   : > { %v1220_v8 = vor.u32 %v1219_v5, %v1215_v4 }
  0x25   : > { %v1228_v18 = vor.u32 %v1226_v14, %v1224_v9 }
  0x26   : > { %2040 = vmatmul.mubr.msk.bf16.vlgmr.msra.gmra.mrb[0].mxu0 %vm522_vm1, %v2458_v38  ;;  %v1225_v12 = vsel %vm585_vm3, %v1220_v8, %v1224_v9 }
  0x27   : > { %2044 = vmatpush3.bf16.msra.mxu0 %v704_v39  ;;  %2045 = vmatprep.mubr.msk.bf16.mxu0 %vm522_vm1, %v688_v40 }
  0x28   : > { %2178 = vmatprep.subr.msk.bf16.mxu0 %vm529_vm0, %v1939_v41 }
  0x29   : > { %2064 = vmatmul.mubr.msk.bf16.vlgmr.msra.gmra.mrb[0].mxu1 %vm522_vm1, %v2458_v38 }
  0x2a   : > { %2068 = vmatpush3.bf16.msra.mxu1 %v959_v44  ;;  %2069 = vmatprep.mubr.msk.bf16.mxu1 %vm522_vm1, %v688_v40 }
  0x2b   : > { %2182 = vmatprep.subr.msk.bf16.mxu1 %vm529_vm0, %v1952_v45 }
  0x32   : > { %2046 = vmatmul.mubr.msk.bf16.vlgmr.msra.gmra.mrb[0].mxu0 %vm522_vm1, %v696_v48 }
  0x33   : > { %2050 = vmatpush3.bf16.msra.mxu0 %v766_v49  ;;  %2051 = vmatprep.mubr.msk.bf16.mxu0 %vm522_vm1, %v2238_v21  ;;  %v1303_v21 = vsel %vm529_vm0, %v1967_v13, 0 }
  0x34   : > { %2183 = vmatprep.subr.msk.bf16.mxu0 %vm529_vm0, %v1956_v52 }
  0x35   : > { %2070 = vmatmul.mubr.msk.bf16.vlgmr.msra.gmra.mrb[0].mxu1 %vm522_vm1, %v696_v48 }
  0x36   : > { %2074 = vmatpush3.bf16.msra.mxu1 %v1028_v53  ;;  %2075 = vmatprep.mubr.msk.bf16.mxu1 %vm522_vm1, %v1018_v54 }
  0x37   : > { %2187 = vmatprep.subr.msk.bf16.mxu1 %vm529_vm0, %v1971_v55 }
  0x3e   : > { %2052 = vmatmul.mubr.msk.bf16.vlgmr.msra.gmra.mrb[0].mxu0 %vm522_vm1, %v2239_v26 }
  0x3f   : > { %2080 = vmatpush3.bf16.msra.mxu0 %v1096_v57  ;;  %2081 = vmatprep.mubr.msk.bf16.mxu0 %vm522_vm1, %v2398_v7  ;;  %v1976_v7 = vld [vmem:[%s2617_s3 + $0x8] sm:$0xf] }
  0x40   : > { %2184 = vmatprep.subr.msk.bf16.mxu0 %vm529_vm0, %v1955_v58  ;;  %v1477_v16 = vsel %vm529_vm0, %v1976_v7, 0 }
  0x41   : > { %2076 = vmatmul.mubr.msk.bf16.vlgmr.msra.gmra.mrb[0].mxu1 %vm522_vm1, %v1020_v59 }
  0x42   : > { %2104 = vmatpush3.bf16.msra.mxu1 %v1371_v60  ;;  %2105 = vmatprep.mubr.msk.bf16.mxu1 %vm522_vm1, %v2430_v22  ;;  %v1533_v22 = vrot.slane %v2241_v61, 1 }
  0x43   : > { %2188 = vmatprep.subr.msk.bf16.mxu1 %vm529_vm0, %v1970_v62 }
  0x46   : > { %2082 = vmatmul.mubr.msk.bf16.vlgmr.msra.gmra.mrb[4].mxu0 %vm522_vm1, %v2409_v10  ;;  %v2243_v10 = vld [vmem:[%s2455_s18 + $0x10] ss:$0 sps:$4 sm:$0x11]  }
  0x47   : > { %2086 = vmatpush3.bf16.msra.mxu0 %v1148_v63  ;;  %2087 = vmatprep.mubr.msk.bf16.mxu0 %vm522_vm1, %v2443_v34  ;;  %v1230_v15 = vshll.u32 %v2243_v10, 16  ;;  %v1536_v26 = vrot.slane %v2243_v10, 1 }
  0x48   : > { %2185 = vmatprep.subr.msk.bf16.mxu0 %vm529_vm0, %v1961_v2 }
  0x49   : > { %2106 = vmatmul.mubr.msk.bf16.vlgmr.msra.gmra.mrb[4].mxu1 %vm522_vm1, %v2436_v25  ;;  %v1232_v19 = vrot.slane %v1230_v15, 1  ;;  %v1535_v25 = vsel %vm840_vm2, %v1533_v22, %v1534_v23  ;;  %v1537_v27 = vsel %vm840_vm2, %v1534_v23, %v1536_v26 }
  0x4a   : > { %2110 = vmatpush3.bf16.msra.mxu1 %v1423_v3  ;;  %2111 = vmatprep.mubr.msk.bf16.mxu1 %vm522_vm1, %v2443_v34 }
  0x4b   : > { %2189 = vmatprep.subr.msk.bf16.mxu1 %vm529_vm0, %v1976_v7  ;;  %v1233_v20 = vsel %vm585_vm3, %v1228_v18, %v1232_v19 }
  0x52   : > { %2088 = vmatmul.mubr.msk.bf16.vlgmr.msra.gmra.mrb[4].mxu0 %vm522_vm1, %v2458_v38 }
  0x53   : > { %2092 = vmatpush3.bf16.msra.mxu0 %v1241_v11  ;;  %2093 = vmatprep.mubr.msk.bf16.mxu0 %vm522_vm1, %v1225_v12 }
  0x54   : > { %2186 = vmatprep.subr.msk.bf16.mxu0 %vm529_vm0, %v1967_v13 }
  0x55   : > { %2112 = vmatmul.mubr.msk.bf16.vlgmr.msra.gmra.mrb[4].mxu1 %vm522_vm1, %v2458_v38 }
  0x56   : > { %2116 = vmatpush3.bf16.msra.mxu1 %v1477_v16  ;;  %2117 = vmatprep.mubr.msk.bf16.mxu1 %vm522_vm1, %v1225_v12 }
  0x57   : > { %2190 = vmatprep.subr.msk.bf16.mxu1 %vm529_vm0, %v1532_v17 }
  0x5e   : > { %2094 = vmatmul.mubr.msk.bf16.vlgmr.msra.gmra.mrb[4].mxu0 %vm522_vm1, %v1233_v20 }
  0x5f   : > { %2098 = vmatpush3.bf16.msra.mxu0 %v1303_v21  ;;  %2099 = vmatprep.mubr.msk.bf16.mxu0 %vm522_vm1, %v2241_v61 }
  0x61   : > { %2118 = vmatmul.mubr.msk.bf16.vlgmr.msra.gmra.mrb[4].mxu1 %vm522_vm1, %v1233_v20 }
  0x62   : > { %2122 = vmatpush3.bf16.msra.mxu1 %v1545_v24  ;;  %2123 = vmatprep.mubr.msk.bf16.mxu1 %vm522_vm1, %v1535_v25 }
  0x6a   : > { %2100 = vmatmul.mubr.msk.bf16.vlgmr.msra.gmra.mrb[4].mxu0 %vm522_vm1, %v2242_v0 }
  0x6d   : > { %2124 = vmatmul.mubr.msk.bf16.vlgmr.msra.gmra.mrb[4].mxu1 %vm522_vm1, %v1537_v27 }
 0x111   : > { %v2053_v29 = vpop.f32.mrb[0].mxu0 }
 0x112   : > { %v829_v30 = vadd.f32 %v2053_v29, %v1942_v28  ;;  %v802_v31 = vpop.f32.mrb[1].mxu0 }
 0x113   : > { %v827_v32 = vadd.f32 %v1942_v28, %v802_v31  ;;  %v2054_v33 = vpop.f32.mrb[2].mxu0 }
 0x114   : > { %834 = vst.msk [vmem:[%s463_s17 + $0x10] sm:$0xff] %vm831_vm4, %v829_v30  ;;  %v830_v34 = vadd.f32 %v2054_v33, %v1942_v28  ;;  %v805_v35 = vpop.f32.mrb[3].mxu0  ;;  %v2077_v37 = vpop.f32.mrb[0].mxu1 }
 0x115   : > { %832 = vst.msk [vmem:[%s463_s17] sm:$0xff] %vm831_vm4, %v827_v32  ;;  %v828_v36 = vadd.f32 %v1942_v28, %v805_v35  ;;  %v1085_v38 = vadd.f32 %v2077_v37, %v1942_v28  ;;  %v1064_v39 = vpop.f32.mrb[1].mxu1 }
 0x116   : > { %835 = vst.msk [vmem:[%s463_s17 + $0x18] sm:$0xff] %vm831_vm4, %v830_v34  ;;  %v1083_v40 = vadd.f32 %v1942_v28, %v1064_v39  ;;  %v2078_v41 = vpop.f32.mrb[2].mxu1 }
 0x117   : > { %833 = vst.msk [vmem:[%s463_s17 + $0x8] sm:$0xff] %vm831_vm4, %v828_v36  ;;  %1089 = vst.msk [vmem:[%s472_s21 + $0x10] sm:$0xff] %vm831_vm4, %v1085_v38  ;;  %v1086_v42 = vadd.f32 %v2078_v41, %v1942_v28  ;;  %v1067_v43 = vpop.f32.mrb[3].mxu1 }
 0x118   : > { %1087 = vst.msk [vmem:[%s472_s21] sm:$0xff] %vm831_vm4, %v1083_v40  ;;  %v1084_v44 = vadd.f32 %v1942_v28, %v1067_v43 }
 0x119   : > { %1090 = vst.msk [vmem:[%s472_s21 + $0x18] sm:$0xff] %vm831_vm4, %v1086_v42 }
 0x11a   : > { %1088 = vst.msk [vmem:[%s472_s21 + $0x8] sm:$0xff] %vm831_vm4, %v1084_v44 }
 0x13d   : > { %v2101_v45 = vpop.f32.mrb[4].mxu0 }
 0x13e   : > { %v1360_v46 = vadd.f32 %v2101_v45, %v1942_v28  ;;  %v1339_v47 = vpop.f32.mrb[5].mxu0 }
 0x13f   : > { %v1358_v48 = vadd.f32 %v1942_v28, %v1339_v47  ;;  %v2102_v49 = vpop.f32.mrb[6].mxu0 }
 0x140   : > { %1364 = vst.msk [vmem:[%s481_s20 + $0x10] sm:$0xff] %vm831_vm4, %v1360_v46  ;;  %v1361_v50 = vadd.f32 %v2102_v49, %v1942_v28  ;;  %v1342_v51 = vpop.f32.mrb[7].mxu0  ;;  %v2125_v53 = vpop.f32.mrb[4].mxu1 }
 0x141   : > { %1362 = vst.msk [vmem:[%s481_s20] sm:$0xff] %vm831_vm4, %v1358_v48  ;;  %v1359_v52 = vadd.f32 %v1942_v28, %v1342_v51  ;;  %v1602_v54 = vadd.f32 %v2125_v53, %v1942_v28  ;;  %v1581_v55 = vpop.f32.mrb[5].mxu1 }
 0x142   : > { %1365 = vst.msk [vmem:[%s481_s20 + $0x18] sm:$0xff] %vm831_vm4, %v1361_v50  ;;  %v1600_v56 = vadd.f32 %v1942_v28, %v1581_v55  ;;  %v2126_v57 = vpop.f32.mrb[6].mxu1 }
 0x143   : > { %1363 = vst.msk [vmem:[%s481_s20 + $0x8] sm:$0xff] %vm831_vm4, %v1359_v52  ;;  %1606 = vst.msk [vmem:[%s490_s23 + $0x10] sm:$0xff] %vm831_vm4, %v1602_v54  ;;  %v1603_v58 = vadd.f32 %v2126_v57, %v1942_v28  ;;  %v1584_v59 = vpop.f32.mrb[7].mxu1 }
 0x144   : > { %1604 = vst.msk [vmem:[%s490_s23] sm:$0xff] %vm831_vm4, %v1600_v56  ;;  %v1601_v60 = vadd.f32 %v1942_v28, %v1584_v59 }
 0x145   : > { %1607 = vst.msk [vmem:[%s490_s23 + $0x18] sm:$0xff] %vm831_vm4, %v1603_v58 }
 0x146   : > { %1605 = vst.msk [vmem:[%s490_s23 + $0x8] sm:$0xff] %vm831_vm4, %v1601_v60 }
 0x147 PF: > { %s19_s9 = sadd.s32 1, %s2282_s9   ;;  %s2624_s27 = smov %s2274_s29 }
 0x148   : > { %p16_p10 = scmp.ge.s32.totalorder %s19_s9, 66   ;;  %s2625_s28 = smov %s2278_s30 }
 0x149   : > { %s2626_s29 = smov %s2629_s10  ;;  %s2627_s30 = smov %s2633_s11 }
 0x14a   :  { %18 = sbr.rel (!%p16_p10) target bundleno = 3 (0x3), region = 127 }

// kernel: custom-call
= control target key start
LH: loop header
LB: loop body
LE: loop exit
PB: predicated region body
PF: predicated region fallthrough
CT: control target
= control target key end

     0   :  { %2 = vsyncpa [#allocation0], 0  ;;  %s61_s0 = inlined_call_operand.hbm [shape: c64[1,1,64,64], index: 0, kind: input, shape index: {}]   ;;  %s62_s1 = inlined_call_operand.vmem [shape: f32[1,1,64,64], index: 1, kind: output, shape index: {}]  }
   0x1   :  { %s3_s8 = sshll.u32 %s62_s1, 4  ;;  %s9_s11 = scalar_lea.hbm %s61_s0, 1024  ;;  %s4_s8 = int_to_ptr.vmem [resolvable:$true] %s3_s8 }
   0x2   :  { %p10_p0 = scmp.ne.s32.totalorder %s61_s0, %s9_s11  ;;  %s11_s16 = scalar_lea.hbm %s61_s0, 2048 }
   0x3   :  { %p12_p1 = scmp.lt.u32.totalorder %s11_s16, %s9_s11  ;;  %p13_p2 = scmp.lt.u32.totalorder %s9_s11, %s61_s0 }
   0x5   :  { %p14_p3 = por %p13_p2, %p12_p1 }
   0x7   :  { %p15_p4 = pnand %p14_p3, %p10_p0 }
   0x9   :  { %18 = shalt.err (!%p15_p4)  }
   0xa   :  { %s19_s1 = scalar_lea.vmem %s4_s8, 1024  ;;  %p24_p6 = scmp.lt.s32.totalorder %s4_s8, %s4_s8 }
   0xb   :  { %p20_p5 = scmp.ne.s32.totalorder %s4_s8, %s19_s1  ;;  %p25_p7 = scmp.lt.s32.totalorder %s19_s1, %s19_s1 }
   0xd   :  { %p26_p8 = por %p25_p7, %p24_p6 }
   0xf   :  { %p27_p9 = pnand %p26_p8, %p20_p5 }
  0x11   :  { %30 = shalt.err (!%p27_p9)  }
  0x12   :  { %6 = dma.hbm_to_vmem [thread:$0]  %s61_s0, 1024, %s4_s8, [#allocation0] }
  0x13   :  { %31 = dma.done.wait [#allocation0], 1024  }
  0x14   :  { %32 = vsyncadd [#allocation0], 4294966272 }
  0x15   :  { %8 = vsyncpa [#allocation0], 1 }

// kernel: custom-call.1
= control target key start
LH: loop header
LB: loop body
LE: loop exit
PB: predicated region body
PF: predicated region fallthrough
CT: control target
= control target key end

     0   :  { %s59_s0 = inlined_call_operand.hbm [shape: c64[1,1,64,64], index: 0, kind: input, shape index: {}]   ;;  %s60_s1 = inlined_call_operand.vmem [shape: f32[1,1,64,64], index: 1, kind: output, shape index: {}]  }
   0x1   :  { %s2_s8 = scalar_lea.hbm %s59_s0, 1024 }
   0x2   :  { %3 = vsyncpa [#allocation0], 0  ;;  %s4_s11 = sshll.u32 %s60_s1, 4  ;;  %s34_s14 = scalar_lea.hbm %s59_s0, 2048  ;;  %s5_s11 = int_to_ptr.vmem [resolvable:$true] %s4_s11 }
   0x3   :  { %p11_p0 = scmp.ne.s32.totalorder %s2_s8, %s34_s14  ;;  %p13_p1 = scmp.lt.u32.totalorder %s2_s8, %s59_s0 }
   0x4   :  { %p14_p2 = scmp.lt.u32.totalorder %s34_s14, %s34_s14  ;;  %p16_p4 = scmp.lt.u32.totalorder %s34_s14, %s2_s8 }
   0x6   :  { %p15_p3 = por %p14_p2, %p13_p1 }
   0x8   :  { %p17_p5 = por %p16_p4, %p15_p3 }
   0xa   :  { %p18_p6 = pnand %p17_p5, %p11_p0 }
   0xc   :  { %21 = shalt.err (!%p18_p6)  }
   0xd   :  { %s22_s17 = scalar_lea.vmem %s5_s11, 1024  ;;  %p27_p8 = scmp.lt.s32.totalorder %s5_s11, %s5_s11 }
   0xe   :  { %p23_p7 = scmp.ne.s32.totalorder %s5_s11, %s22_s17  ;;  %p28_p9 = scmp.lt.s32.totalorder %s22_s17, %s22_s17 }
  0x10   :  { %p29_p10 = por %p28_p9, %p27_p8 }
  0x12   :  { %p30_p11 = pnand %p29_p10, %p23_p7 }
  0x14   :  { %33 = shalt.err (!%p30_p11)  }
  0x15   :  { %7 = dma.hbm_to_vmem [thread:$0]  %s2_s8, 1024, %s5_s11, [#allocation0] }
  0x16   :  { %35 = dma.done.wait [#allocation0], 1024  }
  0x17   :  { %36 = vsyncadd [#allocation0], 4294966272 }
  0x18   :  { %9 = vsyncpa [#allocation0], 1 }

</bundles_post_ra>
